<compile_context>
chip_gen: v7x
topology: tpu7x:2x2x1
jax: 0.10.0
libtpu: 0.0.40
codegen_flags: <defaults>
</compile_context>

<pallas_src>
import functools
import math

import jax
import jax.numpy as jnp
from jax.experimental import pallas as pl
from jax.experimental.pallas import tpu as pltpu


# ----------------------------------------------------------------------------
# Fused GEMM + bias + activation kernels
# ----------------------------------------------------------------------------
def _gemm_bias_act_single_k(act, x_ref, w_ref, b_ref, o_ref):
    """Single K step: no accumulator scratch, write epilogue result directly."""
    r = jnp.dot(x_ref[...], w_ref[...], preferred_element_type=jnp.float32)
    r = r + b_ref[...].astype(jnp.float32)
    if act == "relu":
        r = jnp.maximum(r, 0.0)
    o_ref[...] = r.astype(o_ref.dtype)


def _gemm_bias_act_multi_k(act, x_ref, w_ref, b_ref, o_ref, acc_ref):
    k = pl.program_id(2)
    prod = jnp.dot(x_ref[...], w_ref[...], preferred_element_type=jnp.float32)

    @pl.when(k == 0)
    def _first():
        acc_ref[...] = prod          # no zero-init + add on the first step

    @pl.when(k > 0)
    def _accum():
        acc_ref[...] += prod

    @pl.when(k == pl.num_programs(2) - 1)
    def _finalize():
        r = acc_ref[...] + b_ref[...].astype(jnp.float32)
        if act == "relu":
            r = jnp.maximum(r, 0.0)
        o_ref[...] = r.astype(o_ref.dtype)


def _fc_head_kernel(x_ref, w1_ref, b1_ref, w2_ref, b2_ref,
                    feat_ref, out_ref, acc_ref):
    """fc1 (tiled over K) with fc2 fused into the finalize step."""
    k = pl.program_id(1)
    prod = jnp.dot(x_ref[...], w1_ref[...], preferred_element_type=jnp.float32)

    @pl.when(k == 0)
    def _first():
        acc_ref[...] = prod

    @pl.when(k > 0)
    def _accum():
        acc_ref[...] += prod

    @pl.when(k == pl.num_programs(1) - 1)
    def _finalize():
        feat = acc_ref[...] + b1_ref[...].astype(jnp.float32)
        feat_ref[...] = feat.astype(feat_ref.dtype)
        out = jnp.dot(feat, w2_ref[...], preferred_element_type=jnp.float32)
        out_ref[...] = (out + b2_ref[...].astype(jnp.float32)).astype(out_ref.dtype)


# ----------------------------------------------------------------------------
# Tiling helpers
# ----------------------------------------------------------------------------
def _round_up(v, m):
    return ((v + m - 1) // m) * m


def _m_tiling(M, tm):
    """Pick (Mp, tm_e) so tm_e | Mp, tm_e % 8 == 0 (or full), minimal padding."""
    Mp0 = _round_up(M, 8)
    if Mp0 <= tm:
        return Mp0, Mp0
    n_tiles = -(-Mp0 // tm)                       # ceil
    tm_e = _round_up(-(-Mp0 // n_tiles), 8)       # ceil(Mp0/n) rounded to 8
    return tm_e * n_tiles, tm_e


def _k_tiling(K, tk):
    if K <= tk:
        return K, K
    Kp = _round_up(K, tk)
    return Kp, tk


def _tpu_generation():
    try:
        kind = jax.devices()[0].device_kind.lower()
    except Exception:
        return 0
    for g in (7, 6, 5, 4):
        if f"v{g}" in kind:
            return g
    return 0


def _default_tks():
    """(tk_conv2, tk_fc1): fewer, larger K steps on v5e/v6e; 2304 on v7x."""
    gen = _tpu_generation()
    if gen >= 7:
        return 2304, 2304
    return 6912, 4608


# ----------------------------------------------------------------------------
# Wrappers
# ----------------------------------------------------------------------------
def fused_linear(x, w, b, *, act="none", out_dtype=jnp.float32,
                 tm=256, tn=256, tk=2304):
    """act(x @ w + b) as one tiled Pallas GEMM.  bf16 operands, f32 accumulate."""
    M, K = x.shape
    K2, N = w.shape
    assert K == K2, (K, K2)

    xb = x.astype(jnp.bfloat16)
    wb = w.astype(jnp.bfloat16)
    b2 = b.reshape(1, N).astype(jnp.float32)

    Mp, tm_e = _m_tiling(M, tm)
    if Mp != M:
        xb = jnp.pad(xb, ((0, Mp - M), (0, 0)))

    Kp, tk_e = _k_tiling(K, tk)
    if Kp != K:
        xb = jnp.pad(xb, ((0, 0), (0, Kp - K)))
        wb = jnp.pad(wb, ((0, Kp - K), (0, 0)))

    tn_e = tn if (N > tn and N % tn == 0) else N

    kt = Kp // tk_e
    grid = (Mp // tm_e, N // tn_e, kt)

    if kt == 1:
        kernel = functools.partial(_gemm_bias_act_single_k, act)
        scratch = []
    else:
        kernel = functools.partial(_gemm_bias_act_multi_k, act)
        scratch = [pltpu.VMEM((tm_e, tn_e), jnp.float32)]

    out = pl.pallas_call(
        kernel,
        out_shape=jax.ShapeDtypeStruct((Mp, N), out_dtype),
        grid_spec=pltpu.PrefetchScalarGridSpec(
            num_scalar_prefetch=0,
            grid=grid,
            in_specs=[
                pl.BlockSpec((tm_e, tk_e), lambda i, j, k: (i, k)),
                pl.BlockSpec((tk_e, tn_e), lambda i, j, k: (k, j)),
                pl.BlockSpec((1, tn_e), lambda i, j, k: (0, j)),
            ],
            out_specs=pl.BlockSpec((tm_e, tn_e), lambda i, j, k: (i, j)),
            scratch_shapes=scratch,
        ),
        compiler_params=pltpu.CompilerParams(
            dimension_semantics=("parallel", "parallel", "arbitrary"),
            vmem_limit_bytes=32 << 20,
        ),
    )(xb, wb, b2)

    return out[:M] if Mp != M else out


def fc_head(x, w1, b1, w2, b2, *, tk=2304):
    """feat = x @ w1 + b1 ; out = feat @ w2 + b2 — one pallas_call, two outputs."""
    M, K = x.shape
    K2, N1 = w1.shape
    N1b, N2 = w2.shape
    assert K == K2 and N1 == N1b

    xb = x.astype(jnp.bfloat16)
    w1b = w1.astype(jnp.bfloat16)
    b1r = b1.reshape(1, N1).astype(jnp.float32)
    w2f = w2.astype(jnp.float32)
    b2r = b2.reshape(1, N2).astype(jnp.float32)

    Mp, tm_e = _m_tiling(M, 256)
    if Mp != M:
        xb = jnp.pad(xb, ((0, Mp - M), (0, 0)))

    Kp, tk_e = _k_tiling(K, tk)
    if Kp != K:
        xb = jnp.pad(xb, ((0, 0), (0, Kp - K)))
        w1b = jnp.pad(w1b, ((0, Kp - K), (0, 0)))

    grid = (Mp // tm_e, Kp // tk_e)

    feat, out = pl.pallas_call(
        _fc_head_kernel,
        out_shape=(jax.ShapeDtypeStruct((Mp, N1), jnp.float32),
                   jax.ShapeDtypeStruct((Mp, N2), jnp.float32)),
        grid_spec=pltpu.PrefetchScalarGridSpec(
            num_scalar_prefetch=0,
            grid=grid,
            in_specs=[
                pl.BlockSpec((tm_e, tk_e), lambda i, k: (i, k)),
                pl.BlockSpec((tk_e, N1), lambda i, k: (k, 0)),
                pl.BlockSpec((1, N1), lambda i, k: (0, 0)),
                pl.BlockSpec((N1, N2), lambda i, k: (0, 0)),
                pl.BlockSpec((1, N2), lambda i, k: (0, 0)),
            ],
            out_specs=(
                pl.BlockSpec((tm_e, N1), lambda i, k: (i, 0)),
                pl.BlockSpec((tm_e, N2), lambda i, k: (i, 0)),
            ),
            scratch_shapes=[pltpu.VMEM((tm_e, N1), jnp.float32)],
        ),
        compiler_params=pltpu.CompilerParams(
            dimension_semantics=("parallel", "arbitrary"),
            vmem_limit_bytes=32 << 20,
        ),
    )(xb, w1b, b1r, w2f, b2r)

    if Mp != M:
        feat, out = feat[:M], out[:M]
    return out, feat


# ----------------------------------------------------------------------------
# Backbone forward (Pallas path)
# ----------------------------------------------------------------------------
D_CONV = 256
H_FC1 = 10 * 16   # 160
D_OUT = 10


def cnn_r_backbone(x, params):
    """x: (B, 1, 28, 28) -> (out (B, 10), feat (B, 160)).  Params in PyTorch layout."""
    w1, b1, w2, b2, fw1, fb1, fw2, fb2 = params
    B = x.shape[0]
    x_img = x.reshape(B, 28, 28).astype(jnp.float32)

    tk_conv2, tk_fc1 = _default_tks()

    # ---- conv1 as im2col GEMM: (B*400, 81) @ (81, 256) ----------------------
    # TODO(synk): patch extraction is pure data movement, kept in plain JAX.
    p1 = jnp.stack(
        [x_img[:, ky:ky + 20, kx:kx + 20] for ky in range(9) for kx in range(9)],
        axis=-1,
    ).reshape(B * 400, 81)
    w1g = w1[:, 0].transpose(1, 2, 0).reshape(81, D_CONV)          # (ky*9+kx, co)
    # tm=400 -> 2 exact M tiles at B=2 (no padded rows, 2 parallel tiles for v7x)
    h1 = fused_linear(p1, w1g, b1, act="relu", out_dtype=jnp.bfloat16, tm=400)
    h1 = h1.reshape(B, 20, 20, D_CONV)                              # NHWC

    # ---- conv2 (stride 2) as im2col GEMM: (B*36, 81*256) @ (81*256, 256) ----
    p2 = jnp.stack(
        [h1[:, ky:ky + 11:2, kx:kx + 11:2, :] for ky in range(9) for kx in range(9)],
        axis=3,
    ).reshape(B * 36, 81 * D_CONV)                                  # k = (ky*9+kx)*256 + ci
    w2g = w2.transpose(2, 3, 1, 0).reshape(81 * D_CONV, D_CONV)
    # tn=128 -> N axis of size 2 so v7x megacore splits the weight stream.
    h2 = fused_linear(p2, w2g, b2, act="relu", out_dtype=jnp.bfloat16,
                      tn=128, tk=tk_conv2)

    # ---- fc1 + fused fc2 (fc1 weight permuted to match NHWC flatten order) --
    h2f = h2.reshape(B, 36 * D_CONV)                                # (y*6+x)*256 + c
    fw1g = fw1.reshape(H_FC1, D_CONV, 6, 6).transpose(2, 3, 1, 0).reshape(
        36 * D_CONV, H_FC1
    )
    out, feat = fc_head(h2f, fw1g, fb1, fw2.T, fb2, tk=tk_fc1)
    return out, feat


# ----------------------------------------------------------------------------
# Params (PyTorch default init, PyTorch layouts) and pure-JAX reference
# ----------------------------------------------------------------------------
def init_params(key):
    ks = jax.random.split(key, 8)

    def u(k, shape, fan_in):
        bound = 1.0 / math.sqrt(fan_in)
        return jax.random.uniform(k, shape, jnp.float32, -bound, bound)

    w1 = u(ks[0], (256, 1, 9, 9), 81)
    b1 = u(ks[1], (256,), 81)
    w2 = u(ks[2], (256, 256, 9, 9), 256 * 81)
    b2 = u(ks[3], (256,), 256 * 81)
    fw1 = u(ks[4], (H_FC1, 256 * 6 * 6), 256 * 6 * 6)
    fb1 = u(ks[5], (H_FC1,), 256 * 6 * 6)
    fw2 = u(ks[6], (D_OUT, H_FC1), H_FC1)
    fb2 = u(ks[7], (D_OUT,), H_FC1)
    return (w1, b1, w2, b2, fw1, fb1, fw2, fb2)


def _reference(x, params):
    """Plain-JAX float32 mirror of the PyTorch forward (NCHW, OIHW)."""
    w1, b1, w2, b2, fw1, fb1, fw2, fb2 = params
    dn = ("NCHW", "OIHW", "NCHW")
    h = jax.lax.conv_general_dilated(x, w1, (1, 1), "VALID", dimension_numbers=dn)
    h = jnp.maximum(h + b1.reshape(1, -1, 1, 1), 0.0)
    h = jax.lax.conv_general_dilated(h, w2, (2, 2), "VALID", dimension_numbers=dn)
    h = jnp.maximum(h + b2.reshape(1, -1, 1, 1), 0.0)
    h = h.reshape(h.shape[0], -1)                       # NCHW flatten: c*36 + y*6 + x
    feat = h @ fw1.T + fb1
    out = feat @ fw2.T + fb2
    return out, feat


if __name__ == "__main__":
    key = jax.random.PRNGKey(0)
    k_params, k_x = jax.random.split(key)

    params = init_params(k_params)
    x = jax.random.normal(k_x, (2, 1, 28, 28), dtype=jnp.float32)

    out, feat = jax.block_until_ready(jax.jit(cnn_r_backbone)(x, params))
    out_ref, feat_ref = jax.block_until_ready(jax.jit(_reference)(x, params))

    assert out.shape == (2, 10), out.shape
    assert feat.shape == (2, 160), feat.shape
    # bf16 matmul operands with f32 accumulation -> loosened tolerance vs f32 ref.
    assert jnp.allclose(out, out_ref, atol=2e-2, rtol=2e-2), "fc2 output mismatch"
    assert jnp.allclose(feat, feat_ref, atol=2e-2, rtol=2e-2), "fc1 output mismatch"
    print("KERNEL_OK")
</pallas_src>

<mosaic_0001>
module attributes {stable_mosaic.version = 11 : i64} {
  func.func @_gemm_bias_act_single_k(%arg0: i32, %arg1: i32, %arg2: i32, %arg3: memref<400x81xbf16, #tpu.memory_space<vmem>>, %arg4: memref<81x256xbf16, #tpu.memory_space<vmem>>, %arg5: memref<1x256xf32, #tpu.memory_space<vmem>>, %arg6: memref<400x256xbf16, #tpu.memory_space<vmem>>) attributes {dimension_semantics = [#tpu.dimension_semantics<parallel>, #tpu.dimension_semantics<parallel>, #tpu.dimension_semantics<arbitrary>], iteration_bounds = array<i64: 2, 1, 1>, scalar_prefetch = 0 : i64, scratch_operands = 0 : i64, tpu.core_type = #tpu.core_type<tc>, window_params = [{transform_indices = @transform_0, window_bounds = array<i64: 400, 81>}, {transform_indices = @transform_1, window_bounds = array<i64: 81, 256>}, {transform_indices = @transform_2, window_bounds = array<i64: 1, 256>}, {transform_indices = @transform_3, window_bounds = array<i64: 400, 256>}]} {
    %c0 = arith.constant 0 : index
    %c0_0 = arith.constant 0 : index
    %0 = vector.load %arg3[%c0, %c0_0] : memref<400x81xbf16, #tpu.memory_space<vmem>>, vector<400x81xbf16>
    %c0_1 = arith.constant 0 : index
    %c0_2 = arith.constant 0 : index
    %1 = vector.load %arg4[%c0_1, %c0_2] : memref<81x256xbf16, #tpu.memory_space<vmem>>, vector<81x256xbf16>
    %cst = arith.constant dense<0.000000e+00> : vector<400x256xf32>
    %2 = tpu.matmul %0, %1, %cst {dimension_numbers = #tpu.dot_dimension_numbers<[1], [0], [0], [1], [0, 0, 1, 1], [], []>} : vector<400x81xbf16>, vector<81x256xbf16>, vector<400x256xf32> -> vector<400x256xf32>
    %c0_3 = arith.constant 0 : index
    %c0_4 = arith.constant 0 : index
    %3 = vector.load %arg5[%c0_3, %c0_4] : memref<1x256xf32, #tpu.memory_space<vmem>>, vector<1x256xf32>
    %4 = vector.broadcast %3 : vector<1x256xf32> to vector<400x256xf32>
    %5 = arith.addf %2, %4 : vector<400x256xf32>
    %cst_5 = arith.constant 0.000000e+00 : f32
    %6 = vector.broadcast %cst_5 : f32 to vector<400x256xf32>
    %7 = arith.maximumf %5, %6 : vector<400x256xf32>
    %8 = arith.truncf %7 : vector<400x256xf32> to vector<400x256xbf16>
    %c0_6 = arith.constant 0 : index
    %c0_7 = arith.constant 0 : index
    %9 = vector.load %arg6[%c0_6, %c0_7] : memref<400x256xbf16, #tpu.memory_space<vmem>>, vector<400x256xbf16>
    tpu.vector_store %arg6[%c0_6, %c0_7], %8 {strides = array<i32>} : memref<400x256xbf16, #tpu.memory_space<vmem>>, vector<400x256xbf16>,
    return
  }
  func.func @transform_0(%arg0: i32, %arg1: i32, %arg2: i32) -> (i32, i32) {
    %c0_i32 = arith.constant 0 : i32
    return %arg0, %arg2 : i32, i32
  }
  func.func @transform_1(%arg0: i32, %arg1: i32, %arg2: i32) -> (i32, i32) {
    %c0_i32 = arith.constant 0 : i32
    return %arg2, %arg1 : i32, i32
  }
  func.func @transform_2(%arg0: i32, %arg1: i32, %arg2: i32) -> (i32, i32) {
    %c0_i32 = arith.constant 0 : i32
    %c0_i32_0 = arith.constant 0 : i32
    return %c0_i32, %arg1 : i32, i32
  }
  func.func @transform_3(%arg0: i32, %arg1: i32, %arg2: i32) -> (i32, i32) {
    %c0_i32 = arith.constant 0 : i32
    return %arg0, %arg1 : i32, i32
  }
}

module attributes {stable_mosaic.version = 11 : i64} {
  func.func @_gemm_bias_act_multi_k(%arg0: i32, %arg1: i32, %arg2: i32, %arg3: memref<72x6912xbf16, #tpu.memory_space<vmem>>, %arg4: memref<6912x128xbf16, #tpu.memory_space<vmem>>, %arg5: memref<1x128xf32, #tpu.memory_space<vmem>>, %arg6: memref<72x128xbf16, #tpu.memory_space<vmem>>, %arg7: memref<72x128xf32, #tpu.memory_space<vmem>>) attributes {dimension_semantics = [#tpu.dimension_semantics<parallel>, #tpu.dimension_semantics<parallel>, #tpu.dimension_semantics<arbitrary>], iteration_bounds = array<i64: 1, 2, 3>, scalar_prefetch = 0 : i64, scratch_operands = 1 : i64, tpu.core_type = #tpu.core_type<tc>, window_params = [{transform_indices = @transform_0, window_bounds = array<i64: 72, 6912>}, {transform_indices = @transform_1, window_bounds = array<i64: 6912, 128>}, {transform_indices = @transform_2, window_bounds = array<i64: 1, 128>}, {transform_indices = @transform_3, window_bounds = array<i64: 72, 128>}]} {
    %c0 = arith.constant 0 : index
    %c0_0 = arith.constant 0 : index
    %0 = vector.load %arg3[%c0, %c0_0] : memref<72x6912xbf16, #tpu.memory_space<vmem>>, vector<72x6912xbf16>
    %c0_1 = arith.constant 0 : index
    %c0_2 = arith.constant 0 : index
    %1 = vector.load %arg4[%c0_1, %c0_2] : memref<6912x128xbf16, #tpu.memory_space<vmem>>, vector<6912x128xbf16>
    %cst = arith.constant dense<0.000000e+00> : vector<72x128xf32>
    %2 = tpu.matmul %0, %1, %cst {dimension_numbers = #tpu.dot_dimension_numbers<[1], [0], [0], [1], [0, 0, 1, 1], [], []>} : vector<72x6912xbf16>, vector<6912x128xbf16>, vector<72x128xf32> -> vector<72x128xf32>
    %c0_i32 = arith.constant 0 : i32
    %3 = arith.cmpi eq, %arg2, %c0_i32 : i32
    %4 = arith.extui %3 : i1 to i32
    %c0_i32_3 = arith.constant 0 : i32
    %5 = arith.cmpi ne, %4, %c0_i32_3 : i32
    scf.if %5 {
      %c0_7 = arith.constant 0 : index
      %c0_8 = arith.constant 0 : index
      %12 = vector.load %arg7[%c0_7, %c0_8] : memref<72x128xf32, #tpu.memory_space<vmem>>, vector<72x128xf32>
      tpu.vector_store %arg7[%c0_7, %c0_8], %2 {strides = array<i32>} : memref<72x128xf32, #tpu.memory_space<vmem>>, vector<72x128xf32>,
    } else {
    }
    %c0_i32_4 = arith.constant 0 : i32
    %6 = arith.cmpi sgt, %arg2, %c0_i32_4 : i32
    %7 = arith.extui %6 : i1 to i32
    %c0_i32_5 = arith.constant 0 : i32
    %8 = arith.cmpi ne, %7, %c0_i32_5 : i32
    scf.if %8 {
      %c0_7 = arith.constant 0 : index
      %c0_8 = arith.constant 0 : index
      %12 = vector.load %arg7[%c0_7, %c0_8] : memref<72x128xf32, #tpu.memory_space<vmem>>, vector<72x128xf32>
      %13 = arith.addf %12, %2 : vector<72x128xf32>
      %c0_9 = arith.constant 0 : index
      %c0_10 = arith.constant 0 : index
      %14 = vector.load %arg7[%c0_9, %c0_10] : memref<72x128xf32, #tpu.memory_space<vmem>>, vector<72x128xf32>
      tpu.vector_store %arg7[%c0_9, %c0_10], %13 {strides = array<i32>} : memref<72x128xf32, #tpu.memory_space<vmem>>, vector<72x128xf32>,
    } else {
    }
    %c2_i32 = arith.constant 2 : i32
    %9 = arith.cmpi eq, %arg2, %c2_i32 : i32
    %10 = arith.extui %9 : i1 to i32
    %c0_i32_6 = arith.constant 0 : i32
    %11 = arith.cmpi ne, %10, %c0_i32_6 : i32
    scf.if %11 {
      %c0_7 = arith.constant 0 : index
      %c0_8 = arith.constant 0 : index
      %12 = vector.load %arg7[%c0_7, %c0_8] : memref<72x128xf32, #tpu.memory_space<vmem>>, vector<72x128xf32>
      %c0_9 = arith.constant 0 : index
      %c0_10 = arith.constant 0 : index
      %13 = vector.load %arg5[%c0_9, %c0_10] : memref<1x128xf32, #tpu.memory_space<vmem>>, vector<1x128xf32>
      %14 = vector.broadcast %13 : vector<1x128xf32> to vector<72x128xf32>
      %15 = arith.addf %12, %14 : vector<72x128xf32>
      %cst_11 = arith.constant 0.000000e+00 : f32
      %16 = vector.broadcast %cst_11 : f32 to vector<72x128xf32>
      %17 = arith.maximumf %15, %16 : vector<72x128xf32>
      %18 = arith.truncf %17 : vector<72x128xf32> to vector<72x128xbf16>
      %c0_12 = arith.constant 0 : index
      %c0_13 = arith.constant 0 : index
      %19 = vector.load %arg6[%c0_12, %c0_13] : memref<72x128xbf16, #tpu.memory_space<vmem>>, vector<72x128xbf16>
      tpu.vector_store %arg6[%c0_12, %c0_13], %18 {strides = array<i32>} : memref<72x128xbf16, #tpu.memory_space<vmem>>, vector<72x128xbf16>,
    } else {
    }
    return
  }
  func.func @transform_0(%arg0: i32, %arg1: i32, %arg2: i32) -> (i32, i32) {
    %c0_i32 = arith.constant 0 : i32
    return %arg0, %arg2 : i32, i32
  }
  func.func @transform_1(%arg0: i32, %arg1: i32, %arg2: i32) -> (i32, i32) {
    %c0_i32 = arith.constant 0 : i32
    return %arg2, %arg1 : i32, i32
  }
  func.func @transform_2(%arg0: i32, %arg1: i32, %arg2: i32) -> (i32, i32) {
    %c0_i32 = arith.constant 0 : i32
    %c0_i32_0 = arith.constant 0 : i32
    return %c0_i32, %arg1 : i32, i32
  }
  func.func @transform_3(%arg0: i32, %arg1: i32, %arg2: i32) -> (i32, i32) {
    %c0_i32 = arith.constant 0 : i32
    return %arg0, %arg1 : i32, i32
  }
}

module attributes {stable_mosaic.version = 11 : i64} {
  func.func @_fc_head_kernel(%arg0: i32, %arg1: i32, %arg2: memref<8x4608xbf16, #tpu.memory_space<vmem>>, %arg3: memref<4608x160xbf16, #tpu.memory_space<vmem>>, %arg4: memref<1x160xf32, #tpu.memory_space<vmem>>, %arg5: memref<160x10xf32, #tpu.memory_space<vmem>>, %arg6: memref<1x10xf32, #tpu.memory_space<vmem>>, %arg7: memref<8x160xf32, #tpu.memory_space<vmem>>, %arg8: memref<8x10xf32, #tpu.memory_space<vmem>>, %arg9: memref<8x160xf32, #tpu.memory_space<vmem>>) attributes {dimension_semantics = [#tpu.dimension_semantics<parallel>, #tpu.dimension_semantics<arbitrary>], iteration_bounds = array<i64: 1, 2>, scalar_prefetch = 0 : i64, scratch_operands = 1 : i64, tpu.core_type = #tpu.core_type<tc>, window_params = [{transform_indices = @transform_0, window_bounds = array<i64: 8, 4608>}, {transform_indices = @transform_1, window_bounds = array<i64: 4608, 160>}, {pipeline_mode = #tpu.pipeline_mode<synchronous>, transform_indices = @transform_2, window_bounds = array<i64: 1, 160>}, {pipeline_mode = #tpu.pipeline_mode<synchronous>, transform_indices = @transform_3, window_bounds = array<i64: 160, 10>}, {pipeline_mode = #tpu.pipeline_mode<synchronous>, transform_indices = @transform_4, window_bounds = array<i64: 1, 10>}, {transform_indices = @transform_5, window_bounds = array<i64: 8, 160>}, {transform_indices = @transform_6, window_bounds = array<i64: 8, 10>}]} {
    %c0 = arith.constant 0 : index
    %c0_0 = arith.constant 0 : index
    %0 = vector.load %arg2[%c0, %c0_0] : memref<8x4608xbf16, #tpu.memory_space<vmem>>, vector<8x4608xbf16>
    %c0_1 = arith.constant 0 : index
    %c0_2 = arith.constant 0 : index
    %1 = vector.load %arg3[%c0_1, %c0_2] : memref<4608x160xbf16, #tpu.memory_space<vmem>>, vector<4608x160xbf16>
    %cst = arith.constant dense<0.000000e+00> : vector<8x160xf32>
    %2 = tpu.matmul %0, %1, %cst {dimension_numbers = #tpu.dot_dimension_numbers<[1], [0], [0], [1], [0, 0, 1, 1], [], []>} : vector<8x4608xbf16>, vector<4608x160xbf16>, vector<8x160xf32> -> vector<8x160xf32>
    %c0_i32 = arith.constant 0 : i32
    %3 = arith.cmpi eq, %arg1, %c0_i32 : i32
    %4 = arith.extui %3 : i1 to i32
    %c0_i32_3 = arith.constant 0 : i32
    %5 = arith.cmpi ne, %4, %c0_i32_3 : i32
    scf.if %5 {
      %c0_7 = arith.constant 0 : index
      %c0_8 = arith.constant 0 : index
      %12 = vector.load %arg9[%c0_7, %c0_8] : memref<8x160xf32, #tpu.memory_space<vmem>>, vector<8x160xf32>
      tpu.vector_store %arg9[%c0_7, %c0_8], %2 {strides = array<i32>} : memref<8x160xf32, #tpu.memory_space<vmem>>, vector<8x160xf32>,
    } else {
    }
    %c0_i32_4 = arith.constant 0 : i32
    %6 = arith.cmpi sgt, %arg1, %c0_i32_4 : i32
    %7 = arith.extui %6 : i1 to i32
    %c0_i32_5 = arith.constant 0 : i32
    %8 = arith.cmpi ne, %7, %c0_i32_5 : i32
    scf.if %8 {
      %c0_7 = arith.constant 0 : index
      %c0_8 = arith.constant 0 : index
      %12 = vector.load %arg9[%c0_7, %c0_8] : memref<8x160xf32, #tpu.memory_space<vmem>>, vector<8x160xf32>
      %13 = arith.addf %12, %2 : vector<8x160xf32>
      %c0_9 = arith.constant 0 : index
      %c0_10 = arith.constant 0 : index
      %14 = vector.load %arg9[%c0_9, %c0_10] : memref<8x160xf32, #tpu.memory_space<vmem>>, vector<8x160xf32>
      tpu.vector_store %arg9[%c0_9, %c0_10], %13 {strides = array<i32>} : memref<8x160xf32, #tpu.memory_space<vmem>>, vector<8x160xf32>,
    } else {
    }
    %c1_i32 = arith.constant 1 : i32
    %9 = arith.cmpi eq, %arg1, %c1_i32 : i32
    %10 = arith.extui %9 : i1 to i32
    %c0_i32_6 = arith.constant 0 : i32
    %11 = arith.cmpi ne, %10, %c0_i32_6 : i32
    scf.if %11 {
      %c0_7 = arith.constant 0 : index
      %c0_8 = arith.constant 0 : index
      %12 = vector.load %arg9[%c0_7, %c0_8] : memref<8x160xf32, #tpu.memory_space<vmem>>, vector<8x160xf32>
      %c0_9 = arith.constant 0 : index
      %c0_10 = arith.constant 0 : index
      %13 = vector.load %arg4[%c0_9, %c0_10] : memref<1x160xf32, #tpu.memory_space<vmem>>, vector<1x160xf32>
      %14 = vector.broadcast %13 : vector<1x160xf32> to vector<8x160xf32>
      %15 = arith.addf %12, %14 : vector<8x160xf32>
      %c0_11 = arith.constant 0 : index
      %c0_12 = arith.constant 0 : index
      %16 = vector.load %arg7[%c0_11, %c0_12] : memref<8x160xf32, #tpu.memory_space<vmem>>, vector<8x160xf32>
      tpu.vector_store %arg7[%c0_11, %c0_12], %15 {strides = array<i32>} : memref<8x160xf32, #tpu.memory_space<vmem>>, vector<8x160xf32>,
      %c0_13 = arith.constant 0 : index
      %c0_14 = arith.constant 0 : index
      %17 = vector.load %arg5[%c0_13, %c0_14] : memref<160x10xf32, #tpu.memory_space<vmem>>, vector<160x10xf32>
      %cst_15 = arith.constant dense<0.000000e+00> : vector<8x10xf32>
      %18 = tpu.matmul %15, %17, %cst_15 {dimension_numbers = #tpu.dot_dimension_numbers<[1], [0], [0], [1], [0, 0, 1, 1], [], []>} : vector<8x160xf32>, vector<160x10xf32>, vector<8x10xf32> -> vector<8x10xf32>
      %c0_16 = arith.constant 0 : index
      %c0_17 = arith.constant 0 : index
      %19 = vector.load %arg6[%c0_16, %c0_17] : memref<1x10xf32, #tpu.memory_space<vmem>>, vector<1x10xf32>
      %20 = vector.broadcast %19 : vector<1x10xf32> to vector<8x10xf32>
      %21 = arith.addf %18, %20 : vector<8x10xf32>
      %c0_18 = arith.constant 0 : index
      %c0_19 = arith.constant 0 : index
      %22 = vector.load %arg8[%c0_18, %c0_19] : memref<8x10xf32, #tpu.memory_space<vmem>>, vector<8x10xf32>
      tpu.vector_store %arg8[%c0_18, %c0_19], %21 {strides = array<i32>} : memref<8x10xf32, #tpu.memory_space<vmem>>, vector<8x10xf32>,
    } else {
    }
    return
  }
  func.func @transform_0(%arg0: i32, %arg1: i32) -> (i32, i32) {
    %c0_i32 = arith.constant 0 : i32
    return %arg0, %arg1 : i32, i32
  }
  func.func @transform_1(%arg0: i32, %arg1: i32) -> (i32, i32) {
    %c0_i32 = arith.constant 0 : i32
    %c0_i32_0 = arith.constant 0 : i32
    return %arg1, %c0_i32 : i32, i32
  }
  func.func @transform_2(%arg0: i32, %arg1: i32) -> (i32, i32) {
    %c0_i32 = arith.constant 0 : i32
    %c0_i32_0 = arith.constant 0 : i32
    %c0_i32_1 = arith.constant 0 : i32
    return %c0_i32, %c0_i32_0 : i32, i32
  }
  func.func @transform_3(%arg0: i32, %arg1: i32) -> (i32, i32) {
    %c0_i32 = arith.constant 0 : i32
    %c0_i32_0 = arith.constant 0 : i32
    %c0_i32_1 = arith.constant 0 : i32
    return %c0_i32, %c0_i32_0 : i32, i32
  }
  func.func @transform_4(%arg0: i32, %arg1: i32) -> (i32, i32) {
    %c0_i32 = arith.constant 0 : i32
    %c0_i32_0 = arith.constant 0 : i32
    %c0_i32_1 = arith.constant 0 : i32
    return %c0_i32, %c0_i32_0 : i32, i32
  }
  func.func @transform_5(%arg0: i32, %arg1: i32) -> (i32, i32) {
    %c0_i32 = arith.constant 0 : i32
    %c0_i32_0 = arith.constant 0 : i32
    return %arg0, %c0_i32 : i32, i32
  }
  func.func @transform_6(%arg0: i32, %arg1: i32) -> (i32, i32) {
    %c0_i32 = arith.constant 0 : i32
    %c0_i32_0 = arith.constant 0 : i32
    return %arg0, %c0_i32 : i32, i32
  }
}

</mosaic_0001>

<bundles_post_ra>
// kernel: cnn_r_backbone.3
= control target key start
LH: loop header
LB: loop body
LE: loop exit
PB: predicated region body
PF: predicated region fallthrough
CT: control target
= control target key end

     0   :  { %s1771_s12 = smov 0   ;;  %s1773_s13 = smov 0   ;;  %s2078_s0 = inlined_call_operand.vmem [shape: bf16[800,81], index: 0, kind: input, shape index: {}]   ;;  %s2079_s1 = inlined_call_operand.vmem [shape: bf16[81,256], index: 1, kind: input, shape index: {}]   ;;  %s2080_s2 = inlined_call_operand.vmem [shape: f32[1,256], index: 2, kind: input, shape index: {}]   ;;  %s2081_s3 = inlined_call_operand.vmem [shape: bf16[800,256], index: 3, kind: output, shape index: {}]  }
   0x1   :  { %s1775_s14 = smov 0  }
   0x2 LB: > { %s32_s15 = sadd.s32 1, %s1744_s13  ;;  %p1478_p0 = scmp.ge.s32.totalorder %s1748_s14, 1  ;;  %s1748_s14 = sphi %s1775_s14, %s13_s14   ;;  %s1744_s13 = sphi %s1773_s13, %s2083_s13   ;;  %s1740_s12 = sphi %s1771_s12, %s2082_s12  }
   0x3   : > { %p34_p1 = scmp.ge.s32.totalorder %s32_s15, 2  ;;  %p193_p2 = scmp.lt.s32.totalorder %s1748_s14, 3 }
   0x5   : > { %s2085_s15 = smov (%p34_p1, %s32_s15), 0  ;;  %p194_p3 = pnand %p1478_p0, %p193_p2 }
   0x6   : > { %v1684_v0 = vld [vmem:[%s2079_s1 + $0x4] ss:$8 sps:$4 sm:$0xff] (!%p194_p3)   ;;  %v1686_v1 = vld [vmem:[%s2079_s1] ss:$8 sps:$4 sm:$0xff] (!%p194_p3)   ;;  %v1750_v2 = vmov (!%p194_p3), 0   ;;  %s239_s20 = smul.u32 (!%p194_p3), 50, %s1740_s12  ;;  %v341_v42 = vlaneseq (!%p194_p3) }
   0x7   : > { %197 = sbr.rel (%p194_p3) target bundleno = 350 (0x15e), region = 32  ;;  %648 = vmatprep.mubr.bf16.mxu0 (!%p194_p3), %v1750_v2  ;;  %778 = vmatprep.mubr.bf16.mxu1 (!%p194_p3), %v1750_v2  ;;  %v1687_v3 = vld [vmem:[%s2079_s1 + $0x14] ss:$8 sps:$4 sm:$0xff] (!%p194_p3)   ;;  %v1689_v4 = vld [vmem:[%s2079_s1 + $0x10] ss:$8 sps:$4 sm:$0xff] (!%p194_p3)   ;;  %vm607_vm0 = vcmask (!%p194_p3), 1040384  }
   0x8   : > { %616 = vmatprep.subr.bf16.mxu0 (!%p194_p3), %v1684_v0  ;;  %1647 = vmatprep.subr.bf16.mxu1 (!%p194_p3), %v1684_v0  ;;  %p240_p4 = scmp.lt.s32.totalorder (!%p194_p3), %s239_s20, 99  ;;  %v1690_v5 = vld [vmem:[%s2079_s1 + $0x24] ss:$8 sps:$4 sm:$0xff] (!%p194_p3)   ;;  %v1692_v6 = vld [vmem:[%s2079_s1 + $0x20] ss:$8 sps:$4 sm:$0xff] (!%p194_p3)   ;;  %v609_v12 = vsel (!%p194_p3), %vm607_vm0, 65535, %v1750_v2 }
   0x9   : > { %617 = vmatpush1.bf16.msra.mxu0 (!%p194_p3), %v1686_v1  ;;  %1653 = vmatpush1.bf16.msra.mxu1 (!%p194_p3), %v1686_v1  ;;  %v1693_v7 = vld [vmem:[%s2079_s1 + $0x34] ss:$8 sps:$4 sm:$0xff] (!%p194_p3)   ;;  %v1695_v9 = vld [vmem:[%s2079_s1 + $0x30] ss:$8 sps:$4 sm:$0xff] (!%p194_p3)   ;;  %v1696_v10 = vld [vmem:[%s2079_s1 + $0x44] ss:$8 sps:$4 sm:$0xff] (!%p194_p3)  }
   0xa   : > { %618 = vmatprep.subr.bf16.mxu0 (!%p194_p3), %v1687_v3  ;;  %1648 = vmatprep.subr.bf16.mxu1 (!%p194_p3), %v1687_v3  ;;  %v338_v8 = vld [vmem:[%s2079_s1 + $0x50] sm:$0x11] (!%p194_p3)  ;;  %v1698_v13 = vld [vmem:[%s2079_s1 + $0x40] ss:$8 sps:$4 sm:$0xff] (!%p194_p3)   ;;  %vm531_vm1 = vcmask (!%p194_p3), 662528   ;;  %v342_v43 = vshrl.u32 (!%p194_p3), %v341_v42, 7 }
   0xb   : > { %v1518_v11 = vcombine.high (!%p194_p3), %v338_v8, %v338_v8  ;;  %v1517_v14 = vcombine.low (!%p194_p3), %v338_v8, %v338_v8  ;;  %v339_v45 = vld [vmem:[%s2080_s2] sm:$0x3] (!%p194_p3) }
   0xc   : > { %v343_v44 = vsub.s32 (!%p194_p3), 0, %v342_v43  ;;  %v347_v46 = vsub.s32 (!%p194_p3), 1, %v342_v43 }
   0xd   : > { %619 = vmatpush1.bf16.msra.mxu0 (!%p194_p3), %v1689_v4  ;;  %1654 = vmatpush1.bf16.msra.mxu1 (!%p194_p3), %v1689_v4  ;;  %v614_v15 = vand.u32 (!%p194_p3), %v1518_v11, %v609_v12  ;;  %v611_v16 = vand.u32 (!%p194_p3), %v1517_v14, %v609_v12 }
   0xe   : > { %s2087_s20 = smov (!%p240_p4, %s239_s20), 99  ;;  %620 = vmatprep.subr.bf16.mxu0 %v1690_v5  ;;  %1649 = vmatprep.subr.bf16.mxu1 %v1690_v5  ;;  %v1909_v47 = vrot.slane %v339_v45, %v343_v44  ;;  %v1911_v48 = vrot.slane %v339_v45, %v347_v46 }
   0xf   : > { %s1479_s29 = sshll.u32 %s2087_s20, 2  ;;  %s1596_s22 = sshll.u32 %s2087_s20, 3 }
  0x10   : > { %s1818_s7 = scalar_lea.vmem %s2078_s0, %s1479_s29  ;;  %s1925_s24 = scalar_lea.vmem %s2081_s3, %s1596_s22 }
  0x11   : > { %621 = vmatpush1.bf16.msra.mxu0 %v1692_v6  ;;  %1655 = vmatpush1.bf16.msra.mxu1 %v1692_v6  ;;  %v1701_v17 = vld [vmem:[%s1818_s7] sm:$0xff]   ;;  %v1702_v18 = vld [vmem:[%s1818_s7 + $0x68] sm:$0xff]   ;;  %v1704_v20 = vld [vmem:[%s1818_s7 + $0x70] sm:$0xff]  }
  0x12   : > { %622 = vmatprep.subr.bf16.mxu0 %v1693_v7  ;;  %1650 = vmatprep.subr.bf16.mxu1 %v1693_v7  ;;  %v1703_v19 = vld [vmem:[%s1818_s7 + $0x8] sm:$0xff]   ;;  %v1705_v21 = vld [vmem:[%s1818_s7 + $0x10] sm:$0xff]   ;;  %v1706_v22 = vld [vmem:[%s1818_s7 + $0x78] sm:$0xff]  }
  0x13   : > { %v1707_v23 = vld [vmem:[%s1818_s7 + $0x18] sm:$0xff]   ;;  %v1708_v24 = vld [vmem:[%s1818_s7 + $0x80] sm:$0xff]   ;;  %v1710_v26 = vld [vmem:[%s1818_s7 + $0x88] sm:$0xff]  }
  0x14   : > { %v1709_v25 = vld [vmem:[%s1818_s7 + $0x20] sm:$0xff]   ;;  %v1711_v27 = vld [vmem:[%s1818_s7 + $0x28] sm:$0xff]   ;;  %v1712_v28 = vld [vmem:[%s1818_s7 + $0x90] sm:$0xff]  }
  0x15   : > { %623 = vmatpush1.bf16.msra.mxu0 %v1695_v9  ;;  %1656 = vmatpush1.bf16.msra.mxu1 %v1695_v9  ;;  %v1713_v29 = vld [vmem:[%s1818_s7 + $0x30] sm:$0xff]   ;;  %v1714_v30 = vld [vmem:[%s1818_s7 + $0x98] sm:$0xff]   ;;  %v1716_v32 = vld [vmem:[%s1818_s7 + $0xa0] sm:$0xff]  }
  0x16   : > { %624 = vmatprep.subr.bf16.mxu0 %v1696_v10  ;;  %1651 = vmatprep.subr.bf16.mxu1 %v1696_v10  ;;  %v1715_v31 = vld [vmem:[%s1818_s7 + $0x38] sm:$0xff]   ;;  %v1717_v33 = vld [vmem:[%s1818_s7 + $0x40] sm:$0xff]   ;;  %v1718_v34 = vld [vmem:[%s1818_s7 + $0xa8] sm:$0xff]  }
  0x17   : > { %v1719_v35 = vld [vmem:[%s1818_s7 + $0x48] sm:$0xff]   ;;  %v1720_v36 = vld [vmem:[%s1818_s7 + $0xb0] sm:$0xff]   ;;  %v1722_v38 = vld [vmem:[%s1818_s7 + $0xb8] sm:$0xff]  }
  0x18   : > { %v1721_v37 = vld [vmem:[%s1818_s7 + $0x50] sm:$0xff]   ;;  %v1723_v39 = vld [vmem:[%s1818_s7 + $0x58] sm:$0xff]   ;;  %v1724_v40 = vld [vmem:[%s1818_s7 + $0xc0] sm:$0xff]  }
  0x19   : > { %625 = vmatpush1.bf16.msra.mxu0 %v1698_v13  ;;  %1657 = vmatpush1.bf16.msra.mxu1 %v1698_v13  ;;  %v1725_v41 = vld [vmem:[%s1818_s7 + $0x60] sm:$0xff]  }
  0x1a   : > { %626 = vmatprep.subr.bf16.mxu0 %v614_v15  ;;  %1652 = vmatprep.subr.bf16.mxu1 %v614_v15 }
  0x1d   : > { %627 = vmatpush1.bf16.msra.mxu0 %v611_v16  ;;  %1658 = vmatpush1.bf16.msra.mxu1 %v611_v16 }
  0x20   : > { %1519 = vmatmul.mubr.msk.bf16.vlgmr.msra.gmra.mrb[0].mxu0 %vm531_vm1, %v1701_v17  ;;  %1532 = vmatmul.mubr.msk.bf16.vlgmr.msra.gmra.mrb[0].mxu1 %vm531_vm1, %v1702_v18 }
  0x21   : > { %658 = vmatprep.mubr.bf16.mxu0 %v1750_v2  ;;  %788 = vmatprep.mubr.bf16.mxu1 %v1750_v2 }
  0x28   : > { %1520 = vmatmul.mubr.msk.bf16.gmra.mrb[4].mxu0 %vm531_vm1, %v1703_v19  ;;  %1533 = vmatmul.mubr.msk.bf16.gmra.mrb[4].mxu1 %vm531_vm1, %v1704_v20 }
  0x29   : > { %668 = vmatprep.mubr.bf16.mxu0 %v1750_v2  ;;  %798 = vmatprep.mubr.bf16.mxu1 %v1750_v2 }
  0x30   : > { %1521 = vmatmul.mubr.msk.bf16.gmra.mrb[8].mxu0 %vm531_vm1, %v1705_v21  ;;  %1534 = vmatmul.mubr.msk.bf16.gmra.mrb[8].mxu1 %vm531_vm1, %v1706_v22 }
  0x31   : > { %678 = vmatprep.mubr.bf16.mxu0 %v1750_v2  ;;  %808 = vmatprep.mubr.bf16.mxu1 %v1750_v2 }
  0x38   : > { %1522 = vmatmul.mubr.msk.bf16.gmra.mrb[12].mxu0 %vm531_vm1, %v1707_v23  ;;  %1535 = vmatmul.mubr.msk.bf16.gmra.mrb[12].mxu1 %vm531_vm1, %v1708_v24 }
  0x39   : > { %688 = vmatprep.mubr.bf16.mxu0 %v1750_v2  ;;  %818 = vmatprep.mubr.bf16.mxu1 %v1750_v2 }
  0x40   : > { %1523 = vmatmul.mubr.msk.bf16.gmra.mrb[16].mxu0 %vm531_vm1, %v1709_v25  ;;  %1536 = vmatmul.mubr.msk.bf16.gmra.mrb[16].mxu1 %vm531_vm1, %v1710_v26 }
  0x41   : > { %698 = vmatprep.mubr.bf16.mxu0 %v1750_v2  ;;  %828 = vmatprep.mubr.bf16.mxu1 %v1750_v2 }
  0x48   : > { %1524 = vmatmul.mubr.msk.bf16.gmra.mrb[20].mxu0 %vm531_vm1, %v1711_v27  ;;  %1537 = vmatmul.mubr.msk.bf16.gmra.mrb[20].mxu1 %vm531_vm1, %v1712_v28 }
  0x49   : > { %708 = vmatprep.mubr.bf16.mxu0 %v1750_v2  ;;  %838 = vmatprep.mubr.bf16.mxu1 %v1750_v2 }
  0x50   : > { %1525 = vmatmul.mubr.msk.bf16.gmra.mrb[24].mxu0 %vm531_vm1, %v1713_v29  ;;  %1538 = vmatmul.mubr.msk.bf16.gmra.mrb[24].mxu1 %vm531_vm1, %v1714_v30 }
  0x51   : > { %718 = vmatprep.mubr.bf16.mxu0 %v1750_v2  ;;  %848 = vmatprep.mubr.bf16.mxu1 %v1750_v2 }
  0x58   : > { %1526 = vmatmul.mubr.msk.bf16.gmra.mrb[28].mxu0 %vm531_vm1, %v1715_v31  ;;  %1539 = vmatmul.mubr.msk.bf16.gmra.mrb[28].mxu1 %vm531_vm1, %v1716_v32 }
  0x59   : > { %728 = vmatprep.mubr.bf16.mxu0 %v1750_v2  ;;  %858 = vmatprep.mubr.bf16.mxu1 %v1750_v2 }
  0x60   : > { %1527 = vmatmul.mubr.msk.bf16.gmra.mrb[32].mxu0 %vm531_vm1, %v1717_v33  ;;  %1540 = vmatmul.mubr.msk.bf16.gmra.mrb[32].mxu1 %vm531_vm1, %v1718_v34 }
  0x61   : > { %738 = vmatprep.mubr.bf16.mxu0 %v1750_v2  ;;  %868 = vmatprep.mubr.bf16.mxu1 %v1750_v2 }
  0x68   : > { %1528 = vmatmul.mubr.msk.bf16.gmra.mrb[36].mxu0 %vm531_vm1, %v1719_v35  ;;  %1541 = vmatmul.mubr.msk.bf16.gmra.mrb[36].mxu1 %vm531_vm1, %v1720_v36 }
  0x69   : > { %748 = vmatprep.mubr.bf16.mxu0 %v1750_v2  ;;  %878 = vmatprep.mubr.bf16.mxu1 %v1750_v2 }
  0x70   : > { %1529 = vmatmul.mubr.msk.bf16.gmra.mrb[40].mxu0 %vm531_vm1, %v1721_v37  ;;  %1542 = vmatmul.mubr.msk.bf16.gmra.mrb[40].mxu1 %vm531_vm1, %v1722_v38 }
  0x71   : > { %758 = vmatprep.mubr.bf16.mxu0 %v1750_v2  ;;  %888 = vmatprep.mubr.bf16.mxu1 %v1750_v2 }
  0x78   : > { %1530 = vmatmul.mubr.msk.bf16.gmra.mrb[44].mxu0 %vm531_vm1, %v1723_v39  ;;  %1543 = vmatmul.mubr.msk.bf16.gmra.mrb[44].mxu1 %vm531_vm1, %v1724_v40 }
  0x79   : > { %768 = vmatprep.mubr.bf16.mxu0 %v1750_v2 }
  0x80   : > { %1531 = vmatmul.mubr.msk.bf16.gmra.mrb[48].mxu0 %vm531_vm1, %v1725_v41 }
  0xf3   : > { %v650_v49 = vpop.f32.mrb[0].mxu0  ;;  %v780_v50 = vpop.f32.mrb[0].mxu1 }
  0xf4   : > { %v651_v51 = vadd.f32 %v650_v49, %v1909_v47  ;;  %v652_v52 = vpop.f32.mrb[1].mxu0  ;;  %v781_v53 = vadd.f32 %v780_v50, %v1909_v47  ;;  %v782_v54 = vpop.f32.mrb[1].mxu1 }
  0xf5   : > { %v653_v55 = vadd.f32 %v652_v52, %v1911_v48  ;;  %v654_v56 = vpop.f32.mrb[2].mxu0  ;;  %v783_v57 = vadd.f32 %v782_v54, %v1911_v48  ;;  %v784_v58 = vpop.f32.mrb[2].mxu1 }
  0xf6   : > { %v899_v59 = vmax.f32 %v651_v51, 0.0  ;;  %v655_v60 = vadd.f32 %v654_v56, %v1909_v47  ;;  %v656_v61 = vpop.f32.mrb[3].mxu0  ;;  %v951_v62 = vmax.f32 %v781_v53, 0.0  ;;  %v785_v63 = vadd.f32 %v784_v58, %v1909_v47  ;;  %v786_v0 = vpop.f32.mrb[3].mxu1 }
  0xf7   : > { %v900_v1 = vmax.f32 %v653_v55, 0.0  ;;  %v657_v2 = vadd.f32 %v656_v61, %v1911_v48  ;;  %v952_v3 = vmax.f32 %v783_v57, 0.0  ;;  %v787_v4 = vadd.f32 %v786_v0, %v1911_v48 }
  0xf8   : > { %v901_v5 = vmax.f32 %v655_v60, 0.0  ;;  %v953_v6 = vmax.f32 %v785_v63, 0.0 }
  0xf9   : > { %v1597_v7 = vpack.c.bf16 %v900_v1, %v899_v59  ;;  %v902_v8 = vmax.f32 %v657_v2, 0.0  ;;  %v1623_v9 = vpack.c.bf16 %v952_v3, %v951_v62  ;;  %v954_v10 = vmax.f32 %v787_v4, 0.0 }
  0xfb   : > { %1299 = vst [vmem:[%s1925_s24] sm:$0xff] %v1597_v7  ;;  %v1598_v11 = vpack.c.bf16 %v902_v8, %v901_v5  ;;  %1325 = vst [vmem:[%s1925_s24 + $0xd0] sm:$0xff] %v1623_v9  ;;  %v660_v12 = vpop.f32.mrb[4].mxu0  ;;  %v1624_v13 = vpack.c.bf16 %v954_v10, %v953_v6  ;;  %v790_v14 = vpop.f32.mrb[4].mxu1 }
  0xfc   : > { %v661_v15 = vadd.f32 %v660_v12, %v1909_v47  ;;  %v662_v16 = vpop.f32.mrb[5].mxu0  ;;  %v791_v17 = vadd.f32 %v790_v14, %v1909_v47  ;;  %v792_v18 = vpop.f32.mrb[5].mxu1 }
  0xfd   : > { %1300 = vst [vmem:[%s1925_s24 + $0x8] sm:$0xff] %v1598_v11  ;;  %1326 = vst [vmem:[%s1925_s24 + $0xd8] sm:$0xff] %v1624_v13  ;;  %v663_v19 = vadd.f32 %v662_v16, %v1911_v48  ;;  %v664_v20 = vpop.f32.mrb[6].mxu0  ;;  %v793_v21 = vadd.f32 %v792_v18, %v1911_v48  ;;  %v794_v22 = vpop.f32.mrb[6].mxu1 }
  0xfe   : > { %v903_v23 = vmax.f32 %v661_v15, 0.0  ;;  %v665_v24 = vadd.f32 %v664_v20, %v1909_v47  ;;  %v666_v25 = vpop.f32.mrb[7].mxu0  ;;  %v955_v26 = vmax.f32 %v791_v17, 0.0  ;;  %v795_v27 = vadd.f32 %v794_v22, %v1909_v47  ;;  %v796_v28 = vpop.f32.mrb[7].mxu1 }
  0xff   : > { %v904_v29 = vmax.f32 %v663_v19, 0.0  ;;  %v667_v30 = vadd.f32 %v666_v25, %v1911_v48  ;;  %v956_v31 = vmax.f32 %v793_v21, 0.0  ;;  %v797_v32 = vadd.f32 %v796_v28, %v1911_v48 }
 0x100   : > { %v905_v33 = vmax.f32 %v665_v24, 0.0  ;;  %v957_v34 = vmax.f32 %v795_v27, 0.0 }
 0x101   : > { %v1599_v35 = vpack.c.bf16 %v904_v29, %v903_v23  ;;  %v906_v36 = vmax.f32 %v667_v30, 0.0  ;;  %v1625_v37 = vpack.c.bf16 %v956_v31, %v955_v26  ;;  %v958_v38 = vmax.f32 %v797_v32, 0.0 }
 0x103   : > { %1301 = vst [vmem:[%s1925_s24 + $0x10] sm:$0xff] %v1599_v35  ;;  %v1600_v39 = vpack.c.bf16 %v906_v36, %v905_v33  ;;  %1327 = vst [vmem:[%s1925_s24 + $0xe0] sm:$0xff] %v1625_v37  ;;  %v670_v40 = vpop.f32.mrb[8].mxu0  ;;  %v1626_v41 = vpack.c.bf16 %v958_v38, %v957_v34  ;;  %v800_v42 = vpop.f32.mrb[8].mxu1 }
 0x104   : > { %v671_v43 = vadd.f32 %v670_v40, %v1909_v47  ;;  %v672_v44 = vpop.f32.mrb[9].mxu0  ;;  %v801_v45 = vadd.f32 %v800_v42, %v1909_v47  ;;  %v802_v46 = vpop.f32.mrb[9].mxu1 }
 0x105   : > { %1302 = vst [vmem:[%s1925_s24 + $0x18] sm:$0xff] %v1600_v39  ;;  %1328 = vst [vmem:[%s1925_s24 + $0xe8] sm:$0xff] %v1626_v41  ;;  %v673_v49 = vadd.f32 %v672_v44, %v1911_v48  ;;  %v674_v50 = vpop.f32.mrb[10].mxu0  ;;  %v803_v51 = vadd.f32 %v802_v46, %v1911_v48  ;;  %v804_v52 = vpop.f32.mrb[10].mxu1 }
 0x106   : > { %v907_v53 = vmax.f32 %v671_v43, 0.0  ;;  %v675_v54 = vadd.f32 %v674_v50, %v1909_v47  ;;  %v676_v55 = vpop.f32.mrb[11].mxu0  ;;  %v959_v56 = vmax.f32 %v801_v45, 0.0  ;;  %v805_v57 = vadd.f32 %v804_v52, %v1909_v47  ;;  %v806_v58 = vpop.f32.mrb[11].mxu1 }
 0x107   : > { %v908_v59 = vmax.f32 %v673_v49, 0.0  ;;  %v677_v60 = vadd.f32 %v676_v55, %v1911_v48  ;;  %v960_v61 = vmax.f32 %v803_v51, 0.0  ;;  %v807_v62 = vadd.f32 %v806_v58, %v1911_v48 }
 0x108   : > { %v909_v63 = vmax.f32 %v675_v54, 0.0  ;;  %v961_v0 = vmax.f32 %v805_v57, 0.0 }
 0x109   : > { %v1601_v1 = vpack.c.bf16 %v908_v59, %v907_v53  ;;  %v910_v2 = vmax.f32 %v677_v60, 0.0  ;;  %v1627_v3 = vpack.c.bf16 %v960_v61, %v959_v56  ;;  %v962_v4 = vmax.f32 %v807_v62, 0.0 }
 0x10b   : > { %1303 = vst [vmem:[%s1925_s24 + $0x20] sm:$0xff] %v1601_v1  ;;  %v1602_v5 = vpack.c.bf16 %v910_v2, %v909_v63  ;;  %1329 = vst [vmem:[%s1925_s24 + $0xf0] sm:$0xff] %v1627_v3  ;;  %v680_v6 = vpop.f32.mrb[12].mxu0  ;;  %v1628_v7 = vpack.c.bf16 %v962_v4, %v961_v0  ;;  %v810_v8 = vpop.f32.mrb[12].mxu1 }
 0x10c   : > { %v681_v9 = vadd.f32 %v680_v6, %v1909_v47  ;;  %v682_v10 = vpop.f32.mrb[13].mxu0  ;;  %v811_v11 = vadd.f32 %v810_v8, %v1909_v47  ;;  %v812_v12 = vpop.f32.mrb[13].mxu1 }
 0x10d   : > { %1304 = vst [vmem:[%s1925_s24 + $0x28] sm:$0xff] %v1602_v5  ;;  %1330 = vst [vmem:[%s1925_s24 + $0xf8] sm:$0xff] %v1628_v7  ;;  %v683_v13 = vadd.f32 %v682_v10, %v1911_v48  ;;  %v684_v14 = vpop.f32.mrb[14].mxu0  ;;  %v813_v15 = vadd.f32 %v812_v12, %v1911_v48  ;;  %v814_v16 = vpop.f32.mrb[14].mxu1 }
 0x10e   : > { %v911_v17 = vmax.f32 %v681_v9, 0.0  ;;  %v685_v18 = vadd.f32 %v684_v14, %v1909_v47  ;;  %v686_v19 = vpop.f32.mrb[15].mxu0  ;;  %v963_v20 = vmax.f32 %v811_v11, 0.0  ;;  %v815_v21 = vadd.f32 %v814_v16, %v1909_v47  ;;  %v816_v22 = vpop.f32.mrb[15].mxu1 }
 0x10f   : > { %v912_v23 = vmax.f32 %v683_v13, 0.0  ;;  %v687_v24 = vadd.f32 %v686_v19, %v1911_v48  ;;  %v964_v25 = vmax.f32 %v813_v15, 0.0  ;;  %v817_v26 = vadd.f32 %v816_v22, %v1911_v48 }
 0x110   : > { %v913_v27 = vmax.f32 %v685_v18, 0.0  ;;  %v965_v28 = vmax.f32 %v815_v21, 0.0 }
 0x111   : > { %v1603_v29 = vpack.c.bf16 %v912_v23, %v911_v17  ;;  %v914_v30 = vmax.f32 %v687_v24, 0.0  ;;  %v1629_v31 = vpack.c.bf16 %v964_v25, %v963_v20  ;;  %v966_v32 = vmax.f32 %v817_v26, 0.0 }
 0x113   : > { %1305 = vst [vmem:[%s1925_s24 + $0x30] sm:$0xff] %v1603_v29  ;;  %v1604_v33 = vpack.c.bf16 %v914_v30, %v913_v27  ;;  %1331 = vst [vmem:[%s1925_s24 + $0x100] sm:$0xff] %v1629_v31  ;;  %v690_v34 = vpop.f32.mrb[16].mxu0  ;;  %v1630_v35 = vpack.c.bf16 %v966_v32, %v965_v28  ;;  %v820_v36 = vpop.f32.mrb[16].mxu1 }
 0x114   : > { %v691_v37 = vadd.f32 %v690_v34, %v1909_v47  ;;  %v692_v38 = vpop.f32.mrb[17].mxu0  ;;  %v821_v39 = vadd.f32 %v820_v36, %v1909_v47  ;;  %v822_v40 = vpop.f32.mrb[17].mxu1 }
 0x115   : > { %1306 = vst [vmem:[%s1925_s24 + $0x38] sm:$0xff] %v1604_v33  ;;  %1332 = vst [vmem:[%s1925_s24 + $0x108] sm:$0xff] %v1630_v35  ;;  %v693_v41 = vadd.f32 %v692_v38, %v1911_v48  ;;  %v694_v42 = vpop.f32.mrb[18].mxu0  ;;  %v823_v43 = vadd.f32 %v822_v40, %v1911_v48  ;;  %v824_v44 = vpop.f32.mrb[18].mxu1 }
 0x116   : > { %v915_v45 = vmax.f32 %v691_v37, 0.0  ;;  %v695_v46 = vadd.f32 %v694_v42, %v1909_v47  ;;  %v696_v49 = vpop.f32.mrb[19].mxu0  ;;  %v967_v50 = vmax.f32 %v821_v39, 0.0  ;;  %v825_v51 = vadd.f32 %v824_v44, %v1909_v47  ;;  %v826_v52 = vpop.f32.mrb[19].mxu1 }
 0x117   : > { %v916_v53 = vmax.f32 %v693_v41, 0.0  ;;  %v697_v54 = vadd.f32 %v696_v49, %v1911_v48  ;;  %v968_v55 = vmax.f32 %v823_v43, 0.0  ;;  %v827_v56 = vadd.f32 %v826_v52, %v1911_v48 }
 0x118   : > { %v917_v57 = vmax.f32 %v695_v46, 0.0  ;;  %v969_v58 = vmax.f32 %v825_v51, 0.0 }
 0x119   : > { %v1605_v59 = vpack.c.bf16 %v916_v53, %v915_v45  ;;  %v918_v60 = vmax.f32 %v697_v54, 0.0  ;;  %v1631_v61 = vpack.c.bf16 %v968_v55, %v967_v50  ;;  %v970_v62 = vmax.f32 %v827_v56, 0.0 }
 0x11b   : > { %1307 = vst [vmem:[%s1925_s24 + $0x40] sm:$0xff] %v1605_v59  ;;  %v1606_v63 = vpack.c.bf16 %v918_v60, %v917_v57  ;;  %1333 = vst [vmem:[%s1925_s24 + $0x110] sm:$0xff] %v1631_v61  ;;  %v700_v0 = vpop.f32.mrb[20].mxu0  ;;  %v1632_v1 = vpack.c.bf16 %v970_v62, %v969_v58  ;;  %v830_v2 = vpop.f32.mrb[20].mxu1 }
 0x11c   : > { %v701_v3 = vadd.f32 %v700_v0, %v1909_v47  ;;  %v702_v4 = vpop.f32.mrb[21].mxu0  ;;  %v831_v5 = vadd.f32 %v830_v2, %v1909_v47  ;;  %v832_v6 = vpop.f32.mrb[21].mxu1 }
 0x11d   : > { %1308 = vst [vmem:[%s1925_s24 + $0x48] sm:$0xff] %v1606_v63  ;;  %1334 = vst [vmem:[%s1925_s24 + $0x118] sm:$0xff] %v1632_v1  ;;  %v703_v7 = vadd.f32 %v702_v4, %v1911_v48  ;;  %v704_v8 = vpop.f32.mrb[22].mxu0  ;;  %v833_v9 = vadd.f32 %v832_v6, %v1911_v48  ;;  %v834_v10 = vpop.f32.mrb[22].mxu1 }
 0x11e   : > { %v919_v11 = vmax.f32 %v701_v3, 0.0  ;;  %v705_v12 = vadd.f32 %v704_v8, %v1909_v47  ;;  %v706_v13 = vpop.f32.mrb[23].mxu0  ;;  %v971_v14 = vmax.f32 %v831_v5, 0.0  ;;  %v835_v15 = vadd.f32 %v834_v10, %v1909_v47  ;;  %v836_v16 = vpop.f32.mrb[23].mxu1 }
 0x11f   : > { %v920_v17 = vmax.f32 %v703_v7, 0.0  ;;  %v707_v18 = vadd.f32 %v706_v13, %v1911_v48  ;;  %v972_v19 = vmax.f32 %v833_v9, 0.0  ;;  %v837_v20 = vadd.f32 %v836_v16, %v1911_v48 }
 0x120   : > { %v921_v21 = vmax.f32 %v705_v12, 0.0  ;;  %v973_v22 = vmax.f32 %v835_v15, 0.0 }
 0x121   : > { %v1607_v23 = vpack.c.bf16 %v920_v17, %v919_v11  ;;  %v922_v24 = vmax.f32 %v707_v18, 0.0  ;;  %v1633_v25 = vpack.c.bf16 %v972_v19, %v971_v14  ;;  %v974_v26 = vmax.f32 %v837_v20, 0.0 }
 0x123   : > { %1309 = vst [vmem:[%s1925_s24 + $0x50] sm:$0xff] %v1607_v23  ;;  %v1608_v27 = vpack.c.bf16 %v922_v24, %v921_v21  ;;  %1335 = vst [vmem:[%s1925_s24 + $0x120] sm:$0xff] %v1633_v25  ;;  %v710_v28 = vpop.f32.mrb[24].mxu0  ;;  %v1634_v29 = vpack.c.bf16 %v974_v26, %v973_v22  ;;  %v840_v30 = vpop.f32.mrb[24].mxu1 }
 0x124   : > { %v711_v31 = vadd.f32 %v710_v28, %v1909_v47  ;;  %v712_v32 = vpop.f32.mrb[25].mxu0  ;;  %v841_v33 = vadd.f32 %v840_v30, %v1909_v47  ;;  %v842_v34 = vpop.f32.mrb[25].mxu1 }
 0x125   : > { %1310 = vst [vmem:[%s1925_s24 + $0x58] sm:$0xff] %v1608_v27  ;;  %1336 = vst [vmem:[%s1925_s24 + $0x128] sm:$0xff] %v1634_v29  ;;  %v713_v35 = vadd.f32 %v712_v32, %v1911_v48  ;;  %v714_v36 = vpop.f32.mrb[26].mxu0  ;;  %v843_v37 = vadd.f32 %v842_v34, %v1911_v48  ;;  %v844_v38 = vpop.f32.mrb[26].mxu1 }
 0x126   : > { %v923_v39 = vmax.f32 %v711_v31, 0.0  ;;  %v715_v40 = vadd.f32 %v714_v36, %v1909_v47  ;;  %v716_v41 = vpop.f32.mrb[27].mxu0  ;;  %v975_v42 = vmax.f32 %v841_v33, 0.0  ;;  %v845_v43 = vadd.f32 %v844_v38, %v1909_v47  ;;  %v846_v44 = vpop.f32.mrb[27].mxu1 }
 0x127   : > { %v924_v45 = vmax.f32 %v713_v35, 0.0  ;;  %v717_v46 = vadd.f32 %v716_v41, %v1911_v48  ;;  %v976_v49 = vmax.f32 %v843_v37, 0.0  ;;  %v847_v50 = vadd.f32 %v846_v44, %v1911_v48 }
 0x128   : > { %v925_v51 = vmax.f32 %v715_v40, 0.0  ;;  %v977_v52 = vmax.f32 %v845_v43, 0.0 }
 0x129   : > { %v1609_v53 = vpack.c.bf16 %v924_v45, %v923_v39  ;;  %v926_v54 = vmax.f32 %v717_v46, 0.0  ;;  %v1635_v55 = vpack.c.bf16 %v976_v49, %v975_v42  ;;  %v978_v56 = vmax.f32 %v847_v50, 0.0 }
 0x12b   : > { %1311 = vst [vmem:[%s1925_s24 + $0x60] sm:$0xff] %v1609_v53  ;;  %v1610_v57 = vpack.c.bf16 %v926_v54, %v925_v51  ;;  %1337 = vst [vmem:[%s1925_s24 + $0x130] sm:$0xff] %v1635_v55  ;;  %v720_v58 = vpop.f32.mrb[28].mxu0  ;;  %v1636_v59 = vpack.c.bf16 %v978_v56, %v977_v52  ;;  %v850_v60 = vpop.f32.mrb[28].mxu1 }
 0x12c   : > { %v721_v61 = vadd.f32 %v720_v58, %v1909_v47  ;;  %v722_v62 = vpop.f32.mrb[29].mxu0  ;;  %v851_v63 = vadd.f32 %v850_v60, %v1909_v47  ;;  %v852_v0 = vpop.f32.mrb[29].mxu1 }
 0x12d   : > { %1312 = vst [vmem:[%s1925_s24 + $0x68] sm:$0xff] %v1610_v57  ;;  %1338 = vst [vmem:[%s1925_s24 + $0x138] sm:$0xff] %v1636_v59  ;;  %v723_v1 = vadd.f32 %v722_v62, %v1911_v48  ;;  %v724_v2 = vpop.f32.mrb[30].mxu0  ;;  %v853_v3 = vadd.f32 %v852_v0, %v1911_v48  ;;  %v854_v4 = vpop.f32.mrb[30].mxu1 }
 0x12e   : > { %v927_v5 = vmax.f32 %v721_v61, 0.0  ;;  %v725_v6 = vadd.f32 %v724_v2, %v1909_v47  ;;  %v726_v7 = vpop.f32.mrb[31].mxu0  ;;  %v979_v8 = vmax.f32 %v851_v63, 0.0  ;;  %v855_v9 = vadd.f32 %v854_v4, %v1909_v47  ;;  %v856_v10 = vpop.f32.mrb[31].mxu1 }
 0x12f   : > { %v928_v11 = vmax.f32 %v723_v1, 0.0  ;;  %v727_v12 = vadd.f32 %v726_v7, %v1911_v48  ;;  %v980_v13 = vmax.f32 %v853_v3, 0.0  ;;  %v857_v14 = vadd.f32 %v856_v10, %v1911_v48 }
 0x130   : > { %v929_v15 = vmax.f32 %v725_v6, 0.0  ;;  %v981_v16 = vmax.f32 %v855_v9, 0.0 }
 0x131   : > { %v1611_v17 = vpack.c.bf16 %v928_v11, %v927_v5  ;;  %v930_v18 = vmax.f32 %v727_v12, 0.0  ;;  %v1637_v19 = vpack.c.bf16 %v980_v13, %v979_v8  ;;  %v982_v20 = vmax.f32 %v857_v14, 0.0 }
 0x133   : > { %1313 = vst [vmem:[%s1925_s24 + $0x70] sm:$0xff] %v1611_v17  ;;  %v1612_v21 = vpack.c.bf16 %v930_v18, %v929_v15  ;;  %1339 = vst [vmem:[%s1925_s24 + $0x140] sm:$0xff] %v1637_v19  ;;  %v730_v22 = vpop.f32.mrb[32].mxu0  ;;  %v1638_v23 = vpack.c.bf16 %v982_v20, %v981_v16  ;;  %v860_v24 = vpop.f32.mrb[32].mxu1 }
 0x134   : > { %v731_v25 = vadd.f32 %v730_v22, %v1909_v47  ;;  %v732_v26 = vpop.f32.mrb[33].mxu0  ;;  %v861_v27 = vadd.f32 %v860_v24, %v1909_v47  ;;  %v862_v28 = vpop.f32.mrb[33].mxu1 }
 0x135   : > { %1314 = vst [vmem:[%s1925_s24 + $0x78] sm:$0xff] %v1612_v21  ;;  %1340 = vst [vmem:[%s1925_s24 + $0x148] sm:$0xff] %v1638_v23  ;;  %v733_v29 = vadd.f32 %v732_v26, %v1911_v48  ;;  %v734_v30 = vpop.f32.mrb[34].mxu0  ;;  %v863_v31 = vadd.f32 %v862_v28, %v1911_v48  ;;  %v864_v32 = vpop.f32.mrb[34].mxu1 }
 0x136   : > { %v931_v33 = vmax.f32 %v731_v25, 0.0  ;;  %v735_v34 = vadd.f32 %v734_v30, %v1909_v47  ;;  %v736_v35 = vpop.f32.mrb[35].mxu0  ;;  %v983_v36 = vmax.f32 %v861_v27, 0.0  ;;  %v865_v37 = vadd.f32 %v864_v32, %v1909_v47  ;;  %v866_v38 = vpop.f32.mrb[35].mxu1 }
 0x137   : > { %v932_v39 = vmax.f32 %v733_v29, 0.0  ;;  %v737_v40 = vadd.f32 %v736_v35, %v1911_v48  ;;  %v984_v41 = vmax.f32 %v863_v31, 0.0  ;;  %v867_v42 = vadd.f32 %v866_v38, %v1911_v48 }
 0x138   : > { %v933_v43 = vmax.f32 %v735_v34, 0.0  ;;  %v985_v44 = vmax.f32 %v865_v37, 0.0 }
 0x139   : > { %v1613_v45 = vpack.c.bf16 %v932_v39, %v931_v33  ;;  %v934_v46 = vmax.f32 %v737_v40, 0.0  ;;  %v1639_v49 = vpack.c.bf16 %v984_v41, %v983_v36  ;;  %v986_v50 = vmax.f32 %v867_v42, 0.0 }
 0x13b   : > { %1315 = vst [vmem:[%s1925_s24 + $0x80] sm:$0xff] %v1613_v45  ;;  %v1614_v51 = vpack.c.bf16 %v934_v46, %v933_v43  ;;  %1341 = vst [vmem:[%s1925_s24 + $0x150] sm:$0xff] %v1639_v49  ;;  %v740_v52 = vpop.f32.mrb[36].mxu0  ;;  %v1640_v53 = vpack.c.bf16 %v986_v50, %v985_v44  ;;  %v870_v54 = vpop.f32.mrb[36].mxu1 }
 0x13c   : > { %v741_v55 = vadd.f32 %v740_v52, %v1909_v47  ;;  %v742_v56 = vpop.f32.mrb[37].mxu0  ;;  %v871_v57 = vadd.f32 %v870_v54, %v1909_v47  ;;  %v872_v58 = vpop.f32.mrb[37].mxu1 }
 0x13d   : > { %1316 = vst [vmem:[%s1925_s24 + $0x88] sm:$0xff] %v1614_v51  ;;  %1342 = vst [vmem:[%s1925_s24 + $0x158] sm:$0xff] %v1640_v53  ;;  %v743_v59 = vadd.f32 %v742_v56, %v1911_v48  ;;  %v744_v60 = vpop.f32.mrb[38].mxu0  ;;  %v873_v61 = vadd.f32 %v872_v58, %v1911_v48  ;;  %v874_v62 = vpop.f32.mrb[38].mxu1 }
 0x13e   : > { %v935_v63 = vmax.f32 %v741_v55, 0.0  ;;  %v745_v0 = vadd.f32 %v744_v60, %v1909_v47  ;;  %v746_v1 = vpop.f32.mrb[39].mxu0  ;;  %v987_v2 = vmax.f32 %v871_v57, 0.0  ;;  %v875_v3 = vadd.f32 %v874_v62, %v1909_v47  ;;  %v876_v4 = vpop.f32.mrb[39].mxu1 }
 0x13f   : > { %v936_v5 = vmax.f32 %v743_v59, 0.0  ;;  %v747_v6 = vadd.f32 %v746_v1, %v1911_v48  ;;  %v988_v7 = vmax.f32 %v873_v61, 0.0  ;;  %v877_v8 = vadd.f32 %v876_v4, %v1911_v48 }
 0x140   : > { %v937_v9 = vmax.f32 %v745_v0, 0.0  ;;  %v989_v10 = vmax.f32 %v875_v3, 0.0 }
 0x141   : > { %v1615_v11 = vpack.c.bf16 %v936_v5, %v935_v63  ;;  %v938_v12 = vmax.f32 %v747_v6, 0.0  ;;  %v1641_v13 = vpack.c.bf16 %v988_v7, %v987_v2  ;;  %v990_v14 = vmax.f32 %v877_v8, 0.0 }
 0x143   : > { %1317 = vst [vmem:[%s1925_s24 + $0x90] sm:$0xff] %v1615_v11  ;;  %v1616_v15 = vpack.c.bf16 %v938_v12, %v937_v9  ;;  %1343 = vst [vmem:[%s1925_s24 + $0x160] sm:$0xff] %v1641_v13  ;;  %v750_v16 = vpop.f32.mrb[40].mxu0  ;;  %v1642_v17 = vpack.c.bf16 %v990_v14, %v989_v10  ;;  %v880_v18 = vpop.f32.mrb[40].mxu1 }
 0x144   : > { %v751_v19 = vadd.f32 %v750_v16, %v1909_v47  ;;  %v752_v20 = vpop.f32.mrb[41].mxu0  ;;  %v881_v21 = vadd.f32 %v880_v18, %v1909_v47  ;;  %v882_v22 = vpop.f32.mrb[41].mxu1 }
 0x145   : > { %1318 = vst [vmem:[%s1925_s24 + $0x98] sm:$0xff] %v1616_v15  ;;  %1344 = vst [vmem:[%s1925_s24 + $0x168] sm:$0xff] %v1642_v17  ;;  %v753_v23 = vadd.f32 %v752_v20, %v1911_v48  ;;  %v754_v24 = vpop.f32.mrb[42].mxu0  ;;  %v883_v25 = vadd.f32 %v882_v22, %v1911_v48  ;;  %v884_v26 = vpop.f32.mrb[42].mxu1 }
 0x146   : > { %v939_v27 = vmax.f32 %v751_v19, 0.0  ;;  %v755_v28 = vadd.f32 %v754_v24, %v1909_v47  ;;  %v756_v29 = vpop.f32.mrb[43].mxu0  ;;  %v991_v30 = vmax.f32 %v881_v21, 0.0  ;;  %v885_v31 = vadd.f32 %v884_v26, %v1909_v47  ;;  %v886_v32 = vpop.f32.mrb[43].mxu1 }
 0x147   : > { %v940_v33 = vmax.f32 %v753_v23, 0.0  ;;  %v757_v34 = vadd.f32 %v756_v29, %v1911_v48  ;;  %v992_v35 = vmax.f32 %v883_v25, 0.0  ;;  %v887_v36 = vadd.f32 %v886_v32, %v1911_v48 }
 0x148   : > { %v941_v37 = vmax.f32 %v755_v28, 0.0  ;;  %v993_v38 = vmax.f32 %v885_v31, 0.0 }
 0x149   : > { %v1617_v39 = vpack.c.bf16 %v940_v33, %v939_v27  ;;  %v942_v40 = vmax.f32 %v757_v34, 0.0  ;;  %v1643_v41 = vpack.c.bf16 %v992_v35, %v991_v30  ;;  %v994_v42 = vmax.f32 %v887_v36, 0.0 }
 0x14b   : > { %1319 = vst [vmem:[%s1925_s24 + $0xa0] sm:$0xff] %v1617_v39  ;;  %v1618_v43 = vpack.c.bf16 %v942_v40, %v941_v37  ;;  %1345 = vst [vmem:[%s1925_s24 + $0x170] sm:$0xff] %v1643_v41  ;;  %v760_v44 = vpop.f32.mrb[44].mxu0  ;;  %v1644_v45 = vpack.c.bf16 %v994_v42, %v993_v38  ;;  %v890_v46 = vpop.f32.mrb[44].mxu1 }
 0x14c   : > { %v761_v49 = vadd.f32 %v760_v44, %v1909_v47  ;;  %v762_v50 = vpop.f32.mrb[45].mxu0  ;;  %v891_v51 = vadd.f32 %v890_v46, %v1909_v47  ;;  %v892_v52 = vpop.f32.mrb[45].mxu1 }
 0x14d   : > { %1320 = vst [vmem:[%s1925_s24 + $0xa8] sm:$0xff] %v1618_v43  ;;  %1346 = vst [vmem:[%s1925_s24 + $0x178] sm:$0xff] %v1644_v45  ;;  %v763_v53 = vadd.f32 %v762_v50, %v1911_v48  ;;  %v764_v54 = vpop.f32.mrb[46].mxu0  ;;  %v893_v55 = vadd.f32 %v892_v52, %v1911_v48  ;;  %v894_v56 = vpop.f32.mrb[46].mxu1 }
 0x14e   : > { %v943_v57 = vmax.f32 %v761_v49, 0.0  ;;  %v765_v58 = vadd.f32 %v764_v54, %v1909_v47  ;;  %v766_v59 = vpop.f32.mrb[47].mxu0  ;;  %v995_v60 = vmax.f32 %v891_v51, 0.0  ;;  %v895_v61 = vadd.f32 %v894_v56, %v1909_v47  ;;  %v896_v62 = vpop.f32.mrb[47].mxu1 }
 0x14f   : > { %v944_v63 = vmax.f32 %v763_v53, 0.0  ;;  %v767_v0 = vadd.f32 %v766_v59, %v1911_v48  ;;  %v996_v1 = vmax.f32 %v893_v55, 0.0  ;;  %v897_v2 = vadd.f32 %v896_v62, %v1911_v48 }
 0x150   : > { %v945_v3 = vmax.f32 %v765_v58, 0.0  ;;  %v997_v4 = vmax.f32 %v895_v61, 0.0 }
 0x151   : > { %v1619_v5 = vpack.c.bf16 %v944_v63, %v943_v57  ;;  %v946_v6 = vmax.f32 %v767_v0, 0.0  ;;  %v1645_v7 = vpack.c.bf16 %v996_v1, %v995_v60  ;;  %v998_v8 = vmax.f32 %v897_v2, 0.0 }
 0x153   : > { %1321 = vst [vmem:[%s1925_s24 + $0xb0] sm:$0xff] %v1619_v5  ;;  %v1620_v9 = vpack.c.bf16 %v946_v6, %v945_v3  ;;  %1347 = vst [vmem:[%s1925_s24 + $0x180] sm:$0xff] %v1645_v7  ;;  %v770_v10 = vpop.f32.mrb[48].mxu0  ;;  %v1646_v11 = vpack.c.bf16 %v998_v8, %v997_v4 }
 0x154   : > { %v771_v12 = vadd.f32 %v770_v10, %v1909_v47  ;;  %v772_v13 = vpop.f32.mrb[49].mxu0 }
 0x155   : > { %1322 = vst [vmem:[%s1925_s24 + $0xb8] sm:$0xff] %v1620_v9  ;;  %1348 = vst [vmem:[%s1925_s24 + $0x188] sm:$0xff] %v1646_v11  ;;  %v773_v14 = vadd.f32 %v772_v13, %v1911_v48  ;;  %v774_v15 = vpop.f32.mrb[50].mxu0 }
 0x156   : > { %v947_v16 = vmax.f32 %v771_v12, 0.0  ;;  %v775_v17 = vadd.f32 %v774_v15, %v1909_v47  ;;  %v776_v18 = vpop.f32.mrb[51].mxu0 }
 0x157   : > { %v948_v19 = vmax.f32 %v773_v14, 0.0  ;;  %v777_v20 = vadd.f32 %v776_v18, %v1911_v48 }
 0x158   : > { %v949_v21 = vmax.f32 %v775_v17, 0.0 }
 0x159   : > { %v1621_v22 = vpack.c.bf16 %v948_v19, %v947_v16  ;;  %v950_v23 = vmax.f32 %v777_v20, 0.0 }
 0x15b   : > { %1323 = vst [vmem:[%s1925_s24 + $0xc0] sm:$0xff] %v1621_v22  ;;  %v1622_v24 = vpack.c.bf16 %v950_v23, %v949_v21 }
 0x15d   : > { %1324 = vst [vmem:[%s1925_s24 + $0xc8] sm:$0xff] %v1622_v24 }
 0x15e PF: > { %s13_s14 = sadd.s32 1, %s1748_s14   ;;  %s2082_s12 = smov %s1744_s13 }
 0x15f   : > { %p10_p5 = scmp.ge.s32.totalorder %s13_s14, 4   ;;  %s2083_s13 = smov %s2085_s15 }
 0x161   :  { %12 = sbr.rel (!%p10_p5) target bundleno = 2 (0x2), region = 68 }

// kernel: cnn_r_backbone.4
= control target key start
LH: loop header
LB: loop body
LE: loop exit
PB: predicated region body
PF: predicated region fallthrough
CT: control target
= control target key end

     0   :  { %s21419_s0 = inlined_call_operand.vmem [shape: bf16[72,20736], index: 0, kind: input, shape index: {}]   ;;  %s21420_s1 = inlined_call_operand.vmem [shape: bf16[20736,256], index: 1, kind: input, shape index: {}]   ;;  %s21421_s2 = inlined_call_operand.vmem [shape: f32[1,256], index: 2, kind: input, shape index: {}]   ;;  %s21422_s3 = inlined_call_operand.vmem [shape: bf16[72,256], index: 3, kind: output, shape index: {}]  }
   0x1   :  { %21423 = sst [smem:[#allocation6_spill]] %s21419_s0 }
   0x2   :  { %s17983_s12 = smov 0   ;;  %s17985_s13 = smov 0  }
   0x3   :  { %s17987_s14 = smov 0   ;;  %s17989_s15 = smov 0  }
   0x4   :  { %s17991_s16 = smov 0   ;;  %s17993_s17 = smov 0  }
   0x5   :  { %s17995_s18 = smov 0   ;;  %s17997_s19 = smov 0  }
   0x6   :  { %s17999_s20 = smov 0   ;;  %s18001_s21 = smov 0  }
   0x7   :  { %s18003_s22 = smov 0  }
   0x8 LB: > { %s14954_s23 = sadd.s32 4294967295, %s17961_s22   ;;  %s25_s24 = sadd.s32 1, %s17953_s20  ;;  %s17961_s22 = sphi %s18003_s22, %s13_s22   ;;  %s17957_s21 = sphi %s18001_s21, %s21437_s21   ;;  %s17953_s20 = sphi %s17999_s20, %s21436_s20   ;;  %s17949_s19 = sphi %s17997_s19, %s21435_s19   ;;  %s17945_s18 = sphi %s17995_s18, %s21434_s18   ;;  %s17941_s17 = sphi %s17993_s17, %s21433_s17   ;;  %s17937_s16 = sphi %s17991_s16, %s21432_s16   ;;  %s17933_s15 = sphi %s17989_s15, %s21431_s15   ;;  %s17929_s14 = sphi %s17987_s14, %s21430_s14   ;;  %s17925_s13 = sphi %s17985_s13, %s21429_s13   ;;  %s17921_s12 = sphi %s17983_s12, %s21428_s12  }
   0x9   : > { %p26_p0 = scmp.ge.s32.totalorder %s25_s24, 3  ;;  %s28_s25 = sadd.s32 1, %s17957_s21 }
   0xa   : > { %s41_s26 = sadd.s32 1, %s17941_s17  ;;  %p48_p1 = scmp.ne.s32.totalorder %s17941_s17, %s17937_s16 }
   0xb   : > { %s21439_s24 = smov (%p26_p0, %s25_s24), 0  ;;  %s21441_s25 = smov (!%p26_p0, %s28_s25), %s17957_s21 }
   0xc   : > { %s37_s27 = ssub.s32 %s17953_s20, %s21439_s24  ;;  %p49_p2 = scmp.eq.s32.totalorder %s17961_s22, 0 }
   0xd   : > { %p30_p3 = scmp.ge.s32.totalorder %s21441_s25, 2  ;;  %p39_p4 = scmp.eq.s32.totalorder %s37_s27, 0 }
   0xe   : > { %p18050_p5 = por %p49_p2, %p48_p1  ;;  %s69_s29 = sadd.s32 1, %s17933_s15 }
   0xf   : > { %s21443_s25 = smov (%p30_p3, %s21441_s25), 0  ;;  %p76_p6 = scmp.ne.s32.totalorder %s17933_s15, %s17929_s14 }
  0x10   : > { %s18058_s30 = scalar_select %p39_p4, %s17941_s17, %s41_s26  }
  0x11   : > { %s65_s4 = ssub.s32 %s17957_s21, %s21443_s25  ;;  %p18064_p9 = por %p76_p6, %p49_p2 }
  0x12   : > { %s66_s5 = sor.u32 %s65_s4, %s37_s27  ;;  %p121_p7 = scmp.eq.s32.totalorder %s65_s4, 0 }
  0x13   : > { %p67_p8 = scmp.eq.s32.totalorder %s66_s5, 0  ;;  %s123_s7 = sadd.s32 1, %s17925_s13 }
  0x14   : > { %p133_p10 = scmp.ne.s32.totalorder %s17925_s13, %s17921_s12  ;;  %p134_p11 = scmp.eq.s32.totalorder %s14954_s23, 5 }
  0x15   : > { %s18072_s8 = scalar_select %p67_p8, %s17933_s15, %s69_s29  }
  0x16   : > { %s18075_s9 = scalar_select %p121_p7, %s17925_s13, %s123_s7  }
  0x17   : > { %p18077_p12 = por %p134_p11, %p133_p10  ;;  %p14957_p13 = scmp.ge.s32.totalorder %s17961_s22, 6 }
  0x19   : > { %156 = sbr.rel (%p14957_p13) target bundleno = 746 (0x2ea), region = 16 }
  0x20   : > { %159 = sbr.rel (!%p18050_p5) target bundleno = 163 (0xa3), region = 20  ;;  %s161_s11 = sand.u32 (%p18050_p5), 1, %s17941_s17  }
  0x21   : > { %s15680_s26 = smul.u32 (%p18050_p5), 216, %s17953_s20  ;;  %s21427_s0 = sld [smem:[#allocation6_spill]] (%p18050_p5) }
  0x22   : > { %s16972_s27 = smul.u32 (%p18050_p5), 1944, %s161_s11 }
  0x24   : > { %s18094_s23 = scalar_lea.vmem (%p18050_p5), [#allocation3], %s16972_s27 }
  0x27   : > { %s18089_s5 = scalar_lea.vmem %s21427_s0, %s15680_s26 }
  0x28   : > { %v182_v0 = vld [vmem:[%s18089_s5] sm:$0xff]  ;;  %v184_v1 = vld [vmem:[%s18089_s5 + $0x8] sm:$0xff]  ;;  %v186_v2 = vld [vmem:[%s18089_s5 + $0x10] sm:$0xff] }
  0x29   : > { %183 = vst [vmem:[%s18094_s23] sm:$0xff] %v182_v0  ;;  %185 = vst [vmem:[%s18094_s23 + $0x8] sm:$0xff] %v184_v1  ;;  %v188_v3 = vld [vmem:[%s18089_s5 + $0x18] sm:$0xff]  ;;  %v190_v4 = vld [vmem:[%s18089_s5 + $0x20] sm:$0xff] }
  0x2a   : > { %187 = vst [vmem:[%s18094_s23 + $0x10] sm:$0xff] %v186_v2  ;;  %v192_v5 = vld [vmem:[%s18089_s5 + $0x28] sm:$0xff]  ;;  %189 = vst [vmem:[%s18094_s23 + $0x18] sm:$0xff] %v188_v3  ;;  %v194_v6 = vld [vmem:[%s18089_s5 + $0x30] sm:$0xff] }
  0x2b   : > { %191 = vst [vmem:[%s18094_s23 + $0x20] sm:$0xff] %v190_v4  ;;  %193 = vst [vmem:[%s18094_s23 + $0x28] sm:$0xff] %v192_v5  ;;  %v196_v7 = vld [vmem:[%s18089_s5 + $0x38] sm:$0xff]  ;;  %v198_v8 = vld [vmem:[%s18089_s5 + $0x40] sm:$0xff] }
  0x2c   : > { %195 = vst [vmem:[%s18094_s23 + $0x30] sm:$0xff] %v194_v6  ;;  %197 = vst [vmem:[%s18094_s23 + $0x38] sm:$0xff] %v196_v7  ;;  %v200_v9 = vld [vmem:[%s18089_s5 + $0x48] sm:$0xff]  ;;  %v202_v10 = vld [vmem:[%s18089_s5 + $0x50] sm:$0xff] }
  0x2d   : > { %199 = vst [vmem:[%s18094_s23 + $0x40] sm:$0xff] %v198_v8  ;;  %v204_v11 = vld [vmem:[%s18089_s5 + $0x58] sm:$0xff]  ;;  %201 = vst [vmem:[%s18094_s23 + $0x48] sm:$0xff] %v200_v9  ;;  %v206_v12 = vld [vmem:[%s18089_s5 + $0x60] sm:$0xff] }
  0x2e   : > { %203 = vst [vmem:[%s18094_s23 + $0x50] sm:$0xff] %v202_v10  ;;  %205 = vst [vmem:[%s18094_s23 + $0x58] sm:$0xff] %v204_v11  ;;  %v208_v13 = vld [vmem:[%s18089_s5 + $0x68] sm:$0xff]  ;;  %v210_v14 = vld [vmem:[%s18089_s5 + $0x70] sm:$0xff] }
  0x2f   : > { %207 = vst [vmem:[%s18094_s23 + $0x60] sm:$0xff] %v206_v12  ;;  %209 = vst [vmem:[%s18094_s23 + $0x68] sm:$0xff] %v208_v13  ;;  %v212_v15 = vld [vmem:[%s18089_s5 + $0x78] sm:$0xff]  ;;  %v214_v16 = vld [vmem:[%s18089_s5 + $0x80] sm:$0xff] }
  0x30   : > { %211 = vst [vmem:[%s18094_s23 + $0x70] sm:$0xff] %v210_v14  ;;  %v216_v17 = vld [vmem:[%s18089_s5 + $0x88] sm:$0xff]  ;;  %213 = vst [vmem:[%s18094_s23 + $0x78] sm:$0xff] %v212_v15  ;;  %v218_v18 = vld [vmem:[%s18089_s5 + $0x90] sm:$0xff] }
  0x31   : > { %215 = vst [vmem:[%s18094_s23 + $0x80] sm:$0xff] %v214_v16  ;;  %217 = vst [vmem:[%s18094_s23 + $0x88] sm:$0xff] %v216_v17  ;;  %v220_v19 = vld [vmem:[%s18089_s5 + $0x98] sm:$0xff]  ;;  %v222_v20 = vld [vmem:[%s18089_s5 + $0xa0] sm:$0xff] }
  0x32   : > { %219 = vst [vmem:[%s18094_s23 + $0x90] sm:$0xff] %v218_v18  ;;  %221 = vst [vmem:[%s18094_s23 + $0x98] sm:$0xff] %v220_v19  ;;  %v224_v21 = vld [vmem:[%s18089_s5 + $0xa8] sm:$0xff]  ;;  %v226_v22 = vld [vmem:[%s18089_s5 + $0xb0] sm:$0xff] }
  0x33   : > { %223 = vst [vmem:[%s18094_s23 + $0xa0] sm:$0xff] %v222_v20  ;;  %v228_v23 = vld [vmem:[%s18089_s5 + $0xb8] sm:$0xff]  ;;  %225 = vst [vmem:[%s18094_s23 + $0xa8] sm:$0xff] %v224_v21  ;;  %v230_v24 = vld [vmem:[%s18089_s5 + $0xc0] sm:$0xff] }
  0x34   : > { %227 = vst [vmem:[%s18094_s23 + $0xb0] sm:$0xff] %v226_v22  ;;  %229 = vst [vmem:[%s18094_s23 + $0xb8] sm:$0xff] %v228_v23  ;;  %v232_v25 = vld [vmem:[%s18089_s5 + $0xc8] sm:$0xff]  ;;  %v234_v26 = vld [vmem:[%s18089_s5 + $0xd0] sm:$0xff] }
  0x35   : > { %231 = vst [vmem:[%s18094_s23 + $0xc0] sm:$0xff] %v230_v24  ;;  %233 = vst [vmem:[%s18094_s23 + $0xc8] sm:$0xff] %v232_v25  ;;  %v236_v27 = vld [vmem:[%s18089_s5 + $0x288] sm:$0xff]  ;;  %v238_v28 = vld [vmem:[%s18089_s5 + $0x290] sm:$0xff] }
  0x36   : > { %235 = vst [vmem:[%s18094_s23 + $0xd0] sm:$0xff] %v234_v26  ;;  %v240_v29 = vld [vmem:[%s18089_s5 + $0x298] sm:$0xff]  ;;  %237 = vst [vmem:[%s18094_s23 + $0xd8] sm:$0xff] %v236_v27  ;;  %v242_v30 = vld [vmem:[%s18089_s5 + $0x2a0] sm:$0xff] }
  0x37   : > { %239 = vst [vmem:[%s18094_s23 + $0xe0] sm:$0xff] %v238_v28  ;;  %241 = vst [vmem:[%s18094_s23 + $0xe8] sm:$0xff] %v240_v29  ;;  %v244_v31 = vld [vmem:[%s18089_s5 + $0x2a8] sm:$0xff]  ;;  %v246_v32 = vld [vmem:[%s18089_s5 + $0x2b0] sm:$0xff] }
  0x38   : > { %243 = vst [vmem:[%s18094_s23 + $0xf0] sm:$0xff] %v242_v30  ;;  %245 = vst [vmem:[%s18094_s23 + $0xf8] sm:$0xff] %v244_v31  ;;  %v248_v33 = vld [vmem:[%s18089_s5 + $0x2b8] sm:$0xff]  ;;  %v250_v34 = vld [vmem:[%s18089_s5 + $0x2c0] sm:$0xff] }
  0x39   : > { %247 = vst [vmem:[%s18094_s23 + $0x100] sm:$0xff] %v246_v32  ;;  %v252_v35 = vld [vmem:[%s18089_s5 + $0x2c8] sm:$0xff]  ;;  %249 = vst [vmem:[%s18094_s23 + $0x108] sm:$0xff] %v248_v33  ;;  %v254_v36 = vld [vmem:[%s18089_s5 + $0x2d0] sm:$0xff] }
  0x3a   : > { %251 = vst [vmem:[%s18094_s23 + $0x110] sm:$0xff] %v250_v34  ;;  %253 = vst [vmem:[%s18094_s23 + $0x118] sm:$0xff] %v252_v35  ;;  %v256_v37 = vld [vmem:[%s18089_s5 + $0x2d8] sm:$0xff]  ;;  %v258_v38 = vld [vmem:[%s18089_s5 + $0x2e0] sm:$0xff] }
  0x3b   : > { %255 = vst [vmem:[%s18094_s23 + $0x120] sm:$0xff] %v254_v36  ;;  %257 = vst [vmem:[%s18094_s23 + $0x128] sm:$0xff] %v256_v37  ;;  %v260_v39 = vld [vmem:[%s18089_s5 + $0x2e8] sm:$0xff]  ;;  %v262_v40 = vld [vmem:[%s18089_s5 + $0x2f0] sm:$0xff] }
  0x3c   : > { %259 = vst [vmem:[%s18094_s23 + $0x130] sm:$0xff] %v258_v38  ;;  %v264_v41 = vld [vmem:[%s18089_s5 + $0x2f8] sm:$0xff]  ;;  %261 = vst [vmem:[%s18094_s23 + $0x138] sm:$0xff] %v260_v39  ;;  %v266_v42 = vld [vmem:[%s18089_s5 + $0x300] sm:$0xff] }
  0x3d   : > { %263 = vst [vmem:[%s18094_s23 + $0x140] sm:$0xff] %v262_v40  ;;  %265 = vst [vmem:[%s18094_s23 + $0x148] sm:$0xff] %v264_v41  ;;  %v268_v43 = vld [vmem:[%s18089_s5 + $0x308] sm:$0xff]  ;;  %v270_v44 = vld [vmem:[%s18089_s5 + $0x310] sm:$0xff] }
  0x3e   : > { %267 = vst [vmem:[%s18094_s23 + $0x150] sm:$0xff] %v266_v42  ;;  %269 = vst [vmem:[%s18094_s23 + $0x158] sm:$0xff] %v268_v43  ;;  %v272_v45 = vld [vmem:[%s18089_s5 + $0x318] sm:$0xff]  ;;  %v274_v46 = vld [vmem:[%s18089_s5 + $0x320] sm:$0xff] }
  0x3f   : > { %271 = vst [vmem:[%s18094_s23 + $0x160] sm:$0xff] %v270_v44  ;;  %v276_v47 = vld [vmem:[%s18089_s5 + $0x328] sm:$0xff]  ;;  %273 = vst [vmem:[%s18094_s23 + $0x168] sm:$0xff] %v272_v45  ;;  %v278_v48 = vld [vmem:[%s18089_s5 + $0x330] sm:$0xff] }
  0x40   : > { %275 = vst [vmem:[%s18094_s23 + $0x170] sm:$0xff] %v274_v46  ;;  %277 = vst [vmem:[%s18094_s23 + $0x178] sm:$0xff] %v276_v47  ;;  %v280_v49 = vld [vmem:[%s18089_s5 + $0x338] sm:$0xff]  ;;  %v282_v50 = vld [vmem:[%s18089_s5 + $0x340] sm:$0xff] }
  0x41   : > { %279 = vst [vmem:[%s18094_s23 + $0x180] sm:$0xff] %v278_v48  ;;  %281 = vst [vmem:[%s18094_s23 + $0x188] sm:$0xff] %v280_v49  ;;  %v284_v51 = vld [vmem:[%s18089_s5 + $0x348] sm:$0xff]  ;;  %v286_v52 = vld [vmem:[%s18089_s5 + $0x350] sm:$0xff] }
  0x42   : > { %283 = vst [vmem:[%s18094_s23 + $0x190] sm:$0xff] %v282_v50  ;;  %v288_v53 = vld [vmem:[%s18089_s5 + $0x358] sm:$0xff]  ;;  %285 = vst [vmem:[%s18094_s23 + $0x198] sm:$0xff] %v284_v51  ;;  %v290_v54 = vld [vmem:[%s18089_s5 + $0x510] sm:$0xff] }
  0x43   : > { %287 = vst [vmem:[%s18094_s23 + $0x1a0] sm:$0xff] %v286_v52  ;;  %289 = vst [vmem:[%s18094_s23 + $0x1a8] sm:$0xff] %v288_v53  ;;  %v292_v55 = vld [vmem:[%s18089_s5 + $0x518] sm:$0xff]  ;;  %v294_v56 = vld [vmem:[%s18089_s5 + $0x520] sm:$0xff] }
  0x44   : > { %291 = vst [vmem:[%s18094_s23 + $0x1b0] sm:$0xff] %v290_v54  ;;  %293 = vst [vmem:[%s18094_s23 + $0x1b8] sm:$0xff] %v292_v55  ;;  %v296_v57 = vld [vmem:[%s18089_s5 + $0x528] sm:$0xff]  ;;  %v298_v58 = vld [vmem:[%s18089_s5 + $0x530] sm:$0xff] }
  0x45   : > { %295 = vst [vmem:[%s18094_s23 + $0x1c0] sm:$0xff] %v294_v56  ;;  %v300_v59 = vld [vmem:[%s18089_s5 + $0x538] sm:$0xff]  ;;  %297 = vst [vmem:[%s18094_s23 + $0x1c8] sm:$0xff] %v296_v57  ;;  %v302_v60 = vld [vmem:[%s18089_s5 + $0x540] sm:$0xff] }
  0x46   : > { %299 = vst [vmem:[%s18094_s23 + $0x1d0] sm:$0xff] %v298_v58  ;;  %301 = vst [vmem:[%s18094_s23 + $0x1d8] sm:$0xff] %v300_v59  ;;  %v304_v61 = vld [vmem:[%s18089_s5 + $0x548] sm:$0xff]  ;;  %v306_v62 = vld [vmem:[%s18089_s5 + $0x550] sm:$0xff] }
  0x47   : > { %303 = vst [vmem:[%s18094_s23 + $0x1e0] sm:$0xff] %v302_v60  ;;  %305 = vst [vmem:[%s18094_s23 + $0x1e8] sm:$0xff] %v304_v61  ;;  %v308_v63 = vld [vmem:[%s18089_s5 + $0x558] sm:$0xff]  ;;  %v310_v0 = vld [vmem:[%s18089_s5 + $0x560] sm:$0xff] }
  0x48   : > { %307 = vst [vmem:[%s18094_s23 + $0x1f0] sm:$0xff] %v306_v62  ;;  %v312_v1 = vld [vmem:[%s18089_s5 + $0x568] sm:$0xff]  ;;  %309 = vst [vmem:[%s18094_s23 + $0x1f8] sm:$0xff] %v308_v63  ;;  %v314_v2 = vld [vmem:[%s18089_s5 + $0x570] sm:$0xff] }
  0x49   : > { %311 = vst [vmem:[%s18094_s23 + $0x200] sm:$0xff] %v310_v0  ;;  %313 = vst [vmem:[%s18094_s23 + $0x208] sm:$0xff] %v312_v1  ;;  %v316_v3 = vld [vmem:[%s18089_s5 + $0x578] sm:$0xff]  ;;  %v318_v4 = vld [vmem:[%s18089_s5 + $0x580] sm:$0xff] }
  0x4a   : > { %315 = vst [vmem:[%s18094_s23 + $0x210] sm:$0xff] %v314_v2  ;;  %317 = vst [vmem:[%s18094_s23 + $0x218] sm:$0xff] %v316_v3  ;;  %v320_v5 = vld [vmem:[%s18089_s5 + $0x588] sm:$0xff]  ;;  %v322_v6 = vld [vmem:[%s18089_s5 + $0x590] sm:$0xff] }
  0x4b   : > { %319 = vst [vmem:[%s18094_s23 + $0x220] sm:$0xff] %v318_v4  ;;  %v324_v7 = vld [vmem:[%s18089_s5 + $0x598] sm:$0xff]  ;;  %321 = vst [vmem:[%s18094_s23 + $0x228] sm:$0xff] %v320_v5  ;;  %v326_v8 = vld [vmem:[%s18089_s5 + $0x5a0] sm:$0xff] }
  0x4c   : > { %323 = vst [vmem:[%s18094_s23 + $0x230] sm:$0xff] %v322_v6  ;;  %325 = vst [vmem:[%s18094_s23 + $0x238] sm:$0xff] %v324_v7  ;;  %v328_v9 = vld [vmem:[%s18089_s5 + $0x5a8] sm:$0xff]  ;;  %v330_v10 = vld [vmem:[%s18089_s5 + $0x5b0] sm:$0xff] }
  0x4d   : > { %327 = vst [vmem:[%s18094_s23 + $0x240] sm:$0xff] %v326_v8  ;;  %329 = vst [vmem:[%s18094_s23 + $0x248] sm:$0xff] %v328_v9  ;;  %v332_v11 = vld [vmem:[%s18089_s5 + $0x5b8] sm:$0xff]  ;;  %v334_v12 = vld [vmem:[%s18089_s5 + $0x5c0] sm:$0xff] }
  0x4e   : > { %331 = vst [vmem:[%s18094_s23 + $0x250] sm:$0xff] %v330_v10  ;;  %v336_v13 = vld [vmem:[%s18089_s5 + $0x5c8] sm:$0xff]  ;;  %333 = vst [vmem:[%s18094_s23 + $0x258] sm:$0xff] %v332_v11  ;;  %v338_v14 = vld [vmem:[%s18089_s5 + $0x5d0] sm:$0xff] }
  0x4f   : > { %335 = vst [vmem:[%s18094_s23 + $0x260] sm:$0xff] %v334_v12  ;;  %337 = vst [vmem:[%s18094_s23 + $0x268] sm:$0xff] %v336_v13  ;;  %v340_v15 = vld [vmem:[%s18089_s5 + $0x5d8] sm:$0xff]  ;;  %v342_v16 = vld [vmem:[%s18089_s5 + $0x5e0] sm:$0xff] }
  0x50   : > { %339 = vst [vmem:[%s18094_s23 + $0x270] sm:$0xff] %v338_v14  ;;  %341 = vst [vmem:[%s18094_s23 + $0x278] sm:$0xff] %v340_v15  ;;  %v344_v17 = vld [vmem:[%s18089_s5 + $0x798] sm:$0xff]  ;;  %v346_v18 = vld [vmem:[%s18089_s5 + $0x7a0] sm:$0xff] }
  0x51   : > { %343 = vst [vmem:[%s18094_s23 + $0x280] sm:$0xff] %v342_v16  ;;  %v348_v19 = vld [vmem:[%s18089_s5 + $0x7a8] sm:$0xff]  ;;  %345 = vst [vmem:[%s18094_s23 + $0x288] sm:$0xff] %v344_v17  ;;  %v350_v20 = vld [vmem:[%s18089_s5 + $0x7b0] sm:$0xff] }
  0x52   : > { %347 = vst [vmem:[%s18094_s23 + $0x290] sm:$0xff] %v346_v18  ;;  %349 = vst [vmem:[%s18094_s23 + $0x298] sm:$0xff] %v348_v19  ;;  %v352_v21 = vld [vmem:[%s18089_s5 + $0x7b8] sm:$0xff]  ;;  %v354_v22 = vld [vmem:[%s18089_s5 + $0x7c0] sm:$0xff] }
  0x53   : > { %351 = vst [vmem:[%s18094_s23 + $0x2a0] sm:$0xff] %v350_v20  ;;  %353 = vst [vmem:[%s18094_s23 + $0x2a8] sm:$0xff] %v352_v21  ;;  %v356_v23 = vld [vmem:[%s18089_s5 + $0x7c8] sm:$0xff]  ;;  %v358_v24 = vld [vmem:[%s18089_s5 + $0x7d0] sm:$0xff] }
  0x54   : > { %355 = vst [vmem:[%s18094_s23 + $0x2b0] sm:$0xff] %v354_v22  ;;  %v360_v25 = vld [vmem:[%s18089_s5 + $0x7d8] sm:$0xff]  ;;  %357 = vst [vmem:[%s18094_s23 + $0x2b8] sm:$0xff] %v356_v23  ;;  %v362_v26 = vld [vmem:[%s18089_s5 + $0x7e0] sm:$0xff] }
  0x55   : > { %359 = vst [vmem:[%s18094_s23 + $0x2c0] sm:$0xff] %v358_v24  ;;  %361 = vst [vmem:[%s18094_s23 + $0x2c8] sm:$0xff] %v360_v25  ;;  %v364_v27 = vld [vmem:[%s18089_s5 + $0x7e8] sm:$0xff]  ;;  %v366_v28 = vld [vmem:[%s18089_s5 + $0x7f0] sm:$0xff] }
  0x56   : > { %363 = vst [vmem:[%s18094_s23 + $0x2d0] sm:$0xff] %v362_v26  ;;  %365 = vst [vmem:[%s18094_s23 + $0x2d8] sm:$0xff] %v364_v27  ;;  %v368_v29 = vld [vmem:[%s18089_s5 + $0x7f8] sm:$0xff]  ;;  %v370_v30 = vld [vmem:[%s18089_s5 + $0x800] sm:$0xff] }
  0x57   : > { %367 = vst [vmem:[%s18094_s23 + $0x2e0] sm:$0xff] %v366_v28  ;;  %v372_v31 = vld [vmem:[%s18089_s5 + $0x808] sm:$0xff]  ;;  %369 = vst [vmem:[%s18094_s23 + $0x2e8] sm:$0xff] %v368_v29  ;;  %v374_v32 = vld [vmem:[%s18089_s5 + $0x810] sm:$0xff] }
  0x58   : > { %371 = vst [vmem:[%s18094_s23 + $0x2f0] sm:$0xff] %v370_v30  ;;  %373 = vst [vmem:[%s18094_s23 + $0x2f8] sm:$0xff] %v372_v31  ;;  %v376_v33 = vld [vmem:[%s18089_s5 + $0x818] sm:$0xff]  ;;  %v378_v34 = vld [vmem:[%s18089_s5 + $0x820] sm:$0xff] }
  0x59   : > { %375 = vst [vmem:[%s18094_s23 + $0x300] sm:$0xff] %v374_v32  ;;  %377 = vst [vmem:[%s18094_s23 + $0x308] sm:$0xff] %v376_v33  ;;  %v380_v35 = vld [vmem:[%s18089_s5 + $0x828] sm:$0xff]  ;;  %v382_v36 = vld [vmem:[%s18089_s5 + $0x830] sm:$0xff] }
  0x5a   : > { %379 = vst [vmem:[%s18094_s23 + $0x310] sm:$0xff] %v378_v34  ;;  %v384_v37 = vld [vmem:[%s18089_s5 + $0x838] sm:$0xff]  ;;  %381 = vst [vmem:[%s18094_s23 + $0x318] sm:$0xff] %v380_v35  ;;  %v386_v38 = vld [vmem:[%s18089_s5 + $0x840] sm:$0xff] }
  0x5b   : > { %383 = vst [vmem:[%s18094_s23 + $0x320] sm:$0xff] %v382_v36  ;;  %385 = vst [vmem:[%s18094_s23 + $0x328] sm:$0xff] %v384_v37  ;;  %v388_v39 = vld [vmem:[%s18089_s5 + $0x848] sm:$0xff]  ;;  %v390_v40 = vld [vmem:[%s18089_s5 + $0x850] sm:$0xff] }
  0x5c   : > { %387 = vst [vmem:[%s18094_s23 + $0x330] sm:$0xff] %v386_v38  ;;  %389 = vst [vmem:[%s18094_s23 + $0x338] sm:$0xff] %v388_v39  ;;  %v392_v41 = vld [vmem:[%s18089_s5 + $0x858] sm:$0xff]  ;;  %v394_v42 = vld [vmem:[%s18089_s5 + $0x860] sm:$0xff] }
  0x5d   : > { %391 = vst [vmem:[%s18094_s23 + $0x340] sm:$0xff] %v390_v40  ;;  %v396_v43 = vld [vmem:[%s18089_s5 + $0x868] sm:$0xff]  ;;  %393 = vst [vmem:[%s18094_s23 + $0x348] sm:$0xff] %v392_v41  ;;  %v398_v44 = vld [vmem:[%s18089_s5 + $0xa20] sm:$0xff] }
  0x5e   : > { %395 = vst [vmem:[%s18094_s23 + $0x350] sm:$0xff] %v394_v42  ;;  %397 = vst [vmem:[%s18094_s23 + $0x358] sm:$0xff] %v396_v43  ;;  %v400_v45 = vld [vmem:[%s18089_s5 + $0xa28] sm:$0xff]  ;;  %v402_v46 = vld [vmem:[%s18089_s5 + $0xa30] sm:$0xff] }
  0x5f   : > { %399 = vst [vmem:[%s18094_s23 + $0x360] sm:$0xff] %v398_v44  ;;  %401 = vst [vmem:[%s18094_s23 + $0x368] sm:$0xff] %v400_v45  ;;  %v404_v47 = vld [vmem:[%s18089_s5 + $0xa38] sm:$0xff]  ;;  %v406_v48 = vld [vmem:[%s18089_s5 + $0xa40] sm:$0xff] }
  0x60   : > { %403 = vst [vmem:[%s18094_s23 + $0x370] sm:$0xff] %v402_v46  ;;  %v408_v49 = vld [vmem:[%s18089_s5 + $0xa48] sm:$0xff]  ;;  %405 = vst [vmem:[%s18094_s23 + $0x378] sm:$0xff] %v404_v47  ;;  %v410_v50 = vld [vmem:[%s18089_s5 + $0xa50] sm:$0xff] }
  0x61   : > { %407 = vst [vmem:[%s18094_s23 + $0x380] sm:$0xff] %v406_v48  ;;  %409 = vst [vmem:[%s18094_s23 + $0x388] sm:$0xff] %v408_v49  ;;  %v412_v51 = vld [vmem:[%s18089_s5 + $0xa58] sm:$0xff]  ;;  %v414_v52 = vld [vmem:[%s18089_s5 + $0xa60] sm:$0xff] }
  0x62   : > { %411 = vst [vmem:[%s18094_s23 + $0x390] sm:$0xff] %v410_v50  ;;  %413 = vst [vmem:[%s18094_s23 + $0x398] sm:$0xff] %v412_v51  ;;  %v416_v53 = vld [vmem:[%s18089_s5 + $0xa68] sm:$0xff]  ;;  %v418_v54 = vld [vmem:[%s18089_s5 + $0xa70] sm:$0xff] }
  0x63   : > { %415 = vst [vmem:[%s18094_s23 + $0x3a0] sm:$0xff] %v414_v52  ;;  %v420_v55 = vld [vmem:[%s18089_s5 + $0xa78] sm:$0xff]  ;;  %417 = vst [vmem:[%s18094_s23 + $0x3a8] sm:$0xff] %v416_v53  ;;  %v422_v56 = vld [vmem:[%s18089_s5 + $0xa80] sm:$0xff] }
  0x64   : > { %419 = vst [vmem:[%s18094_s23 + $0x3b0] sm:$0xff] %v418_v54  ;;  %421 = vst [vmem:[%s18094_s23 + $0x3b8] sm:$0xff] %v420_v55  ;;  %v424_v57 = vld [vmem:[%s18089_s5 + $0xa88] sm:$0xff]  ;;  %v426_v58 = vld [vmem:[%s18089_s5 + $0xa90] sm:$0xff] }
  0x65   : > { %423 = vst [vmem:[%s18094_s23 + $0x3c0] sm:$0xff] %v422_v56  ;;  %425 = vst [vmem:[%s18094_s23 + $0x3c8] sm:$0xff] %v424_v57  ;;  %v428_v59 = vld [vmem:[%s18089_s5 + $0xa98] sm:$0xff]  ;;  %v430_v60 = vld [vmem:[%s18089_s5 + $0xaa0] sm:$0xff] }
  0x66   : > { %427 = vst [vmem:[%s18094_s23 + $0x3d0] sm:$0xff] %v426_v58  ;;  %v432_v61 = vld [vmem:[%s18089_s5 + $0xaa8] sm:$0xff]  ;;  %429 = vst [vmem:[%s18094_s23 + $0x3d8] sm:$0xff] %v428_v59  ;;  %v434_v62 = vld [vmem:[%s18089_s5 + $0xab0] sm:$0xff] }
  0x67   : > { %431 = vst [vmem:[%s18094_s23 + $0x3e0] sm:$0xff] %v430_v60  ;;  %433 = vst [vmem:[%s18094_s23 + $0x3e8] sm:$0xff] %v432_v61  ;;  %v436_v63 = vld [vmem:[%s18089_s5 + $0xab8] sm:$0xff]  ;;  %v438_v0 = vld [vmem:[%s18089_s5 + $0xac0] sm:$0xff] }
  0x68   : > { %435 = vst [vmem:[%s18094_s23 + $0x3f0] sm:$0xff] %v434_v62  ;;  %437 = vst [vmem:[%s18094_s23 + $0x3f8] sm:$0xff] %v436_v63  ;;  %v440_v1 = vld [vmem:[%s18089_s5 + $0xac8] sm:$0xff]  ;;  %v442_v2 = vld [vmem:[%s18089_s5 + $0xad0] sm:$0xff] }
  0x69   : > { %439 = vst [vmem:[%s18094_s23 + $0x400] sm:$0xff] %v438_v0  ;;  %v444_v3 = vld [vmem:[%s18089_s5 + $0xad8] sm:$0xff]  ;;  %441 = vst [vmem:[%s18094_s23 + $0x408] sm:$0xff] %v440_v1  ;;  %v446_v4 = vld [vmem:[%s18089_s5 + $0xae0] sm:$0xff] }
  0x6a   : > { %443 = vst [vmem:[%s18094_s23 + $0x410] sm:$0xff] %v442_v2  ;;  %445 = vst [vmem:[%s18094_s23 + $0x418] sm:$0xff] %v444_v3  ;;  %v448_v5 = vld [vmem:[%s18089_s5 + $0xae8] sm:$0xff]  ;;  %v450_v6 = vld [vmem:[%s18089_s5 + $0xaf0] sm:$0xff] }
  0x6b   : > { %447 = vst [vmem:[%s18094_s23 + $0x420] sm:$0xff] %v446_v4  ;;  %449 = vst [vmem:[%s18094_s23 + $0x428] sm:$0xff] %v448_v5  ;;  %v452_v7 = vld [vmem:[%s18089_s5 + $0xca8] sm:$0xff]  ;;  %v454_v8 = vld [vmem:[%s18089_s5 + $0xcb0] sm:$0xff] }
  0x6c   : > { %451 = vst [vmem:[%s18094_s23 + $0x430] sm:$0xff] %v450_v6  ;;  %v456_v9 = vld [vmem:[%s18089_s5 + $0xcb8] sm:$0xff]  ;;  %453 = vst [vmem:[%s18094_s23 + $0x438] sm:$0xff] %v452_v7  ;;  %v458_v10 = vld [vmem:[%s18089_s5 + $0xcc0] sm:$0xff] }
  0x6d   : > { %455 = vst [vmem:[%s18094_s23 + $0x440] sm:$0xff] %v454_v8  ;;  %457 = vst [vmem:[%s18094_s23 + $0x448] sm:$0xff] %v456_v9  ;;  %v460_v11 = vld [vmem:[%s18089_s5 + $0xcc8] sm:$0xff]  ;;  %v462_v12 = vld [vmem:[%s18089_s5 + $0xcd0] sm:$0xff] }
  0x6e   : > { %459 = vst [vmem:[%s18094_s23 + $0x450] sm:$0xff] %v458_v10  ;;  %461 = vst [vmem:[%s18094_s23 + $0x458] sm:$0xff] %v460_v11  ;;  %v464_v13 = vld [vmem:[%s18089_s5 + $0xcd8] sm:$0xff]  ;;  %v466_v14 = vld [vmem:[%s18089_s5 + $0xce0] sm:$0xff] }
  0x6f   : > { %463 = vst [vmem:[%s18094_s23 + $0x460] sm:$0xff] %v462_v12  ;;  %v468_v15 = vld [vmem:[%s18089_s5 + $0xce8] sm:$0xff]  ;;  %465 = vst [vmem:[%s18094_s23 + $0x468] sm:$0xff] %v464_v13  ;;  %v470_v16 = vld [vmem:[%s18089_s5 + $0xcf0] sm:$0xff] }
  0x70   : > { %467 = vst [vmem:[%s18094_s23 + $0x470] sm:$0xff] %v466_v14  ;;  %469 = vst [vmem:[%s18094_s23 + $0x478] sm:$0xff] %v468_v15  ;;  %v472_v17 = vld [vmem:[%s18089_s5 + $0xcf8] sm:$0xff]  ;;  %v474_v18 = vld [vmem:[%s18089_s5 + $0xd00] sm:$0xff] }
  0x71   : > { %471 = vst [vmem:[%s18094_s23 + $0x480] sm:$0xff] %v470_v16  ;;  %473 = vst [vmem:[%s18094_s23 + $0x488] sm:$0xff] %v472_v17  ;;  %v476_v19 = vld [vmem:[%s18089_s5 + $0xd08] sm:$0xff]  ;;  %v478_v20 = vld [vmem:[%s18089_s5 + $0xd10] sm:$0xff] }
  0x72   : > { %475 = vst [vmem:[%s18094_s23 + $0x490] sm:$0xff] %v474_v18  ;;  %v480_v21 = vld [vmem:[%s18089_s5 + $0xd18] sm:$0xff]  ;;  %477 = vst [vmem:[%s18094_s23 + $0x498] sm:$0xff] %v476_v19  ;;  %v482_v22 = vld [vmem:[%s18089_s5 + $0xd20] sm:$0xff] }
  0x73   : > { %479 = vst [vmem:[%s18094_s23 + $0x4a0] sm:$0xff] %v478_v20  ;;  %481 = vst [vmem:[%s18094_s23 + $0x4a8] sm:$0xff] %v480_v21  ;;  %v484_v23 = vld [vmem:[%s18089_s5 + $0xd28] sm:$0xff]  ;;  %v486_v24 = vld [vmem:[%s18089_s5 + $0xd30] sm:$0xff] }
  0x74   : > { %483 = vst [vmem:[%s18094_s23 + $0x4b0] sm:$0xff] %v482_v22  ;;  %485 = vst [vmem:[%s18094_s23 + $0x4b8] sm:$0xff] %v484_v23  ;;  %v488_v25 = vld [vmem:[%s18089_s5 + $0xd38] sm:$0xff]  ;;  %v490_v26 = vld [vmem:[%s18089_s5 + $0xd40] sm:$0xff] }
  0x75   : > { %487 = vst [vmem:[%s18094_s23 + $0x4c0] sm:$0xff] %v486_v24  ;;  %v492_v27 = vld [vmem:[%s18089_s5 + $0xd48] sm:$0xff]  ;;  %489 = vst [vmem:[%s18094_s23 + $0x4c8] sm:$0xff] %v488_v25  ;;  %v494_v28 = vld [vmem:[%s18089_s5 + $0xd50] sm:$0xff] }
  0x76   : > { %491 = vst [vmem:[%s18094_s23 + $0x4d0] sm:$0xff] %v490_v26  ;;  %493 = vst [vmem:[%s18094_s23 + $0x4d8] sm:$0xff] %v492_v27  ;;  %v496_v29 = vld [vmem:[%s18089_s5 + $0xd58] sm:$0xff]  ;;  %v498_v30 = vld [vmem:[%s18089_s5 + $0xd60] sm:$0xff] }
  0x77   : > { %495 = vst [vmem:[%s18094_s23 + $0x4e0] sm:$0xff] %v494_v28  ;;  %497 = vst [vmem:[%s18094_s23 + $0x4e8] sm:$0xff] %v496_v29  ;;  %v500_v31 = vld [vmem:[%s18089_s5 + $0xd68] sm:$0xff]  ;;  %v502_v32 = vld [vmem:[%s18089_s5 + $0xd70] sm:$0xff] }
  0x78   : > { %499 = vst [vmem:[%s18094_s23 + $0x4f0] sm:$0xff] %v498_v30  ;;  %v504_v33 = vld [vmem:[%s18089_s5 + $0xd78] sm:$0xff]  ;;  %501 = vst [vmem:[%s18094_s23 + $0x4f8] sm:$0xff] %v500_v31  ;;  %v506_v34 = vld [vmem:[%s18089_s5 + $0xf30] sm:$0xff] }
  0x79   : > { %503 = vst [vmem:[%s18094_s23 + $0x500] sm:$0xff] %v502_v32  ;;  %505 = vst [vmem:[%s18094_s23 + $0x508] sm:$0xff] %v504_v33  ;;  %v508_v35 = vld [vmem:[%s18089_s5 + $0xf38] sm:$0xff]  ;;  %v510_v36 = vld [vmem:[%s18089_s5 + $0xf40] sm:$0xff] }
  0x7a   : > { %507 = vst [vmem:[%s18094_s23 + $0x510] sm:$0xff] %v506_v34  ;;  %509 = vst [vmem:[%s18094_s23 + $0x518] sm:$0xff] %v508_v35  ;;  %v512_v37 = vld [vmem:[%s18089_s5 + $0xf48] sm:$0xff]  ;;  %v514_v38 = vld [vmem:[%s18089_s5 + $0xf50] sm:$0xff] }
  0x7b   : > { %511 = vst [vmem:[%s18094_s23 + $0x520] sm:$0xff] %v510_v36  ;;  %v516_v39 = vld [vmem:[%s18089_s5 + $0xf58] sm:$0xff]  ;;  %513 = vst [vmem:[%s18094_s23 + $0x528] sm:$0xff] %v512_v37  ;;  %v518_v40 = vld [vmem:[%s18089_s5 + $0xf60] sm:$0xff] }
  0x7c   : > { %515 = vst [vmem:[%s18094_s23 + $0x530] sm:$0xff] %v514_v38  ;;  %517 = vst [vmem:[%s18094_s23 + $0x538] sm:$0xff] %v516_v39  ;;  %v520_v41 = vld [vmem:[%s18089_s5 + $0xf68] sm:$0xff]  ;;  %v522_v42 = vld [vmem:[%s18089_s5 + $0xf70] sm:$0xff] }
  0x7d   : > { %519 = vst [vmem:[%s18094_s23 + $0x540] sm:$0xff] %v518_v40  ;;  %521 = vst [vmem:[%s18094_s23 + $0x548] sm:$0xff] %v520_v41  ;;  %v524_v43 = vld [vmem:[%s18089_s5 + $0xf78] sm:$0xff]  ;;  %v526_v44 = vld [vmem:[%s18089_s5 + $0xf80] sm:$0xff] }
  0x7e   : > { %523 = vst [vmem:[%s18094_s23 + $0x550] sm:$0xff] %v522_v42  ;;  %v528_v45 = vld [vmem:[%s18089_s5 + $0xf88] sm:$0xff]  ;;  %525 = vst [vmem:[%s18094_s23 + $0x558] sm:$0xff] %v524_v43  ;;  %v530_v46 = vld [vmem:[%s18089_s5 + $0xf90] sm:$0xff] }
  0x7f   : > { %527 = vst [vmem:[%s18094_s23 + $0x560] sm:$0xff] %v526_v44  ;;  %529 = vst [vmem:[%s18094_s23 + $0x568] sm:$0xff] %v528_v45  ;;  %v532_v47 = vld [vmem:[%s18089_s5 + $0xf98] sm:$0xff]  ;;  %v534_v48 = vld [vmem:[%s18089_s5 + $0xfa0] sm:$0xff] }
  0x80   : > { %531 = vst [vmem:[%s18094_s23 + $0x570] sm:$0xff] %v530_v46  ;;  %533 = vst [vmem:[%s18094_s23 + $0x578] sm:$0xff] %v532_v47  ;;  %v536_v49 = vld [vmem:[%s18089_s5 + $0xfa8] sm:$0xff]  ;;  %v538_v50 = vld [vmem:[%s18089_s5 + $0xfb0] sm:$0xff] }
  0x81   : > { %535 = vst [vmem:[%s18094_s23 + $0x580] sm:$0xff] %v534_v48  ;;  %v540_v51 = vld [vmem:[%s18089_s5 + $0xfb8] sm:$0xff]  ;;  %537 = vst [vmem:[%s18094_s23 + $0x588] sm:$0xff] %v536_v49  ;;  %v542_v52 = vld [vmem:[%s18089_s5 + $0xfc0] sm:$0xff] }
  0x82   : > { %539 = vst [vmem:[%s18094_s23 + $0x590] sm:$0xff] %v538_v50  ;;  %541 = vst [vmem:[%s18094_s23 + $0x598] sm:$0xff] %v540_v51  ;;  %v544_v53 = vld [vmem:[%s18089_s5 + $0xfc8] sm:$0xff]  ;;  %v546_v54 = vld [vmem:[%s18089_s5 + $0xfd0] sm:$0xff] }
  0x83   : > { %543 = vst [vmem:[%s18094_s23 + $0x5a0] sm:$0xff] %v542_v52  ;;  %545 = vst [vmem:[%s18094_s23 + $0x5a8] sm:$0xff] %v544_v53  ;;  %v548_v55 = vld [vmem:[%s18089_s5 + $0xfd8] sm:$0xff]  ;;  %v550_v56 = vld [vmem:[%s18089_s5 + $0xfe0] sm:$0xff] }
  0x84   : > { %547 = vst [vmem:[%s18094_s23 + $0x5b0] sm:$0xff] %v546_v54  ;;  %v552_v57 = vld [vmem:[%s18089_s5 + $0xfe8] sm:$0xff]  ;;  %549 = vst [vmem:[%s18094_s23 + $0x5b8] sm:$0xff] %v548_v55  ;;  %v554_v58 = vld [vmem:[%s18089_s5 + $0xff0] sm:$0xff] }
  0x85   : > { %551 = vst [vmem:[%s18094_s23 + $0x5c0] sm:$0xff] %v550_v56  ;;  %553 = vst [vmem:[%s18094_s23 + $0x5c8] sm:$0xff] %v552_v57  ;;  %v556_v59 = vld [vmem:[%s18089_s5 + $0xff8] sm:$0xff]  ;;  %v558_v60 = vld [vmem:[%s18089_s5 + $0x1000] sm:$0xff] }
  0x86   : > { %555 = vst [vmem:[%s18094_s23 + $0x5d0] sm:$0xff] %v554_v58  ;;  %557 = vst [vmem:[%s18094_s23 + $0x5d8] sm:$0xff] %v556_v59  ;;  %v560_v61 = vld [vmem:[%s18089_s5 + $0x11b8] sm:$0xff]  ;;  %v562_v62 = vld [vmem:[%s18089_s5 + $0x11c0] sm:$0xff] }
  0x87   : > { %559 = vst [vmem:[%s18094_s23 + $0x5e0] sm:$0xff] %v558_v60  ;;  %v564_v63 = vld [vmem:[%s18089_s5 + $0x11c8] sm:$0xff]  ;;  %561 = vst [vmem:[%s18094_s23 + $0x5e8] sm:$0xff] %v560_v61  ;;  %v566_v0 = vld [vmem:[%s18089_s5 + $0x11d0] sm:$0xff] }
  0x88   : > { %563 = vst [vmem:[%s18094_s23 + $0x5f0] sm:$0xff] %v562_v62  ;;  %565 = vst [vmem:[%s18094_s23 + $0x5f8] sm:$0xff] %v564_v63  ;;  %v568_v1 = vld [vmem:[%s18089_s5 + $0x11d8] sm:$0xff]  ;;  %v570_v2 = vld [vmem:[%s18089_s5 + $0x11e0] sm:$0xff] }
  0x89   : > { %567 = vst [vmem:[%s18094_s23 + $0x600] sm:$0xff] %v566_v0  ;;  %569 = vst [vmem:[%s18094_s23 + $0x608] sm:$0xff] %v568_v1  ;;  %v572_v3 = vld [vmem:[%s18089_s5 + $0x11e8] sm:$0xff]  ;;  %v574_v4 = vld [vmem:[%s18089_s5 + $0x11f0] sm:$0xff] }
  0x8a   : > { %571 = vst [vmem:[%s18094_s23 + $0x610] sm:$0xff] %v570_v2  ;;  %v576_v5 = vld [vmem:[%s18089_s5 + $0x11f8] sm:$0xff]  ;;  %573 = vst [vmem:[%s18094_s23 + $0x618] sm:$0xff] %v572_v3  ;;  %v578_v6 = vld [vmem:[%s18089_s5 + $0x1200] sm:$0xff] }
  0x8b   : > { %575 = vst [vmem:[%s18094_s23 + $0x620] sm:$0xff] %v574_v4  ;;  %577 = vst [vmem:[%s18094_s23 + $0x628] sm:$0xff] %v576_v5  ;;  %v580_v7 = vld [vmem:[%s18089_s5 + $0x1208] sm:$0xff]  ;;  %v582_v8 = vld [vmem:[%s18089_s5 + $0x1210] sm:$0xff] }
  0x8c   : > { %579 = vst [vmem:[%s18094_s23 + $0x630] sm:$0xff] %v578_v6  ;;  %581 = vst [vmem:[%s18094_s23 + $0x638] sm:$0xff] %v580_v7  ;;  %v584_v9 = vld [vmem:[%s18089_s5 + $0x1218] sm:$0xff]  ;;  %v586_v10 = vld [vmem:[%s18089_s5 + $0x1220] sm:$0xff] }
  0x8d   : > { %583 = vst [vmem:[%s18094_s23 + $0x640] sm:$0xff] %v582_v8  ;;  %v588_v11 = vld [vmem:[%s18089_s5 + $0x1228] sm:$0xff]  ;;  %585 = vst [vmem:[%s18094_s23 + $0x648] sm:$0xff] %v584_v9  ;;  %v590_v12 = vld [vmem:[%s18089_s5 + $0x1230] sm:$0xff] }
  0x8e   : > { %587 = vst [vmem:[%s18094_s23 + $0x650] sm:$0xff] %v586_v10  ;;  %589 = vst [vmem:[%s18094_s23 + $0x658] sm:$0xff] %v588_v11  ;;  %v592_v13 = vld [vmem:[%s18089_s5 + $0x1238] sm:$0xff]  ;;  %v594_v14 = vld [vmem:[%s18089_s5 + $0x1240] sm:$0xff] }
  0x8f   : > { %591 = vst [vmem:[%s18094_s23 + $0x660] sm:$0xff] %v590_v12  ;;  %593 = vst [vmem:[%s18094_s23 + $0x668] sm:$0xff] %v592_v13  ;;  %v596_v15 = vld [vmem:[%s18089_s5 + $0x1248] sm:$0xff]  ;;  %v598_v16 = vld [vmem:[%s18089_s5 + $0x1250] sm:$0xff] }
  0x90   : > { %595 = vst [vmem:[%s18094_s23 + $0x670] sm:$0xff] %v594_v14  ;;  %v600_v17 = vld [vmem:[%s18089_s5 + $0x1258] sm:$0xff]  ;;  %597 = vst [vmem:[%s18094_s23 + $0x678] sm:$0xff] %v596_v15  ;;  %v602_v18 = vld [vmem:[%s18089_s5 + $0x1260] sm:$0xff] }
  0x91   : > { %599 = vst [vmem:[%s18094_s23 + $0x680] sm:$0xff] %v598_v16  ;;  %601 = vst [vmem:[%s18094_s23 + $0x688] sm:$0xff] %v600_v17  ;;  %v604_v19 = vld [vmem:[%s18089_s5 + $0x1268] sm:$0xff]  ;;  %v606_v20 = vld [vmem:[%s18089_s5 + $0x1270] sm:$0xff] }
  0x92   : > { %603 = vst [vmem:[%s18094_s23 + $0x690] sm:$0xff] %v602_v18  ;;  %605 = vst [vmem:[%s18094_s23 + $0x698] sm:$0xff] %v604_v19  ;;  %v608_v21 = vld [vmem:[%s18089_s5 + $0x1278] sm:$0xff]  ;;  %v610_v22 = vld [vmem:[%s18089_s5 + $0x1280] sm:$0xff] }
  0x93   : > { %607 = vst [vmem:[%s18094_s23 + $0x6a0] sm:$0xff] %v606_v20  ;;  %v612_v23 = vld [vmem:[%s18089_s5 + $0x1288] sm:$0xff]  ;;  %609 = vst [vmem:[%s18094_s23 + $0x6a8] sm:$0xff] %v608_v21  ;;  %v614_v24 = vld [vmem:[%s18089_s5 + $0x1440] sm:$0xff] }
  0x94   : > { %611 = vst [vmem:[%s18094_s23 + $0x6b0] sm:$0xff] %v610_v22  ;;  %613 = vst [vmem:[%s18094_s23 + $0x6b8] sm:$0xff] %v612_v23  ;;  %v616_v25 = vld [vmem:[%s18089_s5 + $0x1448] sm:$0xff]  ;;  %v618_v26 = vld [vmem:[%s18089_s5 + $0x1450] sm:$0xff] }
  0x95   : > { %615 = vst [vmem:[%s18094_s23 + $0x6c0] sm:$0xff] %v614_v24  ;;  %617 = vst [vmem:[%s18094_s23 + $0x6c8] sm:$0xff] %v616_v25  ;;  %v620_v27 = vld [vmem:[%s18089_s5 + $0x1458] sm:$0xff]  ;;  %v622_v28 = vld [vmem:[%s18089_s5 + $0x1460] sm:$0xff] }
  0x96   : > { %619 = vst [vmem:[%s18094_s23 + $0x6d0] sm:$0xff] %v618_v26  ;;  %v624_v29 = vld [vmem:[%s18089_s5 + $0x1468] sm:$0xff]  ;;  %621 = vst [vmem:[%s18094_s23 + $0x6d8] sm:$0xff] %v620_v27  ;;  %v626_v30 = vld [vmem:[%s18089_s5 + $0x1470] sm:$0xff] }
  0x97   : > { %623 = vst [vmem:[%s18094_s23 + $0x6e0] sm:$0xff] %v622_v28  ;;  %625 = vst [vmem:[%s18094_s23 + $0x6e8] sm:$0xff] %v624_v29  ;;  %v628_v31 = vld [vmem:[%s18089_s5 + $0x1478] sm:$0xff]  ;;  %v630_v32 = vld [vmem:[%s18089_s5 + $0x1480] sm:$0xff] }
  0x98   : > { %627 = vst [vmem:[%s18094_s23 + $0x6f0] sm:$0xff] %v626_v30  ;;  %629 = vst [vmem:[%s18094_s23 + $0x6f8] sm:$0xff] %v628_v31  ;;  %v632_v33 = vld [vmem:[%s18089_s5 + $0x1488] sm:$0xff]  ;;  %v634_v34 = vld [vmem:[%s18089_s5 + $0x1490] sm:$0xff] }
  0x99   : > { %631 = vst [vmem:[%s18094_s23 + $0x700] sm:$0xff] %v630_v32  ;;  %v636_v35 = vld [vmem:[%s18089_s5 + $0x1498] sm:$0xff]  ;;  %633 = vst [vmem:[%s18094_s23 + $0x708] sm:$0xff] %v632_v33  ;;  %v638_v36 = vld [vmem:[%s18089_s5 + $0x14a0] sm:$0xff] }
  0x9a   : > { %635 = vst [vmem:[%s18094_s23 + $0x710] sm:$0xff] %v634_v34  ;;  %637 = vst [vmem:[%s18094_s23 + $0x718] sm:$0xff] %v636_v35  ;;  %v640_v37 = vld [vmem:[%s18089_s5 + $0x14a8] sm:$0xff]  ;;  %v642_v38 = vld [vmem:[%s18089_s5 + $0x14b0] sm:$0xff] }
  0x9b   : > { %639 = vst [vmem:[%s18094_s23 + $0x720] sm:$0xff] %v638_v36  ;;  %641 = vst [vmem:[%s18094_s23 + $0x728] sm:$0xff] %v640_v37  ;;  %v644_v39 = vld [vmem:[%s18089_s5 + $0x14b8] sm:$0xff]  ;;  %v646_v40 = vld [vmem:[%s18089_s5 + $0x14c0] sm:$0xff] }
  0x9c   : > { %643 = vst [vmem:[%s18094_s23 + $0x730] sm:$0xff] %v642_v38  ;;  %v648_v41 = vld [vmem:[%s18089_s5 + $0x14c8] sm:$0xff]  ;;  %645 = vst [vmem:[%s18094_s23 + $0x738] sm:$0xff] %v644_v39  ;;  %v650_v42 = vld [vmem:[%s18089_s5 + $0x14d0] sm:$0xff] }
  0x9d   : > { %647 = vst [vmem:[%s18094_s23 + $0x740] sm:$0xff] %v646_v40  ;;  %649 = vst [vmem:[%s18094_s23 + $0x748] sm:$0xff] %v648_v41  ;;  %v652_v43 = vld [vmem:[%s18089_s5 + $0x14d8] sm:$0xff]  ;;  %v654_v44 = vld [vmem:[%s18089_s5 + $0x14e0] sm:$0xff] }
  0x9e   : > { %651 = vst [vmem:[%s18094_s23 + $0x750] sm:$0xff] %v650_v42  ;;  %653 = vst [vmem:[%s18094_s23 + $0x758] sm:$0xff] %v652_v43  ;;  %v656_v45 = vld [vmem:[%s18089_s5 + $0x14e8] sm:$0xff]  ;;  %v658_v46 = vld [vmem:[%s18089_s5 + $0x14f0] sm:$0xff] }
  0x9f   : > { %655 = vst [vmem:[%s18094_s23 + $0x760] sm:$0xff] %v654_v44  ;;  %v660_v47 = vld [vmem:[%s18089_s5 + $0x14f8] sm:$0xff]  ;;  %657 = vst [vmem:[%s18094_s23 + $0x768] sm:$0xff] %v656_v45  ;;  %v662_v48 = vld [vmem:[%s18089_s5 + $0x1500] sm:$0xff] }
  0xa0   : > { %659 = vst [vmem:[%s18094_s23 + $0x770] sm:$0xff] %v658_v46  ;;  %661 = vst [vmem:[%s18094_s23 + $0x778] sm:$0xff] %v660_v47  ;;  %v664_v49 = vld [vmem:[%s18089_s5 + $0x1508] sm:$0xff]  ;;  %v666_v50 = vld [vmem:[%s18089_s5 + $0x1510] sm:$0xff] }
  0xa1   : > { %663 = vst [vmem:[%s18094_s23 + $0x780] sm:$0xff] %v662_v48  ;;  %665 = vst [vmem:[%s18094_s23 + $0x788] sm:$0xff] %v664_v49 }
  0xa2   : > { %667 = vst [vmem:[%s18094_s23 + $0x790] sm:$0xff] %v666_v50 }
  0xa3 PF: > { %673 = sbr.rel (!%p18064_p9) target bundleno = 746 (0x2ea), region = 43  ;;  %s675_s28 = sand.u32 (%p18064_p9), 1, %s17933_s15  }
  0xa4   : > { %s15681_s7 = smul.u32 (%p18064_p9), 1728, %s17953_s20 }
  0xa5   : > { %s16973_s11 = smul.u32 (%p18064_p9), 3456, %s675_s28 }
  0xa6   : > { %s680_s26 = sadd.s32 (%p18064_p9), %s17957_s21, %s15681_s7 }
  0xa7   : > { %s14960_s27 = sshll.u32 (%p18064_p9), %s680_s26, 2  ;;  %s18592_s6 = scalar_lea.vmem (%p18064_p9), [#allocation4], %s16973_s11 }
  0xa8   : > { %s18587_s0 = scalar_lea.vmem (%p18064_p9), %s21420_s1, %s14960_s27 }
  0xa9   : > { %v698_v51 = vld [vmem:[%s18587_s0] sm:$0xf] (%p18064_p9)  ;;  %v700_v52 = vld [vmem:[%s18587_s0 + $0x8] sm:$0xf] (%p18064_p9)  ;;  %v702_v53 = vld [vmem:[%s18587_s0 + $0x10] sm:$0xf] (%p18064_p9) }
  0xaa   : > { %699 = vst [vmem:[%s18592_s6] sm:$0xf] %v698_v51  ;;  %701 = vst [vmem:[%s18592_s6 + $0x4] sm:$0xf] %v700_v52  ;;  %v704_v54 = vld [vmem:[%s18587_s0 + $0x18] sm:$0xf] }
  0xab   : > { %703 = vst [vmem:[%s18592_s6 + $0x8] sm:$0xf] %v702_v53  ;;  %v706_v55 = vld [vmem:[%s18587_s0 + $0x20] sm:$0xf]  ;;  %v708_v56 = vld [vmem:[%s18587_s0 + $0x28] sm:$0xf] }
  0xac   : > { %705 = vst [vmem:[%s18592_s6 + $0xc] sm:$0xf] %v704_v54  ;;  %707 = vst [vmem:[%s18592_s6 + $0x10] sm:$0xf] %v706_v55  ;;  %v710_v57 = vld [vmem:[%s18587_s0 + $0x30] sm:$0xf] }
  0xad   : > { %709 = vst [vmem:[%s18592_s6 + $0x14] sm:$0xf] %v708_v56  ;;  %v712_v58 = vld [vmem:[%s18587_s0 + $0x38] sm:$0xf]  ;;  %v714_v59 = vld [vmem:[%s18587_s0 + $0x40] sm:$0xf] }
  0xae   : > { %711 = vst [vmem:[%s18592_s6 + $0x18] sm:$0xf] %v710_v57  ;;  %713 = vst [vmem:[%s18592_s6 + $0x1c] sm:$0xf] %v712_v58  ;;  %v716_v60 = vld [vmem:[%s18587_s0 + $0x48] sm:$0xf] }
  0xaf   : > { %715 = vst [vmem:[%s18592_s6 + $0x20] sm:$0xf] %v714_v59  ;;  %v718_v61 = vld [vmem:[%s18587_s0 + $0x50] sm:$0xf]  ;;  %v720_v62 = vld [vmem:[%s18587_s0 + $0x58] sm:$0xf] }
  0xb0   : > { %717 = vst [vmem:[%s18592_s6 + $0x24] sm:$0xf] %v716_v60  ;;  %719 = vst [vmem:[%s18592_s6 + $0x28] sm:$0xf] %v718_v61  ;;  %v722_v63 = vld [vmem:[%s18587_s0 + $0x60] sm:$0xf] }
  0xb1   : > { %721 = vst [vmem:[%s18592_s6 + $0x2c] sm:$0xf] %v720_v62  ;;  %v724_v0 = vld [vmem:[%s18587_s0 + $0x68] sm:$0xf]  ;;  %v726_v1 = vld [vmem:[%s18587_s0 + $0x70] sm:$0xf] }
  0xb2   : > { %723 = vst [vmem:[%s18592_s6 + $0x30] sm:$0xf] %v722_v63  ;;  %725 = vst [vmem:[%s18592_s6 + $0x34] sm:$0xf] %v724_v0  ;;  %v728_v2 = vld [vmem:[%s18587_s0 + $0x78] sm:$0xf] }
  0xb3   : > { %727 = vst [vmem:[%s18592_s6 + $0x38] sm:$0xf] %v726_v1  ;;  %v730_v3 = vld [vmem:[%s18587_s0 + $0x80] sm:$0xf]  ;;  %v732_v4 = vld [vmem:[%s18587_s0 + $0x88] sm:$0xf] }
  0xb4   : > { %729 = vst [vmem:[%s18592_s6 + $0x3c] sm:$0xf] %v728_v2  ;;  %731 = vst [vmem:[%s18592_s6 + $0x40] sm:$0xf] %v730_v3  ;;  %v734_v5 = vld [vmem:[%s18587_s0 + $0x90] sm:$0xf] }
  0xb5   : > { %733 = vst [vmem:[%s18592_s6 + $0x44] sm:$0xf] %v732_v4  ;;  %v736_v6 = vld [vmem:[%s18587_s0 + $0x98] sm:$0xf]  ;;  %v738_v7 = vld [vmem:[%s18587_s0 + $0xa0] sm:$0xf] }
  0xb6   : > { %735 = vst [vmem:[%s18592_s6 + $0x48] sm:$0xf] %v734_v5  ;;  %737 = vst [vmem:[%s18592_s6 + $0x4c] sm:$0xf] %v736_v6  ;;  %v740_v8 = vld [vmem:[%s18587_s0 + $0xa8] sm:$0xf] }
  0xb7   : > { %739 = vst [vmem:[%s18592_s6 + $0x50] sm:$0xf] %v738_v7  ;;  %v742_v9 = vld [vmem:[%s18587_s0 + $0xb0] sm:$0xf]  ;;  %v744_v10 = vld [vmem:[%s18587_s0 + $0xb8] sm:$0xf] }
  0xb8   : > { %741 = vst [vmem:[%s18592_s6 + $0x54] sm:$0xf] %v740_v8  ;;  %743 = vst [vmem:[%s18592_s6 + $0x58] sm:$0xf] %v742_v9  ;;  %v746_v11 = vld [vmem:[%s18587_s0 + $0xc0] sm:$0xf] }
  0xb9   : > { %745 = vst [vmem:[%s18592_s6 + $0x5c] sm:$0xf] %v744_v10  ;;  %v748_v12 = vld [vmem:[%s18587_s0 + $0xc8] sm:$0xf]  ;;  %v750_v13 = vld [vmem:[%s18587_s0 + $0xd0] sm:$0xf] }
  0xba   : > { %747 = vst [vmem:[%s18592_s6 + $0x60] sm:$0xf] %v746_v11  ;;  %749 = vst [vmem:[%s18592_s6 + $0x64] sm:$0xf] %v748_v12  ;;  %v752_v14 = vld [vmem:[%s18587_s0 + $0xd8] sm:$0xf] }
  0xbb   : > { %751 = vst [vmem:[%s18592_s6 + $0x68] sm:$0xf] %v750_v13  ;;  %v754_v15 = vld [vmem:[%s18587_s0 + $0xe0] sm:$0xf]  ;;  %v756_v16 = vld [vmem:[%s18587_s0 + $0xe8] sm:$0xf] }
  0xbc   : > { %753 = vst [vmem:[%s18592_s6 + $0x6c] sm:$0xf] %v752_v14  ;;  %755 = vst [vmem:[%s18592_s6 + $0x70] sm:$0xf] %v754_v15  ;;  %v758_v17 = vld [vmem:[%s18587_s0 + $0xf0] sm:$0xf] }
  0xbd   : > { %757 = vst [vmem:[%s18592_s6 + $0x74] sm:$0xf] %v756_v16  ;;  %v760_v18 = vld [vmem:[%s18587_s0 + $0xf8] sm:$0xf]  ;;  %v762_v19 = vld [vmem:[%s18587_s0 + $0x100] sm:$0xf] }
  0xbe   : > { %759 = vst [vmem:[%s18592_s6 + $0x78] sm:$0xf] %v758_v17  ;;  %761 = vst [vmem:[%s18592_s6 + $0x7c] sm:$0xf] %v760_v18  ;;  %v764_v20 = vld [vmem:[%s18587_s0 + $0x108] sm:$0xf] }
  0xbf   : > { %763 = vst [vmem:[%s18592_s6 + $0x80] sm:$0xf] %v762_v19  ;;  %v766_v21 = vld [vmem:[%s18587_s0 + $0x110] sm:$0xf]  ;;  %v768_v22 = vld [vmem:[%s18587_s0 + $0x118] sm:$0xf] }
  0xc0   : > { %765 = vst [vmem:[%s18592_s6 + $0x84] sm:$0xf] %v764_v20  ;;  %767 = vst [vmem:[%s18592_s6 + $0x88] sm:$0xf] %v766_v21  ;;  %v770_v23 = vld [vmem:[%s18587_s0 + $0x120] sm:$0xf] }
  0xc1   : > { %769 = vst [vmem:[%s18592_s6 + $0x8c] sm:$0xf] %v768_v22  ;;  %v772_v24 = vld [vmem:[%s18587_s0 + $0x128] sm:$0xf]  ;;  %v774_v25 = vld [vmem:[%s18587_s0 + $0x130] sm:$0xf] }
  0xc2   : > { %771 = vst [vmem:[%s18592_s6 + $0x90] sm:$0xf] %v770_v23  ;;  %773 = vst [vmem:[%s18592_s6 + $0x94] sm:$0xf] %v772_v24  ;;  %v776_v26 = vld [vmem:[%s18587_s0 + $0x138] sm:$0xf] }
  0xc3   : > { %775 = vst [vmem:[%s18592_s6 + $0x98] sm:$0xf] %v774_v25  ;;  %v778_v27 = vld [vmem:[%s18587_s0 + $0x140] sm:$0xf]  ;;  %v780_v28 = vld [vmem:[%s18587_s0 + $0x148] sm:$0xf] }
  0xc4   : > { %777 = vst [vmem:[%s18592_s6 + $0x9c] sm:$0xf] %v776_v26  ;;  %779 = vst [vmem:[%s18592_s6 + $0xa0] sm:$0xf] %v778_v27  ;;  %v782_v29 = vld [vmem:[%s18587_s0 + $0x150] sm:$0xf] }
  0xc5   : > { %781 = vst [vmem:[%s18592_s6 + $0xa4] sm:$0xf] %v780_v28  ;;  %v784_v30 = vld [vmem:[%s18587_s0 + $0x158] sm:$0xf]  ;;  %v786_v31 = vld [vmem:[%s18587_s0 + $0x160] sm:$0xf] }
  0xc6   : > { %783 = vst [vmem:[%s18592_s6 + $0xa8] sm:$0xf] %v782_v29  ;;  %785 = vst [vmem:[%s18592_s6 + $0xac] sm:$0xf] %v784_v30  ;;  %v788_v32 = vld [vmem:[%s18587_s0 + $0x168] sm:$0xf] }
  0xc7   : > { %787 = vst [vmem:[%s18592_s6 + $0xb0] sm:$0xf] %v786_v31  ;;  %v790_v33 = vld [vmem:[%s18587_s0 + $0x170] sm:$0xf]  ;;  %v792_v34 = vld [vmem:[%s18587_s0 + $0x178] sm:$0xf] }
  0xc8   : > { %789 = vst [vmem:[%s18592_s6 + $0xb4] sm:$0xf] %v788_v32  ;;  %791 = vst [vmem:[%s18592_s6 + $0xb8] sm:$0xf] %v790_v33  ;;  %v794_v35 = vld [vmem:[%s18587_s0 + $0x180] sm:$0xf] }
  0xc9   : > { %793 = vst [vmem:[%s18592_s6 + $0xbc] sm:$0xf] %v792_v34  ;;  %v796_v36 = vld [vmem:[%s18587_s0 + $0x188] sm:$0xf]  ;;  %v798_v37 = vld [vmem:[%s18587_s0 + $0x190] sm:$0xf] }
  0xca   : > { %795 = vst [vmem:[%s18592_s6 + $0xc0] sm:$0xf] %v794_v35  ;;  %797 = vst [vmem:[%s18592_s6 + $0xc4] sm:$0xf] %v796_v36  ;;  %v800_v38 = vld [vmem:[%s18587_s0 + $0x198] sm:$0xf] }
  0xcb   : > { %799 = vst [vmem:[%s18592_s6 + $0xc8] sm:$0xf] %v798_v37  ;;  %v802_v39 = vld [vmem:[%s18587_s0 + $0x1a0] sm:$0xf]  ;;  %v804_v40 = vld [vmem:[%s18587_s0 + $0x1a8] sm:$0xf] }
  0xcc   : > { %801 = vst [vmem:[%s18592_s6 + $0xcc] sm:$0xf] %v800_v38  ;;  %803 = vst [vmem:[%s18592_s6 + $0xd0] sm:$0xf] %v802_v39  ;;  %v806_v41 = vld [vmem:[%s18587_s0 + $0x1b0] sm:$0xf] }
  0xcd   : > { %805 = vst [vmem:[%s18592_s6 + $0xd4] sm:$0xf] %v804_v40  ;;  %v808_v42 = vld [vmem:[%s18587_s0 + $0x1b8] sm:$0xf]  ;;  %v810_v43 = vld [vmem:[%s18587_s0 + $0x1c0] sm:$0xf] }
  0xce   : > { %807 = vst [vmem:[%s18592_s6 + $0xd8] sm:$0xf] %v806_v41  ;;  %809 = vst [vmem:[%s18592_s6 + $0xdc] sm:$0xf] %v808_v42  ;;  %v812_v44 = vld [vmem:[%s18587_s0 + $0x1c8] sm:$0xf] }
  0xcf   : > { %811 = vst [vmem:[%s18592_s6 + $0xe0] sm:$0xf] %v810_v43  ;;  %v814_v45 = vld [vmem:[%s18587_s0 + $0x1d0] sm:$0xf]  ;;  %v816_v46 = vld [vmem:[%s18587_s0 + $0x1d8] sm:$0xf] }
  0xd0   : > { %813 = vst [vmem:[%s18592_s6 + $0xe4] sm:$0xf] %v812_v44  ;;  %815 = vst [vmem:[%s18592_s6 + $0xe8] sm:$0xf] %v814_v45  ;;  %v818_v47 = vld [vmem:[%s18587_s0 + $0x1e0] sm:$0xf] }
  0xd1   : > { %817 = vst [vmem:[%s18592_s6 + $0xec] sm:$0xf] %v816_v46  ;;  %v820_v48 = vld [vmem:[%s18587_s0 + $0x1e8] sm:$0xf]  ;;  %v822_v49 = vld [vmem:[%s18587_s0 + $0x1f0] sm:$0xf] }
  0xd2   : > { %819 = vst [vmem:[%s18592_s6 + $0xf0] sm:$0xf] %v818_v47  ;;  %821 = vst [vmem:[%s18592_s6 + $0xf4] sm:$0xf] %v820_v48  ;;  %v824_v50 = vld [vmem:[%s18587_s0 + $0x1f8] sm:$0xf] }
  0xd3   : > { %823 = vst [vmem:[%s18592_s6 + $0xf8] sm:$0xf] %v822_v49  ;;  %v826_v51 = vld [vmem:[%s18587_s0 + $0x200] sm:$0xf]  ;;  %v828_v52 = vld [vmem:[%s18587_s0 + $0x208] sm:$0xf] }
  0xd4   : > { %825 = vst [vmem:[%s18592_s6 + $0xfc] sm:$0xf] %v824_v50  ;;  %827 = vst [vmem:[%s18592_s6 + $0x100] sm:$0xf] %v826_v51  ;;  %v830_v53 = vld [vmem:[%s18587_s0 + $0x210] sm:$0xf] }
  0xd5   : > { %829 = vst [vmem:[%s18592_s6 + $0x104] sm:$0xf] %v828_v52  ;;  %v832_v54 = vld [vmem:[%s18587_s0 + $0x218] sm:$0xf]  ;;  %v834_v55 = vld [vmem:[%s18587_s0 + $0x220] sm:$0xf] }
  0xd6   : > { %831 = vst [vmem:[%s18592_s6 + $0x108] sm:$0xf] %v830_v53  ;;  %833 = vst [vmem:[%s18592_s6 + $0x10c] sm:$0xf] %v832_v54  ;;  %v836_v56 = vld [vmem:[%s18587_s0 + $0x228] sm:$0xf] }
  0xd7   : > { %835 = vst [vmem:[%s18592_s6 + $0x110] sm:$0xf] %v834_v55  ;;  %v838_v57 = vld [vmem:[%s18587_s0 + $0x230] sm:$0xf]  ;;  %v840_v58 = vld [vmem:[%s18587_s0 + $0x238] sm:$0xf] }
  0xd8   : > { %837 = vst [vmem:[%s18592_s6 + $0x114] sm:$0xf] %v836_v56  ;;  %839 = vst [vmem:[%s18592_s6 + $0x118] sm:$0xf] %v838_v57  ;;  %v842_v59 = vld [vmem:[%s18587_s0 + $0x240] sm:$0xf] }
  0xd9   : > { %841 = vst [vmem:[%s18592_s6 + $0x11c] sm:$0xf] %v840_v58  ;;  %v844_v60 = vld [vmem:[%s18587_s0 + $0x248] sm:$0xf]  ;;  %v846_v61 = vld [vmem:[%s18587_s0 + $0x250] sm:$0xf] }
  0xda   : > { %843 = vst [vmem:[%s18592_s6 + $0x120] sm:$0xf] %v842_v59  ;;  %845 = vst [vmem:[%s18592_s6 + $0x124] sm:$0xf] %v844_v60  ;;  %v848_v62 = vld [vmem:[%s18587_s0 + $0x258] sm:$0xf] }
  0xdb   : > { %847 = vst [vmem:[%s18592_s6 + $0x128] sm:$0xf] %v846_v61  ;;  %v850_v63 = vld [vmem:[%s18587_s0 + $0x260] sm:$0xf]  ;;  %v852_v0 = vld [vmem:[%s18587_s0 + $0x268] sm:$0xf] }
  0xdc   : > { %849 = vst [vmem:[%s18592_s6 + $0x12c] sm:$0xf] %v848_v62  ;;  %851 = vst [vmem:[%s18592_s6 + $0x130] sm:$0xf] %v850_v63  ;;  %v854_v1 = vld [vmem:[%s18587_s0 + $0x270] sm:$0xf] }
  0xdd   : > { %853 = vst [vmem:[%s18592_s6 + $0x134] sm:$0xf] %v852_v0  ;;  %v856_v2 = vld [vmem:[%s18587_s0 + $0x278] sm:$0xf]  ;;  %v858_v3 = vld [vmem:[%s18587_s0 + $0x280] sm:$0xf] }
  0xde   : > { %855 = vst [vmem:[%s18592_s6 + $0x138] sm:$0xf] %v854_v1  ;;  %857 = vst [vmem:[%s18592_s6 + $0x13c] sm:$0xf] %v856_v2  ;;  %v860_v4 = vld [vmem:[%s18587_s0 + $0x288] sm:$0xf] }
  0xdf   : > { %859 = vst [vmem:[%s18592_s6 + $0x140] sm:$0xf] %v858_v3  ;;  %v862_v5 = vld [vmem:[%s18587_s0 + $0x290] sm:$0xf]  ;;  %v864_v6 = vld [vmem:[%s18587_s0 + $0x298] sm:$0xf] }
  0xe0   : > { %861 = vst [vmem:[%s18592_s6 + $0x144] sm:$0xf] %v860_v4  ;;  %863 = vst [vmem:[%s18592_s6 + $0x148] sm:$0xf] %v862_v5  ;;  %v866_v7 = vld [vmem:[%s18587_s0 + $0x2a0] sm:$0xf] }
  0xe1   : > { %865 = vst [vmem:[%s18592_s6 + $0x14c] sm:$0xf] %v864_v6  ;;  %v868_v8 = vld [vmem:[%s18587_s0 + $0x2a8] sm:$0xf]  ;;  %v870_v9 = vld [vmem:[%s18587_s0 + $0x2b0] sm:$0xf] }
  0xe2   : > { %867 = vst [vmem:[%s18592_s6 + $0x150] sm:$0xf] %v866_v7  ;;  %869 = vst [vmem:[%s18592_s6 + $0x154] sm:$0xf] %v868_v8  ;;  %v872_v10 = vld [vmem:[%s18587_s0 + $0x2b8] sm:$0xf] }
  0xe3   : > { %871 = vst [vmem:[%s18592_s6 + $0x158] sm:$0xf] %v870_v9  ;;  %v874_v11 = vld [vmem:[%s18587_s0 + $0x2c0] sm:$0xf]  ;;  %v876_v12 = vld [vmem:[%s18587_s0 + $0x2c8] sm:$0xf] }
  0xe4   : > { %873 = vst [vmem:[%s18592_s6 + $0x15c] sm:$0xf] %v872_v10  ;;  %875 = vst [vmem:[%s18592_s6 + $0x160] sm:$0xf] %v874_v11  ;;  %v878_v13 = vld [vmem:[%s18587_s0 + $0x2d0] sm:$0xf] }
  0xe5   : > { %877 = vst [vmem:[%s18592_s6 + $0x164] sm:$0xf] %v876_v12  ;;  %v880_v14 = vld [vmem:[%s18587_s0 + $0x2d8] sm:$0xf]  ;;  %v882_v15 = vld [vmem:[%s18587_s0 + $0x2e0] sm:$0xf] }
  0xe6   : > { %879 = vst [vmem:[%s18592_s6 + $0x168] sm:$0xf] %v878_v13  ;;  %881 = vst [vmem:[%s18592_s6 + $0x16c] sm:$0xf] %v880_v14  ;;  %v884_v16 = vld [vmem:[%s18587_s0 + $0x2e8] sm:$0xf] }
  0xe7   : > { %883 = vst [vmem:[%s18592_s6 + $0x170] sm:$0xf] %v882_v15  ;;  %v886_v17 = vld [vmem:[%s18587_s0 + $0x2f0] sm:$0xf]  ;;  %v888_v18 = vld [vmem:[%s18587_s0 + $0x2f8] sm:$0xf] }
  0xe8   : > { %885 = vst [vmem:[%s18592_s6 + $0x174] sm:$0xf] %v884_v16  ;;  %887 = vst [vmem:[%s18592_s6 + $0x178] sm:$0xf] %v886_v17  ;;  %v890_v19 = vld [vmem:[%s18587_s0 + $0x300] sm:$0xf] }
  0xe9   : > { %889 = vst [vmem:[%s18592_s6 + $0x17c] sm:$0xf] %v888_v18  ;;  %v892_v20 = vld [vmem:[%s18587_s0 + $0x308] sm:$0xf]  ;;  %v894_v21 = vld [vmem:[%s18587_s0 + $0x310] sm:$0xf] }
  0xea   : > { %891 = vst [vmem:[%s18592_s6 + $0x180] sm:$0xf] %v890_v19  ;;  %893 = vst [vmem:[%s18592_s6 + $0x184] sm:$0xf] %v892_v20  ;;  %v896_v22 = vld [vmem:[%s18587_s0 + $0x318] sm:$0xf] }
  0xeb   : > { %895 = vst [vmem:[%s18592_s6 + $0x188] sm:$0xf] %v894_v21  ;;  %v898_v23 = vld [vmem:[%s18587_s0 + $0x320] sm:$0xf]  ;;  %v900_v24 = vld [vmem:[%s18587_s0 + $0x328] sm:$0xf] }
  0xec   : > { %897 = vst [vmem:[%s18592_s6 + $0x18c] sm:$0xf] %v896_v22  ;;  %899 = vst [vmem:[%s18592_s6 + $0x190] sm:$0xf] %v898_v23  ;;  %v902_v25 = vld [vmem:[%s18587_s0 + $0x330] sm:$0xf] }
  0xed   : > { %901 = vst [vmem:[%s18592_s6 + $0x194] sm:$0xf] %v900_v24  ;;  %v904_v26 = vld [vmem:[%s18587_s0 + $0x338] sm:$0xf]  ;;  %v906_v27 = vld [vmem:[%s18587_s0 + $0x340] sm:$0xf] }
  0xee   : > { %903 = vst [vmem:[%s18592_s6 + $0x198] sm:$0xf] %v902_v25  ;;  %905 = vst [vmem:[%s18592_s6 + $0x19c] sm:$0xf] %v904_v26  ;;  %v908_v28 = vld [vmem:[%s18587_s0 + $0x348] sm:$0xf] }
  0xef   : > { %907 = vst [vmem:[%s18592_s6 + $0x1a0] sm:$0xf] %v906_v27  ;;  %v910_v29 = vld [vmem:[%s18587_s0 + $0x350] sm:$0xf]  ;;  %v912_v30 = vld [vmem:[%s18587_s0 + $0x358] sm:$0xf] }
  0xf0   : > { %909 = vst [vmem:[%s18592_s6 + $0x1a4] sm:$0xf] %v908_v28  ;;  %911 = vst [vmem:[%s18592_s6 + $0x1a8] sm:$0xf] %v910_v29  ;;  %v914_v31 = vld [vmem:[%s18587_s0 + $0x360] sm:$0xf] }
  0xf1   : > { %913 = vst [vmem:[%s18592_s6 + $0x1ac] sm:$0xf] %v912_v30  ;;  %v916_v32 = vld [vmem:[%s18587_s0 + $0x368] sm:$0xf]  ;;  %v918_v33 = vld [vmem:[%s18587_s0 + $0x370] sm:$0xf] }
  0xf2   : > { %915 = vst [vmem:[%s18592_s6 + $0x1b0] sm:$0xf] %v914_v31  ;;  %917 = vst [vmem:[%s18592_s6 + $0x1b4] sm:$0xf] %v916_v32  ;;  %v920_v34 = vld [vmem:[%s18587_s0 + $0x378] sm:$0xf] }
  0xf3   : > { %919 = vst [vmem:[%s18592_s6 + $0x1b8] sm:$0xf] %v918_v33  ;;  %v922_v35 = vld [vmem:[%s18587_s0 + $0x380] sm:$0xf]  ;;  %v924_v36 = vld [vmem:[%s18587_s0 + $0x388] sm:$0xf] }
  0xf4   : > { %921 = vst [vmem:[%s18592_s6 + $0x1bc] sm:$0xf] %v920_v34  ;;  %923 = vst [vmem:[%s18592_s6 + $0x1c0] sm:$0xf] %v922_v35  ;;  %v926_v37 = vld [vmem:[%s18587_s0 + $0x390] sm:$0xf] }
  0xf5   : > { %925 = vst [vmem:[%s18592_s6 + $0x1c4] sm:$0xf] %v924_v36  ;;  %v928_v38 = vld [vmem:[%s18587_s0 + $0x398] sm:$0xf]  ;;  %v930_v39 = vld [vmem:[%s18587_s0 + $0x3a0] sm:$0xf] }
  0xf6   : > { %927 = vst [vmem:[%s18592_s6 + $0x1c8] sm:$0xf] %v926_v37  ;;  %929 = vst [vmem:[%s18592_s6 + $0x1cc] sm:$0xf] %v928_v38  ;;  %v932_v40 = vld [vmem:[%s18587_s0 + $0x3a8] sm:$0xf] }
  0xf7   : > { %931 = vst [vmem:[%s18592_s6 + $0x1d0] sm:$0xf] %v930_v39  ;;  %v934_v41 = vld [vmem:[%s18587_s0 + $0x3b0] sm:$0xf]  ;;  %v936_v42 = vld [vmem:[%s18587_s0 + $0x3b8] sm:$0xf] }
  0xf8   : > { %933 = vst [vmem:[%s18592_s6 + $0x1d4] sm:$0xf] %v932_v40  ;;  %935 = vst [vmem:[%s18592_s6 + $0x1d8] sm:$0xf] %v934_v41  ;;  %v938_v43 = vld [vmem:[%s18587_s0 + $0x3c0] sm:$0xf] }
  0xf9   : > { %937 = vst [vmem:[%s18592_s6 + $0x1dc] sm:$0xf] %v936_v42  ;;  %v940_v44 = vld [vmem:[%s18587_s0 + $0x3c8] sm:$0xf]  ;;  %v942_v45 = vld [vmem:[%s18587_s0 + $0x3d0] sm:$0xf] }
  0xfa   : > { %939 = vst [vmem:[%s18592_s6 + $0x1e0] sm:$0xf] %v938_v43  ;;  %941 = vst [vmem:[%s18592_s6 + $0x1e4] sm:$0xf] %v940_v44  ;;  %v944_v46 = vld [vmem:[%s18587_s0 + $0x3d8] sm:$0xf] }
  0xfb   : > { %943 = vst [vmem:[%s18592_s6 + $0x1e8] sm:$0xf] %v942_v45  ;;  %v946_v47 = vld [vmem:[%s18587_s0 + $0x3e0] sm:$0xf]  ;;  %v948_v48 = vld [vmem:[%s18587_s0 + $0x3e8] sm:$0xf] }
  0xfc   : > { %945 = vst [vmem:[%s18592_s6 + $0x1ec] sm:$0xf] %v944_v46  ;;  %947 = vst [vmem:[%s18592_s6 + $0x1f0] sm:$0xf] %v946_v47  ;;  %v950_v49 = vld [vmem:[%s18587_s0 + $0x3f0] sm:$0xf] }
  0xfd   : > { %949 = vst [vmem:[%s18592_s6 + $0x1f4] sm:$0xf] %v948_v48  ;;  %v952_v50 = vld [vmem:[%s18587_s0 + $0x3f8] sm:$0xf]  ;;  %v954_v51 = vld [vmem:[%s18587_s0 + $0x400] sm:$0xf] }
  0xfe   : > { %951 = vst [vmem:[%s18592_s6 + $0x1f8] sm:$0xf] %v950_v49  ;;  %953 = vst [vmem:[%s18592_s6 + $0x1fc] sm:$0xf] %v952_v50  ;;  %v956_v52 = vld [vmem:[%s18587_s0 + $0x408] sm:$0xf] }
  0xff   : > { %955 = vst [vmem:[%s18592_s6 + $0x200] sm:$0xf] %v954_v51  ;;  %v958_v53 = vld [vmem:[%s18587_s0 + $0x410] sm:$0xf]  ;;  %v960_v54 = vld [vmem:[%s18587_s0 + $0x418] sm:$0xf] }
 0x100   : > { %957 = vst [vmem:[%s18592_s6 + $0x204] sm:$0xf] %v956_v52  ;;  %959 = vst [vmem:[%s18592_s6 + $0x208] sm:$0xf] %v958_v53  ;;  %v962_v55 = vld [vmem:[%s18587_s0 + $0x420] sm:$0xf] }
 0x101   : > { %961 = vst [vmem:[%s18592_s6 + $0x20c] sm:$0xf] %v960_v54  ;;  %v964_v56 = vld [vmem:[%s18587_s0 + $0x428] sm:$0xf]  ;;  %v966_v57 = vld [vmem:[%s18587_s0 + $0x430] sm:$0xf] }
 0x102   : > { %963 = vst [vmem:[%s18592_s6 + $0x210] sm:$0xf] %v962_v55  ;;  %965 = vst [vmem:[%s18592_s6 + $0x214] sm:$0xf] %v964_v56  ;;  %v968_v58 = vld [vmem:[%s18587_s0 + $0x438] sm:$0xf] }
 0x103   : > { %967 = vst [vmem:[%s18592_s6 + $0x218] sm:$0xf] %v966_v57  ;;  %v970_v59 = vld [vmem:[%s18587_s0 + $0x440] sm:$0xf]  ;;  %v972_v60 = vld [vmem:[%s18587_s0 + $0x448] sm:$0xf] }
 0x104   : > { %969 = vst [vmem:[%s18592_s6 + $0x21c] sm:$0xf] %v968_v58  ;;  %971 = vst [vmem:[%s18592_s6 + $0x220] sm:$0xf] %v970_v59  ;;  %v974_v61 = vld [vmem:[%s18587_s0 + $0x450] sm:$0xf] }
 0x105   : > { %973 = vst [vmem:[%s18592_s6 + $0x224] sm:$0xf] %v972_v60  ;;  %v976_v62 = vld [vmem:[%s18587_s0 + $0x458] sm:$0xf]  ;;  %v978_v63 = vld [vmem:[%s18587_s0 + $0x460] sm:$0xf] }
 0x106   : > { %975 = vst [vmem:[%s18592_s6 + $0x228] sm:$0xf] %v974_v61  ;;  %977 = vst [vmem:[%s18592_s6 + $0x22c] sm:$0xf] %v976_v62  ;;  %v980_v0 = vld [vmem:[%s18587_s0 + $0x468] sm:$0xf] }
 0x107   : > { %979 = vst [vmem:[%s18592_s6 + $0x230] sm:$0xf] %v978_v63  ;;  %v982_v1 = vld [vmem:[%s18587_s0 + $0x470] sm:$0xf]  ;;  %v984_v2 = vld [vmem:[%s18587_s0 + $0x478] sm:$0xf] }
 0x108   : > { %981 = vst [vmem:[%s18592_s6 + $0x234] sm:$0xf] %v980_v0  ;;  %983 = vst [vmem:[%s18592_s6 + $0x238] sm:$0xf] %v982_v1  ;;  %v986_v3 = vld [vmem:[%s18587_s0 + $0x480] sm:$0xf] }
 0x109   : > { %985 = vst [vmem:[%s18592_s6 + $0x23c] sm:$0xf] %v984_v2  ;;  %v988_v4 = vld [vmem:[%s18587_s0 + $0x488] sm:$0xf]  ;;  %v990_v5 = vld [vmem:[%s18587_s0 + $0x490] sm:$0xf] }
 0x10a   : > { %987 = vst [vmem:[%s18592_s6 + $0x240] sm:$0xf] %v986_v3  ;;  %989 = vst [vmem:[%s18592_s6 + $0x244] sm:$0xf] %v988_v4  ;;  %v992_v6 = vld [vmem:[%s18587_s0 + $0x498] sm:$0xf] }
 0x10b   : > { %991 = vst [vmem:[%s18592_s6 + $0x248] sm:$0xf] %v990_v5  ;;  %v994_v7 = vld [vmem:[%s18587_s0 + $0x4a0] sm:$0xf]  ;;  %v996_v8 = vld [vmem:[%s18587_s0 + $0x4a8] sm:$0xf] }
 0x10c   : > { %993 = vst [vmem:[%s18592_s6 + $0x24c] sm:$0xf] %v992_v6  ;;  %995 = vst [vmem:[%s18592_s6 + $0x250] sm:$0xf] %v994_v7  ;;  %v998_v9 = vld [vmem:[%s18587_s0 + $0x4b0] sm:$0xf] }
 0x10d   : > { %997 = vst [vmem:[%s18592_s6 + $0x254] sm:$0xf] %v996_v8  ;;  %v1000_v10 = vld [vmem:[%s18587_s0 + $0x4b8] sm:$0xf]  ;;  %v1002_v11 = vld [vmem:[%s18587_s0 + $0x4c0] sm:$0xf] }
 0x10e   : > { %999 = vst [vmem:[%s18592_s6 + $0x258] sm:$0xf] %v998_v9  ;;  %1001 = vst [vmem:[%s18592_s6 + $0x25c] sm:$0xf] %v1000_v10  ;;  %v1004_v12 = vld [vmem:[%s18587_s0 + $0x4c8] sm:$0xf] }
 0x10f   : > { %1003 = vst [vmem:[%s18592_s6 + $0x260] sm:$0xf] %v1002_v11  ;;  %v1006_v13 = vld [vmem:[%s18587_s0 + $0x4d0] sm:$0xf]  ;;  %v1008_v14 = vld [vmem:[%s18587_s0 + $0x4d8] sm:$0xf] }
 0x110   : > { %1005 = vst [vmem:[%s18592_s6 + $0x264] sm:$0xf] %v1004_v12  ;;  %1007 = vst [vmem:[%s18592_s6 + $0x268] sm:$0xf] %v1006_v13  ;;  %v1010_v15 = vld [vmem:[%s18587_s0 + $0x4e0] sm:$0xf] }
 0x111   : > { %1009 = vst [vmem:[%s18592_s6 + $0x26c] sm:$0xf] %v1008_v14  ;;  %v1012_v16 = vld [vmem:[%s18587_s0 + $0x4e8] sm:$0xf]  ;;  %v1014_v17 = vld [vmem:[%s18587_s0 + $0x4f0] sm:$0xf] }
 0x112   : > { %1011 = vst [vmem:[%s18592_s6 + $0x270] sm:$0xf] %v1010_v15  ;;  %1013 = vst [vmem:[%s18592_s6 + $0x274] sm:$0xf] %v1012_v16  ;;  %v1016_v18 = vld [vmem:[%s18587_s0 + $0x4f8] sm:$0xf] }
 0x113   : > { %1015 = vst [vmem:[%s18592_s6 + $0x278] sm:$0xf] %v1014_v17  ;;  %v1018_v19 = vld [vmem:[%s18587_s0 + $0x500] sm:$0xf]  ;;  %v1020_v20 = vld [vmem:[%s18587_s0 + $0x508] sm:$0xf] }
 0x114   : > { %1017 = vst [vmem:[%s18592_s6 + $0x27c] sm:$0xf] %v1016_v18  ;;  %1019 = vst [vmem:[%s18592_s6 + $0x280] sm:$0xf] %v1018_v19  ;;  %v1022_v21 = vld [vmem:[%s18587_s0 + $0x510] sm:$0xf] }
 0x115   : > { %1021 = vst [vmem:[%s18592_s6 + $0x284] sm:$0xf] %v1020_v20  ;;  %v1024_v22 = vld [vmem:[%s18587_s0 + $0x518] sm:$0xf]  ;;  %v1026_v23 = vld [vmem:[%s18587_s0 + $0x520] sm:$0xf] }
 0x116   : > { %1023 = vst [vmem:[%s18592_s6 + $0x288] sm:$0xf] %v1022_v21  ;;  %1025 = vst [vmem:[%s18592_s6 + $0x28c] sm:$0xf] %v1024_v22  ;;  %v1028_v24 = vld [vmem:[%s18587_s0 + $0x528] sm:$0xf] }
 0x117   : > { %1027 = vst [vmem:[%s18592_s6 + $0x290] sm:$0xf] %v1026_v23  ;;  %v1030_v25 = vld [vmem:[%s18587_s0 + $0x530] sm:$0xf]  ;;  %v1032_v26 = vld [vmem:[%s18587_s0 + $0x538] sm:$0xf] }
 0x118   : > { %1029 = vst [vmem:[%s18592_s6 + $0x294] sm:$0xf] %v1028_v24  ;;  %1031 = vst [vmem:[%s18592_s6 + $0x298] sm:$0xf] %v1030_v25  ;;  %v1034_v27 = vld [vmem:[%s18587_s0 + $0x540] sm:$0xf] }
 0x119   : > { %1033 = vst [vmem:[%s18592_s6 + $0x29c] sm:$0xf] %v1032_v26  ;;  %v1036_v28 = vld [vmem:[%s18587_s0 + $0x548] sm:$0xf]  ;;  %v1038_v29 = vld [vmem:[%s18587_s0 + $0x550] sm:$0xf] }
 0x11a   : > { %1035 = vst [vmem:[%s18592_s6 + $0x2a0] sm:$0xf] %v1034_v27  ;;  %1037 = vst [vmem:[%s18592_s6 + $0x2a4] sm:$0xf] %v1036_v28  ;;  %v1040_v30 = vld [vmem:[%s18587_s0 + $0x558] sm:$0xf] }
 0x11b   : > { %1039 = vst [vmem:[%s18592_s6 + $0x2a8] sm:$0xf] %v1038_v29  ;;  %v1042_v31 = vld [vmem:[%s18587_s0 + $0x560] sm:$0xf]  ;;  %v1044_v32 = vld [vmem:[%s18587_s0 + $0x568] sm:$0xf] }
 0x11c   : > { %1041 = vst [vmem:[%s18592_s6 + $0x2ac] sm:$0xf] %v1040_v30  ;;  %1043 = vst [vmem:[%s18592_s6 + $0x2b0] sm:$0xf] %v1042_v31  ;;  %v1046_v33 = vld [vmem:[%s18587_s0 + $0x570] sm:$0xf] }
 0x11d   : > { %1045 = vst [vmem:[%s18592_s6 + $0x2b4] sm:$0xf] %v1044_v32  ;;  %v1048_v34 = vld [vmem:[%s18587_s0 + $0x578] sm:$0xf]  ;;  %v1050_v35 = vld [vmem:[%s18587_s0 + $0x580] sm:$0xf] }
 0x11e   : > { %1047 = vst [vmem:[%s18592_s6 + $0x2b8] sm:$0xf] %v1046_v33  ;;  %1049 = vst [vmem:[%s18592_s6 + $0x2bc] sm:$0xf] %v1048_v34  ;;  %v1052_v36 = vld [vmem:[%s18587_s0 + $0x588] sm:$0xf] }
 0x11f   : > { %1051 = vst [vmem:[%s18592_s6 + $0x2c0] sm:$0xf] %v1050_v35  ;;  %v1054_v37 = vld [vmem:[%s18587_s0 + $0x590] sm:$0xf]  ;;  %v1056_v38 = vld [vmem:[%s18587_s0 + $0x598] sm:$0xf] }
 0x120   : > { %1053 = vst [vmem:[%s18592_s6 + $0x2c4] sm:$0xf] %v1052_v36  ;;  %1055 = vst [vmem:[%s18592_s6 + $0x2c8] sm:$0xf] %v1054_v37  ;;  %v1058_v39 = vld [vmem:[%s18587_s0 + $0x5a0] sm:$0xf] }
 0x121   : > { %1057 = vst [vmem:[%s18592_s6 + $0x2cc] sm:$0xf] %v1056_v38  ;;  %v1060_v40 = vld [vmem:[%s18587_s0 + $0x5a8] sm:$0xf]  ;;  %v1062_v41 = vld [vmem:[%s18587_s0 + $0x5b0] sm:$0xf] }
 0x122   : > { %1059 = vst [vmem:[%s18592_s6 + $0x2d0] sm:$0xf] %v1058_v39  ;;  %1061 = vst [vmem:[%s18592_s6 + $0x2d4] sm:$0xf] %v1060_v40  ;;  %v1064_v42 = vld [vmem:[%s18587_s0 + $0x5b8] sm:$0xf] }
 0x123   : > { %1063 = vst [vmem:[%s18592_s6 + $0x2d8] sm:$0xf] %v1062_v41  ;;  %v1066_v43 = vld [vmem:[%s18587_s0 + $0x5c0] sm:$0xf]  ;;  %v1068_v44 = vld [vmem:[%s18587_s0 + $0x5c8] sm:$0xf] }
 0x124   : > { %1065 = vst [vmem:[%s18592_s6 + $0x2dc] sm:$0xf] %v1064_v42  ;;  %1067 = vst [vmem:[%s18592_s6 + $0x2e0] sm:$0xf] %v1066_v43  ;;  %v1070_v45 = vld [vmem:[%s18587_s0 + $0x5d0] sm:$0xf] }
 0x125   : > { %1069 = vst [vmem:[%s18592_s6 + $0x2e4] sm:$0xf] %v1068_v44  ;;  %v1072_v46 = vld [vmem:[%s18587_s0 + $0x5d8] sm:$0xf]  ;;  %v1074_v47 = vld [vmem:[%s18587_s0 + $0x5e0] sm:$0xf] }
 0x126   : > { %1071 = vst [vmem:[%s18592_s6 + $0x2e8] sm:$0xf] %v1070_v45  ;;  %1073 = vst [vmem:[%s18592_s6 + $0x2ec] sm:$0xf] %v1072_v46  ;;  %v1076_v48 = vld [vmem:[%s18587_s0 + $0x5e8] sm:$0xf] }
 0x127   : > { %1075 = vst [vmem:[%s18592_s6 + $0x2f0] sm:$0xf] %v1074_v47  ;;  %v1078_v49 = vld [vmem:[%s18587_s0 + $0x5f0] sm:$0xf]  ;;  %v1080_v50 = vld [vmem:[%s18587_s0 + $0x5f8] sm:$0xf] }
 0x128   : > { %1077 = vst [vmem:[%s18592_s6 + $0x2f4] sm:$0xf] %v1076_v48  ;;  %1079 = vst [vmem:[%s18592_s6 + $0x2f8] sm:$0xf] %v1078_v49  ;;  %v1082_v51 = vld [vmem:[%s18587_s0 + $0x600] sm:$0xf] }
 0x129   : > { %1081 = vst [vmem:[%s18592_s6 + $0x2fc] sm:$0xf] %v1080_v50  ;;  %v1084_v52 = vld [vmem:[%s18587_s0 + $0x608] sm:$0xf]  ;;  %v1086_v53 = vld [vmem:[%s18587_s0 + $0x610] sm:$0xf] }
 0x12a   : > { %1083 = vst [vmem:[%s18592_s6 + $0x300] sm:$0xf] %v1082_v51  ;;  %1085 = vst [vmem:[%s18592_s6 + $0x304] sm:$0xf] %v1084_v52  ;;  %v1088_v54 = vld [vmem:[%s18587_s0 + $0x618] sm:$0xf] }
 0x12b   : > { %1087 = vst [vmem:[%s18592_s6 + $0x308] sm:$0xf] %v1086_v53  ;;  %v1090_v55 = vld [vmem:[%s18587_s0 + $0x620] sm:$0xf]  ;;  %v1092_v56 = vld [vmem:[%s18587_s0 + $0x628] sm:$0xf] }
 0x12c   : > { %1089 = vst [vmem:[%s18592_s6 + $0x30c] sm:$0xf] %v1088_v54  ;;  %1091 = vst [vmem:[%s18592_s6 + $0x310] sm:$0xf] %v1090_v55  ;;  %v1094_v57 = vld [vmem:[%s18587_s0 + $0x630] sm:$0xf] }
 0x12d   : > { %1093 = vst [vmem:[%s18592_s6 + $0x314] sm:$0xf] %v1092_v56  ;;  %v1096_v58 = vld [vmem:[%s18587_s0 + $0x638] sm:$0xf]  ;;  %v1098_v59 = vld [vmem:[%s18587_s0 + $0x640] sm:$0xf] }
 0x12e   : > { %1095 = vst [vmem:[%s18592_s6 + $0x318] sm:$0xf] %v1094_v57  ;;  %1097 = vst [vmem:[%s18592_s6 + $0x31c] sm:$0xf] %v1096_v58  ;;  %v1100_v60 = vld [vmem:[%s18587_s0 + $0x648] sm:$0xf] }
 0x12f   : > { %1099 = vst [vmem:[%s18592_s6 + $0x320] sm:$0xf] %v1098_v59  ;;  %v1102_v61 = vld [vmem:[%s18587_s0 + $0x650] sm:$0xf]  ;;  %v1104_v62 = vld [vmem:[%s18587_s0 + $0x658] sm:$0xf] }
 0x130   : > { %1101 = vst [vmem:[%s18592_s6 + $0x324] sm:$0xf] %v1100_v60  ;;  %1103 = vst [vmem:[%s18592_s6 + $0x328] sm:$0xf] %v1102_v61  ;;  %v1106_v63 = vld [vmem:[%s18587_s0 + $0x660] sm:$0xf] }
 0x131   : > { %1105 = vst [vmem:[%s18592_s6 + $0x32c] sm:$0xf] %v1104_v62  ;;  %v1108_v0 = vld [vmem:[%s18587_s0 + $0x668] sm:$0xf]  ;;  %v1110_v1 = vld [vmem:[%s18587_s0 + $0x670] sm:$0xf] }
 0x132   : > { %1107 = vst [vmem:[%s18592_s6 + $0x330] sm:$0xf] %v1106_v63  ;;  %1109 = vst [vmem:[%s18592_s6 + $0x334] sm:$0xf] %v1108_v0  ;;  %v1112_v2 = vld [vmem:[%s18587_s0 + $0x678] sm:$0xf] }
 0x133   : > { %1111 = vst [vmem:[%s18592_s6 + $0x338] sm:$0xf] %v1110_v1  ;;  %v1114_v3 = vld [vmem:[%s18587_s0 + $0x680] sm:$0xf]  ;;  %v1116_v4 = vld [vmem:[%s18587_s0 + $0x688] sm:$0xf] }
 0x134   : > { %1113 = vst [vmem:[%s18592_s6 + $0x33c] sm:$0xf] %v1112_v2  ;;  %1115 = vst [vmem:[%s18592_s6 + $0x340] sm:$0xf] %v1114_v3  ;;  %v1118_v5 = vld [vmem:[%s18587_s0 + $0x690] sm:$0xf] }
 0x135   : > { %1117 = vst [vmem:[%s18592_s6 + $0x344] sm:$0xf] %v1116_v4  ;;  %v1120_v6 = vld [vmem:[%s18587_s0 + $0x698] sm:$0xf]  ;;  %v1122_v7 = vld [vmem:[%s18587_s0 + $0x6a0] sm:$0xf] }
 0x136   : > { %1119 = vst [vmem:[%s18592_s6 + $0x348] sm:$0xf] %v1118_v5  ;;  %1121 = vst [vmem:[%s18592_s6 + $0x34c] sm:$0xf] %v1120_v6  ;;  %v1124_v8 = vld [vmem:[%s18587_s0 + $0x6a8] sm:$0xf] }
 0x137   : > { %1123 = vst [vmem:[%s18592_s6 + $0x350] sm:$0xf] %v1122_v7  ;;  %v1126_v9 = vld [vmem:[%s18587_s0 + $0x6b0] sm:$0xf]  ;;  %v1128_v10 = vld [vmem:[%s18587_s0 + $0x6b8] sm:$0xf] }
 0x138   : > { %1125 = vst [vmem:[%s18592_s6 + $0x354] sm:$0xf] %v1124_v8  ;;  %1127 = vst [vmem:[%s18592_s6 + $0x358] sm:$0xf] %v1126_v9  ;;  %v1130_v11 = vld [vmem:[%s18587_s0 + $0x6c0] sm:$0xf] }
 0x139   : > { %1129 = vst [vmem:[%s18592_s6 + $0x35c] sm:$0xf] %v1128_v10  ;;  %v1132_v12 = vld [vmem:[%s18587_s0 + $0x6c8] sm:$0xf]  ;;  %v1134_v13 = vld [vmem:[%s18587_s0 + $0x6d0] sm:$0xf] }
 0x13a   : > { %1131 = vst [vmem:[%s18592_s6 + $0x360] sm:$0xf] %v1130_v11  ;;  %1133 = vst [vmem:[%s18592_s6 + $0x364] sm:$0xf] %v1132_v12  ;;  %v1136_v14 = vld [vmem:[%s18587_s0 + $0x6d8] sm:$0xf] }
 0x13b   : > { %1135 = vst [vmem:[%s18592_s6 + $0x368] sm:$0xf] %v1134_v13  ;;  %v1138_v15 = vld [vmem:[%s18587_s0 + $0x6e0] sm:$0xf]  ;;  %v1140_v16 = vld [vmem:[%s18587_s0 + $0x6e8] sm:$0xf] }
 0x13c   : > { %1137 = vst [vmem:[%s18592_s6 + $0x36c] sm:$0xf] %v1136_v14  ;;  %1139 = vst [vmem:[%s18592_s6 + $0x370] sm:$0xf] %v1138_v15  ;;  %v1142_v17 = vld [vmem:[%s18587_s0 + $0x6f0] sm:$0xf] }
 0x13d   : > { %1141 = vst [vmem:[%s18592_s6 + $0x374] sm:$0xf] %v1140_v16  ;;  %v1144_v18 = vld [vmem:[%s18587_s0 + $0x6f8] sm:$0xf]  ;;  %v1146_v19 = vld [vmem:[%s18587_s0 + $0x700] sm:$0xf] }
 0x13e   : > { %1143 = vst [vmem:[%s18592_s6 + $0x378] sm:$0xf] %v1142_v17  ;;  %1145 = vst [vmem:[%s18592_s6 + $0x37c] sm:$0xf] %v1144_v18  ;;  %v1148_v20 = vld [vmem:[%s18587_s0 + $0x708] sm:$0xf] }
 0x13f   : > { %1147 = vst [vmem:[%s18592_s6 + $0x380] sm:$0xf] %v1146_v19  ;;  %v1150_v21 = vld [vmem:[%s18587_s0 + $0x710] sm:$0xf]  ;;  %v1152_v22 = vld [vmem:[%s18587_s0 + $0x718] sm:$0xf] }
 0x140   : > { %1149 = vst [vmem:[%s18592_s6 + $0x384] sm:$0xf] %v1148_v20  ;;  %1151 = vst [vmem:[%s18592_s6 + $0x388] sm:$0xf] %v1150_v21  ;;  %v1154_v23 = vld [vmem:[%s18587_s0 + $0x720] sm:$0xf] }
 0x141   : > { %1153 = vst [vmem:[%s18592_s6 + $0x38c] sm:$0xf] %v1152_v22  ;;  %v1156_v24 = vld [vmem:[%s18587_s0 + $0x728] sm:$0xf]  ;;  %v1158_v25 = vld [vmem:[%s18587_s0 + $0x730] sm:$0xf] }
 0x142   : > { %1155 = vst [vmem:[%s18592_s6 + $0x390] sm:$0xf] %v1154_v23  ;;  %1157 = vst [vmem:[%s18592_s6 + $0x394] sm:$0xf] %v1156_v24  ;;  %v1160_v26 = vld [vmem:[%s18587_s0 + $0x738] sm:$0xf] }
 0x143   : > { %1159 = vst [vmem:[%s18592_s6 + $0x398] sm:$0xf] %v1158_v25  ;;  %v1162_v27 = vld [vmem:[%s18587_s0 + $0x740] sm:$0xf]  ;;  %v1164_v28 = vld [vmem:[%s18587_s0 + $0x748] sm:$0xf] }
 0x144   : > { %1161 = vst [vmem:[%s18592_s6 + $0x39c] sm:$0xf] %v1160_v26  ;;  %1163 = vst [vmem:[%s18592_s6 + $0x3a0] sm:$0xf] %v1162_v27  ;;  %v1166_v29 = vld [vmem:[%s18587_s0 + $0x750] sm:$0xf] }
 0x145   : > { %1165 = vst [vmem:[%s18592_s6 + $0x3a4] sm:$0xf] %v1164_v28  ;;  %v1168_v30 = vld [vmem:[%s18587_s0 + $0x758] sm:$0xf]  ;;  %v1170_v31 = vld [vmem:[%s18587_s0 + $0x760] sm:$0xf] }
 0x146   : > { %1167 = vst [vmem:[%s18592_s6 + $0x3a8] sm:$0xf] %v1166_v29  ;;  %1169 = vst [vmem:[%s18592_s6 + $0x3ac] sm:$0xf] %v1168_v30  ;;  %v1172_v32 = vld [vmem:[%s18587_s0 + $0x768] sm:$0xf] }
 0x147   : > { %1171 = vst [vmem:[%s18592_s6 + $0x3b0] sm:$0xf] %v1170_v31  ;;  %v1174_v33 = vld [vmem:[%s18587_s0 + $0x770] sm:$0xf]  ;;  %v1176_v34 = vld [vmem:[%s18587_s0 + $0x778] sm:$0xf] }
 0x148   : > { %1173 = vst [vmem:[%s18592_s6 + $0x3b4] sm:$0xf] %v1172_v32  ;;  %1175 = vst [vmem:[%s18592_s6 + $0x3b8] sm:$0xf] %v1174_v33  ;;  %v1178_v35 = vld [vmem:[%s18587_s0 + $0x780] sm:$0xf] }
 0x149   : > { %1177 = vst [vmem:[%s18592_s6 + $0x3bc] sm:$0xf] %v1176_v34  ;;  %v1180_v36 = vld [vmem:[%s18587_s0 + $0x788] sm:$0xf]  ;;  %v1182_v37 = vld [vmem:[%s18587_s0 + $0x790] sm:$0xf] }
 0x14a   : > { %1179 = vst [vmem:[%s18592_s6 + $0x3c0] sm:$0xf] %v1178_v35  ;;  %1181 = vst [vmem:[%s18592_s6 + $0x3c4] sm:$0xf] %v1180_v36  ;;  %v1184_v38 = vld [vmem:[%s18587_s0 + $0x798] sm:$0xf] }
 0x14b   : > { %1183 = vst [vmem:[%s18592_s6 + $0x3c8] sm:$0xf] %v1182_v37  ;;  %v1186_v39 = vld [vmem:[%s18587_s0 + $0x7a0] sm:$0xf]  ;;  %v1188_v40 = vld [vmem:[%s18587_s0 + $0x7a8] sm:$0xf] }
 0x14c   : > { %1185 = vst [vmem:[%s18592_s6 + $0x3cc] sm:$0xf] %v1184_v38  ;;  %1187 = vst [vmem:[%s18592_s6 + $0x3d0] sm:$0xf] %v1186_v39  ;;  %v1190_v41 = vld [vmem:[%s18587_s0 + $0x7b0] sm:$0xf] }
 0x14d   : > { %1189 = vst [vmem:[%s18592_s6 + $0x3d4] sm:$0xf] %v1188_v40  ;;  %v1192_v42 = vld [vmem:[%s18587_s0 + $0x7b8] sm:$0xf]  ;;  %v1194_v43 = vld [vmem:[%s18587_s0 + $0x7c0] sm:$0xf] }
 0x14e   : > { %1191 = vst [vmem:[%s18592_s6 + $0x3d8] sm:$0xf] %v1190_v41  ;;  %1193 = vst [vmem:[%s18592_s6 + $0x3dc] sm:$0xf] %v1192_v42  ;;  %v1196_v44 = vld [vmem:[%s18587_s0 + $0x7c8] sm:$0xf] }
 0x14f   : > { %1195 = vst [vmem:[%s18592_s6 + $0x3e0] sm:$0xf] %v1194_v43  ;;  %v1198_v45 = vld [vmem:[%s18587_s0 + $0x7d0] sm:$0xf]  ;;  %v1200_v46 = vld [vmem:[%s18587_s0 + $0x7d8] sm:$0xf] }
 0x150   : > { %1197 = vst [vmem:[%s18592_s6 + $0x3e4] sm:$0xf] %v1196_v44  ;;  %1199 = vst [vmem:[%s18592_s6 + $0x3e8] sm:$0xf] %v1198_v45  ;;  %v1202_v47 = vld [vmem:[%s18587_s0 + $0x7e0] sm:$0xf] }
 0x151   : > { %1201 = vst [vmem:[%s18592_s6 + $0x3ec] sm:$0xf] %v1200_v46  ;;  %v1204_v48 = vld [vmem:[%s18587_s0 + $0x7e8] sm:$0xf]  ;;  %v1206_v49 = vld [vmem:[%s18587_s0 + $0x7f0] sm:$0xf] }
 0x152   : > { %1203 = vst [vmem:[%s18592_s6 + $0x3f0] sm:$0xf] %v1202_v47  ;;  %1205 = vst [vmem:[%s18592_s6 + $0x3f4] sm:$0xf] %v1204_v48  ;;  %v1208_v50 = vld [vmem:[%s18587_s0 + $0x7f8] sm:$0xf] }
 0x153   : > { %1207 = vst [vmem:[%s18592_s6 + $0x3f8] sm:$0xf] %v1206_v49  ;;  %v1210_v51 = vld [vmem:[%s18587_s0 + $0x800] sm:$0xf]  ;;  %v1212_v52 = vld [vmem:[%s18587_s0 + $0x808] sm:$0xf] }
 0x154   : > { %1209 = vst [vmem:[%s18592_s6 + $0x3fc] sm:$0xf] %v1208_v50  ;;  %1211 = vst [vmem:[%s18592_s6 + $0x400] sm:$0xf] %v1210_v51  ;;  %v1214_v53 = vld [vmem:[%s18587_s0 + $0x810] sm:$0xf] }
 0x155   : > { %1213 = vst [vmem:[%s18592_s6 + $0x404] sm:$0xf] %v1212_v52  ;;  %v1216_v54 = vld [vmem:[%s18587_s0 + $0x818] sm:$0xf]  ;;  %v1218_v55 = vld [vmem:[%s18587_s0 + $0x820] sm:$0xf] }
 0x156   : > { %1215 = vst [vmem:[%s18592_s6 + $0x408] sm:$0xf] %v1214_v53  ;;  %1217 = vst [vmem:[%s18592_s6 + $0x40c] sm:$0xf] %v1216_v54  ;;  %v1220_v56 = vld [vmem:[%s18587_s0 + $0x828] sm:$0xf] }
 0x157   : > { %1219 = vst [vmem:[%s18592_s6 + $0x410] sm:$0xf] %v1218_v55  ;;  %v1222_v57 = vld [vmem:[%s18587_s0 + $0x830] sm:$0xf]  ;;  %v1224_v58 = vld [vmem:[%s18587_s0 + $0x838] sm:$0xf] }
 0x158   : > { %1221 = vst [vmem:[%s18592_s6 + $0x414] sm:$0xf] %v1220_v56  ;;  %1223 = vst [vmem:[%s18592_s6 + $0x418] sm:$0xf] %v1222_v57  ;;  %v1226_v59 = vld [vmem:[%s18587_s0 + $0x840] sm:$0xf] }
 0x159   : > { %1225 = vst [vmem:[%s18592_s6 + $0x41c] sm:$0xf] %v1224_v58  ;;  %v1228_v60 = vld [vmem:[%s18587_s0 + $0x848] sm:$0xf]  ;;  %v1230_v61 = vld [vmem:[%s18587_s0 + $0x850] sm:$0xf] }
 0x15a   : > { %1227 = vst [vmem:[%s18592_s6 + $0x420] sm:$0xf] %v1226_v59  ;;  %1229 = vst [vmem:[%s18592_s6 + $0x424] sm:$0xf] %v1228_v60  ;;  %v1232_v62 = vld [vmem:[%s18587_s0 + $0x858] sm:$0xf] }
 0x15b   : > { %1231 = vst [vmem:[%s18592_s6 + $0x428] sm:$0xf] %v1230_v61  ;;  %v1234_v63 = vld [vmem:[%s18587_s0 + $0x860] sm:$0xf]  ;;  %v1236_v0 = vld [vmem:[%s18587_s0 + $0x868] sm:$0xf] }
 0x15c   : > { %1233 = vst [vmem:[%s18592_s6 + $0x42c] sm:$0xf] %v1232_v62  ;;  %1235 = vst [vmem:[%s18592_s6 + $0x430] sm:$0xf] %v1234_v63  ;;  %v1238_v1 = vld [vmem:[%s18587_s0 + $0x870] sm:$0xf] }
 0x15d   : > { %1237 = vst [vmem:[%s18592_s6 + $0x434] sm:$0xf] %v1236_v0  ;;  %v1240_v2 = vld [vmem:[%s18587_s0 + $0x878] sm:$0xf]  ;;  %v1242_v3 = vld [vmem:[%s18587_s0 + $0x880] sm:$0xf] }
 0x15e   : > { %1239 = vst [vmem:[%s18592_s6 + $0x438] sm:$0xf] %v1238_v1  ;;  %1241 = vst [vmem:[%s18592_s6 + $0x43c] sm:$0xf] %v1240_v2  ;;  %v1244_v4 = vld [vmem:[%s18587_s0 + $0x888] sm:$0xf] }
 0x15f   : > { %1243 = vst [vmem:[%s18592_s6 + $0x440] sm:$0xf] %v1242_v3  ;;  %v1246_v5 = vld [vmem:[%s18587_s0 + $0x890] sm:$0xf]  ;;  %v1248_v6 = vld [vmem:[%s18587_s0 + $0x898] sm:$0xf] }
 0x160   : > { %1245 = vst [vmem:[%s18592_s6 + $0x444] sm:$0xf] %v1244_v4  ;;  %1247 = vst [vmem:[%s18592_s6 + $0x448] sm:$0xf] %v1246_v5  ;;  %v1250_v7 = vld [vmem:[%s18587_s0 + $0x8a0] sm:$0xf] }
 0x161   : > { %1249 = vst [vmem:[%s18592_s6 + $0x44c] sm:$0xf] %v1248_v6  ;;  %v1252_v8 = vld [vmem:[%s18587_s0 + $0x8a8] sm:$0xf]  ;;  %v1254_v9 = vld [vmem:[%s18587_s0 + $0x8b0] sm:$0xf] }
 0x162   : > { %1251 = vst [vmem:[%s18592_s6 + $0x450] sm:$0xf] %v1250_v7  ;;  %1253 = vst [vmem:[%s18592_s6 + $0x454] sm:$0xf] %v1252_v8  ;;  %v1256_v10 = vld [vmem:[%s18587_s0 + $0x8b8] sm:$0xf] }
 0x163   : > { %1255 = vst [vmem:[%s18592_s6 + $0x458] sm:$0xf] %v1254_v9  ;;  %v1258_v11 = vld [vmem:[%s18587_s0 + $0x8c0] sm:$0xf]  ;;  %v1260_v12 = vld [vmem:[%s18587_s0 + $0x8c8] sm:$0xf] }
 0x164   : > { %1257 = vst [vmem:[%s18592_s6 + $0x45c] sm:$0xf] %v1256_v10  ;;  %1259 = vst [vmem:[%s18592_s6 + $0x460] sm:$0xf] %v1258_v11  ;;  %v1262_v13 = vld [vmem:[%s18587_s0 + $0x8d0] sm:$0xf] }
 0x165   : > { %1261 = vst [vmem:[%s18592_s6 + $0x464] sm:$0xf] %v1260_v12  ;;  %v1264_v14 = vld [vmem:[%s18587_s0 + $0x8d8] sm:$0xf]  ;;  %v1266_v15 = vld [vmem:[%s18587_s0 + $0x8e0] sm:$0xf] }
 0x166   : > { %1263 = vst [vmem:[%s18592_s6 + $0x468] sm:$0xf] %v1262_v13  ;;  %1265 = vst [vmem:[%s18592_s6 + $0x46c] sm:$0xf] %v1264_v14  ;;  %v1268_v16 = vld [vmem:[%s18587_s0 + $0x8e8] sm:$0xf] }
 0x167   : > { %1267 = vst [vmem:[%s18592_s6 + $0x470] sm:$0xf] %v1266_v15  ;;  %v1270_v17 = vld [vmem:[%s18587_s0 + $0x8f0] sm:$0xf]  ;;  %v1272_v18 = vld [vmem:[%s18587_s0 + $0x8f8] sm:$0xf] }
 0x168   : > { %1269 = vst [vmem:[%s18592_s6 + $0x474] sm:$0xf] %v1268_v16  ;;  %1271 = vst [vmem:[%s18592_s6 + $0x478] sm:$0xf] %v1270_v17  ;;  %v1274_v19 = vld [vmem:[%s18587_s0 + $0x900] sm:$0xf] }
 0x169   : > { %1273 = vst [vmem:[%s18592_s6 + $0x47c] sm:$0xf] %v1272_v18  ;;  %v1276_v20 = vld [vmem:[%s18587_s0 + $0x908] sm:$0xf]  ;;  %v1278_v21 = vld [vmem:[%s18587_s0 + $0x910] sm:$0xf] }
 0x16a   : > { %1275 = vst [vmem:[%s18592_s6 + $0x480] sm:$0xf] %v1274_v19  ;;  %1277 = vst [vmem:[%s18592_s6 + $0x484] sm:$0xf] %v1276_v20  ;;  %v1280_v22 = vld [vmem:[%s18587_s0 + $0x918] sm:$0xf] }
 0x16b   : > { %1279 = vst [vmem:[%s18592_s6 + $0x488] sm:$0xf] %v1278_v21  ;;  %v1282_v23 = vld [vmem:[%s18587_s0 + $0x920] sm:$0xf]  ;;  %v1284_v24 = vld [vmem:[%s18587_s0 + $0x928] sm:$0xf] }
 0x16c   : > { %1281 = vst [vmem:[%s18592_s6 + $0x48c] sm:$0xf] %v1280_v22  ;;  %1283 = vst [vmem:[%s18592_s6 + $0x490] sm:$0xf] %v1282_v23  ;;  %v1286_v25 = vld [vmem:[%s18587_s0 + $0x930] sm:$0xf] }
 0x16d   : > { %1285 = vst [vmem:[%s18592_s6 + $0x494] sm:$0xf] %v1284_v24  ;;  %v1288_v26 = vld [vmem:[%s18587_s0 + $0x938] sm:$0xf]  ;;  %v1290_v27 = vld [vmem:[%s18587_s0 + $0x940] sm:$0xf] }
 0x16e   : > { %1287 = vst [vmem:[%s18592_s6 + $0x498] sm:$0xf] %v1286_v25  ;;  %1289 = vst [vmem:[%s18592_s6 + $0x49c] sm:$0xf] %v1288_v26  ;;  %v1292_v28 = vld [vmem:[%s18587_s0 + $0x948] sm:$0xf] }
 0x16f   : > { %1291 = vst [vmem:[%s18592_s6 + $0x4a0] sm:$0xf] %v1290_v27  ;;  %v1294_v29 = vld [vmem:[%s18587_s0 + $0x950] sm:$0xf]  ;;  %v1296_v30 = vld [vmem:[%s18587_s0 + $0x958] sm:$0xf] }
 0x170   : > { %1293 = vst [vmem:[%s18592_s6 + $0x4a4] sm:$0xf] %v1292_v28  ;;  %1295 = vst [vmem:[%s18592_s6 + $0x4a8] sm:$0xf] %v1294_v29  ;;  %v1298_v31 = vld [vmem:[%s18587_s0 + $0x960] sm:$0xf] }
 0x171   : > { %1297 = vst [vmem:[%s18592_s6 + $0x4ac] sm:$0xf] %v1296_v30  ;;  %v1300_v32 = vld [vmem:[%s18587_s0 + $0x968] sm:$0xf]  ;;  %v1302_v33 = vld [vmem:[%s18587_s0 + $0x970] sm:$0xf] }
 0x172   : > { %1299 = vst [vmem:[%s18592_s6 + $0x4b0] sm:$0xf] %v1298_v31  ;;  %1301 = vst [vmem:[%s18592_s6 + $0x4b4] sm:$0xf] %v1300_v32  ;;  %v1304_v34 = vld [vmem:[%s18587_s0 + $0x978] sm:$0xf] }
 0x173   : > { %1303 = vst [vmem:[%s18592_s6 + $0x4b8] sm:$0xf] %v1302_v33  ;;  %v1306_v35 = vld [vmem:[%s18587_s0 + $0x980] sm:$0xf]  ;;  %v1308_v36 = vld [vmem:[%s18587_s0 + $0x988] sm:$0xf] }
 0x174   : > { %1305 = vst [vmem:[%s18592_s6 + $0x4bc] sm:$0xf] %v1304_v34  ;;  %1307 = vst [vmem:[%s18592_s6 + $0x4c0] sm:$0xf] %v1306_v35  ;;  %v1310_v37 = vld [vmem:[%s18587_s0 + $0x990] sm:$0xf] }
 0x175   : > { %1309 = vst [vmem:[%s18592_s6 + $0x4c4] sm:$0xf] %v1308_v36  ;;  %v1312_v38 = vld [vmem:[%s18587_s0 + $0x998] sm:$0xf]  ;;  %v1314_v39 = vld [vmem:[%s18587_s0 + $0x9a0] sm:$0xf] }
 0x176   : > { %1311 = vst [vmem:[%s18592_s6 + $0x4c8] sm:$0xf] %v1310_v37  ;;  %1313 = vst [vmem:[%s18592_s6 + $0x4cc] sm:$0xf] %v1312_v38  ;;  %v1316_v40 = vld [vmem:[%s18587_s0 + $0x9a8] sm:$0xf] }
 0x177   : > { %1315 = vst [vmem:[%s18592_s6 + $0x4d0] sm:$0xf] %v1314_v39  ;;  %v1318_v41 = vld [vmem:[%s18587_s0 + $0x9b0] sm:$0xf]  ;;  %v1320_v42 = vld [vmem:[%s18587_s0 + $0x9b8] sm:$0xf] }
 0x178   : > { %1317 = vst [vmem:[%s18592_s6 + $0x4d4] sm:$0xf] %v1316_v40  ;;  %1319 = vst [vmem:[%s18592_s6 + $0x4d8] sm:$0xf] %v1318_v41  ;;  %v1322_v43 = vld [vmem:[%s18587_s0 + $0x9c0] sm:$0xf] }
 0x179   : > { %1321 = vst [vmem:[%s18592_s6 + $0x4dc] sm:$0xf] %v1320_v42  ;;  %v1324_v44 = vld [vmem:[%s18587_s0 + $0x9c8] sm:$0xf]  ;;  %v1326_v45 = vld [vmem:[%s18587_s0 + $0x9d0] sm:$0xf] }
 0x17a   : > { %1323 = vst [vmem:[%s18592_s6 + $0x4e0] sm:$0xf] %v1322_v43  ;;  %1325 = vst [vmem:[%s18592_s6 + $0x4e4] sm:$0xf] %v1324_v44  ;;  %v1328_v46 = vld [vmem:[%s18587_s0 + $0x9d8] sm:$0xf] }
 0x17b   : > { %1327 = vst [vmem:[%s18592_s6 + $0x4e8] sm:$0xf] %v1326_v45  ;;  %v1330_v47 = vld [vmem:[%s18587_s0 + $0x9e0] sm:$0xf]  ;;  %v1332_v48 = vld [vmem:[%s18587_s0 + $0x9e8] sm:$0xf] }
 0x17c   : > { %1329 = vst [vmem:[%s18592_s6 + $0x4ec] sm:$0xf] %v1328_v46  ;;  %1331 = vst [vmem:[%s18592_s6 + $0x4f0] sm:$0xf] %v1330_v47  ;;  %v1334_v49 = vld [vmem:[%s18587_s0 + $0x9f0] sm:$0xf] }
 0x17d   : > { %1333 = vst [vmem:[%s18592_s6 + $0x4f4] sm:$0xf] %v1332_v48  ;;  %v1336_v50 = vld [vmem:[%s18587_s0 + $0x9f8] sm:$0xf]  ;;  %v1338_v51 = vld [vmem:[%s18587_s0 + $0xa00] sm:$0xf] }
 0x17e   : > { %1335 = vst [vmem:[%s18592_s6 + $0x4f8] sm:$0xf] %v1334_v49  ;;  %1337 = vst [vmem:[%s18592_s6 + $0x4fc] sm:$0xf] %v1336_v50  ;;  %v1340_v52 = vld [vmem:[%s18587_s0 + $0xa08] sm:$0xf] }
 0x17f   : > { %1339 = vst [vmem:[%s18592_s6 + $0x500] sm:$0xf] %v1338_v51  ;;  %v1342_v53 = vld [vmem:[%s18587_s0 + $0xa10] sm:$0xf]  ;;  %v1344_v54 = vld [vmem:[%s18587_s0 + $0xa18] sm:$0xf] }
 0x180   : > { %1341 = vst [vmem:[%s18592_s6 + $0x504] sm:$0xf] %v1340_v52  ;;  %1343 = vst [vmem:[%s18592_s6 + $0x508] sm:$0xf] %v1342_v53  ;;  %v1346_v55 = vld [vmem:[%s18587_s0 + $0xa20] sm:$0xf] }
 0x181   : > { %1345 = vst [vmem:[%s18592_s6 + $0x50c] sm:$0xf] %v1344_v54  ;;  %v1348_v56 = vld [vmem:[%s18587_s0 + $0xa28] sm:$0xf]  ;;  %v1350_v57 = vld [vmem:[%s18587_s0 + $0xa30] sm:$0xf] }
 0x182   : > { %1347 = vst [vmem:[%s18592_s6 + $0x510] sm:$0xf] %v1346_v55  ;;  %1349 = vst [vmem:[%s18592_s6 + $0x514] sm:$0xf] %v1348_v56  ;;  %v1352_v58 = vld [vmem:[%s18587_s0 + $0xa38] sm:$0xf] }
 0x183   : > { %1351 = vst [vmem:[%s18592_s6 + $0x518] sm:$0xf] %v1350_v57  ;;  %v1354_v59 = vld [vmem:[%s18587_s0 + $0xa40] sm:$0xf]  ;;  %v1356_v60 = vld [vmem:[%s18587_s0 + $0xa48] sm:$0xf] }
 0x184   : > { %1353 = vst [vmem:[%s18592_s6 + $0x51c] sm:$0xf] %v1352_v58  ;;  %1355 = vst [vmem:[%s18592_s6 + $0x520] sm:$0xf] %v1354_v59  ;;  %v1358_v61 = vld [vmem:[%s18587_s0 + $0xa50] sm:$0xf] }
 0x185   : > { %1357 = vst [vmem:[%s18592_s6 + $0x524] sm:$0xf] %v1356_v60  ;;  %v1360_v62 = vld [vmem:[%s18587_s0 + $0xa58] sm:$0xf]  ;;  %v1362_v63 = vld [vmem:[%s18587_s0 + $0xa60] sm:$0xf] }
 0x186   : > { %1359 = vst [vmem:[%s18592_s6 + $0x528] sm:$0xf] %v1358_v61  ;;  %1361 = vst [vmem:[%s18592_s6 + $0x52c] sm:$0xf] %v1360_v62  ;;  %v1364_v0 = vld [vmem:[%s18587_s0 + $0xa68] sm:$0xf] }
 0x187   : > { %1363 = vst [vmem:[%s18592_s6 + $0x530] sm:$0xf] %v1362_v63  ;;  %v1366_v1 = vld [vmem:[%s18587_s0 + $0xa70] sm:$0xf]  ;;  %v1368_v2 = vld [vmem:[%s18587_s0 + $0xa78] sm:$0xf] }
 0x188   : > { %1365 = vst [vmem:[%s18592_s6 + $0x534] sm:$0xf] %v1364_v0  ;;  %1367 = vst [vmem:[%s18592_s6 + $0x538] sm:$0xf] %v1366_v1  ;;  %v1370_v3 = vld [vmem:[%s18587_s0 + $0xa80] sm:$0xf] }
 0x189   : > { %1369 = vst [vmem:[%s18592_s6 + $0x53c] sm:$0xf] %v1368_v2  ;;  %v1372_v4 = vld [vmem:[%s18587_s0 + $0xa88] sm:$0xf]  ;;  %v1374_v5 = vld [vmem:[%s18587_s0 + $0xa90] sm:$0xf] }
 0x18a   : > { %1371 = vst [vmem:[%s18592_s6 + $0x540] sm:$0xf] %v1370_v3  ;;  %1373 = vst [vmem:[%s18592_s6 + $0x544] sm:$0xf] %v1372_v4  ;;  %v1376_v6 = vld [vmem:[%s18587_s0 + $0xa98] sm:$0xf] }
 0x18b   : > { %1375 = vst [vmem:[%s18592_s6 + $0x548] sm:$0xf] %v1374_v5  ;;  %v1378_v7 = vld [vmem:[%s18587_s0 + $0xaa0] sm:$0xf]  ;;  %v1380_v8 = vld [vmem:[%s18587_s0 + $0xaa8] sm:$0xf] }
 0x18c   : > { %1377 = vst [vmem:[%s18592_s6 + $0x54c] sm:$0xf] %v1376_v6  ;;  %1379 = vst [vmem:[%s18592_s6 + $0x550] sm:$0xf] %v1378_v7  ;;  %v1382_v9 = vld [vmem:[%s18587_s0 + $0xab0] sm:$0xf] }
 0x18d   : > { %1381 = vst [vmem:[%s18592_s6 + $0x554] sm:$0xf] %v1380_v8  ;;  %v1384_v10 = vld [vmem:[%s18587_s0 + $0xab8] sm:$0xf]  ;;  %v1386_v11 = vld [vmem:[%s18587_s0 + $0xac0] sm:$0xf] }
 0x18e   : > { %1383 = vst [vmem:[%s18592_s6 + $0x558] sm:$0xf] %v1382_v9  ;;  %1385 = vst [vmem:[%s18592_s6 + $0x55c] sm:$0xf] %v1384_v10  ;;  %v1388_v12 = vld [vmem:[%s18587_s0 + $0xac8] sm:$0xf] }
 0x18f   : > { %1387 = vst [vmem:[%s18592_s6 + $0x560] sm:$0xf] %v1386_v11  ;;  %v1390_v13 = vld [vmem:[%s18587_s0 + $0xad0] sm:$0xf]  ;;  %v1392_v14 = vld [vmem:[%s18587_s0 + $0xad8] sm:$0xf] }
 0x190   : > { %1389 = vst [vmem:[%s18592_s6 + $0x564] sm:$0xf] %v1388_v12  ;;  %1391 = vst [vmem:[%s18592_s6 + $0x568] sm:$0xf] %v1390_v13  ;;  %v1394_v15 = vld [vmem:[%s18587_s0 + $0xae0] sm:$0xf] }
 0x191   : > { %1393 = vst [vmem:[%s18592_s6 + $0x56c] sm:$0xf] %v1392_v14  ;;  %v1396_v16 = vld [vmem:[%s18587_s0 + $0xae8] sm:$0xf]  ;;  %v1398_v17 = vld [vmem:[%s18587_s0 + $0xaf0] sm:$0xf] }
 0x192   : > { %1395 = vst [vmem:[%s18592_s6 + $0x570] sm:$0xf] %v1394_v15  ;;  %1397 = vst [vmem:[%s18592_s6 + $0x574] sm:$0xf] %v1396_v16  ;;  %v1400_v18 = vld [vmem:[%s18587_s0 + $0xaf8] sm:$0xf] }
 0x193   : > { %1399 = vst [vmem:[%s18592_s6 + $0x578] sm:$0xf] %v1398_v17  ;;  %v1402_v19 = vld [vmem:[%s18587_s0 + $0xb00] sm:$0xf]  ;;  %v1404_v20 = vld [vmem:[%s18587_s0 + $0xb08] sm:$0xf] }
 0x194   : > { %1401 = vst [vmem:[%s18592_s6 + $0x57c] sm:$0xf] %v1400_v18  ;;  %1403 = vst [vmem:[%s18592_s6 + $0x580] sm:$0xf] %v1402_v19  ;;  %v1406_v21 = vld [vmem:[%s18587_s0 + $0xb10] sm:$0xf] }
 0x195   : > { %1405 = vst [vmem:[%s18592_s6 + $0x584] sm:$0xf] %v1404_v20  ;;  %v1408_v22 = vld [vmem:[%s18587_s0 + $0xb18] sm:$0xf]  ;;  %v1410_v23 = vld [vmem:[%s18587_s0 + $0xb20] sm:$0xf] }
 0x196   : > { %1407 = vst [vmem:[%s18592_s6 + $0x588] sm:$0xf] %v1406_v21  ;;  %1409 = vst [vmem:[%s18592_s6 + $0x58c] sm:$0xf] %v1408_v22  ;;  %v1412_v24 = vld [vmem:[%s18587_s0 + $0xb28] sm:$0xf] }
 0x197   : > { %1411 = vst [vmem:[%s18592_s6 + $0x590] sm:$0xf] %v1410_v23  ;;  %v1414_v25 = vld [vmem:[%s18587_s0 + $0xb30] sm:$0xf]  ;;  %v1416_v26 = vld [vmem:[%s18587_s0 + $0xb38] sm:$0xf] }
 0x198   : > { %1413 = vst [vmem:[%s18592_s6 + $0x594] sm:$0xf] %v1412_v24  ;;  %1415 = vst [vmem:[%s18592_s6 + $0x598] sm:$0xf] %v1414_v25  ;;  %v1418_v27 = vld [vmem:[%s18587_s0 + $0xb40] sm:$0xf] }
 0x199   : > { %1417 = vst [vmem:[%s18592_s6 + $0x59c] sm:$0xf] %v1416_v26  ;;  %v1420_v28 = vld [vmem:[%s18587_s0 + $0xb48] sm:$0xf]  ;;  %v1422_v29 = vld [vmem:[%s18587_s0 + $0xb50] sm:$0xf] }
 0x19a   : > { %1419 = vst [vmem:[%s18592_s6 + $0x5a0] sm:$0xf] %v1418_v27  ;;  %1421 = vst [vmem:[%s18592_s6 + $0x5a4] sm:$0xf] %v1420_v28  ;;  %v1424_v30 = vld [vmem:[%s18587_s0 + $0xb58] sm:$0xf] }
 0x19b   : > { %1423 = vst [vmem:[%s18592_s6 + $0x5a8] sm:$0xf] %v1422_v29  ;;  %v1426_v31 = vld [vmem:[%s18587_s0 + $0xb60] sm:$0xf]  ;;  %v1428_v32 = vld [vmem:[%s18587_s0 + $0xb68] sm:$0xf] }
 0x19c   : > { %1425 = vst [vmem:[%s18592_s6 + $0x5ac] sm:$0xf] %v1424_v30  ;;  %1427 = vst [vmem:[%s18592_s6 + $0x5b0] sm:$0xf] %v1426_v31  ;;  %v1430_v33 = vld [vmem:[%s18587_s0 + $0xb70] sm:$0xf] }
 0x19d   : > { %1429 = vst [vmem:[%s18592_s6 + $0x5b4] sm:$0xf] %v1428_v32  ;;  %v1432_v34 = vld [vmem:[%s18587_s0 + $0xb78] sm:$0xf]  ;;  %v1434_v35 = vld [vmem:[%s18587_s0 + $0xb80] sm:$0xf] }
 0x19e   : > { %1431 = vst [vmem:[%s18592_s6 + $0x5b8] sm:$0xf] %v1430_v33  ;;  %1433 = vst [vmem:[%s18592_s6 + $0x5bc] sm:$0xf] %v1432_v34  ;;  %v1436_v36 = vld [vmem:[%s18587_s0 + $0xb88] sm:$0xf] }
 0x19f   : > { %1435 = vst [vmem:[%s18592_s6 + $0x5c0] sm:$0xf] %v1434_v35  ;;  %v1438_v37 = vld [vmem:[%s18587_s0 + $0xb90] sm:$0xf]  ;;  %v1440_v38 = vld [vmem:[%s18587_s0 + $0xb98] sm:$0xf] }
 0x1a0   : > { %1437 = vst [vmem:[%s18592_s6 + $0x5c4] sm:$0xf] %v1436_v36  ;;  %1439 = vst [vmem:[%s18592_s6 + $0x5c8] sm:$0xf] %v1438_v37  ;;  %v1442_v39 = vld [vmem:[%s18587_s0 + $0xba0] sm:$0xf] }
 0x1a1   : > { %1441 = vst [vmem:[%s18592_s6 + $0x5cc] sm:$0xf] %v1440_v38  ;;  %v1444_v40 = vld [vmem:[%s18587_s0 + $0xba8] sm:$0xf]  ;;  %v1446_v41 = vld [vmem:[%s18587_s0 + $0xbb0] sm:$0xf] }
 0x1a2   : > { %1443 = vst [vmem:[%s18592_s6 + $0x5d0] sm:$0xf] %v1442_v39  ;;  %1445 = vst [vmem:[%s18592_s6 + $0x5d4] sm:$0xf] %v1444_v40  ;;  %v1448_v42 = vld [vmem:[%s18587_s0 + $0xbb8] sm:$0xf] }
 0x1a3   : > { %1447 = vst [vmem:[%s18592_s6 + $0x5d8] sm:$0xf] %v1446_v41  ;;  %v1450_v43 = vld [vmem:[%s18587_s0 + $0xbc0] sm:$0xf]  ;;  %v1452_v44 = vld [vmem:[%s18587_s0 + $0xbc8] sm:$0xf] }
 0x1a4   : > { %1449 = vst [vmem:[%s18592_s6 + $0x5dc] sm:$0xf] %v1448_v42  ;;  %1451 = vst [vmem:[%s18592_s6 + $0x5e0] sm:$0xf] %v1450_v43  ;;  %v1454_v45 = vld [vmem:[%s18587_s0 + $0xbd0] sm:$0xf] }
 0x1a5   : > { %1453 = vst [vmem:[%s18592_s6 + $0x5e4] sm:$0xf] %v1452_v44  ;;  %v1456_v46 = vld [vmem:[%s18587_s0 + $0xbd8] sm:$0xf]  ;;  %v1458_v47 = vld [vmem:[%s18587_s0 + $0xbe0] sm:$0xf] }
 0x1a6   : > { %1455 = vst [vmem:[%s18592_s6 + $0x5e8] sm:$0xf] %v1454_v45  ;;  %1457 = vst [vmem:[%s18592_s6 + $0x5ec] sm:$0xf] %v1456_v46  ;;  %v1460_v48 = vld [vmem:[%s18587_s0 + $0xbe8] sm:$0xf] }
 0x1a7   : > { %1459 = vst [vmem:[%s18592_s6 + $0x5f0] sm:$0xf] %v1458_v47  ;;  %v1462_v49 = vld [vmem:[%s18587_s0 + $0xbf0] sm:$0xf]  ;;  %v1464_v50 = vld [vmem:[%s18587_s0 + $0xbf8] sm:$0xf] }
 0x1a8   : > { %1461 = vst [vmem:[%s18592_s6 + $0x5f4] sm:$0xf] %v1460_v48  ;;  %1463 = vst [vmem:[%s18592_s6 + $0x5f8] sm:$0xf] %v1462_v49  ;;  %v1466_v51 = vld [vmem:[%s18587_s0 + $0xc00] sm:$0xf] }
 0x1a9   : > { %1465 = vst [vmem:[%s18592_s6 + $0x5fc] sm:$0xf] %v1464_v50  ;;  %v1468_v52 = vld [vmem:[%s18587_s0 + $0xc08] sm:$0xf]  ;;  %v1470_v53 = vld [vmem:[%s18587_s0 + $0xc10] sm:$0xf] }
 0x1aa   : > { %1467 = vst [vmem:[%s18592_s6 + $0x600] sm:$0xf] %v1466_v51  ;;  %1469 = vst [vmem:[%s18592_s6 + $0x604] sm:$0xf] %v1468_v52  ;;  %v1472_v54 = vld [vmem:[%s18587_s0 + $0xc18] sm:$0xf] }
 0x1ab   : > { %1471 = vst [vmem:[%s18592_s6 + $0x608] sm:$0xf] %v1470_v53  ;;  %v1474_v55 = vld [vmem:[%s18587_s0 + $0xc20] sm:$0xf]  ;;  %v1476_v56 = vld [vmem:[%s18587_s0 + $0xc28] sm:$0xf] }
 0x1ac   : > { %1473 = vst [vmem:[%s18592_s6 + $0x60c] sm:$0xf] %v1472_v54  ;;  %1475 = vst [vmem:[%s18592_s6 + $0x610] sm:$0xf] %v1474_v55  ;;  %v1478_v57 = vld [vmem:[%s18587_s0 + $0xc30] sm:$0xf] }
 0x1ad   : > { %1477 = vst [vmem:[%s18592_s6 + $0x614] sm:$0xf] %v1476_v56  ;;  %v1480_v58 = vld [vmem:[%s18587_s0 + $0xc38] sm:$0xf]  ;;  %v1482_v59 = vld [vmem:[%s18587_s0 + $0xc40] sm:$0xf] }
 0x1ae   : > { %1479 = vst [vmem:[%s18592_s6 + $0x618] sm:$0xf] %v1478_v57  ;;  %1481 = vst [vmem:[%s18592_s6 + $0x61c] sm:$0xf] %v1480_v58  ;;  %v1484_v60 = vld [vmem:[%s18587_s0 + $0xc48] sm:$0xf] }
 0x1af   : > { %1483 = vst [vmem:[%s18592_s6 + $0x620] sm:$0xf] %v1482_v59  ;;  %v1486_v61 = vld [vmem:[%s18587_s0 + $0xc50] sm:$0xf]  ;;  %v1488_v62 = vld [vmem:[%s18587_s0 + $0xc58] sm:$0xf] }
 0x1b0   : > { %1485 = vst [vmem:[%s18592_s6 + $0x624] sm:$0xf] %v1484_v60  ;;  %1487 = vst [vmem:[%s18592_s6 + $0x628] sm:$0xf] %v1486_v61  ;;  %v1490_v63 = vld [vmem:[%s18587_s0 + $0xc60] sm:$0xf] }
 0x1b1   : > { %1489 = vst [vmem:[%s18592_s6 + $0x62c] sm:$0xf] %v1488_v62  ;;  %v1492_v0 = vld [vmem:[%s18587_s0 + $0xc68] sm:$0xf]  ;;  %v1494_v1 = vld [vmem:[%s18587_s0 + $0xc70] sm:$0xf] }
 0x1b2   : > { %1491 = vst [vmem:[%s18592_s6 + $0x630] sm:$0xf] %v1490_v63  ;;  %1493 = vst [vmem:[%s18592_s6 + $0x634] sm:$0xf] %v1492_v0  ;;  %v1496_v2 = vld [vmem:[%s18587_s0 + $0xc78] sm:$0xf] }
 0x1b3   : > { %1495 = vst [vmem:[%s18592_s6 + $0x638] sm:$0xf] %v1494_v1  ;;  %v1498_v3 = vld [vmem:[%s18587_s0 + $0xc80] sm:$0xf]  ;;  %v1500_v4 = vld [vmem:[%s18587_s0 + $0xc88] sm:$0xf] }
 0x1b4   : > { %1497 = vst [vmem:[%s18592_s6 + $0x63c] sm:$0xf] %v1496_v2  ;;  %1499 = vst [vmem:[%s18592_s6 + $0x640] sm:$0xf] %v1498_v3  ;;  %v1502_v5 = vld [vmem:[%s18587_s0 + $0xc90] sm:$0xf] }
 0x1b5   : > { %1501 = vst [vmem:[%s18592_s6 + $0x644] sm:$0xf] %v1500_v4  ;;  %v1504_v6 = vld [vmem:[%s18587_s0 + $0xc98] sm:$0xf]  ;;  %v1506_v7 = vld [vmem:[%s18587_s0 + $0xca0] sm:$0xf] }
 0x1b6   : > { %1503 = vst [vmem:[%s18592_s6 + $0x648] sm:$0xf] %v1502_v5  ;;  %1505 = vst [vmem:[%s18592_s6 + $0x64c] sm:$0xf] %v1504_v6  ;;  %v1508_v8 = vld [vmem:[%s18587_s0 + $0xca8] sm:$0xf] }
 0x1b7   : > { %1507 = vst [vmem:[%s18592_s6 + $0x650] sm:$0xf] %v1506_v7  ;;  %v1510_v9 = vld [vmem:[%s18587_s0 + $0xcb0] sm:$0xf]  ;;  %v1512_v10 = vld [vmem:[%s18587_s0 + $0xcb8] sm:$0xf] }
 0x1b8   : > { %1509 = vst [vmem:[%s18592_s6 + $0x654] sm:$0xf] %v1508_v8  ;;  %1511 = vst [vmem:[%s18592_s6 + $0x658] sm:$0xf] %v1510_v9  ;;  %v1514_v11 = vld [vmem:[%s18587_s0 + $0xcc0] sm:$0xf] }
 0x1b9   : > { %1513 = vst [vmem:[%s18592_s6 + $0x65c] sm:$0xf] %v1512_v10  ;;  %v1516_v12 = vld [vmem:[%s18587_s0 + $0xcc8] sm:$0xf]  ;;  %v1518_v13 = vld [vmem:[%s18587_s0 + $0xcd0] sm:$0xf] }
 0x1ba   : > { %1515 = vst [vmem:[%s18592_s6 + $0x660] sm:$0xf] %v1514_v11  ;;  %1517 = vst [vmem:[%s18592_s6 + $0x664] sm:$0xf] %v1516_v12  ;;  %v1520_v14 = vld [vmem:[%s18587_s0 + $0xcd8] sm:$0xf] }
 0x1bb   : > { %1519 = vst [vmem:[%s18592_s6 + $0x668] sm:$0xf] %v1518_v13  ;;  %v1522_v15 = vld [vmem:[%s18587_s0 + $0xce0] sm:$0xf]  ;;  %v1524_v16 = vld [vmem:[%s18587_s0 + $0xce8] sm:$0xf] }
 0x1bc   : > { %1521 = vst [vmem:[%s18592_s6 + $0x66c] sm:$0xf] %v1520_v14  ;;  %1523 = vst [vmem:[%s18592_s6 + $0x670] sm:$0xf] %v1522_v15  ;;  %v1526_v17 = vld [vmem:[%s18587_s0 + $0xcf0] sm:$0xf] }
 0x1bd   : > { %1525 = vst [vmem:[%s18592_s6 + $0x674] sm:$0xf] %v1524_v16  ;;  %v1528_v18 = vld [vmem:[%s18587_s0 + $0xcf8] sm:$0xf]  ;;  %v1530_v19 = vld [vmem:[%s18587_s0 + $0xd00] sm:$0xf] }
 0x1be   : > { %1527 = vst [vmem:[%s18592_s6 + $0x678] sm:$0xf] %v1526_v17  ;;  %1529 = vst [vmem:[%s18592_s6 + $0x67c] sm:$0xf] %v1528_v18  ;;  %v1532_v20 = vld [vmem:[%s18587_s0 + $0xd08] sm:$0xf] }
 0x1bf   : > { %1531 = vst [vmem:[%s18592_s6 + $0x680] sm:$0xf] %v1530_v19  ;;  %v1534_v21 = vld [vmem:[%s18587_s0 + $0xd10] sm:$0xf]  ;;  %v1536_v22 = vld [vmem:[%s18587_s0 + $0xd18] sm:$0xf] }
 0x1c0   : > { %1533 = vst [vmem:[%s18592_s6 + $0x684] sm:$0xf] %v1532_v20  ;;  %1535 = vst [vmem:[%s18592_s6 + $0x688] sm:$0xf] %v1534_v21  ;;  %v1538_v23 = vld [vmem:[%s18587_s0 + $0xd20] sm:$0xf] }
 0x1c1   : > { %1537 = vst [vmem:[%s18592_s6 + $0x68c] sm:$0xf] %v1536_v22  ;;  %v1540_v24 = vld [vmem:[%s18587_s0 + $0xd28] sm:$0xf]  ;;  %v1542_v25 = vld [vmem:[%s18587_s0 + $0xd30] sm:$0xf] }
 0x1c2   : > { %1539 = vst [vmem:[%s18592_s6 + $0x690] sm:$0xf] %v1538_v23  ;;  %1541 = vst [vmem:[%s18592_s6 + $0x694] sm:$0xf] %v1540_v24  ;;  %v1544_v26 = vld [vmem:[%s18587_s0 + $0xd38] sm:$0xf] }
 0x1c3   : > { %1543 = vst [vmem:[%s18592_s6 + $0x698] sm:$0xf] %v1542_v25  ;;  %v1546_v27 = vld [vmem:[%s18587_s0 + $0xd40] sm:$0xf]  ;;  %v1548_v28 = vld [vmem:[%s18587_s0 + $0xd48] sm:$0xf] }
 0x1c4   : > { %1545 = vst [vmem:[%s18592_s6 + $0x69c] sm:$0xf] %v1544_v26  ;;  %1547 = vst [vmem:[%s18592_s6 + $0x6a0] sm:$0xf] %v1546_v27  ;;  %v1550_v29 = vld [vmem:[%s18587_s0 + $0xd50] sm:$0xf] }
 0x1c5   : > { %1549 = vst [vmem:[%s18592_s6 + $0x6a4] sm:$0xf] %v1548_v28  ;;  %v1552_v30 = vld [vmem:[%s18587_s0 + $0xd58] sm:$0xf]  ;;  %v1554_v31 = vld [vmem:[%s18587_s0 + $0xd60] sm:$0xf] }
 0x1c6   : > { %1551 = vst [vmem:[%s18592_s6 + $0x6a8] sm:$0xf] %v1550_v29  ;;  %1553 = vst [vmem:[%s18592_s6 + $0x6ac] sm:$0xf] %v1552_v30  ;;  %v1556_v32 = vld [vmem:[%s18587_s0 + $0xd68] sm:$0xf] }
 0x1c7   : > { %1555 = vst [vmem:[%s18592_s6 + $0x6b0] sm:$0xf] %v1554_v31  ;;  %v1558_v33 = vld [vmem:[%s18587_s0 + $0xd70] sm:$0xf]  ;;  %v1560_v34 = vld [vmem:[%s18587_s0 + $0xd78] sm:$0xf] }
 0x1c8   : > { %1557 = vst [vmem:[%s18592_s6 + $0x6b4] sm:$0xf] %v1556_v32  ;;  %1559 = vst [vmem:[%s18592_s6 + $0x6b8] sm:$0xf] %v1558_v33  ;;  %v1562_v35 = vld [vmem:[%s18587_s0 + $0xd80] sm:$0xf] }
 0x1c9   : > { %1561 = vst [vmem:[%s18592_s6 + $0x6bc] sm:$0xf] %v1560_v34  ;;  %v1564_v36 = vld [vmem:[%s18587_s0 + $0xd88] sm:$0xf]  ;;  %v1566_v37 = vld [vmem:[%s18587_s0 + $0xd90] sm:$0xf] }
 0x1ca   : > { %1563 = vst [vmem:[%s18592_s6 + $0x6c0] sm:$0xf] %v1562_v35  ;;  %1565 = vst [vmem:[%s18592_s6 + $0x6c4] sm:$0xf] %v1564_v36  ;;  %v1568_v38 = vld [vmem:[%s18587_s0 + $0xd98] sm:$0xf] }
 0x1cb   : > { %1567 = vst [vmem:[%s18592_s6 + $0x6c8] sm:$0xf] %v1566_v37  ;;  %v1570_v39 = vld [vmem:[%s18587_s0 + $0xda0] sm:$0xf]  ;;  %v1572_v40 = vld [vmem:[%s18587_s0 + $0xda8] sm:$0xf] }
 0x1cc   : > { %1569 = vst [vmem:[%s18592_s6 + $0x6cc] sm:$0xf] %v1568_v38  ;;  %1571 = vst [vmem:[%s18592_s6 + $0x6d0] sm:$0xf] %v1570_v39  ;;  %v1574_v41 = vld [vmem:[%s18587_s0 + $0xdb0] sm:$0xf] }
 0x1cd   : > { %1573 = vst [vmem:[%s18592_s6 + $0x6d4] sm:$0xf] %v1572_v40  ;;  %v1576_v42 = vld [vmem:[%s18587_s0 + $0xdb8] sm:$0xf]  ;;  %v1578_v43 = vld [vmem:[%s18587_s0 + $0xdc0] sm:$0xf] }
 0x1ce   : > { %1575 = vst [vmem:[%s18592_s6 + $0x6d8] sm:$0xf] %v1574_v41  ;;  %1577 = vst [vmem:[%s18592_s6 + $0x6dc] sm:$0xf] %v1576_v42  ;;  %v1580_v44 = vld [vmem:[%s18587_s0 + $0xdc8] sm:$0xf] }
 0x1cf   : > { %1579 = vst [vmem:[%s18592_s6 + $0x6e0] sm:$0xf] %v1578_v43  ;;  %v1582_v45 = vld [vmem:[%s18587_s0 + $0xdd0] sm:$0xf]  ;;  %v1584_v46 = vld [vmem:[%s18587_s0 + $0xdd8] sm:$0xf] }
 0x1d0   : > { %1581 = vst [vmem:[%s18592_s6 + $0x6e4] sm:$0xf] %v1580_v44  ;;  %1583 = vst [vmem:[%s18592_s6 + $0x6e8] sm:$0xf] %v1582_v45  ;;  %v1586_v47 = vld [vmem:[%s18587_s0 + $0xde0] sm:$0xf] }
 0x1d1   : > { %1585 = vst [vmem:[%s18592_s6 + $0x6ec] sm:$0xf] %v1584_v46  ;;  %v1588_v48 = vld [vmem:[%s18587_s0 + $0xde8] sm:$0xf]  ;;  %v1590_v49 = vld [vmem:[%s18587_s0 + $0xdf0] sm:$0xf] }
 0x1d2   : > { %1587 = vst [vmem:[%s18592_s6 + $0x6f0] sm:$0xf] %v1586_v47  ;;  %1589 = vst [vmem:[%s18592_s6 + $0x6f4] sm:$0xf] %v1588_v48  ;;  %v1592_v50 = vld [vmem:[%s18587_s0 + $0xdf8] sm:$0xf] }
 0x1d3   : > { %1591 = vst [vmem:[%s18592_s6 + $0x6f8] sm:$0xf] %v1590_v49  ;;  %v1594_v51 = vld [vmem:[%s18587_s0 + $0xe00] sm:$0xf]  ;;  %v1596_v52 = vld [vmem:[%s18587_s0 + $0xe08] sm:$0xf] }
 0x1d4   : > { %1593 = vst [vmem:[%s18592_s6 + $0x6fc] sm:$0xf] %v1592_v50  ;;  %1595 = vst [vmem:[%s18592_s6 + $0x700] sm:$0xf] %v1594_v51  ;;  %v1598_v53 = vld [vmem:[%s18587_s0 + $0xe10] sm:$0xf] }
 0x1d5   : > { %1597 = vst [vmem:[%s18592_s6 + $0x704] sm:$0xf] %v1596_v52  ;;  %v1600_v54 = vld [vmem:[%s18587_s0 + $0xe18] sm:$0xf]  ;;  %v1602_v55 = vld [vmem:[%s18587_s0 + $0xe20] sm:$0xf] }
 0x1d6   : > { %1599 = vst [vmem:[%s18592_s6 + $0x708] sm:$0xf] %v1598_v53  ;;  %1601 = vst [vmem:[%s18592_s6 + $0x70c] sm:$0xf] %v1600_v54  ;;  %v1604_v56 = vld [vmem:[%s18587_s0 + $0xe28] sm:$0xf] }
 0x1d7   : > { %1603 = vst [vmem:[%s18592_s6 + $0x710] sm:$0xf] %v1602_v55  ;;  %v1606_v57 = vld [vmem:[%s18587_s0 + $0xe30] sm:$0xf]  ;;  %v1608_v58 = vld [vmem:[%s18587_s0 + $0xe38] sm:$0xf] }
 0x1d8   : > { %1605 = vst [vmem:[%s18592_s6 + $0x714] sm:$0xf] %v1604_v56  ;;  %1607 = vst [vmem:[%s18592_s6 + $0x718] sm:$0xf] %v1606_v57  ;;  %v1610_v59 = vld [vmem:[%s18587_s0 + $0xe40] sm:$0xf] }
 0x1d9   : > { %1609 = vst [vmem:[%s18592_s6 + $0x71c] sm:$0xf] %v1608_v58  ;;  %v1612_v60 = vld [vmem:[%s18587_s0 + $0xe48] sm:$0xf]  ;;  %v1614_v61 = vld [vmem:[%s18587_s0 + $0xe50] sm:$0xf] }
 0x1da   : > { %1611 = vst [vmem:[%s18592_s6 + $0x720] sm:$0xf] %v1610_v59  ;;  %1613 = vst [vmem:[%s18592_s6 + $0x724] sm:$0xf] %v1612_v60  ;;  %v1616_v62 = vld [vmem:[%s18587_s0 + $0xe58] sm:$0xf] }
 0x1db   : > { %1615 = vst [vmem:[%s18592_s6 + $0x728] sm:$0xf] %v1614_v61  ;;  %v1618_v63 = vld [vmem:[%s18587_s0 + $0xe60] sm:$0xf]  ;;  %v1620_v0 = vld [vmem:[%s18587_s0 + $0xe68] sm:$0xf] }
 0x1dc   : > { %1617 = vst [vmem:[%s18592_s6 + $0x72c] sm:$0xf] %v1616_v62  ;;  %1619 = vst [vmem:[%s18592_s6 + $0x730] sm:$0xf] %v1618_v63  ;;  %v1622_v1 = vld [vmem:[%s18587_s0 + $0xe70] sm:$0xf] }
 0x1dd   : > { %1621 = vst [vmem:[%s18592_s6 + $0x734] sm:$0xf] %v1620_v0  ;;  %v1624_v2 = vld [vmem:[%s18587_s0 + $0xe78] sm:$0xf]  ;;  %v1626_v3 = vld [vmem:[%s18587_s0 + $0xe80] sm:$0xf] }
 0x1de   : > { %1623 = vst [vmem:[%s18592_s6 + $0x738] sm:$0xf] %v1622_v1  ;;  %1625 = vst [vmem:[%s18592_s6 + $0x73c] sm:$0xf] %v1624_v2  ;;  %v1628_v4 = vld [vmem:[%s18587_s0 + $0xe88] sm:$0xf] }
 0x1df   : > { %1627 = vst [vmem:[%s18592_s6 + $0x740] sm:$0xf] %v1626_v3  ;;  %v1630_v5 = vld [vmem:[%s18587_s0 + $0xe90] sm:$0xf]  ;;  %v1632_v6 = vld [vmem:[%s18587_s0 + $0xe98] sm:$0xf] }
 0x1e0   : > { %1629 = vst [vmem:[%s18592_s6 + $0x744] sm:$0xf] %v1628_v4  ;;  %1631 = vst [vmem:[%s18592_s6 + $0x748] sm:$0xf] %v1630_v5  ;;  %v1634_v7 = vld [vmem:[%s18587_s0 + $0xea0] sm:$0xf] }
 0x1e1   : > { %1633 = vst [vmem:[%s18592_s6 + $0x74c] sm:$0xf] %v1632_v6  ;;  %v1636_v8 = vld [vmem:[%s18587_s0 + $0xea8] sm:$0xf]  ;;  %v1638_v9 = vld [vmem:[%s18587_s0 + $0xeb0] sm:$0xf] }
 0x1e2   : > { %1635 = vst [vmem:[%s18592_s6 + $0x750] sm:$0xf] %v1634_v7  ;;  %1637 = vst [vmem:[%s18592_s6 + $0x754] sm:$0xf] %v1636_v8  ;;  %v1640_v10 = vld [vmem:[%s18587_s0 + $0xeb8] sm:$0xf] }
 0x1e3   : > { %1639 = vst [vmem:[%s18592_s6 + $0x758] sm:$0xf] %v1638_v9  ;;  %v1642_v11 = vld [vmem:[%s18587_s0 + $0xec0] sm:$0xf]  ;;  %v1644_v12 = vld [vmem:[%s18587_s0 + $0xec8] sm:$0xf] }
 0x1e4   : > { %1641 = vst [vmem:[%s18592_s6 + $0x75c] sm:$0xf] %v1640_v10  ;;  %1643 = vst [vmem:[%s18592_s6 + $0x760] sm:$0xf] %v1642_v11  ;;  %v1646_v13 = vld [vmem:[%s18587_s0 + $0xed0] sm:$0xf] }
 0x1e5   : > { %1645 = vst [vmem:[%s18592_s6 + $0x764] sm:$0xf] %v1644_v12  ;;  %v1648_v14 = vld [vmem:[%s18587_s0 + $0xed8] sm:$0xf]  ;;  %v1650_v15 = vld [vmem:[%s18587_s0 + $0xee0] sm:$0xf] }
 0x1e6   : > { %1647 = vst [vmem:[%s18592_s6 + $0x768] sm:$0xf] %v1646_v13  ;;  %1649 = vst [vmem:[%s18592_s6 + $0x76c] sm:$0xf] %v1648_v14  ;;  %v1652_v16 = vld [vmem:[%s18587_s0 + $0xee8] sm:$0xf] }
 0x1e7   : > { %1651 = vst [vmem:[%s18592_s6 + $0x770] sm:$0xf] %v1650_v15  ;;  %v1654_v17 = vld [vmem:[%s18587_s0 + $0xef0] sm:$0xf]  ;;  %v1656_v18 = vld [vmem:[%s18587_s0 + $0xef8] sm:$0xf] }
 0x1e8   : > { %1653 = vst [vmem:[%s18592_s6 + $0x774] sm:$0xf] %v1652_v16  ;;  %1655 = vst [vmem:[%s18592_s6 + $0x778] sm:$0xf] %v1654_v17  ;;  %v1658_v19 = vld [vmem:[%s18587_s0 + $0xf00] sm:$0xf] }
 0x1e9   : > { %1657 = vst [vmem:[%s18592_s6 + $0x77c] sm:$0xf] %v1656_v18  ;;  %v1660_v20 = vld [vmem:[%s18587_s0 + $0xf08] sm:$0xf]  ;;  %v1662_v21 = vld [vmem:[%s18587_s0 + $0xf10] sm:$0xf] }
 0x1ea   : > { %1659 = vst [vmem:[%s18592_s6 + $0x780] sm:$0xf] %v1658_v19  ;;  %1661 = vst [vmem:[%s18592_s6 + $0x784] sm:$0xf] %v1660_v20  ;;  %v1664_v22 = vld [vmem:[%s18587_s0 + $0xf18] sm:$0xf] }
 0x1eb   : > { %1663 = vst [vmem:[%s18592_s6 + $0x788] sm:$0xf] %v1662_v21  ;;  %v1666_v23 = vld [vmem:[%s18587_s0 + $0xf20] sm:$0xf]  ;;  %v1668_v24 = vld [vmem:[%s18587_s0 + $0xf28] sm:$0xf] }
 0x1ec   : > { %1665 = vst [vmem:[%s18592_s6 + $0x78c] sm:$0xf] %v1664_v22  ;;  %1667 = vst [vmem:[%s18592_s6 + $0x790] sm:$0xf] %v1666_v23  ;;  %v1670_v25 = vld [vmem:[%s18587_s0 + $0xf30] sm:$0xf] }
 0x1ed   : > { %1669 = vst [vmem:[%s18592_s6 + $0x794] sm:$0xf] %v1668_v24  ;;  %v1672_v26 = vld [vmem:[%s18587_s0 + $0xf38] sm:$0xf]  ;;  %v1674_v27 = vld [vmem:[%s18587_s0 + $0xf40] sm:$0xf] }
 0x1ee   : > { %1671 = vst [vmem:[%s18592_s6 + $0x798] sm:$0xf] %v1670_v25  ;;  %1673 = vst [vmem:[%s18592_s6 + $0x79c] sm:$0xf] %v1672_v26  ;;  %v1676_v28 = vld [vmem:[%s18587_s0 + $0xf48] sm:$0xf] }
 0x1ef   : > { %1675 = vst [vmem:[%s18592_s6 + $0x7a0] sm:$0xf] %v1674_v27  ;;  %v1678_v29 = vld [vmem:[%s18587_s0 + $0xf50] sm:$0xf]  ;;  %v1680_v30 = vld [vmem:[%s18587_s0 + $0xf58] sm:$0xf] }
 0x1f0   : > { %1677 = vst [vmem:[%s18592_s6 + $0x7a4] sm:$0xf] %v1676_v28  ;;  %1679 = vst [vmem:[%s18592_s6 + $0x7a8] sm:$0xf] %v1678_v29  ;;  %v1682_v31 = vld [vmem:[%s18587_s0 + $0xf60] sm:$0xf] }
 0x1f1   : > { %1681 = vst [vmem:[%s18592_s6 + $0x7ac] sm:$0xf] %v1680_v30  ;;  %v1684_v32 = vld [vmem:[%s18587_s0 + $0xf68] sm:$0xf]  ;;  %v1686_v33 = vld [vmem:[%s18587_s0 + $0xf70] sm:$0xf] }
 0x1f2   : > { %1683 = vst [vmem:[%s18592_s6 + $0x7b0] sm:$0xf] %v1682_v31  ;;  %1685 = vst [vmem:[%s18592_s6 + $0x7b4] sm:$0xf] %v1684_v32  ;;  %v1688_v34 = vld [vmem:[%s18587_s0 + $0xf78] sm:$0xf] }
 0x1f3   : > { %1687 = vst [vmem:[%s18592_s6 + $0x7b8] sm:$0xf] %v1686_v33  ;;  %v1690_v35 = vld [vmem:[%s18587_s0 + $0xf80] sm:$0xf]  ;;  %v1692_v36 = vld [vmem:[%s18587_s0 + $0xf88] sm:$0xf] }
 0x1f4   : > { %1689 = vst [vmem:[%s18592_s6 + $0x7bc] sm:$0xf] %v1688_v34  ;;  %1691 = vst [vmem:[%s18592_s6 + $0x7c0] sm:$0xf] %v1690_v35  ;;  %v1694_v37 = vld [vmem:[%s18587_s0 + $0xf90] sm:$0xf] }
 0x1f5   : > { %1693 = vst [vmem:[%s18592_s6 + $0x7c4] sm:$0xf] %v1692_v36  ;;  %v1696_v38 = vld [vmem:[%s18587_s0 + $0xf98] sm:$0xf]  ;;  %v1698_v39 = vld [vmem:[%s18587_s0 + $0xfa0] sm:$0xf] }
 0x1f6   : > { %1695 = vst [vmem:[%s18592_s6 + $0x7c8] sm:$0xf] %v1694_v37  ;;  %1697 = vst [vmem:[%s18592_s6 + $0x7cc] sm:$0xf] %v1696_v38  ;;  %v1700_v40 = vld [vmem:[%s18587_s0 + $0xfa8] sm:$0xf] }
 0x1f7   : > { %1699 = vst [vmem:[%s18592_s6 + $0x7d0] sm:$0xf] %v1698_v39  ;;  %v1702_v41 = vld [vmem:[%s18587_s0 + $0xfb0] sm:$0xf]  ;;  %v1704_v42 = vld [vmem:[%s18587_s0 + $0xfb8] sm:$0xf] }
 0x1f8   : > { %1701 = vst [vmem:[%s18592_s6 + $0x7d4] sm:$0xf] %v1700_v40  ;;  %1703 = vst [vmem:[%s18592_s6 + $0x7d8] sm:$0xf] %v1702_v41  ;;  %v1706_v43 = vld [vmem:[%s18587_s0 + $0xfc0] sm:$0xf] }
 0x1f9   : > { %1705 = vst [vmem:[%s18592_s6 + $0x7dc] sm:$0xf] %v1704_v42  ;;  %v1708_v44 = vld [vmem:[%s18587_s0 + $0xfc8] sm:$0xf]  ;;  %v1710_v45 = vld [vmem:[%s18587_s0 + $0xfd0] sm:$0xf] }
 0x1fa   : > { %1707 = vst [vmem:[%s18592_s6 + $0x7e0] sm:$0xf] %v1706_v43  ;;  %1709 = vst [vmem:[%s18592_s6 + $0x7e4] sm:$0xf] %v1708_v44  ;;  %v1712_v46 = vld [vmem:[%s18587_s0 + $0xfd8] sm:$0xf] }
 0x1fb   : > { %1711 = vst [vmem:[%s18592_s6 + $0x7e8] sm:$0xf] %v1710_v45  ;;  %v1714_v47 = vld [vmem:[%s18587_s0 + $0xfe0] sm:$0xf]  ;;  %v1716_v48 = vld [vmem:[%s18587_s0 + $0xfe8] sm:$0xf] }
 0x1fc   : > { %1713 = vst [vmem:[%s18592_s6 + $0x7ec] sm:$0xf] %v1712_v46  ;;  %1715 = vst [vmem:[%s18592_s6 + $0x7f0] sm:$0xf] %v1714_v47  ;;  %v1718_v49 = vld [vmem:[%s18587_s0 + $0xff0] sm:$0xf] }
 0x1fd   : > { %1717 = vst [vmem:[%s18592_s6 + $0x7f4] sm:$0xf] %v1716_v48  ;;  %v1720_v50 = vld [vmem:[%s18587_s0 + $0xff8] sm:$0xf]  ;;  %v1722_v51 = vld [vmem:[%s18587_s0 + $0x1000] sm:$0xf] }
 0x1fe   : > { %1719 = vst [vmem:[%s18592_s6 + $0x7f8] sm:$0xf] %v1718_v49  ;;  %1721 = vst [vmem:[%s18592_s6 + $0x7fc] sm:$0xf] %v1720_v50  ;;  %v1724_v52 = vld [vmem:[%s18587_s0 + $0x1008] sm:$0xf] }
 0x1ff   : > { %1723 = vst [vmem:[%s18592_s6 + $0x800] sm:$0xf] %v1722_v51  ;;  %v1726_v53 = vld [vmem:[%s18587_s0 + $0x1010] sm:$0xf]  ;;  %v1728_v54 = vld [vmem:[%s18587_s0 + $0x1018] sm:$0xf] }
 0x200   : > { %1725 = vst [vmem:[%s18592_s6 + $0x804] sm:$0xf] %v1724_v52  ;;  %1727 = vst [vmem:[%s18592_s6 + $0x808] sm:$0xf] %v1726_v53  ;;  %v1730_v55 = vld [vmem:[%s18587_s0 + $0x1020] sm:$0xf] }
 0x201   : > { %1729 = vst [vmem:[%s18592_s6 + $0x80c] sm:$0xf] %v1728_v54  ;;  %v1732_v56 = vld [vmem:[%s18587_s0 + $0x1028] sm:$0xf]  ;;  %v1734_v57 = vld [vmem:[%s18587_s0 + $0x1030] sm:$0xf] }
 0x202   : > { %1731 = vst [vmem:[%s18592_s6 + $0x810] sm:$0xf] %v1730_v55  ;;  %1733 = vst [vmem:[%s18592_s6 + $0x814] sm:$0xf] %v1732_v56  ;;  %v1736_v58 = vld [vmem:[%s18587_s0 + $0x1038] sm:$0xf] }
 0x203   : > { %1735 = vst [vmem:[%s18592_s6 + $0x818] sm:$0xf] %v1734_v57  ;;  %v1738_v59 = vld [vmem:[%s18587_s0 + $0x1040] sm:$0xf]  ;;  %v1740_v60 = vld [vmem:[%s18587_s0 + $0x1048] sm:$0xf] }
 0x204   : > { %1737 = vst [vmem:[%s18592_s6 + $0x81c] sm:$0xf] %v1736_v58  ;;  %1739 = vst [vmem:[%s18592_s6 + $0x820] sm:$0xf] %v1738_v59  ;;  %v1742_v61 = vld [vmem:[%s18587_s0 + $0x1050] sm:$0xf] }
 0x205   : > { %1741 = vst [vmem:[%s18592_s6 + $0x824] sm:$0xf] %v1740_v60  ;;  %v1744_v62 = vld [vmem:[%s18587_s0 + $0x1058] sm:$0xf]  ;;  %v1746_v63 = vld [vmem:[%s18587_s0 + $0x1060] sm:$0xf] }
 0x206   : > { %1743 = vst [vmem:[%s18592_s6 + $0x828] sm:$0xf] %v1742_v61  ;;  %1745 = vst [vmem:[%s18592_s6 + $0x82c] sm:$0xf] %v1744_v62  ;;  %v1748_v0 = vld [vmem:[%s18587_s0 + $0x1068] sm:$0xf] }
 0x207   : > { %1747 = vst [vmem:[%s18592_s6 + $0x830] sm:$0xf] %v1746_v63  ;;  %v1750_v1 = vld [vmem:[%s18587_s0 + $0x1070] sm:$0xf]  ;;  %v1752_v2 = vld [vmem:[%s18587_s0 + $0x1078] sm:$0xf] }
 0x208   : > { %1749 = vst [vmem:[%s18592_s6 + $0x834] sm:$0xf] %v1748_v0  ;;  %1751 = vst [vmem:[%s18592_s6 + $0x838] sm:$0xf] %v1750_v1  ;;  %v1754_v3 = vld [vmem:[%s18587_s0 + $0x1080] sm:$0xf] }
 0x209   : > { %1753 = vst [vmem:[%s18592_s6 + $0x83c] sm:$0xf] %v1752_v2  ;;  %v1756_v4 = vld [vmem:[%s18587_s0 + $0x1088] sm:$0xf]  ;;  %v1758_v5 = vld [vmem:[%s18587_s0 + $0x1090] sm:$0xf] }
 0x20a   : > { %1755 = vst [vmem:[%s18592_s6 + $0x840] sm:$0xf] %v1754_v3  ;;  %1757 = vst [vmem:[%s18592_s6 + $0x844] sm:$0xf] %v1756_v4  ;;  %v1760_v6 = vld [vmem:[%s18587_s0 + $0x1098] sm:$0xf] }
 0x20b   : > { %1759 = vst [vmem:[%s18592_s6 + $0x848] sm:$0xf] %v1758_v5  ;;  %v1762_v7 = vld [vmem:[%s18587_s0 + $0x10a0] sm:$0xf]  ;;  %v1764_v8 = vld [vmem:[%s18587_s0 + $0x10a8] sm:$0xf] }
 0x20c   : > { %1761 = vst [vmem:[%s18592_s6 + $0x84c] sm:$0xf] %v1760_v6  ;;  %1763 = vst [vmem:[%s18592_s6 + $0x850] sm:$0xf] %v1762_v7  ;;  %v1766_v9 = vld [vmem:[%s18587_s0 + $0x10b0] sm:$0xf] }
 0x20d   : > { %1765 = vst [vmem:[%s18592_s6 + $0x854] sm:$0xf] %v1764_v8  ;;  %v1768_v10 = vld [vmem:[%s18587_s0 + $0x10b8] sm:$0xf]  ;;  %v1770_v11 = vld [vmem:[%s18587_s0 + $0x10c0] sm:$0xf] }
 0x20e   : > { %1767 = vst [vmem:[%s18592_s6 + $0x858] sm:$0xf] %v1766_v9  ;;  %1769 = vst [vmem:[%s18592_s6 + $0x85c] sm:$0xf] %v1768_v10  ;;  %v1772_v12 = vld [vmem:[%s18587_s0 + $0x10c8] sm:$0xf] }
 0x20f   : > { %1771 = vst [vmem:[%s18592_s6 + $0x860] sm:$0xf] %v1770_v11  ;;  %v1774_v13 = vld [vmem:[%s18587_s0 + $0x10d0] sm:$0xf]  ;;  %v1776_v14 = vld [vmem:[%s18587_s0 + $0x10d8] sm:$0xf] }
 0x210   : > { %1773 = vst [vmem:[%s18592_s6 + $0x864] sm:$0xf] %v1772_v12  ;;  %1775 = vst [vmem:[%s18592_s6 + $0x868] sm:$0xf] %v1774_v13  ;;  %v1778_v15 = vld [vmem:[%s18587_s0 + $0x10e0] sm:$0xf] }
 0x211   : > { %1777 = vst [vmem:[%s18592_s6 + $0x86c] sm:$0xf] %v1776_v14  ;;  %v1780_v16 = vld [vmem:[%s18587_s0 + $0x10e8] sm:$0xf]  ;;  %v1782_v17 = vld [vmem:[%s18587_s0 + $0x10f0] sm:$0xf] }
 0x212   : > { %1779 = vst [vmem:[%s18592_s6 + $0x870] sm:$0xf] %v1778_v15  ;;  %1781 = vst [vmem:[%s18592_s6 + $0x874] sm:$0xf] %v1780_v16  ;;  %v1784_v18 = vld [vmem:[%s18587_s0 + $0x10f8] sm:$0xf] }
 0x213   : > { %1783 = vst [vmem:[%s18592_s6 + $0x878] sm:$0xf] %v1782_v17  ;;  %v1786_v19 = vld [vmem:[%s18587_s0 + $0x1100] sm:$0xf]  ;;  %v1788_v20 = vld [vmem:[%s18587_s0 + $0x1108] sm:$0xf] }
 0x214   : > { %1785 = vst [vmem:[%s18592_s6 + $0x87c] sm:$0xf] %v1784_v18  ;;  %1787 = vst [vmem:[%s18592_s6 + $0x880] sm:$0xf] %v1786_v19  ;;  %v1790_v21 = vld [vmem:[%s18587_s0 + $0x1110] sm:$0xf] }
 0x215   : > { %1789 = vst [vmem:[%s18592_s6 + $0x884] sm:$0xf] %v1788_v20  ;;  %v1792_v22 = vld [vmem:[%s18587_s0 + $0x1118] sm:$0xf]  ;;  %v1794_v23 = vld [vmem:[%s18587_s0 + $0x1120] sm:$0xf] }
 0x216   : > { %1791 = vst [vmem:[%s18592_s6 + $0x888] sm:$0xf] %v1790_v21  ;;  %1793 = vst [vmem:[%s18592_s6 + $0x88c] sm:$0xf] %v1792_v22  ;;  %v1796_v24 = vld [vmem:[%s18587_s0 + $0x1128] sm:$0xf] }
 0x217   : > { %1795 = vst [vmem:[%s18592_s6 + $0x890] sm:$0xf] %v1794_v23  ;;  %v1798_v25 = vld [vmem:[%s18587_s0 + $0x1130] sm:$0xf]  ;;  %v1800_v26 = vld [vmem:[%s18587_s0 + $0x1138] sm:$0xf] }
 0x218   : > { %1797 = vst [vmem:[%s18592_s6 + $0x894] sm:$0xf] %v1796_v24  ;;  %1799 = vst [vmem:[%s18592_s6 + $0x898] sm:$0xf] %v1798_v25  ;;  %v1802_v27 = vld [vmem:[%s18587_s0 + $0x1140] sm:$0xf] }
 0x219   : > { %1801 = vst [vmem:[%s18592_s6 + $0x89c] sm:$0xf] %v1800_v26  ;;  %v1804_v28 = vld [vmem:[%s18587_s0 + $0x1148] sm:$0xf]  ;;  %v1806_v29 = vld [vmem:[%s18587_s0 + $0x1150] sm:$0xf] }
 0x21a   : > { %1803 = vst [vmem:[%s18592_s6 + $0x8a0] sm:$0xf] %v1802_v27  ;;  %1805 = vst [vmem:[%s18592_s6 + $0x8a4] sm:$0xf] %v1804_v28  ;;  %v1808_v30 = vld [vmem:[%s18587_s0 + $0x1158] sm:$0xf] }
 0x21b   : > { %1807 = vst [vmem:[%s18592_s6 + $0x8a8] sm:$0xf] %v1806_v29  ;;  %v1810_v31 = vld [vmem:[%s18587_s0 + $0x1160] sm:$0xf]  ;;  %v1812_v32 = vld [vmem:[%s18587_s0 + $0x1168] sm:$0xf] }
 0x21c   : > { %1809 = vst [vmem:[%s18592_s6 + $0x8ac] sm:$0xf] %v1808_v30  ;;  %1811 = vst [vmem:[%s18592_s6 + $0x8b0] sm:$0xf] %v1810_v31  ;;  %v1814_v33 = vld [vmem:[%s18587_s0 + $0x1170] sm:$0xf] }
 0x21d   : > { %1813 = vst [vmem:[%s18592_s6 + $0x8b4] sm:$0xf] %v1812_v32  ;;  %v1816_v34 = vld [vmem:[%s18587_s0 + $0x1178] sm:$0xf]  ;;  %v1818_v35 = vld [vmem:[%s18587_s0 + $0x1180] sm:$0xf] }
 0x21e   : > { %1815 = vst [vmem:[%s18592_s6 + $0x8b8] sm:$0xf] %v1814_v33  ;;  %1817 = vst [vmem:[%s18592_s6 + $0x8bc] sm:$0xf] %v1816_v34  ;;  %v1820_v36 = vld [vmem:[%s18587_s0 + $0x1188] sm:$0xf] }
 0x21f   : > { %1819 = vst [vmem:[%s18592_s6 + $0x8c0] sm:$0xf] %v1818_v35  ;;  %v1822_v37 = vld [vmem:[%s18587_s0 + $0x1190] sm:$0xf]  ;;  %v1824_v38 = vld [vmem:[%s18587_s0 + $0x1198] sm:$0xf] }
 0x220   : > { %1821 = vst [vmem:[%s18592_s6 + $0x8c4] sm:$0xf] %v1820_v36  ;;  %1823 = vst [vmem:[%s18592_s6 + $0x8c8] sm:$0xf] %v1822_v37  ;;  %v1826_v39 = vld [vmem:[%s18587_s0 + $0x11a0] sm:$0xf] }
 0x221   : > { %1825 = vst [vmem:[%s18592_s6 + $0x8cc] sm:$0xf] %v1824_v38  ;;  %v1828_v40 = vld [vmem:[%s18587_s0 + $0x11a8] sm:$0xf]  ;;  %v1830_v41 = vld [vmem:[%s18587_s0 + $0x11b0] sm:$0xf] }
 0x222   : > { %1827 = vst [vmem:[%s18592_s6 + $0x8d0] sm:$0xf] %v1826_v39  ;;  %1829 = vst [vmem:[%s18592_s6 + $0x8d4] sm:$0xf] %v1828_v40  ;;  %v1832_v42 = vld [vmem:[%s18587_s0 + $0x11b8] sm:$0xf] }
 0x223   : > { %1831 = vst [vmem:[%s18592_s6 + $0x8d8] sm:$0xf] %v1830_v41  ;;  %v1834_v43 = vld [vmem:[%s18587_s0 + $0x11c0] sm:$0xf]  ;;  %v1836_v44 = vld [vmem:[%s18587_s0 + $0x11c8] sm:$0xf] }
 0x224   : > { %1833 = vst [vmem:[%s18592_s6 + $0x8dc] sm:$0xf] %v1832_v42  ;;  %1835 = vst [vmem:[%s18592_s6 + $0x8e0] sm:$0xf] %v1834_v43  ;;  %v1838_v45 = vld [vmem:[%s18587_s0 + $0x11d0] sm:$0xf] }
 0x225   : > { %1837 = vst [vmem:[%s18592_s6 + $0x8e4] sm:$0xf] %v1836_v44  ;;  %v1840_v46 = vld [vmem:[%s18587_s0 + $0x11d8] sm:$0xf]  ;;  %v1842_v47 = vld [vmem:[%s18587_s0 + $0x11e0] sm:$0xf] }
 0x226   : > { %1839 = vst [vmem:[%s18592_s6 + $0x8e8] sm:$0xf] %v1838_v45  ;;  %1841 = vst [vmem:[%s18592_s6 + $0x8ec] sm:$0xf] %v1840_v46  ;;  %v1844_v48 = vld [vmem:[%s18587_s0 + $0x11e8] sm:$0xf] }
 0x227   : > { %1843 = vst [vmem:[%s18592_s6 + $0x8f0] sm:$0xf] %v1842_v47  ;;  %v1846_v49 = vld [vmem:[%s18587_s0 + $0x11f0] sm:$0xf]  ;;  %v1848_v50 = vld [vmem:[%s18587_s0 + $0x11f8] sm:$0xf] }
 0x228   : > { %1845 = vst [vmem:[%s18592_s6 + $0x8f4] sm:$0xf] %v1844_v48  ;;  %1847 = vst [vmem:[%s18592_s6 + $0x8f8] sm:$0xf] %v1846_v49  ;;  %v1850_v51 = vld [vmem:[%s18587_s0 + $0x1200] sm:$0xf] }
 0x229   : > { %1849 = vst [vmem:[%s18592_s6 + $0x8fc] sm:$0xf] %v1848_v50  ;;  %v1852_v52 = vld [vmem:[%s18587_s0 + $0x1208] sm:$0xf]  ;;  %v1854_v53 = vld [vmem:[%s18587_s0 + $0x1210] sm:$0xf] }
 0x22a   : > { %1851 = vst [vmem:[%s18592_s6 + $0x900] sm:$0xf] %v1850_v51  ;;  %1853 = vst [vmem:[%s18592_s6 + $0x904] sm:$0xf] %v1852_v52  ;;  %v1856_v54 = vld [vmem:[%s18587_s0 + $0x1218] sm:$0xf] }
 0x22b   : > { %1855 = vst [vmem:[%s18592_s6 + $0x908] sm:$0xf] %v1854_v53  ;;  %v1858_v55 = vld [vmem:[%s18587_s0 + $0x1220] sm:$0xf]  ;;  %v1860_v56 = vld [vmem:[%s18587_s0 + $0x1228] sm:$0xf] }
 0x22c   : > { %1857 = vst [vmem:[%s18592_s6 + $0x90c] sm:$0xf] %v1856_v54  ;;  %1859 = vst [vmem:[%s18592_s6 + $0x910] sm:$0xf] %v1858_v55  ;;  %v1862_v57 = vld [vmem:[%s18587_s0 + $0x1230] sm:$0xf] }
 0x22d   : > { %1861 = vst [vmem:[%s18592_s6 + $0x914] sm:$0xf] %v1860_v56  ;;  %v1864_v58 = vld [vmem:[%s18587_s0 + $0x1238] sm:$0xf]  ;;  %v1866_v59 = vld [vmem:[%s18587_s0 + $0x1240] sm:$0xf] }
 0x22e   : > { %1863 = vst [vmem:[%s18592_s6 + $0x918] sm:$0xf] %v1862_v57  ;;  %1865 = vst [vmem:[%s18592_s6 + $0x91c] sm:$0xf] %v1864_v58  ;;  %v1868_v60 = vld [vmem:[%s18587_s0 + $0x1248] sm:$0xf] }
 0x22f   : > { %1867 = vst [vmem:[%s18592_s6 + $0x920] sm:$0xf] %v1866_v59  ;;  %v1870_v61 = vld [vmem:[%s18587_s0 + $0x1250] sm:$0xf]  ;;  %v1872_v62 = vld [vmem:[%s18587_s0 + $0x1258] sm:$0xf] }
 0x230   : > { %1869 = vst [vmem:[%s18592_s6 + $0x924] sm:$0xf] %v1868_v60  ;;  %1871 = vst [vmem:[%s18592_s6 + $0x928] sm:$0xf] %v1870_v61  ;;  %v1874_v63 = vld [vmem:[%s18587_s0 + $0x1260] sm:$0xf] }
 0x231   : > { %1873 = vst [vmem:[%s18592_s6 + $0x92c] sm:$0xf] %v1872_v62  ;;  %v1876_v0 = vld [vmem:[%s18587_s0 + $0x1268] sm:$0xf]  ;;  %v1878_v1 = vld [vmem:[%s18587_s0 + $0x1270] sm:$0xf] }
 0x232   : > { %1875 = vst [vmem:[%s18592_s6 + $0x930] sm:$0xf] %v1874_v63  ;;  %1877 = vst [vmem:[%s18592_s6 + $0x934] sm:$0xf] %v1876_v0  ;;  %v1880_v2 = vld [vmem:[%s18587_s0 + $0x1278] sm:$0xf] }
 0x233   : > { %1879 = vst [vmem:[%s18592_s6 + $0x938] sm:$0xf] %v1878_v1  ;;  %v1882_v3 = vld [vmem:[%s18587_s0 + $0x1280] sm:$0xf]  ;;  %v1884_v4 = vld [vmem:[%s18587_s0 + $0x1288] sm:$0xf] }
 0x234   : > { %1881 = vst [vmem:[%s18592_s6 + $0x93c] sm:$0xf] %v1880_v2  ;;  %1883 = vst [vmem:[%s18592_s6 + $0x940] sm:$0xf] %v1882_v3  ;;  %v1886_v5 = vld [vmem:[%s18587_s0 + $0x1290] sm:$0xf] }
 0x235   : > { %1885 = vst [vmem:[%s18592_s6 + $0x944] sm:$0xf] %v1884_v4  ;;  %v1888_v6 = vld [vmem:[%s18587_s0 + $0x1298] sm:$0xf]  ;;  %v1890_v7 = vld [vmem:[%s18587_s0 + $0x12a0] sm:$0xf] }
 0x236   : > { %1887 = vst [vmem:[%s18592_s6 + $0x948] sm:$0xf] %v1886_v5  ;;  %1889 = vst [vmem:[%s18592_s6 + $0x94c] sm:$0xf] %v1888_v6  ;;  %v1892_v8 = vld [vmem:[%s18587_s0 + $0x12a8] sm:$0xf] }
 0x237   : > { %1891 = vst [vmem:[%s18592_s6 + $0x950] sm:$0xf] %v1890_v7  ;;  %v1894_v9 = vld [vmem:[%s18587_s0 + $0x12b0] sm:$0xf]  ;;  %v1896_v10 = vld [vmem:[%s18587_s0 + $0x12b8] sm:$0xf] }
 0x238   : > { %1893 = vst [vmem:[%s18592_s6 + $0x954] sm:$0xf] %v1892_v8  ;;  %1895 = vst [vmem:[%s18592_s6 + $0x958] sm:$0xf] %v1894_v9  ;;  %v1898_v11 = vld [vmem:[%s18587_s0 + $0x12c0] sm:$0xf] }
 0x239   : > { %1897 = vst [vmem:[%s18592_s6 + $0x95c] sm:$0xf] %v1896_v10  ;;  %v1900_v12 = vld [vmem:[%s18587_s0 + $0x12c8] sm:$0xf]  ;;  %v1902_v13 = vld [vmem:[%s18587_s0 + $0x12d0] sm:$0xf] }
 0x23a   : > { %1899 = vst [vmem:[%s18592_s6 + $0x960] sm:$0xf] %v1898_v11  ;;  %1901 = vst [vmem:[%s18592_s6 + $0x964] sm:$0xf] %v1900_v12  ;;  %v1904_v14 = vld [vmem:[%s18587_s0 + $0x12d8] sm:$0xf] }
 0x23b   : > { %1903 = vst [vmem:[%s18592_s6 + $0x968] sm:$0xf] %v1902_v13  ;;  %v1906_v15 = vld [vmem:[%s18587_s0 + $0x12e0] sm:$0xf]  ;;  %v1908_v16 = vld [vmem:[%s18587_s0 + $0x12e8] sm:$0xf] }
 0x23c   : > { %1905 = vst [vmem:[%s18592_s6 + $0x96c] sm:$0xf] %v1904_v14  ;;  %1907 = vst [vmem:[%s18592_s6 + $0x970] sm:$0xf] %v1906_v15  ;;  %v1910_v17 = vld [vmem:[%s18587_s0 + $0x12f0] sm:$0xf] }
 0x23d   : > { %1909 = vst [vmem:[%s18592_s6 + $0x974] sm:$0xf] %v1908_v16  ;;  %v1912_v18 = vld [vmem:[%s18587_s0 + $0x12f8] sm:$0xf]  ;;  %v1914_v19 = vld [vmem:[%s18587_s0 + $0x1300] sm:$0xf] }
 0x23e   : > { %1911 = vst [vmem:[%s18592_s6 + $0x978] sm:$0xf] %v1910_v17  ;;  %1913 = vst [vmem:[%s18592_s6 + $0x97c] sm:$0xf] %v1912_v18  ;;  %v1916_v20 = vld [vmem:[%s18587_s0 + $0x1308] sm:$0xf] }
 0x23f   : > { %1915 = vst [vmem:[%s18592_s6 + $0x980] sm:$0xf] %v1914_v19  ;;  %v1918_v21 = vld [vmem:[%s18587_s0 + $0x1310] sm:$0xf]  ;;  %v1920_v22 = vld [vmem:[%s18587_s0 + $0x1318] sm:$0xf] }
 0x240   : > { %1917 = vst [vmem:[%s18592_s6 + $0x984] sm:$0xf] %v1916_v20  ;;  %1919 = vst [vmem:[%s18592_s6 + $0x988] sm:$0xf] %v1918_v21  ;;  %v1922_v23 = vld [vmem:[%s18587_s0 + $0x1320] sm:$0xf] }
 0x241   : > { %1921 = vst [vmem:[%s18592_s6 + $0x98c] sm:$0xf] %v1920_v22  ;;  %v1924_v24 = vld [vmem:[%s18587_s0 + $0x1328] sm:$0xf]  ;;  %v1926_v25 = vld [vmem:[%s18587_s0 + $0x1330] sm:$0xf] }
 0x242   : > { %1923 = vst [vmem:[%s18592_s6 + $0x990] sm:$0xf] %v1922_v23  ;;  %1925 = vst [vmem:[%s18592_s6 + $0x994] sm:$0xf] %v1924_v24  ;;  %v1928_v26 = vld [vmem:[%s18587_s0 + $0x1338] sm:$0xf] }
 0x243   : > { %1927 = vst [vmem:[%s18592_s6 + $0x998] sm:$0xf] %v1926_v25  ;;  %v1930_v27 = vld [vmem:[%s18587_s0 + $0x1340] sm:$0xf]  ;;  %v1932_v28 = vld [vmem:[%s18587_s0 + $0x1348] sm:$0xf] }
 0x244   : > { %1929 = vst [vmem:[%s18592_s6 + $0x99c] sm:$0xf] %v1928_v26  ;;  %1931 = vst [vmem:[%s18592_s6 + $0x9a0] sm:$0xf] %v1930_v27  ;;  %v1934_v29 = vld [vmem:[%s18587_s0 + $0x1350] sm:$0xf] }
 0x245   : > { %1933 = vst [vmem:[%s18592_s6 + $0x9a4] sm:$0xf] %v1932_v28  ;;  %v1936_v30 = vld [vmem:[%s18587_s0 + $0x1358] sm:$0xf]  ;;  %v1938_v31 = vld [vmem:[%s18587_s0 + $0x1360] sm:$0xf] }
 0x246   : > { %1935 = vst [vmem:[%s18592_s6 + $0x9a8] sm:$0xf] %v1934_v29  ;;  %1937 = vst [vmem:[%s18592_s6 + $0x9ac] sm:$0xf] %v1936_v30  ;;  %v1940_v32 = vld [vmem:[%s18587_s0 + $0x1368] sm:$0xf] }
 0x247   : > { %1939 = vst [vmem:[%s18592_s6 + $0x9b0] sm:$0xf] %v1938_v31  ;;  %v1942_v33 = vld [vmem:[%s18587_s0 + $0x1370] sm:$0xf]  ;;  %v1944_v34 = vld [vmem:[%s18587_s0 + $0x1378] sm:$0xf] }
 0x248   : > { %1941 = vst [vmem:[%s18592_s6 + $0x9b4] sm:$0xf] %v1940_v32  ;;  %1943 = vst [vmem:[%s18592_s6 + $0x9b8] sm:$0xf] %v1942_v33  ;;  %v1946_v35 = vld [vmem:[%s18587_s0 + $0x1380] sm:$0xf] }
 0x249   : > { %1945 = vst [vmem:[%s18592_s6 + $0x9bc] sm:$0xf] %v1944_v34  ;;  %v1948_v36 = vld [vmem:[%s18587_s0 + $0x1388] sm:$0xf]  ;;  %v1950_v37 = vld [vmem:[%s18587_s0 + $0x1390] sm:$0xf] }
 0x24a   : > { %1947 = vst [vmem:[%s18592_s6 + $0x9c0] sm:$0xf] %v1946_v35  ;;  %1949 = vst [vmem:[%s18592_s6 + $0x9c4] sm:$0xf] %v1948_v36  ;;  %v1952_v38 = vld [vmem:[%s18587_s0 + $0x1398] sm:$0xf] }
 0x24b   : > { %1951 = vst [vmem:[%s18592_s6 + $0x9c8] sm:$0xf] %v1950_v37  ;;  %v1954_v39 = vld [vmem:[%s18587_s0 + $0x13a0] sm:$0xf]  ;;  %v1956_v40 = vld [vmem:[%s18587_s0 + $0x13a8] sm:$0xf] }
 0x24c   : > { %1953 = vst [vmem:[%s18592_s6 + $0x9cc] sm:$0xf] %v1952_v38  ;;  %1955 = vst [vmem:[%s18592_s6 + $0x9d0] sm:$0xf] %v1954_v39  ;;  %v1958_v41 = vld [vmem:[%s18587_s0 + $0x13b0] sm:$0xf] }
 0x24d   : > { %1957 = vst [vmem:[%s18592_s6 + $0x9d4] sm:$0xf] %v1956_v40  ;;  %v1960_v42 = vld [vmem:[%s18587_s0 + $0x13b8] sm:$0xf]  ;;  %v1962_v43 = vld [vmem:[%s18587_s0 + $0x13c0] sm:$0xf] }
 0x24e   : > { %1959 = vst [vmem:[%s18592_s6 + $0x9d8] sm:$0xf] %v1958_v41  ;;  %1961 = vst [vmem:[%s18592_s6 + $0x9dc] sm:$0xf] %v1960_v42  ;;  %v1964_v44 = vld [vmem:[%s18587_s0 + $0x13c8] sm:$0xf] }
 0x24f   : > { %1963 = vst [vmem:[%s18592_s6 + $0x9e0] sm:$0xf] %v1962_v43  ;;  %v1966_v45 = vld [vmem:[%s18587_s0 + $0x13d0] sm:$0xf]  ;;  %v1968_v46 = vld [vmem:[%s18587_s0 + $0x13d8] sm:$0xf] }
 0x250   : > { %1965 = vst [vmem:[%s18592_s6 + $0x9e4] sm:$0xf] %v1964_v44  ;;  %1967 = vst [vmem:[%s18592_s6 + $0x9e8] sm:$0xf] %v1966_v45  ;;  %v1970_v47 = vld [vmem:[%s18587_s0 + $0x13e0] sm:$0xf] }
 0x251   : > { %1969 = vst [vmem:[%s18592_s6 + $0x9ec] sm:$0xf] %v1968_v46  ;;  %v1972_v48 = vld [vmem:[%s18587_s0 + $0x13e8] sm:$0xf]  ;;  %v1974_v49 = vld [vmem:[%s18587_s0 + $0x13f0] sm:$0xf] }
 0x252   : > { %1971 = vst [vmem:[%s18592_s6 + $0x9f0] sm:$0xf] %v1970_v47  ;;  %1973 = vst [vmem:[%s18592_s6 + $0x9f4] sm:$0xf] %v1972_v48  ;;  %v1976_v50 = vld [vmem:[%s18587_s0 + $0x13f8] sm:$0xf] }
 0x253   : > { %1975 = vst [vmem:[%s18592_s6 + $0x9f8] sm:$0xf] %v1974_v49  ;;  %v1978_v51 = vld [vmem:[%s18587_s0 + $0x1400] sm:$0xf]  ;;  %v1980_v52 = vld [vmem:[%s18587_s0 + $0x1408] sm:$0xf] }
 0x254   : > { %1977 = vst [vmem:[%s18592_s6 + $0x9fc] sm:$0xf] %v1976_v50  ;;  %1979 = vst [vmem:[%s18592_s6 + $0xa00] sm:$0xf] %v1978_v51  ;;  %v1982_v53 = vld [vmem:[%s18587_s0 + $0x1410] sm:$0xf] }
 0x255   : > { %1981 = vst [vmem:[%s18592_s6 + $0xa04] sm:$0xf] %v1980_v52  ;;  %v1984_v54 = vld [vmem:[%s18587_s0 + $0x1418] sm:$0xf]  ;;  %v1986_v55 = vld [vmem:[%s18587_s0 + $0x1420] sm:$0xf] }
 0x256   : > { %1983 = vst [vmem:[%s18592_s6 + $0xa08] sm:$0xf] %v1982_v53  ;;  %1985 = vst [vmem:[%s18592_s6 + $0xa0c] sm:$0xf] %v1984_v54  ;;  %v1988_v56 = vld [vmem:[%s18587_s0 + $0x1428] sm:$0xf] }
 0x257   : > { %1987 = vst [vmem:[%s18592_s6 + $0xa10] sm:$0xf] %v1986_v55  ;;  %v1990_v57 = vld [vmem:[%s18587_s0 + $0x1430] sm:$0xf]  ;;  %v1992_v58 = vld [vmem:[%s18587_s0 + $0x1438] sm:$0xf] }
 0x258   : > { %1989 = vst [vmem:[%s18592_s6 + $0xa14] sm:$0xf] %v1988_v56  ;;  %1991 = vst [vmem:[%s18592_s6 + $0xa18] sm:$0xf] %v1990_v57  ;;  %v1994_v59 = vld [vmem:[%s18587_s0 + $0x1440] sm:$0xf] }
 0x259   : > { %1993 = vst [vmem:[%s18592_s6 + $0xa1c] sm:$0xf] %v1992_v58  ;;  %v1996_v60 = vld [vmem:[%s18587_s0 + $0x1448] sm:$0xf]  ;;  %v1998_v61 = vld [vmem:[%s18587_s0 + $0x1450] sm:$0xf] }
 0x25a   : > { %1995 = vst [vmem:[%s18592_s6 + $0xa20] sm:$0xf] %v1994_v59  ;;  %1997 = vst [vmem:[%s18592_s6 + $0xa24] sm:$0xf] %v1996_v60  ;;  %v2000_v62 = vld [vmem:[%s18587_s0 + $0x1458] sm:$0xf] }
 0x25b   : > { %1999 = vst [vmem:[%s18592_s6 + $0xa28] sm:$0xf] %v1998_v61  ;;  %v2002_v63 = vld [vmem:[%s18587_s0 + $0x1460] sm:$0xf]  ;;  %v2004_v0 = vld [vmem:[%s18587_s0 + $0x1468] sm:$0xf] }
 0x25c   : > { %2001 = vst [vmem:[%s18592_s6 + $0xa2c] sm:$0xf] %v2000_v62  ;;  %2003 = vst [vmem:[%s18592_s6 + $0xa30] sm:$0xf] %v2002_v63  ;;  %v2006_v1 = vld [vmem:[%s18587_s0 + $0x1470] sm:$0xf] }
 0x25d   : > { %2005 = vst [vmem:[%s18592_s6 + $0xa34] sm:$0xf] %v2004_v0  ;;  %v2008_v2 = vld [vmem:[%s18587_s0 + $0x1478] sm:$0xf]  ;;  %v2010_v3 = vld [vmem:[%s18587_s0 + $0x1480] sm:$0xf] }
 0x25e   : > { %2007 = vst [vmem:[%s18592_s6 + $0xa38] sm:$0xf] %v2006_v1  ;;  %2009 = vst [vmem:[%s18592_s6 + $0xa3c] sm:$0xf] %v2008_v2  ;;  %v2012_v4 = vld [vmem:[%s18587_s0 + $0x1488] sm:$0xf] }
 0x25f   : > { %2011 = vst [vmem:[%s18592_s6 + $0xa40] sm:$0xf] %v2010_v3  ;;  %v2014_v5 = vld [vmem:[%s18587_s0 + $0x1490] sm:$0xf]  ;;  %v2016_v6 = vld [vmem:[%s18587_s0 + $0x1498] sm:$0xf] }
 0x260   : > { %2013 = vst [vmem:[%s18592_s6 + $0xa44] sm:$0xf] %v2012_v4  ;;  %2015 = vst [vmem:[%s18592_s6 + $0xa48] sm:$0xf] %v2014_v5  ;;  %v2018_v7 = vld [vmem:[%s18587_s0 + $0x14a0] sm:$0xf] }
 0x261   : > { %2017 = vst [vmem:[%s18592_s6 + $0xa4c] sm:$0xf] %v2016_v6  ;;  %v2020_v8 = vld [vmem:[%s18587_s0 + $0x14a8] sm:$0xf]  ;;  %v2022_v9 = vld [vmem:[%s18587_s0 + $0x14b0] sm:$0xf] }
 0x262   : > { %2019 = vst [vmem:[%s18592_s6 + $0xa50] sm:$0xf] %v2018_v7  ;;  %2021 = vst [vmem:[%s18592_s6 + $0xa54] sm:$0xf] %v2020_v8  ;;  %v2024_v10 = vld [vmem:[%s18587_s0 + $0x14b8] sm:$0xf] }
 0x263   : > { %2023 = vst [vmem:[%s18592_s6 + $0xa58] sm:$0xf] %v2022_v9  ;;  %v2026_v11 = vld [vmem:[%s18587_s0 + $0x14c0] sm:$0xf]  ;;  %v2028_v12 = vld [vmem:[%s18587_s0 + $0x14c8] sm:$0xf] }
 0x264   : > { %2025 = vst [vmem:[%s18592_s6 + $0xa5c] sm:$0xf] %v2024_v10  ;;  %2027 = vst [vmem:[%s18592_s6 + $0xa60] sm:$0xf] %v2026_v11  ;;  %v2030_v13 = vld [vmem:[%s18587_s0 + $0x14d0] sm:$0xf] }
 0x265   : > { %2029 = vst [vmem:[%s18592_s6 + $0xa64] sm:$0xf] %v2028_v12  ;;  %v2032_v14 = vld [vmem:[%s18587_s0 + $0x14d8] sm:$0xf]  ;;  %v2034_v15 = vld [vmem:[%s18587_s0 + $0x14e0] sm:$0xf] }
 0x266   : > { %2031 = vst [vmem:[%s18592_s6 + $0xa68] sm:$0xf] %v2030_v13  ;;  %2033 = vst [vmem:[%s18592_s6 + $0xa6c] sm:$0xf] %v2032_v14  ;;  %v2036_v16 = vld [vmem:[%s18587_s0 + $0x14e8] sm:$0xf] }
 0x267   : > { %2035 = vst [vmem:[%s18592_s6 + $0xa70] sm:$0xf] %v2034_v15  ;;  %v2038_v17 = vld [vmem:[%s18587_s0 + $0x14f0] sm:$0xf]  ;;  %v2040_v18 = vld [vmem:[%s18587_s0 + $0x14f8] sm:$0xf] }
 0x268   : > { %2037 = vst [vmem:[%s18592_s6 + $0xa74] sm:$0xf] %v2036_v16  ;;  %2039 = vst [vmem:[%s18592_s6 + $0xa78] sm:$0xf] %v2038_v17  ;;  %v2042_v19 = vld [vmem:[%s18587_s0 + $0x1500] sm:$0xf] }
 0x269   : > { %2041 = vst [vmem:[%s18592_s6 + $0xa7c] sm:$0xf] %v2040_v18  ;;  %v2044_v20 = vld [vmem:[%s18587_s0 + $0x1508] sm:$0xf]  ;;  %v2046_v21 = vld [vmem:[%s18587_s0 + $0x1510] sm:$0xf] }
 0x26a   : > { %2043 = vst [vmem:[%s18592_s6 + $0xa80] sm:$0xf] %v2042_v19  ;;  %2045 = vst [vmem:[%s18592_s6 + $0xa84] sm:$0xf] %v2044_v20  ;;  %v2048_v22 = vld [vmem:[%s18587_s0 + $0x1518] sm:$0xf] }
 0x26b   : > { %2047 = vst [vmem:[%s18592_s6 + $0xa88] sm:$0xf] %v2046_v21  ;;  %v2050_v23 = vld [vmem:[%s18587_s0 + $0x1520] sm:$0xf]  ;;  %v2052_v24 = vld [vmem:[%s18587_s0 + $0x1528] sm:$0xf] }
 0x26c   : > { %2049 = vst [vmem:[%s18592_s6 + $0xa8c] sm:$0xf] %v2048_v22  ;;  %2051 = vst [vmem:[%s18592_s6 + $0xa90] sm:$0xf] %v2050_v23  ;;  %v2054_v25 = vld [vmem:[%s18587_s0 + $0x1530] sm:$0xf] }
 0x26d   : > { %2053 = vst [vmem:[%s18592_s6 + $0xa94] sm:$0xf] %v2052_v24  ;;  %v2056_v26 = vld [vmem:[%s18587_s0 + $0x1538] sm:$0xf]  ;;  %v2058_v27 = vld [vmem:[%s18587_s0 + $0x1540] sm:$0xf] }
 0x26e   : > { %2055 = vst [vmem:[%s18592_s6 + $0xa98] sm:$0xf] %v2054_v25  ;;  %2057 = vst [vmem:[%s18592_s6 + $0xa9c] sm:$0xf] %v2056_v26  ;;  %v2060_v28 = vld [vmem:[%s18587_s0 + $0x1548] sm:$0xf] }
 0x26f   : > { %2059 = vst [vmem:[%s18592_s6 + $0xaa0] sm:$0xf] %v2058_v27  ;;  %v2062_v29 = vld [vmem:[%s18587_s0 + $0x1550] sm:$0xf]  ;;  %v2064_v30 = vld [vmem:[%s18587_s0 + $0x1558] sm:$0xf] }
 0x270   : > { %2061 = vst [vmem:[%s18592_s6 + $0xaa4] sm:$0xf] %v2060_v28  ;;  %2063 = vst [vmem:[%s18592_s6 + $0xaa8] sm:$0xf] %v2062_v29  ;;  %v2066_v31 = vld [vmem:[%s18587_s0 + $0x1560] sm:$0xf] }
 0x271   : > { %2065 = vst [vmem:[%s18592_s6 + $0xaac] sm:$0xf] %v2064_v30  ;;  %v2068_v32 = vld [vmem:[%s18587_s0 + $0x1568] sm:$0xf]  ;;  %v2070_v33 = vld [vmem:[%s18587_s0 + $0x1570] sm:$0xf] }
 0x272   : > { %2067 = vst [vmem:[%s18592_s6 + $0xab0] sm:$0xf] %v2066_v31  ;;  %2069 = vst [vmem:[%s18592_s6 + $0xab4] sm:$0xf] %v2068_v32  ;;  %v2072_v34 = vld [vmem:[%s18587_s0 + $0x1578] sm:$0xf] }
 0x273   : > { %2071 = vst [vmem:[%s18592_s6 + $0xab8] sm:$0xf] %v2070_v33  ;;  %v2074_v35 = vld [vmem:[%s18587_s0 + $0x1580] sm:$0xf]  ;;  %v2076_v36 = vld [vmem:[%s18587_s0 + $0x1588] sm:$0xf] }
 0x274   : > { %2073 = vst [vmem:[%s18592_s6 + $0xabc] sm:$0xf] %v2072_v34  ;;  %2075 = vst [vmem:[%s18592_s6 + $0xac0] sm:$0xf] %v2074_v35  ;;  %v2078_v37 = vld [vmem:[%s18587_s0 + $0x1590] sm:$0xf] }
 0x275   : > { %2077 = vst [vmem:[%s18592_s6 + $0xac4] sm:$0xf] %v2076_v36  ;;  %v2080_v38 = vld [vmem:[%s18587_s0 + $0x1598] sm:$0xf]  ;;  %v2082_v39 = vld [vmem:[%s18587_s0 + $0x15a0] sm:$0xf] }
 0x276   : > { %2079 = vst [vmem:[%s18592_s6 + $0xac8] sm:$0xf] %v2078_v37  ;;  %2081 = vst [vmem:[%s18592_s6 + $0xacc] sm:$0xf] %v2080_v38  ;;  %v2084_v40 = vld [vmem:[%s18587_s0 + $0x15a8] sm:$0xf] }
 0x277   : > { %2083 = vst [vmem:[%s18592_s6 + $0xad0] sm:$0xf] %v2082_v39  ;;  %v2086_v41 = vld [vmem:[%s18587_s0 + $0x15b0] sm:$0xf]  ;;  %v2088_v42 = vld [vmem:[%s18587_s0 + $0x15b8] sm:$0xf] }
 0x278   : > { %2085 = vst [vmem:[%s18592_s6 + $0xad4] sm:$0xf] %v2084_v40  ;;  %2087 = vst [vmem:[%s18592_s6 + $0xad8] sm:$0xf] %v2086_v41  ;;  %v2090_v43 = vld [vmem:[%s18587_s0 + $0x15c0] sm:$0xf] }
 0x279   : > { %2089 = vst [vmem:[%s18592_s6 + $0xadc] sm:$0xf] %v2088_v42  ;;  %v2092_v44 = vld [vmem:[%s18587_s0 + $0x15c8] sm:$0xf]  ;;  %v2094_v45 = vld [vmem:[%s18587_s0 + $0x15d0] sm:$0xf] }
 0x27a   : > { %2091 = vst [vmem:[%s18592_s6 + $0xae0] sm:$0xf] %v2090_v43  ;;  %2093 = vst [vmem:[%s18592_s6 + $0xae4] sm:$0xf] %v2092_v44  ;;  %v2096_v46 = vld [vmem:[%s18587_s0 + $0x15d8] sm:$0xf] }
 0x27b   : > { %2095 = vst [vmem:[%s18592_s6 + $0xae8] sm:$0xf] %v2094_v45  ;;  %v2098_v47 = vld [vmem:[%s18587_s0 + $0x15e0] sm:$0xf]  ;;  %v2100_v48 = vld [vmem:[%s18587_s0 + $0x15e8] sm:$0xf] }
 0x27c   : > { %2097 = vst [vmem:[%s18592_s6 + $0xaec] sm:$0xf] %v2096_v46  ;;  %2099 = vst [vmem:[%s18592_s6 + $0xaf0] sm:$0xf] %v2098_v47  ;;  %v2102_v49 = vld [vmem:[%s18587_s0 + $0x15f0] sm:$0xf] }
 0x27d   : > { %2101 = vst [vmem:[%s18592_s6 + $0xaf4] sm:$0xf] %v2100_v48  ;;  %v2104_v50 = vld [vmem:[%s18587_s0 + $0x15f8] sm:$0xf]  ;;  %v2106_v51 = vld [vmem:[%s18587_s0 + $0x1600] sm:$0xf] }
 0x27e   : > { %2103 = vst [vmem:[%s18592_s6 + $0xaf8] sm:$0xf] %v2102_v49  ;;  %2105 = vst [vmem:[%s18592_s6 + $0xafc] sm:$0xf] %v2104_v50  ;;  %v2108_v52 = vld [vmem:[%s18587_s0 + $0x1608] sm:$0xf] }
 0x27f   : > { %2107 = vst [vmem:[%s18592_s6 + $0xb00] sm:$0xf] %v2106_v51  ;;  %v2110_v53 = vld [vmem:[%s18587_s0 + $0x1610] sm:$0xf]  ;;  %v2112_v54 = vld [vmem:[%s18587_s0 + $0x1618] sm:$0xf] }
 0x280   : > { %2109 = vst [vmem:[%s18592_s6 + $0xb04] sm:$0xf] %v2108_v52  ;;  %2111 = vst [vmem:[%s18592_s6 + $0xb08] sm:$0xf] %v2110_v53  ;;  %v2114_v55 = vld [vmem:[%s18587_s0 + $0x1620] sm:$0xf] }
 0x281   : > { %2113 = vst [vmem:[%s18592_s6 + $0xb0c] sm:$0xf] %v2112_v54  ;;  %v2116_v56 = vld [vmem:[%s18587_s0 + $0x1628] sm:$0xf]  ;;  %v2118_v57 = vld [vmem:[%s18587_s0 + $0x1630] sm:$0xf] }
 0x282   : > { %2115 = vst [vmem:[%s18592_s6 + $0xb10] sm:$0xf] %v2114_v55  ;;  %2117 = vst [vmem:[%s18592_s6 + $0xb14] sm:$0xf] %v2116_v56  ;;  %v2120_v58 = vld [vmem:[%s18587_s0 + $0x1638] sm:$0xf] }
 0x283   : > { %2119 = vst [vmem:[%s18592_s6 + $0xb18] sm:$0xf] %v2118_v57  ;;  %v2122_v59 = vld [vmem:[%s18587_s0 + $0x1640] sm:$0xf]  ;;  %v2124_v60 = vld [vmem:[%s18587_s0 + $0x1648] sm:$0xf] }
 0x284   : > { %2121 = vst [vmem:[%s18592_s6 + $0xb1c] sm:$0xf] %v2120_v58  ;;  %2123 = vst [vmem:[%s18592_s6 + $0xb20] sm:$0xf] %v2122_v59  ;;  %v2126_v61 = vld [vmem:[%s18587_s0 + $0x1650] sm:$0xf] }
 0x285   : > { %2125 = vst [vmem:[%s18592_s6 + $0xb24] sm:$0xf] %v2124_v60  ;;  %v2128_v62 = vld [vmem:[%s18587_s0 + $0x1658] sm:$0xf]  ;;  %v2130_v63 = vld [vmem:[%s18587_s0 + $0x1660] sm:$0xf] }
 0x286   : > { %2127 = vst [vmem:[%s18592_s6 + $0xb28] sm:$0xf] %v2126_v61  ;;  %2129 = vst [vmem:[%s18592_s6 + $0xb2c] sm:$0xf] %v2128_v62  ;;  %v2132_v0 = vld [vmem:[%s18587_s0 + $0x1668] sm:$0xf] }
 0x287   : > { %2131 = vst [vmem:[%s18592_s6 + $0xb30] sm:$0xf] %v2130_v63  ;;  %v2134_v1 = vld [vmem:[%s18587_s0 + $0x1670] sm:$0xf]  ;;  %v2136_v2 = vld [vmem:[%s18587_s0 + $0x1678] sm:$0xf] }
 0x288   : > { %2133 = vst [vmem:[%s18592_s6 + $0xb34] sm:$0xf] %v2132_v0  ;;  %2135 = vst [vmem:[%s18592_s6 + $0xb38] sm:$0xf] %v2134_v1  ;;  %v2138_v3 = vld [vmem:[%s18587_s0 + $0x1680] sm:$0xf] }
 0x289   : > { %2137 = vst [vmem:[%s18592_s6 + $0xb3c] sm:$0xf] %v2136_v2  ;;  %v2140_v4 = vld [vmem:[%s18587_s0 + $0x1688] sm:$0xf]  ;;  %v2142_v5 = vld [vmem:[%s18587_s0 + $0x1690] sm:$0xf] }
 0x28a   : > { %2139 = vst [vmem:[%s18592_s6 + $0xb40] sm:$0xf] %v2138_v3  ;;  %2141 = vst [vmem:[%s18592_s6 + $0xb44] sm:$0xf] %v2140_v4  ;;  %v2144_v6 = vld [vmem:[%s18587_s0 + $0x1698] sm:$0xf] }
 0x28b   : > { %2143 = vst [vmem:[%s18592_s6 + $0xb48] sm:$0xf] %v2142_v5  ;;  %v2146_v7 = vld [vmem:[%s18587_s0 + $0x16a0] sm:$0xf]  ;;  %v2148_v8 = vld [vmem:[%s18587_s0 + $0x16a8] sm:$0xf] }
 0x28c   : > { %2145 = vst [vmem:[%s18592_s6 + $0xb4c] sm:$0xf] %v2144_v6  ;;  %2147 = vst [vmem:[%s18592_s6 + $0xb50] sm:$0xf] %v2146_v7  ;;  %v2150_v9 = vld [vmem:[%s18587_s0 + $0x16b0] sm:$0xf] }
 0x28d   : > { %2149 = vst [vmem:[%s18592_s6 + $0xb54] sm:$0xf] %v2148_v8  ;;  %v2152_v10 = vld [vmem:[%s18587_s0 + $0x16b8] sm:$0xf]  ;;  %v2154_v11 = vld [vmem:[%s18587_s0 + $0x16c0] sm:$0xf] }
 0x28e   : > { %2151 = vst [vmem:[%s18592_s6 + $0xb58] sm:$0xf] %v2150_v9  ;;  %2153 = vst [vmem:[%s18592_s6 + $0xb5c] sm:$0xf] %v2152_v10  ;;  %v2156_v12 = vld [vmem:[%s18587_s0 + $0x16c8] sm:$0xf] }
 0x28f   : > { %2155 = vst [vmem:[%s18592_s6 + $0xb60] sm:$0xf] %v2154_v11  ;;  %v2158_v13 = vld [vmem:[%s18587_s0 + $0x16d0] sm:$0xf]  ;;  %v2160_v14 = vld [vmem:[%s18587_s0 + $0x16d8] sm:$0xf] }
 0x290   : > { %2157 = vst [vmem:[%s18592_s6 + $0xb64] sm:$0xf] %v2156_v12  ;;  %2159 = vst [vmem:[%s18592_s6 + $0xb68] sm:$0xf] %v2158_v13  ;;  %v2162_v15 = vld [vmem:[%s18587_s0 + $0x16e0] sm:$0xf] }
 0x291   : > { %2161 = vst [vmem:[%s18592_s6 + $0xb6c] sm:$0xf] %v2160_v14  ;;  %v2164_v16 = vld [vmem:[%s18587_s0 + $0x16e8] sm:$0xf]  ;;  %v2166_v17 = vld [vmem:[%s18587_s0 + $0x16f0] sm:$0xf] }
 0x292   : > { %2163 = vst [vmem:[%s18592_s6 + $0xb70] sm:$0xf] %v2162_v15  ;;  %2165 = vst [vmem:[%s18592_s6 + $0xb74] sm:$0xf] %v2164_v16  ;;  %v2168_v18 = vld [vmem:[%s18587_s0 + $0x16f8] sm:$0xf] }
 0x293   : > { %2167 = vst [vmem:[%s18592_s6 + $0xb78] sm:$0xf] %v2166_v17  ;;  %v2170_v19 = vld [vmem:[%s18587_s0 + $0x1700] sm:$0xf]  ;;  %v2172_v20 = vld [vmem:[%s18587_s0 + $0x1708] sm:$0xf] }
 0x294   : > { %2169 = vst [vmem:[%s18592_s6 + $0xb7c] sm:$0xf] %v2168_v18  ;;  %2171 = vst [vmem:[%s18592_s6 + $0xb80] sm:$0xf] %v2170_v19  ;;  %v2174_v21 = vld [vmem:[%s18587_s0 + $0x1710] sm:$0xf] }
 0x295   : > { %2173 = vst [vmem:[%s18592_s6 + $0xb84] sm:$0xf] %v2172_v20  ;;  %v2176_v22 = vld [vmem:[%s18587_s0 + $0x1718] sm:$0xf]  ;;  %v2178_v23 = vld [vmem:[%s18587_s0 + $0x1720] sm:$0xf] }
 0x296   : > { %2175 = vst [vmem:[%s18592_s6 + $0xb88] sm:$0xf] %v2174_v21  ;;  %2177 = vst [vmem:[%s18592_s6 + $0xb8c] sm:$0xf] %v2176_v22  ;;  %v2180_v24 = vld [vmem:[%s18587_s0 + $0x1728] sm:$0xf] }
 0x297   : > { %2179 = vst [vmem:[%s18592_s6 + $0xb90] sm:$0xf] %v2178_v23  ;;  %v2182_v25 = vld [vmem:[%s18587_s0 + $0x1730] sm:$0xf]  ;;  %v2184_v26 = vld [vmem:[%s18587_s0 + $0x1738] sm:$0xf] }
 0x298   : > { %2181 = vst [vmem:[%s18592_s6 + $0xb94] sm:$0xf] %v2180_v24  ;;  %2183 = vst [vmem:[%s18592_s6 + $0xb98] sm:$0xf] %v2182_v25  ;;  %v2186_v27 = vld [vmem:[%s18587_s0 + $0x1740] sm:$0xf] }
 0x299   : > { %2185 = vst [vmem:[%s18592_s6 + $0xb9c] sm:$0xf] %v2184_v26  ;;  %v2188_v28 = vld [vmem:[%s18587_s0 + $0x1748] sm:$0xf]  ;;  %v2190_v29 = vld [vmem:[%s18587_s0 + $0x1750] sm:$0xf] }
 0x29a   : > { %2187 = vst [vmem:[%s18592_s6 + $0xba0] sm:$0xf] %v2186_v27  ;;  %2189 = vst [vmem:[%s18592_s6 + $0xba4] sm:$0xf] %v2188_v28  ;;  %v2192_v30 = vld [vmem:[%s18587_s0 + $0x1758] sm:$0xf] }
 0x29b   : > { %2191 = vst [vmem:[%s18592_s6 + $0xba8] sm:$0xf] %v2190_v29  ;;  %v2194_v31 = vld [vmem:[%s18587_s0 + $0x1760] sm:$0xf]  ;;  %v2196_v32 = vld [vmem:[%s18587_s0 + $0x1768] sm:$0xf] }
 0x29c   : > { %2193 = vst [vmem:[%s18592_s6 + $0xbac] sm:$0xf] %v2192_v30  ;;  %2195 = vst [vmem:[%s18592_s6 + $0xbb0] sm:$0xf] %v2194_v31  ;;  %v2198_v33 = vld [vmem:[%s18587_s0 + $0x1770] sm:$0xf] }
 0x29d   : > { %2197 = vst [vmem:[%s18592_s6 + $0xbb4] sm:$0xf] %v2196_v32  ;;  %v2200_v34 = vld [vmem:[%s18587_s0 + $0x1778] sm:$0xf]  ;;  %v2202_v35 = vld [vmem:[%s18587_s0 + $0x1780] sm:$0xf] }
 0x29e   : > { %2199 = vst [vmem:[%s18592_s6 + $0xbb8] sm:$0xf] %v2198_v33  ;;  %2201 = vst [vmem:[%s18592_s6 + $0xbbc] sm:$0xf] %v2200_v34  ;;  %v2204_v36 = vld [vmem:[%s18587_s0 + $0x1788] sm:$0xf] }
 0x29f   : > { %2203 = vst [vmem:[%s18592_s6 + $0xbc0] sm:$0xf] %v2202_v35  ;;  %v2206_v37 = vld [vmem:[%s18587_s0 + $0x1790] sm:$0xf]  ;;  %v2208_v38 = vld [vmem:[%s18587_s0 + $0x1798] sm:$0xf] }
 0x2a0   : > { %2205 = vst [vmem:[%s18592_s6 + $0xbc4] sm:$0xf] %v2204_v36  ;;  %2207 = vst [vmem:[%s18592_s6 + $0xbc8] sm:$0xf] %v2206_v37  ;;  %v2210_v39 = vld [vmem:[%s18587_s0 + $0x17a0] sm:$0xf] }
 0x2a1   : > { %2209 = vst [vmem:[%s18592_s6 + $0xbcc] sm:$0xf] %v2208_v38  ;;  %v2212_v40 = vld [vmem:[%s18587_s0 + $0x17a8] sm:$0xf]  ;;  %v2214_v41 = vld [vmem:[%s18587_s0 + $0x17b0] sm:$0xf] }
 0x2a2   : > { %2211 = vst [vmem:[%s18592_s6 + $0xbd0] sm:$0xf] %v2210_v39  ;;  %2213 = vst [vmem:[%s18592_s6 + $0xbd4] sm:$0xf] %v2212_v40  ;;  %v2216_v42 = vld [vmem:[%s18587_s0 + $0x17b8] sm:$0xf] }
 0x2a3   : > { %2215 = vst [vmem:[%s18592_s6 + $0xbd8] sm:$0xf] %v2214_v41  ;;  %v2218_v43 = vld [vmem:[%s18587_s0 + $0x17c0] sm:$0xf]  ;;  %v2220_v44 = vld [vmem:[%s18587_s0 + $0x17c8] sm:$0xf] }
 0x2a4   : > { %2217 = vst [vmem:[%s18592_s6 + $0xbdc] sm:$0xf] %v2216_v42  ;;  %2219 = vst [vmem:[%s18592_s6 + $0xbe0] sm:$0xf] %v2218_v43  ;;  %v2222_v45 = vld [vmem:[%s18587_s0 + $0x17d0] sm:$0xf] }
 0x2a5   : > { %2221 = vst [vmem:[%s18592_s6 + $0xbe4] sm:$0xf] %v2220_v44  ;;  %v2224_v46 = vld [vmem:[%s18587_s0 + $0x17d8] sm:$0xf]  ;;  %v2226_v47 = vld [vmem:[%s18587_s0 + $0x17e0] sm:$0xf] }
 0x2a6   : > { %2223 = vst [vmem:[%s18592_s6 + $0xbe8] sm:$0xf] %v2222_v45  ;;  %2225 = vst [vmem:[%s18592_s6 + $0xbec] sm:$0xf] %v2224_v46  ;;  %v2228_v48 = vld [vmem:[%s18587_s0 + $0x17e8] sm:$0xf] }
 0x2a7   : > { %2227 = vst [vmem:[%s18592_s6 + $0xbf0] sm:$0xf] %v2226_v47  ;;  %v2230_v49 = vld [vmem:[%s18587_s0 + $0x17f0] sm:$0xf]  ;;  %v2232_v50 = vld [vmem:[%s18587_s0 + $0x17f8] sm:$0xf] }
 0x2a8   : > { %2229 = vst [vmem:[%s18592_s6 + $0xbf4] sm:$0xf] %v2228_v48  ;;  %2231 = vst [vmem:[%s18592_s6 + $0xbf8] sm:$0xf] %v2230_v49  ;;  %v2234_v51 = vld [vmem:[%s18587_s0 + $0x1800] sm:$0xf] }
 0x2a9   : > { %2233 = vst [vmem:[%s18592_s6 + $0xbfc] sm:$0xf] %v2232_v50  ;;  %v2236_v52 = vld [vmem:[%s18587_s0 + $0x1808] sm:$0xf]  ;;  %v2238_v53 = vld [vmem:[%s18587_s0 + $0x1810] sm:$0xf] }
 0x2aa   : > { %2235 = vst [vmem:[%s18592_s6 + $0xc00] sm:$0xf] %v2234_v51  ;;  %2237 = vst [vmem:[%s18592_s6 + $0xc04] sm:$0xf] %v2236_v52  ;;  %v2240_v54 = vld [vmem:[%s18587_s0 + $0x1818] sm:$0xf] }
 0x2ab   : > { %2239 = vst [vmem:[%s18592_s6 + $0xc08] sm:$0xf] %v2238_v53  ;;  %v2242_v55 = vld [vmem:[%s18587_s0 + $0x1820] sm:$0xf]  ;;  %v2244_v56 = vld [vmem:[%s18587_s0 + $0x1828] sm:$0xf] }
 0x2ac   : > { %2241 = vst [vmem:[%s18592_s6 + $0xc0c] sm:$0xf] %v2240_v54  ;;  %2243 = vst [vmem:[%s18592_s6 + $0xc10] sm:$0xf] %v2242_v55  ;;  %v2246_v57 = vld [vmem:[%s18587_s0 + $0x1830] sm:$0xf] }
 0x2ad   : > { %2245 = vst [vmem:[%s18592_s6 + $0xc14] sm:$0xf] %v2244_v56  ;;  %v2248_v58 = vld [vmem:[%s18587_s0 + $0x1838] sm:$0xf]  ;;  %v2250_v59 = vld [vmem:[%s18587_s0 + $0x1840] sm:$0xf] }
 0x2ae   : > { %2247 = vst [vmem:[%s18592_s6 + $0xc18] sm:$0xf] %v2246_v57  ;;  %2249 = vst [vmem:[%s18592_s6 + $0xc1c] sm:$0xf] %v2248_v58  ;;  %v2252_v60 = vld [vmem:[%s18587_s0 + $0x1848] sm:$0xf] }
 0x2af   : > { %2251 = vst [vmem:[%s18592_s6 + $0xc20] sm:$0xf] %v2250_v59  ;;  %v2254_v61 = vld [vmem:[%s18587_s0 + $0x1850] sm:$0xf]  ;;  %v2256_v62 = vld [vmem:[%s18587_s0 + $0x1858] sm:$0xf] }
 0x2b0   : > { %2253 = vst [vmem:[%s18592_s6 + $0xc24] sm:$0xf] %v2252_v60  ;;  %2255 = vst [vmem:[%s18592_s6 + $0xc28] sm:$0xf] %v2254_v61  ;;  %v2258_v63 = vld [vmem:[%s18587_s0 + $0x1860] sm:$0xf] }
 0x2b1   : > { %2257 = vst [vmem:[%s18592_s6 + $0xc2c] sm:$0xf] %v2256_v62  ;;  %v2260_v0 = vld [vmem:[%s18587_s0 + $0x1868] sm:$0xf]  ;;  %v2262_v1 = vld [vmem:[%s18587_s0 + $0x1870] sm:$0xf] }
 0x2b2   : > { %2259 = vst [vmem:[%s18592_s6 + $0xc30] sm:$0xf] %v2258_v63  ;;  %2261 = vst [vmem:[%s18592_s6 + $0xc34] sm:$0xf] %v2260_v0  ;;  %v2264_v2 = vld [vmem:[%s18587_s0 + $0x1878] sm:$0xf] }
 0x2b3   : > { %2263 = vst [vmem:[%s18592_s6 + $0xc38] sm:$0xf] %v2262_v1  ;;  %v2266_v3 = vld [vmem:[%s18587_s0 + $0x1880] sm:$0xf]  ;;  %v2268_v4 = vld [vmem:[%s18587_s0 + $0x1888] sm:$0xf] }
 0x2b4   : > { %2265 = vst [vmem:[%s18592_s6 + $0xc3c] sm:$0xf] %v2264_v2  ;;  %2267 = vst [vmem:[%s18592_s6 + $0xc40] sm:$0xf] %v2266_v3  ;;  %v2270_v5 = vld [vmem:[%s18587_s0 + $0x1890] sm:$0xf] }
 0x2b5   : > { %2269 = vst [vmem:[%s18592_s6 + $0xc44] sm:$0xf] %v2268_v4  ;;  %v2272_v6 = vld [vmem:[%s18587_s0 + $0x1898] sm:$0xf]  ;;  %v2274_v7 = vld [vmem:[%s18587_s0 + $0x18a0] sm:$0xf] }
 0x2b6   : > { %2271 = vst [vmem:[%s18592_s6 + $0xc48] sm:$0xf] %v2270_v5  ;;  %2273 = vst [vmem:[%s18592_s6 + $0xc4c] sm:$0xf] %v2272_v6  ;;  %v2276_v8 = vld [vmem:[%s18587_s0 + $0x18a8] sm:$0xf] }
 0x2b7   : > { %2275 = vst [vmem:[%s18592_s6 + $0xc50] sm:$0xf] %v2274_v7  ;;  %v2278_v9 = vld [vmem:[%s18587_s0 + $0x18b0] sm:$0xf]  ;;  %v2280_v10 = vld [vmem:[%s18587_s0 + $0x18b8] sm:$0xf] }
 0x2b8   : > { %2277 = vst [vmem:[%s18592_s6 + $0xc54] sm:$0xf] %v2276_v8  ;;  %2279 = vst [vmem:[%s18592_s6 + $0xc58] sm:$0xf] %v2278_v9  ;;  %v2282_v11 = vld [vmem:[%s18587_s0 + $0x18c0] sm:$0xf] }
 0x2b9   : > { %2281 = vst [vmem:[%s18592_s6 + $0xc5c] sm:$0xf] %v2280_v10  ;;  %v2284_v12 = vld [vmem:[%s18587_s0 + $0x18c8] sm:$0xf]  ;;  %v2286_v13 = vld [vmem:[%s18587_s0 + $0x18d0] sm:$0xf] }
 0x2ba   : > { %2283 = vst [vmem:[%s18592_s6 + $0xc60] sm:$0xf] %v2282_v11  ;;  %2285 = vst [vmem:[%s18592_s6 + $0xc64] sm:$0xf] %v2284_v12  ;;  %v2288_v14 = vld [vmem:[%s18587_s0 + $0x18d8] sm:$0xf] }
 0x2bb   : > { %2287 = vst [vmem:[%s18592_s6 + $0xc68] sm:$0xf] %v2286_v13  ;;  %v2290_v15 = vld [vmem:[%s18587_s0 + $0x18e0] sm:$0xf]  ;;  %v2292_v16 = vld [vmem:[%s18587_s0 + $0x18e8] sm:$0xf] }
 0x2bc   : > { %2289 = vst [vmem:[%s18592_s6 + $0xc6c] sm:$0xf] %v2288_v14  ;;  %2291 = vst [vmem:[%s18592_s6 + $0xc70] sm:$0xf] %v2290_v15  ;;  %v2294_v17 = vld [vmem:[%s18587_s0 + $0x18f0] sm:$0xf] }
 0x2bd   : > { %2293 = vst [vmem:[%s18592_s6 + $0xc74] sm:$0xf] %v2292_v16  ;;  %v2296_v18 = vld [vmem:[%s18587_s0 + $0x18f8] sm:$0xf]  ;;  %v2298_v19 = vld [vmem:[%s18587_s0 + $0x1900] sm:$0xf] }
 0x2be   : > { %2295 = vst [vmem:[%s18592_s6 + $0xc78] sm:$0xf] %v2294_v17  ;;  %2297 = vst [vmem:[%s18592_s6 + $0xc7c] sm:$0xf] %v2296_v18  ;;  %v2300_v20 = vld [vmem:[%s18587_s0 + $0x1908] sm:$0xf] }
 0x2bf   : > { %2299 = vst [vmem:[%s18592_s6 + $0xc80] sm:$0xf] %v2298_v19  ;;  %v2302_v21 = vld [vmem:[%s18587_s0 + $0x1910] sm:$0xf]  ;;  %v2304_v22 = vld [vmem:[%s18587_s0 + $0x1918] sm:$0xf] }
 0x2c0   : > { %2301 = vst [vmem:[%s18592_s6 + $0xc84] sm:$0xf] %v2300_v20  ;;  %2303 = vst [vmem:[%s18592_s6 + $0xc88] sm:$0xf] %v2302_v21  ;;  %v2306_v23 = vld [vmem:[%s18587_s0 + $0x1920] sm:$0xf] }
 0x2c1   : > { %2305 = vst [vmem:[%s18592_s6 + $0xc8c] sm:$0xf] %v2304_v22  ;;  %v2308_v24 = vld [vmem:[%s18587_s0 + $0x1928] sm:$0xf]  ;;  %v2310_v25 = vld [vmem:[%s18587_s0 + $0x1930] sm:$0xf] }
 0x2c2   : > { %2307 = vst [vmem:[%s18592_s6 + $0xc90] sm:$0xf] %v2306_v23  ;;  %2309 = vst [vmem:[%s18592_s6 + $0xc94] sm:$0xf] %v2308_v24  ;;  %v2312_v26 = vld [vmem:[%s18587_s0 + $0x1938] sm:$0xf] }
 0x2c3   : > { %2311 = vst [vmem:[%s18592_s6 + $0xc98] sm:$0xf] %v2310_v25  ;;  %v2314_v27 = vld [vmem:[%s18587_s0 + $0x1940] sm:$0xf]  ;;  %v2316_v28 = vld [vmem:[%s18587_s0 + $0x1948] sm:$0xf] }
 0x2c4   : > { %2313 = vst [vmem:[%s18592_s6 + $0xc9c] sm:$0xf] %v2312_v26  ;;  %2315 = vst [vmem:[%s18592_s6 + $0xca0] sm:$0xf] %v2314_v27  ;;  %v2318_v29 = vld [vmem:[%s18587_s0 + $0x1950] sm:$0xf] }
 0x2c5   : > { %2317 = vst [vmem:[%s18592_s6 + $0xca4] sm:$0xf] %v2316_v28  ;;  %v2320_v30 = vld [vmem:[%s18587_s0 + $0x1958] sm:$0xf]  ;;  %v2322_v31 = vld [vmem:[%s18587_s0 + $0x1960] sm:$0xf] }
 0x2c6   : > { %2319 = vst [vmem:[%s18592_s6 + $0xca8] sm:$0xf] %v2318_v29  ;;  %2321 = vst [vmem:[%s18592_s6 + $0xcac] sm:$0xf] %v2320_v30  ;;  %v2324_v32 = vld [vmem:[%s18587_s0 + $0x1968] sm:$0xf] }
 0x2c7   : > { %2323 = vst [vmem:[%s18592_s6 + $0xcb0] sm:$0xf] %v2322_v31  ;;  %v2326_v33 = vld [vmem:[%s18587_s0 + $0x1970] sm:$0xf]  ;;  %v2328_v34 = vld [vmem:[%s18587_s0 + $0x1978] sm:$0xf] }
 0x2c8   : > { %2325 = vst [vmem:[%s18592_s6 + $0xcb4] sm:$0xf] %v2324_v32  ;;  %2327 = vst [vmem:[%s18592_s6 + $0xcb8] sm:$0xf] %v2326_v33  ;;  %v2330_v35 = vld [vmem:[%s18587_s0 + $0x1980] sm:$0xf] }
 0x2c9   : > { %2329 = vst [vmem:[%s18592_s6 + $0xcbc] sm:$0xf] %v2328_v34  ;;  %v2332_v36 = vld [vmem:[%s18587_s0 + $0x1988] sm:$0xf]  ;;  %v2334_v37 = vld [vmem:[%s18587_s0 + $0x1990] sm:$0xf] }
 0x2ca   : > { %2331 = vst [vmem:[%s18592_s6 + $0xcc0] sm:$0xf] %v2330_v35  ;;  %2333 = vst [vmem:[%s18592_s6 + $0xcc4] sm:$0xf] %v2332_v36  ;;  %v2336_v38 = vld [vmem:[%s18587_s0 + $0x1998] sm:$0xf] }
 0x2cb   : > { %2335 = vst [vmem:[%s18592_s6 + $0xcc8] sm:$0xf] %v2334_v37  ;;  %v2338_v39 = vld [vmem:[%s18587_s0 + $0x19a0] sm:$0xf]  ;;  %v2340_v40 = vld [vmem:[%s18587_s0 + $0x19a8] sm:$0xf] }
 0x2cc   : > { %2337 = vst [vmem:[%s18592_s6 + $0xccc] sm:$0xf] %v2336_v38  ;;  %2339 = vst [vmem:[%s18592_s6 + $0xcd0] sm:$0xf] %v2338_v39  ;;  %v2342_v41 = vld [vmem:[%s18587_s0 + $0x19b0] sm:$0xf] }
 0x2cd   : > { %2341 = vst [vmem:[%s18592_s6 + $0xcd4] sm:$0xf] %v2340_v40  ;;  %v2344_v42 = vld [vmem:[%s18587_s0 + $0x19b8] sm:$0xf]  ;;  %v2346_v43 = vld [vmem:[%s18587_s0 + $0x19c0] sm:$0xf] }
 0x2ce   : > { %2343 = vst [vmem:[%s18592_s6 + $0xcd8] sm:$0xf] %v2342_v41  ;;  %2345 = vst [vmem:[%s18592_s6 + $0xcdc] sm:$0xf] %v2344_v42  ;;  %v2348_v44 = vld [vmem:[%s18587_s0 + $0x19c8] sm:$0xf] }
 0x2cf   : > { %2347 = vst [vmem:[%s18592_s6 + $0xce0] sm:$0xf] %v2346_v43  ;;  %v2350_v45 = vld [vmem:[%s18587_s0 + $0x19d0] sm:$0xf]  ;;  %v2352_v46 = vld [vmem:[%s18587_s0 + $0x19d8] sm:$0xf] }
 0x2d0   : > { %2349 = vst [vmem:[%s18592_s6 + $0xce4] sm:$0xf] %v2348_v44  ;;  %2351 = vst [vmem:[%s18592_s6 + $0xce8] sm:$0xf] %v2350_v45  ;;  %v2354_v47 = vld [vmem:[%s18587_s0 + $0x19e0] sm:$0xf] }
 0x2d1   : > { %2353 = vst [vmem:[%s18592_s6 + $0xcec] sm:$0xf] %v2352_v46  ;;  %v2356_v48 = vld [vmem:[%s18587_s0 + $0x19e8] sm:$0xf]  ;;  %v2358_v49 = vld [vmem:[%s18587_s0 + $0x19f0] sm:$0xf] }
 0x2d2   : > { %2355 = vst [vmem:[%s18592_s6 + $0xcf0] sm:$0xf] %v2354_v47  ;;  %2357 = vst [vmem:[%s18592_s6 + $0xcf4] sm:$0xf] %v2356_v48  ;;  %v2360_v50 = vld [vmem:[%s18587_s0 + $0x19f8] sm:$0xf] }
 0x2d3   : > { %2359 = vst [vmem:[%s18592_s6 + $0xcf8] sm:$0xf] %v2358_v49  ;;  %v2362_v51 = vld [vmem:[%s18587_s0 + $0x1a00] sm:$0xf]  ;;  %v2364_v52 = vld [vmem:[%s18587_s0 + $0x1a08] sm:$0xf] }
 0x2d4   : > { %2361 = vst [vmem:[%s18592_s6 + $0xcfc] sm:$0xf] %v2360_v50  ;;  %2363 = vst [vmem:[%s18592_s6 + $0xd00] sm:$0xf] %v2362_v51  ;;  %v2366_v53 = vld [vmem:[%s18587_s0 + $0x1a10] sm:$0xf] }
 0x2d5   : > { %2365 = vst [vmem:[%s18592_s6 + $0xd04] sm:$0xf] %v2364_v52  ;;  %v2368_v54 = vld [vmem:[%s18587_s0 + $0x1a18] sm:$0xf]  ;;  %v2370_v55 = vld [vmem:[%s18587_s0 + $0x1a20] sm:$0xf] }
 0x2d6   : > { %2367 = vst [vmem:[%s18592_s6 + $0xd08] sm:$0xf] %v2366_v53  ;;  %2369 = vst [vmem:[%s18592_s6 + $0xd0c] sm:$0xf] %v2368_v54  ;;  %v2372_v56 = vld [vmem:[%s18587_s0 + $0x1a28] sm:$0xf] }
 0x2d7   : > { %2371 = vst [vmem:[%s18592_s6 + $0xd10] sm:$0xf] %v2370_v55  ;;  %v2374_v57 = vld [vmem:[%s18587_s0 + $0x1a30] sm:$0xf]  ;;  %v2376_v58 = vld [vmem:[%s18587_s0 + $0x1a38] sm:$0xf] }
 0x2d8   : > { %2373 = vst [vmem:[%s18592_s6 + $0xd14] sm:$0xf] %v2372_v56  ;;  %2375 = vst [vmem:[%s18592_s6 + $0xd18] sm:$0xf] %v2374_v57  ;;  %v2378_v59 = vld [vmem:[%s18587_s0 + $0x1a40] sm:$0xf] }
 0x2d9   : > { %2377 = vst [vmem:[%s18592_s6 + $0xd1c] sm:$0xf] %v2376_v58  ;;  %v2380_v60 = vld [vmem:[%s18587_s0 + $0x1a48] sm:$0xf]  ;;  %v2382_v61 = vld [vmem:[%s18587_s0 + $0x1a50] sm:$0xf] }
 0x2da   : > { %2379 = vst [vmem:[%s18592_s6 + $0xd20] sm:$0xf] %v2378_v59  ;;  %2381 = vst [vmem:[%s18592_s6 + $0xd24] sm:$0xf] %v2380_v60  ;;  %v2384_v62 = vld [vmem:[%s18587_s0 + $0x1a58] sm:$0xf] }
 0x2db   : > { %2383 = vst [vmem:[%s18592_s6 + $0xd28] sm:$0xf] %v2382_v61  ;;  %v2386_v63 = vld [vmem:[%s18587_s0 + $0x1a60] sm:$0xf]  ;;  %v2388_v0 = vld [vmem:[%s18587_s0 + $0x1a68] sm:$0xf] }
 0x2dc   : > { %2385 = vst [vmem:[%s18592_s6 + $0xd2c] sm:$0xf] %v2384_v62  ;;  %2387 = vst [vmem:[%s18592_s6 + $0xd30] sm:$0xf] %v2386_v63  ;;  %v2390_v1 = vld [vmem:[%s18587_s0 + $0x1a70] sm:$0xf] }
 0x2dd   : > { %2389 = vst [vmem:[%s18592_s6 + $0xd34] sm:$0xf] %v2388_v0  ;;  %v2392_v2 = vld [vmem:[%s18587_s0 + $0x1a78] sm:$0xf]  ;;  %v2394_v3 = vld [vmem:[%s18587_s0 + $0x1a80] sm:$0xf] }
 0x2de   : > { %2391 = vst [vmem:[%s18592_s6 + $0xd38] sm:$0xf] %v2390_v1  ;;  %2393 = vst [vmem:[%s18592_s6 + $0xd3c] sm:$0xf] %v2392_v2  ;;  %v2396_v4 = vld [vmem:[%s18587_s0 + $0x1a88] sm:$0xf] }
 0x2df   : > { %2395 = vst [vmem:[%s18592_s6 + $0xd40] sm:$0xf] %v2394_v3  ;;  %v2398_v5 = vld [vmem:[%s18587_s0 + $0x1a90] sm:$0xf]  ;;  %v2400_v6 = vld [vmem:[%s18587_s0 + $0x1a98] sm:$0xf] }
 0x2e0   : > { %2397 = vst [vmem:[%s18592_s6 + $0xd44] sm:$0xf] %v2396_v4  ;;  %2399 = vst [vmem:[%s18592_s6 + $0xd48] sm:$0xf] %v2398_v5  ;;  %v2402_v7 = vld [vmem:[%s18587_s0 + $0x1aa0] sm:$0xf] }
 0x2e1   : > { %2401 = vst [vmem:[%s18592_s6 + $0xd4c] sm:$0xf] %v2400_v6  ;;  %v2404_v8 = vld [vmem:[%s18587_s0 + $0x1aa8] sm:$0xf]  ;;  %v2406_v9 = vld [vmem:[%s18587_s0 + $0x1ab0] sm:$0xf] }
 0x2e2   : > { %2403 = vst [vmem:[%s18592_s6 + $0xd50] sm:$0xf] %v2402_v7  ;;  %2405 = vst [vmem:[%s18592_s6 + $0xd54] sm:$0xf] %v2404_v8  ;;  %v2408_v10 = vld [vmem:[%s18587_s0 + $0x1ab8] sm:$0xf] }
 0x2e3   : > { %2407 = vst [vmem:[%s18592_s6 + $0xd58] sm:$0xf] %v2406_v9  ;;  %v2410_v11 = vld [vmem:[%s18587_s0 + $0x1ac0] sm:$0xf]  ;;  %v2412_v12 = vld [vmem:[%s18587_s0 + $0x1ac8] sm:$0xf] }
 0x2e4   : > { %2409 = vst [vmem:[%s18592_s6 + $0xd5c] sm:$0xf] %v2408_v10  ;;  %2411 = vst [vmem:[%s18592_s6 + $0xd60] sm:$0xf] %v2410_v11  ;;  %v2414_v13 = vld [vmem:[%s18587_s0 + $0x1ad0] sm:$0xf] }
 0x2e5   : > { %2413 = vst [vmem:[%s18592_s6 + $0xd64] sm:$0xf] %v2412_v12  ;;  %v2416_v14 = vld [vmem:[%s18587_s0 + $0x1ad8] sm:$0xf]  ;;  %v2418_v15 = vld [vmem:[%s18587_s0 + $0x1ae0] sm:$0xf] }
 0x2e6   : > { %2415 = vst [vmem:[%s18592_s6 + $0xd68] sm:$0xf] %v2414_v13  ;;  %2417 = vst [vmem:[%s18592_s6 + $0xd6c] sm:$0xf] %v2416_v14  ;;  %v2420_v16 = vld [vmem:[%s18587_s0 + $0x1ae8] sm:$0xf] }
 0x2e7   : > { %2419 = vst [vmem:[%s18592_s6 + $0xd70] sm:$0xf] %v2418_v15  ;;  %v2422_v17 = vld [vmem:[%s18587_s0 + $0x1af0] sm:$0xf]  ;;  %v2424_v18 = vld [vmem:[%s18587_s0 + $0x1af8] sm:$0xf] }
 0x2e8   : > { %2421 = vst [vmem:[%s18592_s6 + $0xd74] sm:$0xf] %v2420_v16  ;;  %2423 = vst [vmem:[%s18592_s6 + $0xd78] sm:$0xf] %v2422_v17 }
 0x2e9   : > { %2425 = vst [vmem:[%s18592_s6 + $0xd7c] sm:$0xf] %v2424_v18 }
 0x2ea PF: > { %p14961_p0 = scmp.ge.s32.totalorder %s17961_s22, 1  ;;  %p7667_p1 = scmp.lt.s32.totalorder %s17961_s22, 7 }
 0x2ec   : > { %p7668_p2 = pnand %p14961_p0, %p7667_p1 }
 0x2ed   : > { %s7681_s5 = sand.u32 (!%p7668_p2), 1, %s17929_s14   ;;  %s7707_s23 = sand.u32 (!%p7668_p2), 1, %s17921_s12  }
 0x2ee   : > { %7671 = sbr.rel (%p7668_p2) target bundleno = 1600 (0x640), region = 99  ;;  %p7713_p3 = scmp.lt.s32.totalorder (!%p7668_p2), %s17949_s19, 1 }
 0x2ef   : > { %s16975_s28 = smul.u32 (!%p7668_p2), 3456, %s7681_s5  ;;  %s7674_s27 = sand.u32 (!%p7668_p2), 1, %s17937_s16  }
 0x2f0   : > { %s20324_s0 = smul.u32 (!%p7668_p2), 36, %s7707_s23  ;;  %p15664_p4 = scmp.ne.s32.totalorder (!%p7668_p2), %s17945_s18, 0 }
 0x2f1   : > { %s20326_s7 = scalar_lea.vmem (!%p7668_p2), [#allocation4], %s16975_s28  ;;  %s16974_s29 = smul.u32 (!%p7668_p2), 1944, %s7674_s27 }
 0x2f2   : > { %v17065_v19 = vld [vmem:[%s20326_s7 + $0x40] sm:$0xff] (!%p7668_p2)   ;;  %v17069_v23 = vld [vmem:[%s20326_s7 + $0x48] sm:$0xff] (!%p7668_p2)   ;;  %v17073_v27 = vld [vmem:[%s20326_s7 + $0x50] sm:$0xff] (!%p7668_p2)   ;;  %s21356_s4 = scalar_lea.vmem (!%p7668_p2), [#allocation5], %s20324_s0 }
 0x2f3   : > { %v17066_v20 = vld [vmem:[%s20326_s7 + $0xc0] sm:$0xff] (!%p7668_p2)   ;;  %15714 = vmatprep.subr.bf16.mxu0 (!%p7668_p2), %v17065_v19  ;;  %v17070_v24 = vld [vmem:[%s20326_s7 + $0xc8] sm:$0xff] (!%p7668_p2)   ;;  %v17074_v28 = vld [vmem:[%s20326_s7 + $0xd0] sm:$0xff] (!%p7668_p2)   ;;  %s20368_s16 = scalar_lea.vmem (!%p7668_p2), [#allocation3], %s16974_s29 }
 0x2f4   : > { %v17067_v21 = vld [vmem:[%s20326_s7] sm:$0xff] (!%p7668_p2)   ;;  %15760 = vmatprep.subr.bf16.mxu1 (!%p7668_p2), %v17066_v20  ;;  %v17071_v25 = vld [vmem:[%s20326_s7 + $0x8] sm:$0xff] (!%p7668_p2)   ;;  %v17075_v29 = vld [vmem:[%s20326_s7 + $0x10] sm:$0xff] (!%p7668_p2)  }
 0x2f5   : > { %s20330_s11 = scalar_select %p7713_p3, %s17949_s19, 1  ;;  %v17068_v22 = vld [vmem:[%s20326_s7 + $0x80] sm:$0xff]   ;;  %15715 = vmatpush3.bf16.msra.mxu0 %v17067_v21  ;;  %v17072_v26 = vld [vmem:[%s20326_s7 + $0x88] sm:$0xff]   ;;  %v17076_v30 = vld [vmem:[%s20326_s7 + $0x90] sm:$0xff]  }
 0x2f6   : > { %15761 = vmatpush3.bf16.msra.mxu1 %v17068_v22  ;;  %15716 = vmatprep.subr.bf16.mxu0 %v17069_v23  ;;  %v17077_v31 = vld [vmem:[%s20326_s7 + $0x58] sm:$0xff]   ;;  %v17081_v35 = vld [vmem:[%s20326_s7 + $0x60] sm:$0xff]   ;;  %v17085_v39 = vld [vmem:[%s20326_s7 + $0x68] sm:$0xff]  }
 0x2f7   : > { %s7715_s26 = scalar_lea.vmem %s21421_s2, %s20330_s11  ;;  %15762 = vmatprep.subr.bf16.mxu1 %v17070_v24  ;;  %v17078_v32 = vld [vmem:[%s20326_s7 + $0xd8] sm:$0xff]   ;;  %v17082_v36 = vld [vmem:[%s20326_s7 + $0xe0] sm:$0xff]   ;;  %v17086_v40 = vld [vmem:[%s20326_s7 + $0xe8] sm:$0xff]  }
 0x2f8   : > { %v17079_v33 = vld [vmem:[%s20326_s7 + $0x18] sm:$0xff]   ;;  %v17083_v37 = vld [vmem:[%s20326_s7 + $0x20] sm:$0xff]   ;;  %v17087_v41 = vld [vmem:[%s20326_s7 + $0x28] sm:$0xff]  }
 0x2f9   : > { %15717 = vmatpush3.bf16.msra.mxu0 %v17071_v25  ;;  %v17080_v34 = vld [vmem:[%s20326_s7 + $0x98] sm:$0xff]   ;;  %v17084_v38 = vld [vmem:[%s20326_s7 + $0xa0] sm:$0xff]   ;;  %v17088_v42 = vld [vmem:[%s20326_s7 + $0xa8] sm:$0xff]  }
 0x2fa   : > { %15763 = vmatpush3.bf16.msra.mxu1 %v17072_v26  ;;  %15718 = vmatprep.subr.bf16.mxu0 %v17073_v27  ;;  %v17089_v43 = vld [vmem:[%s20326_s7 + $0x70] sm:$0xff]   ;;  %v17093_v47 = vld [vmem:[%s20326_s7 + $0x78] sm:$0xff]   ;;  %v17103_v55 = vld [vmem:[%s20326_s7 + $0x140] sm:$0xff]  }
 0x2fb   : > { %15764 = vmatprep.subr.bf16.mxu1 %v17074_v28  ;;  %v17090_v44 = vld [vmem:[%s20326_s7 + $0xf0] sm:$0xff]   ;;  %v17094_v48 = vld [vmem:[%s20326_s7 + $0xf8] sm:$0xff]   ;;  %v17104_v56 = vld [vmem:[%s20326_s7 + $0x100] sm:$0xff]  }
 0x2fc   : > { %v17091_v45 = vld [vmem:[%s20326_s7 + $0x30] sm:$0xff]   ;;  %v17095_v49 = vld [vmem:[%s20326_s7 + $0x38] sm:$0xff]   ;;  %v17105_v57 = vld [vmem:[%s20326_s7 + $0x148] sm:$0xff]  }
 0x2fd   : > { %15719 = vmatpush3.bf16.msra.mxu0 %v17075_v29  ;;  %v17092_v46 = vld [vmem:[%s20326_s7 + $0xb0] sm:$0xff]   ;;  %v17096_v50 = vld [vmem:[%s20326_s7 + $0xb8] sm:$0xff]   ;;  %v17106_v58 = vld [vmem:[%s20326_s7 + $0x108] sm:$0xff]  }
 0x2fe   : > { %15765 = vmatpush3.bf16.msra.mxu1 %v17076_v30  ;;  %15720 = vmatprep.subr.bf16.mxu0 %v17077_v31  ;;  %v17097_v51 = vld [vmem:[%s20368_s16] ss:$216 sps:$4 sm:$0xff]   ;;  %v17099_v52 = vld [vmem:[%s20368_s16 + $0x4] ss:$216 sps:$4 sm:$0xff]   ;;  %v17107_v59 = vld [vmem:[%s20368_s16 + $0x1b4] ss:$216 sps:$4 sm:$0xff]  }
 0x2ff   : > { %15766 = vmatprep.subr.bf16.mxu1 %v17078_v32  ;;  %v17100_v53 = vld [vmem:[%s20368_s16 + $0x8] ss:$216 sps:$4 sm:$0xff]   ;;  %v17102_v54 = vld [vmem:[%s20368_s16 + $0xc] ss:$216 sps:$4 sm:$0xff]   ;;  %12718 = vmatprep.mubr.bf16.mxu0 %v17099_v52  ;;  %v17109_v60 = vld [vmem:[%s20368_s16 + $0x1bc] ss:$216 sps:$4 sm:$0xff]  }
 0x300   : > { %12790 = vmatprep.mubr.bf16.mxu1 %v17102_v54  ;;  %v17111_v61 = vld [vmem:[%s20368_s16 + $0x1b0] ss:$216 sps:$4 sm:$0xff]   ;;  %v17117_v3 = vld [vmem:[%s20326_s7 + $0x1c8] sm:$0xff]   ;;  %v17133_v17 = vld [vmem:[%s20368_s16 + $0x514] ss:$216 sps:$4 sm:$0xff]  }
 0x301   : > { %15721 = vmatpush3.bf16.msra.mxu0 %v17079_v33  ;;  %v17112_v62 = vld [vmem:[%s20368_s16 + $0x1b8] ss:$216 sps:$4 sm:$0xff]   ;;  %v17115_v1 = vld [vmem:[%s20326_s7 + $0x150] sm:$0xff]   ;;  %v17135_v18 = vld [vmem:[%s20368_s16 + $0x51c] ss:$216 sps:$4 sm:$0xff]  }
 0x302   : > { %15767 = vmatpush3.bf16.msra.mxu1 %v17080_v34  ;;  %15722 = vmatprep.subr.bf16.mxu0 %v17081_v35  ;;  %v17113_v63 = vld [vmem:[%s20326_s7 + $0x1c0] sm:$0xff]   ;;  %v17116_v2 = vld [vmem:[%s20326_s7 + $0x110] sm:$0xff]   ;;  %v17118_v4 = vld [vmem:[%s20326_s7 + $0x188] sm:$0xff]  }
 0x303   : > { %15768 = vmatprep.subr.bf16.mxu1 %v17082_v36  ;;  %v17114_v0 = vld [vmem:[%s20326_s7 + $0x180] sm:$0xff]   ;;  %v17121_v6 = vld [vmem:[%s20368_s16 + $0x36c] ss:$216 sps:$4 sm:$0xff]   ;;  %v17125_v9 = vld [vmem:[%s20368_s16 + $0x368] ss:$216 sps:$4 sm:$0xff]  }
 0x304   : > { %v17119_v5 = vld [vmem:[%s20368_s16 + $0x364] ss:$216 sps:$4 sm:$0xff]   ;;  %v17123_v7 = vld [vmem:[%s20326_s7 + $0x158] sm:$0xff]   ;;  %v17124_v8 = vld [vmem:[%s20368_s16 + $0x360] ss:$216 sps:$4 sm:$0xff]  }
 0x305   : > { %15723 = vmatpush3.bf16.msra.mxu0 %v17083_v37  ;;  %v17126_v10 = vld [vmem:[%s20326_s7 + $0x118] sm:$0xff]   ;;  %v17127_v11 = vld [vmem:[%s20326_s7 + $0x1d0] sm:$0xff]   ;;  %v17129_v13 = vld [vmem:[%s20326_s7 + $0x160] sm:$0xff]  }
 0x306   : > { %15769 = vmatpush3.bf16.msra.mxu1 %v17084_v38  ;;  %15724 = vmatprep.subr.bf16.mxu0 %v17085_v39  ;;  %v17128_v12 = vld [vmem:[%s20326_s7 + $0x190] sm:$0xff]   ;;  %v17130_v14 = vld [vmem:[%s20326_s7 + $0x1d8] sm:$0xff]   ;;  %v17131_v15 = vld [vmem:[%s20326_s7 + $0x120] sm:$0xff]  }
 0x307   : > { %15770 = vmatprep.subr.bf16.mxu1 %v17086_v40  ;;  %v17132_v16 = vld [vmem:[%s20326_s7 + $0x198] sm:$0xff]   ;;  %v17139_v21 = vld [vmem:[%s20326_s7 + $0x1e0] sm:$0xff]   ;;  %v17140_v22 = vld [vmem:[%s20326_s7 + $0x168] sm:$0xff]  }
 0x308   : > { %v17137_v19 = vld [vmem:[%s20368_s16 + $0x510] ss:$216 sps:$4 sm:$0xff]   ;;  %v17142_v24 = vld [vmem:[%s20326_s7 + $0x128] sm:$0xff]  }
 0x309   : > { %15725 = vmatpush3.bf16.msra.mxu0 %v17087_v41  ;;  %v17138_v20 = vld [vmem:[%s20368_s16 + $0x518] ss:$216 sps:$4 sm:$0xff]   ;;  %v17145_v27 = vld [vmem:[%s20326_s7 + $0x170] sm:$0xff]  }
 0x30a   : > { %15771 = vmatpush3.bf16.msra.mxu1 %v17088_v42  ;;  %15726 = vmatprep.subr.bf16.mxu0 %v17089_v43  ;;  %v17141_v23 = vld [vmem:[%s20326_s7 + $0x1a0] sm:$0xff]   ;;  %v17143_v25 = vld [vmem:[%s20326_s7 + $0x1e8] sm:$0xff]   ;;  %v7935_v30 = vld [vmem:[%s20368_s16 + $0x6c8] sm:$0xff] }
 0x30b   : > { %15772 = vmatprep.subr.bf16.mxu1 %v17090_v44  ;;  %v17144_v26 = vld [vmem:[%s20326_s7 + $0x1a8] sm:$0xff]   ;;  %v15181_v32 = vcombine.high %v7935_v30, %v7935_v30  ;;  %v17148_v33 = vld [vmem:[%s20326_s7 + $0x130] sm:$0xff]   ;;  %v15180_v34 = vcombine.low %v7935_v30, %v7935_v30  ;;  %v17153_v37 = vld [vmem:[%s20326_s7 + $0x178] sm:$0xff]  }
 0x30c   : > { %v7934_v28 = vld [vmem:[%s20368_s16 + $0x6c0] sm:$0xff]  ;;  %v17154_v38 = vld [vmem:[%s20326_s7 + $0x138] sm:$0xff]   ;;  %v17174_v54 = vld [vmem:[%s20326_s7 + $0x280] sm:$0xff]  }
 0x30d   : > { %15727 = vmatpush3.bf16.msra.mxu0 %v17091_v45  ;;  %v15179_v29 = vcombine.high %v7934_v28, %v7934_v28  ;;  %v15178_v31 = vcombine.low %v7934_v28, %v7934_v28  ;;  %v17151_v35 = vld [vmem:[%s20326_s7 + $0x1f0] sm:$0xff]   ;;  %v17155_v39 = vld [vmem:[%s20326_s7 + $0x1f8] sm:$0xff]   ;;  %v17163_v45 = vld [vmem:[%s20326_s7 + $0x240] sm:$0xff]  }
 0x30e   : > { %15773 = vmatpush3.bf16.msra.mxu1 %v17092_v46  ;;  %15728 = vmatprep.subr.bf16.mxu0 %v17093_v47  ;;  %v17152_v36 = vld [vmem:[%s20326_s7 + $0x1b0] sm:$0xff]   ;;  %v17156_v40 = vld [vmem:[%s20326_s7 + $0x1b8] sm:$0xff]   ;;  %v17164_v46 = vld [vmem:[%s20326_s7 + $0x200] sm:$0xff]  }
 0x30f   : > { %15774 = vmatprep.subr.bf16.mxu1 %v17094_v48  ;;  %v17157_v41 = vld [vmem:[%s20368_s16 + $0x10] ss:$216 sps:$4 sm:$0xff]   ;;  %v17159_v42 = vld [vmem:[%s20368_s16 + $0x14] ss:$216 sps:$4 sm:$0xff]   ;;  %v17165_v47 = vld [vmem:[%s20326_s7 + $0x248] sm:$0xff]  }
 0x310   : > { %v17160_v43 = vld [vmem:[%s20368_s16 + $0x18] ss:$216 sps:$4 sm:$0xff]   ;;  %v17162_v44 = vld [vmem:[%s20368_s16 + $0x1c] ss:$216 sps:$4 sm:$0xff]   ;;  %v17172_v52 = vld [vmem:[%s20368_s16 + $0x1c8] ss:$216 sps:$4 sm:$0xff]  }
 0x311   : > { %15729 = vmatpush3.bf16.msra.mxu0 %v17095_v49  ;;  %v17166_v48 = vld [vmem:[%s20326_s7 + $0x208] sm:$0xff]   ;;  %v17214_v28 = vld [vmem:[%s20326_s7 + $0x238] sm:$0xff]  }
 0x312   : > { %15775 = vmatpush3.bf16.msra.mxu1 %v17096_v50  ;;  %15806 = vmatprep.subr.bf16.mxu0 %v17103_v55  ;;  %v17167_v49 = vld [vmem:[%s20368_s16 + $0x1c4] ss:$216 sps:$4 sm:$0xff]   ;;  %v17216_v30 = vld [vmem:[%s20326_s7 + $0x2b8] sm:$0xff]  }
 0x313   : > { %15852 = vmatprep.subr.bf16.mxu1 %v17113_v63  ;;  %v17169_v50 = vld [vmem:[%s20368_s16 + $0x1cc] ss:$216 sps:$4 sm:$0xff]   ;;  %v17185_v63 = vld [vmem:[%s20368_s16 + $0x378] ss:$216 sps:$4 sm:$0xff]  }
 0x314   : > { %12719 = vmatmul.mubr.bf16.vlgmr.msra.gmra.mrb[0].mxu0 %v17097_v51  ;;  %v17171_v51 = vld [vmem:[%s20368_s16 + $0x1c0] ss:$216 sps:$4 sm:$0xff]  }
 0x315   : > { %12791 = vmatmul.mubr.bf16.vlgmr.msra.gmra.mrb[0].mxu1 %v17100_v53  ;;  %15807 = vmatpush3.bf16.msra.mxu0 %v17104_v56  ;;  %v17173_v53 = vld [vmem:[%s20326_s7 + $0x2c0] sm:$0xff]   ;;  %v17175_v55 = vld [vmem:[%s20326_s7 + $0x250] sm:$0xff]  }
 0x316   : > { %15808 = vmatprep.subr.bf16.mxu0 %v17105_v57  ;;  %12726 = vmatprep.mubr.bf16.mxu0 %v17107_v59  ;;  %v17176_v56 = vld [vmem:[%s20326_s7 + $0x210] sm:$0xff]   ;;  %v17177_v57 = vld [vmem:[%s20326_s7 + $0x2c8] sm:$0xff]  }
 0x317   : > { %12798 = vmatprep.mubr.bf16.mxu1 %v17109_v60  ;;  %15853 = vmatpush3.bf16.msra.mxu1 %v17114_v0  ;;  %v17179_v59 = vld [vmem:[%s20368_s16 + $0x374] ss:$216 sps:$4 sm:$0xff]  }
 0x318   : > { %15854 = vmatprep.subr.bf16.mxu1 %v17117_v3  ;;  %v17181_v60 = vld [vmem:[%s20368_s16 + $0x37c] ss:$216 sps:$4 sm:$0xff]  }
 0x319   : > { %15809 = vmatpush3.bf16.msra.mxu0 %v17106_v58  ;;  %v17178_v58 = vld [vmem:[%s20326_s7 + $0x288] sm:$0xff]   ;;  %v17186_v0 = vld [vmem:[%s20326_s7 + $0x218] sm:$0xff]   ;;  %v17189_v3 = vld [vmem:[%s20326_s7 + $0x260] sm:$0xff]  }
 0x31a   : > { %15810 = vmatprep.subr.bf16.mxu0 %v17115_v1  ;;  %v17187_v1 = vld [vmem:[%s20326_s7 + $0x2d0] sm:$0xff]  }
 0x31b   : > { %15855 = vmatpush3.bf16.msra.mxu1 %v17118_v4  ;;  %v17190_v4 = vld [vmem:[%s20326_s7 + $0x2d8] sm:$0xff]  }
 0x31c   : > { %12727 = vmatmul.mubr.bf16.gmra.mrb[4].mxu0 %v17111_v61  ;;  %15856 = vmatprep.subr.bf16.mxu1 %v17127_v11  ;;  %v17183_v61 = vld [vmem:[%s20326_s7 + $0x258] sm:$0xff]   ;;  %v17199_v11 = vld [vmem:[%s20326_s7 + $0x2e0] sm:$0xff]  }
 0x31d   : > { %12799 = vmatmul.mubr.bf16.gmra.mrb[4].mxu1 %v17112_v62  ;;  %15811 = vmatpush3.bf16.msra.mxu0 %v17116_v2  ;;  %v17184_v62 = vld [vmem:[%s20368_s16 + $0x370] ss:$216 sps:$4 sm:$0xff]  }
 0x31e   : > { %12734 = vmatprep.mubr.bf16.mxu0 %v17119_v5  ;;  %12806 = vmatprep.mubr.bf16.mxu1 %v17121_v6  ;;  %v17188_v2 = vld [vmem:[%s20326_s7 + $0x290] sm:$0xff]   ;;  %v17191_v5 = vld [vmem:[%s20326_s7 + $0x220] sm:$0xff]   ;;  %v17192_v6 = vld [vmem:[%s20326_s7 + $0x298] sm:$0xff]  }
 0x31f   : > { %15812 = vmatprep.subr.bf16.mxu0 %v17123_v7  ;;  %15857 = vmatpush3.bf16.msra.mxu1 %v17128_v12  ;;  %v17193_v7 = vld [vmem:[%s20368_s16 + $0x524] ss:$216 sps:$4 sm:$0xff]  }
 0x320   : > { %15858 = vmatprep.subr.bf16.mxu1 %v17130_v14  ;;  %v17200_v12 = vld [vmem:[%s20326_s7 + $0x268] sm:$0xff]  }
 0x321   : > { %15813 = vmatpush3.bf16.msra.mxu0 %v17126_v10  ;;  %v17198_v10 = vld [vmem:[%s20368_s16 + $0x528] ss:$216 sps:$4 sm:$0xff]  }
 0x322   : > { %15814 = vmatprep.subr.bf16.mxu0 %v17129_v13  ;;  %v17201_v13 = vld [vmem:[%s20326_s7 + $0x2a0] sm:$0xff]   ;;  %v17202_v14 = vld [vmem:[%s20326_s7 + $0x228] sm:$0xff]  }
 0x323   : > { %15859 = vmatpush3.bf16.msra.mxu1 %v17132_v16  ;;  %v17204_v16 = vld [vmem:[%s20326_s7 + $0x2a8] sm:$0xff]  }
 0x324   : > { %12735 = vmatmul.mubr.bf16.gmra.mrb[8].mxu0 %v17124_v8  ;;  %15860 = vmatprep.subr.bf16.mxu1 %v17139_v21  ;;  %v17195_v8 = vld [vmem:[%s20368_s16 + $0x52c] ss:$216 sps:$4 sm:$0xff]  }
 0x325   : > { %12807 = vmatmul.mubr.bf16.gmra.mrb[8].mxu1 %v17125_v9  ;;  %15815 = vmatpush3.bf16.msra.mxu0 %v17131_v15  ;;  %v17197_v9 = vld [vmem:[%s20368_s16 + $0x520] ss:$216 sps:$4 sm:$0xff]  }
 0x326   : > { %12742 = vmatprep.mubr.bf16.mxu0 %v17133_v17  ;;  %12814 = vmatprep.mubr.bf16.mxu1 %v17135_v18  ;;  %v17203_v15 = vld [vmem:[%s20326_s7 + $0x2e8] sm:$0xff]   ;;  %v17205_v17 = vld [vmem:[%s20326_s7 + $0x270] sm:$0xff]   ;;  %v7936_v18 = vld [vmem:[%s20368_s16 + $0x6d0] sm:$0xff] }
 0x327   : > { %15816 = vmatprep.subr.bf16.mxu0 %v17140_v22  ;;  %15861 = vmatpush3.bf16.msra.mxu1 %v17141_v23  ;;  %v17208_v22 = vld [vmem:[%s20326_s7 + $0x230] sm:$0xff]   ;;  %v15182_v23 = vcombine.low %v7936_v18, %v7936_v18 }
 0x328   : > { %15862 = vmatprep.subr.bf16.mxu1 %v17143_v25  ;;  %v17211_v25 = vld [vmem:[%s20326_s7 + $0x2f0] sm:$0xff]  }
 0x329   : > { %15817 = vmatpush3.bf16.msra.mxu0 %v17142_v24 }
 0x32a   : > { %15818 = vmatprep.subr.bf16.mxu0 %v17145_v27  ;;  %v17213_v27 = vld [vmem:[%s20326_s7 + $0x278] sm:$0xff]  }
 0x32b   : > { %15863 = vmatpush3.bf16.msra.mxu1 %v17144_v26  ;;  %v17212_v26 = vld [vmem:[%s20326_s7 + $0x2b0] sm:$0xff]  }
 0x32c   : > { %12743 = vmatmul.mubr.bf16.gmra.mrb[12].mxu0 %v17137_v19  ;;  %15864 = vmatprep.subr.bf16.mxu1 %v17151_v35  ;;  %v7937_v19 = vld [vmem:[%s20368_s16 + $0x6d8] sm:$0xff] }
 0x32d   : > { %12815 = vmatmul.mubr.bf16.gmra.mrb[12].mxu1 %v17138_v20  ;;  %12750 = vmatprep.mubr.bf16.mxu0 %v15179_v29  ;;  %v15183_v20 = vcombine.high %v7936_v18, %v7936_v18  ;;  %v15185_v21 = vcombine.high %v7937_v19, %v7937_v19  ;;  %v15184_v24 = vcombine.low %v7937_v19, %v7937_v19  ;;  %v17215_v29 = vld [vmem:[%s20326_s7 + $0x2f8] sm:$0xff]   ;;  %v17223_v35 = vld [vmem:[%s20326_s7 + $0x340] sm:$0xff]  }
 0x32e   : > { %12822 = vmatprep.mubr.bf16.mxu1 %v15181_v32  ;;  %15819 = vmatpush3.bf16.msra.mxu0 %v17148_v33  ;;  %v17219_v32 = vld [vmem:[%s20368_s16 + $0x24] ss:$216 sps:$4 sm:$0xff]   ;;  %v17220_v33 = vld [vmem:[%s20368_s16 + $0x28] ss:$216 sps:$4 sm:$0xff]  }
 0x32f   : > { %15865 = vmatpush3.bf16.msra.mxu1 %v17152_v36  ;;  %15820 = vmatprep.subr.bf16.mxu0 %v17153_v37  ;;  %v17224_v36 = vld [vmem:[%s20326_s7 + $0x300] sm:$0xff]   ;;  %v17225_v37 = vld [vmem:[%s20326_s7 + $0x348] sm:$0xff]   ;;  %v17274_v18 = vld [vmem:[%s20326_s7 + $0x338] sm:$0xff]  }
 0x330   : > { %15866 = vmatprep.subr.bf16.mxu1 %v17155_v39  ;;  %v17227_v39 = vld [vmem:[%s20368_s16 + $0x1d4] ss:$216 sps:$4 sm:$0xff]  }
 0x331   : > { %v17275_v19 = vld [vmem:[%s20326_s7 + $0x3f8] sm:$0xff]  }
 0x332   : > { %15821 = vmatpush3.bf16.msra.mxu0 %v17154_v38  ;;  %v17226_v38 = vld [vmem:[%s20326_s7 + $0x308] sm:$0xff]  }
 0x333   : > { %15867 = vmatpush3.bf16.msra.mxu1 %v17156_v40  ;;  %15898 = vmatprep.subr.bf16.mxu0 %v17163_v45  ;;  %v17229_v40 = vld [vmem:[%s20368_s16 + $0x1dc] ss:$216 sps:$4 sm:$0xff]   ;;  %v17235_v45 = vld [vmem:[%s20326_s7 + $0x350] sm:$0xff]  }
 0x334   : > { %12751 = vmatmul.mubr.bf16.gmra.mrb[16].mxu0 %v15178_v31  ;;  %15944 = vmatprep.subr.bf16.mxu1 %v17173_v53  ;;  %v17217_v31 = vld [vmem:[%s20368_s16 + $0x20] ss:$216 sps:$4 sm:$0xff]  }
 0x335   : > { %12823 = vmatmul.mubr.bf16.gmra.mrb[16].mxu1 %v15180_v34  ;;  %12862 = vmatprep.mubr.bf16.mxu0 %v17159_v42  ;;  %v17222_v34 = vld [vmem:[%s20368_s16 + $0x2c] ss:$216 sps:$4 sm:$0xff]   ;;  %v17232_v42 = vld [vmem:[%s20368_s16 + $0x1d8] ss:$216 sps:$4 sm:$0xff]   ;;  %v17245_v53 = vld [vmem:[%s20368_s16 + $0x388] ss:$216 sps:$4 sm:$0xff]  }
 0x336   : > { %12934 = vmatprep.mubr.bf16.mxu1 %v17162_v44  ;;  %v17234_v44 = vld [vmem:[%s20326_s7 + $0x380] sm:$0xff]  }
 0x33c   : > { %12863 = vmatmul.mubr.bf16.vlgmr.msra.gmra.mrb[20].mxu0 %v17157_v41  ;;  %v17231_v41 = vld [vmem:[%s20368_s16 + $0x1d0] ss:$216 sps:$4 sm:$0xff]  }
 0x33d   : > { %12935 = vmatmul.mubr.bf16.vlgmr.msra.gmra.mrb[20].mxu1 %v17160_v43  ;;  %15899 = vmatpush3.bf16.msra.mxu0 %v17164_v46  ;;  %v17233_v43 = vld [vmem:[%s20326_s7 + $0x3c0] sm:$0xff]   ;;  %v17236_v46 = vld [vmem:[%s20326_s7 + $0x310] sm:$0xff]  }
 0x33e   : > { %15900 = vmatprep.subr.bf16.mxu0 %v17165_v47  ;;  %12870 = vmatprep.mubr.bf16.mxu0 %v17167_v49  ;;  %v17237_v47 = vld [vmem:[%s20326_s7 + $0x3c8] sm:$0xff]  }
 0x33f   : > { %12942 = vmatprep.mubr.bf16.mxu1 %v17169_v50  ;;  %15945 = vmatpush3.bf16.msra.mxu1 %v17174_v54  ;;  %v17239_v49 = vld [vmem:[%s20368_s16 + $0x384] ss:$216 sps:$4 sm:$0xff]   ;;  %v17246_v54 = vld [vmem:[%s20326_s7 + $0x318] sm:$0xff]  }
 0x340   : > { %15946 = vmatprep.subr.bf16.mxu1 %v17177_v57  ;;  %v17241_v50 = vld [vmem:[%s20368_s16 + $0x38c] ss:$216 sps:$4 sm:$0xff]   ;;  %v17249_v57 = vld [vmem:[%s20326_s7 + $0x360] sm:$0xff]  }
 0x341   : > { %15901 = vmatpush3.bf16.msra.mxu0 %v17166_v48  ;;  %v17238_v48 = vld [vmem:[%s20326_s7 + $0x388] sm:$0xff]  }
 0x342   : > { %15902 = vmatprep.subr.bf16.mxu0 %v17175_v55  ;;  %v17247_v55 = vld [vmem:[%s20326_s7 + $0x3d0] sm:$0xff]  }
 0x343   : > { %15947 = vmatpush3.bf16.msra.mxu1 %v17178_v58  ;;  %v17250_v58 = vld [vmem:[%s20326_s7 + $0x3d8] sm:$0xff]  }
 0x344   : > { %12871 = vmatmul.mubr.bf16.gmra.mrb[24].mxu0 %v17171_v51  ;;  %15948 = vmatprep.subr.bf16.mxu1 %v17187_v1  ;;  %v17243_v51 = vld [vmem:[%s20326_s7 + $0x358] sm:$0xff]   ;;  %v17259_v1 = vld [vmem:[%s20326_s7 + $0x3e0] sm:$0xff]  }
 0x345   : > { %12943 = vmatmul.mubr.bf16.gmra.mrb[24].mxu1 %v17172_v52  ;;  %15903 = vmatpush3.bf16.msra.mxu0 %v17176_v56  ;;  %v17244_v52 = vld [vmem:[%s20368_s16 + $0x380] ss:$216 sps:$4 sm:$0xff]  }
 0x346   : > { %12878 = vmatprep.mubr.bf16.mxu0 %v17179_v59  ;;  %12950 = vmatprep.mubr.bf16.mxu1 %v17181_v60  ;;  %v17248_v56 = vld [vmem:[%s20326_s7 + $0x390] sm:$0xff]   ;;  %v17251_v59 = vld [vmem:[%s20326_s7 + $0x320] sm:$0xff]   ;;  %v17252_v60 = vld [vmem:[%s20326_s7 + $0x398] sm:$0xff]  }
 0x347   : > { %15904 = vmatprep.subr.bf16.mxu0 %v17183_v61  ;;  %15949 = vmatpush3.bf16.msra.mxu1 %v17188_v2  ;;  %v17253_v61 = vld [vmem:[%s20368_s16 + $0x534] ss:$216 sps:$4 sm:$0xff]   ;;  %v17260_v2 = vld [vmem:[%s20326_s7 + $0x368] sm:$0xff]  }
 0x348   : > { %15950 = vmatprep.subr.bf16.mxu1 %v17190_v4  ;;  %v17262_v4 = vld [vmem:[%s20326_s7 + $0x328] sm:$0xff]  }
 0x349   : > { %15905 = vmatpush3.bf16.msra.mxu0 %v17186_v0  ;;  %v17258_v0 = vld [vmem:[%s20368_s16 + $0x538] ss:$216 sps:$4 sm:$0xff]  }
 0x34a   : > { %15906 = vmatprep.subr.bf16.mxu0 %v17189_v3  ;;  %v17261_v3 = vld [vmem:[%s20326_s7 + $0x3a0] sm:$0xff]  }
 0x34b   : > { %15951 = vmatpush3.bf16.msra.mxu1 %v17192_v6  ;;  %v17264_v6 = vld [vmem:[%s20326_s7 + $0x3a8] sm:$0xff]  }
 0x34c   : > { %12879 = vmatmul.mubr.bf16.gmra.mrb[28].mxu0 %v17184_v62  ;;  %15952 = vmatprep.subr.bf16.mxu1 %v17199_v11  ;;  %v17255_v62 = vld [vmem:[%s20368_s16 + $0x53c] ss:$216 sps:$4 sm:$0xff]  }
 0x34d   : > { %12951 = vmatmul.mubr.bf16.gmra.mrb[28].mxu1 %v17185_v63  ;;  %15907 = vmatpush3.bf16.msra.mxu0 %v17191_v5  ;;  %v17257_v63 = vld [vmem:[%s20368_s16 + $0x530] ss:$216 sps:$4 sm:$0xff]   ;;  %v17263_v5 = vld [vmem:[%s20326_s7 + $0x3e8] sm:$0xff]  }
 0x34e   : > { %12886 = vmatprep.mubr.bf16.mxu0 %v17193_v7  ;;  %12958 = vmatprep.mubr.bf16.mxu1 %v17195_v8  ;;  %v17265_v7 = vld [vmem:[%s20326_s7 + $0x370] sm:$0xff]  }
 0x34f   : > { %15908 = vmatprep.subr.bf16.mxu0 %v17200_v12  ;;  %15953 = vmatpush3.bf16.msra.mxu1 %v17201_v13  ;;  %v7938_v8 = vld [vmem:[%s20368_s16 + $0x6e0] sm:$0xff] }
 0x350   : > { %15954 = vmatprep.subr.bf16.mxu1 %v17203_v15  ;;  %v17268_v12 = vld [vmem:[%s20326_s7 + $0x330] sm:$0xff]   ;;  %v15186_v13 = vcombine.low %v7938_v8, %v7938_v8 }
 0x351   : > { %15909 = vmatpush3.bf16.msra.mxu0 %v17202_v14  ;;  %v17271_v15 = vld [vmem:[%s20326_s7 + $0x3f0] sm:$0xff]  }
 0x352   : > { %15910 = vmatprep.subr.bf16.mxu0 %v17205_v17  ;;  %v17273_v17 = vld [vmem:[%s20326_s7 + $0x378] sm:$0xff]  }
 0x353   : > { %15955 = vmatpush3.bf16.msra.mxu1 %v17204_v16  ;;  %v17272_v16 = vld [vmem:[%s20326_s7 + $0x3b0] sm:$0xff]  }
 0x354   : > { %12887 = vmatmul.mubr.bf16.gmra.mrb[32].mxu0 %v17197_v9  ;;  %15956 = vmatprep.subr.bf16.mxu1 %v17211_v25  ;;  %v7939_v9 = vld [vmem:[%s20368_s16 + $0x6e8] sm:$0xff]  ;;  %v17283_v25 = vld [vmem:[%s20326_s7 + $0x440] sm:$0xff]  }
 0x355   : > { %12959 = vmatmul.mubr.bf16.gmra.mrb[32].mxu1 %v17198_v10  ;;  %12894 = vmatprep.mubr.bf16.mxu0 %v15183_v20  ;;  %v15187_v10 = vcombine.high %v7938_v8, %v7938_v8  ;;  %v15189_v11 = vcombine.high %v7939_v9, %v7939_v9  ;;  %v15188_v14 = vcombine.low %v7939_v9, %v7939_v9  ;;  %v17276_v20 = vld [vmem:[%s20326_s7 + $0x3b8] sm:$0xff]  }
 0x356   : > { %12966 = vmatprep.mubr.bf16.mxu1 %v15185_v21  ;;  %15911 = vmatpush3.bf16.msra.mxu0 %v17208_v22  ;;  %v17277_v21 = vld [vmem:[%s20368_s16 + $0x30] ss:$216 sps:$4 sm:$0xff]   ;;  %v17279_v22 = vld [vmem:[%s20368_s16 + $0x34] ss:$216 sps:$4 sm:$0xff]  }
 0x357   : > { %15957 = vmatpush3.bf16.msra.mxu1 %v17212_v26  ;;  %15912 = vmatprep.subr.bf16.mxu0 %v17213_v27  ;;  %v17284_v26 = vld [vmem:[%s20326_s7 + $0x400] sm:$0xff]   ;;  %v17285_v27 = vld [vmem:[%s20326_s7 + $0x448] sm:$0xff]   ;;  %v17334_v8 = vld [vmem:[%s20326_s7 + $0x438] sm:$0xff]  }
 0x358   : > { %15958 = vmatprep.subr.bf16.mxu1 %v17215_v29  ;;  %v17287_v29 = vld [vmem:[%s20368_s16 + $0x1e4] ss:$216 sps:$4 sm:$0xff]   ;;  %v17335_v9 = vld [vmem:[%s20326_s7 + $0x4f8] sm:$0xff]  }
 0x35a   : > { %15913 = vmatpush3.bf16.msra.mxu0 %v17214_v28  ;;  %v17286_v28 = vld [vmem:[%s20326_s7 + $0x408] sm:$0xff]  }
 0x35b   : > { %15959 = vmatpush3.bf16.msra.mxu1 %v17216_v30  ;;  %15990 = vmatprep.subr.bf16.mxu0 %v17223_v35  ;;  %v17289_v30 = vld [vmem:[%s20368_s16 + $0x1ec] ss:$216 sps:$4 sm:$0xff]  }
 0x35c   : > { %12895 = vmatmul.mubr.bf16.gmra.mrb[36].mxu0 %v15182_v23  ;;  %16036 = vmatprep.subr.bf16.mxu1 %v17233_v43  ;;  %v17280_v23 = vld [vmem:[%s20368_s16 + $0x38] ss:$216 sps:$4 sm:$0xff]   ;;  %v17295_v35 = vld [vmem:[%s20326_s7 + $0x450] sm:$0xff]  }
 0x35d   : > { %12967 = vmatmul.mubr.bf16.gmra.mrb[36].mxu1 %v15184_v24  ;;  %13006 = vmatprep.mubr.bf16.mxu0 %v17219_v32  ;;  %v17282_v24 = vld [vmem:[%s20368_s16 + $0x3c] ss:$216 sps:$4 sm:$0xff]   ;;  %v17292_v32 = vld [vmem:[%s20368_s16 + $0x1e8] ss:$216 sps:$4 sm:$0xff]   ;;  %v17305_v43 = vld [vmem:[%s20368_s16 + $0x398] ss:$216 sps:$4 sm:$0xff]  }
 0x35e   : > { %13078 = vmatprep.mubr.bf16.mxu1 %v17222_v34  ;;  %v17294_v34 = vld [vmem:[%s20326_s7 + $0x480] sm:$0xff]  }
 0x364   : > { %13007 = vmatmul.mubr.bf16.vlgmr.msra.gmra.mrb[40].mxu0 %v17217_v31  ;;  %v17291_v31 = vld [vmem:[%s20368_s16 + $0x1e0] ss:$216 sps:$4 sm:$0xff]  }
 0x365   : > { %13079 = vmatmul.mubr.bf16.vlgmr.msra.gmra.mrb[40].mxu1 %v17220_v33  ;;  %15991 = vmatpush3.bf16.msra.mxu0 %v17224_v36  ;;  %v17293_v33 = vld [vmem:[%s20326_s7 + $0x4c0] sm:$0xff]   ;;  %v17296_v36 = vld [vmem:[%s20326_s7 + $0x410] sm:$0xff]  }
 0x366   : > { %15992 = vmatprep.subr.bf16.mxu0 %v17225_v37  ;;  %13014 = vmatprep.mubr.bf16.mxu0 %v17227_v39  ;;  %v17297_v37 = vld [vmem:[%s20326_s7 + $0x4c8] sm:$0xff]   ;;  %v17299_v39 = vld [vmem:[%s20368_s16 + $0x394] ss:$216 sps:$4 sm:$0xff]  }
 0x367   : > { %13086 = vmatprep.mubr.bf16.mxu1 %v17229_v40  ;;  %16037 = vmatpush3.bf16.msra.mxu1 %v17234_v44  ;;  %v17301_v40 = vld [vmem:[%s20368_s16 + $0x39c] ss:$216 sps:$4 sm:$0xff]  }
 0x368   : > { %16038 = vmatprep.subr.bf16.mxu1 %v17237_v47  ;;  %v17306_v44 = vld [vmem:[%s20326_s7 + $0x418] sm:$0xff]   ;;  %v17309_v47 = vld [vmem:[%s20326_s7 + $0x460] sm:$0xff]  }
 0x369   : > { %15993 = vmatpush3.bf16.msra.mxu0 %v17226_v38  ;;  %v17298_v38 = vld [vmem:[%s20326_s7 + $0x488] sm:$0xff]  }
 0x36a   : > { %15994 = vmatprep.subr.bf16.mxu0 %v17235_v45  ;;  %v17307_v45 = vld [vmem:[%s20326_s7 + $0x4d0] sm:$0xff]  }
 0x36b   : > { %16039 = vmatpush3.bf16.msra.mxu1 %v17238_v48  ;;  %v17310_v48 = vld [vmem:[%s20326_s7 + $0x4d8] sm:$0xff]  }
 0x36c   : > { %13015 = vmatmul.mubr.bf16.gmra.mrb[44].mxu0 %v17231_v41  ;;  %16040 = vmatprep.subr.bf16.mxu1 %v17247_v55  ;;  %v17303_v41 = vld [vmem:[%s20326_s7 + $0x458] sm:$0xff]   ;;  %v17319_v55 = vld [vmem:[%s20326_s7 + $0x4e0] sm:$0xff]  }
 0x36d   : > { %13087 = vmatmul.mubr.bf16.gmra.mrb[44].mxu1 %v17232_v42  ;;  %15995 = vmatpush3.bf16.msra.mxu0 %v17236_v46  ;;  %v17304_v42 = vld [vmem:[%s20368_s16 + $0x390] ss:$216 sps:$4 sm:$0xff]  }
 0x36e   : > { %13022 = vmatprep.mubr.bf16.mxu0 %v17239_v49  ;;  %13094 = vmatprep.mubr.bf16.mxu1 %v17241_v50  ;;  %v17308_v46 = vld [vmem:[%s20326_s7 + $0x490] sm:$0xff]   ;;  %v17311_v49 = vld [vmem:[%s20326_s7 + $0x420] sm:$0xff]   ;;  %v17312_v50 = vld [vmem:[%s20326_s7 + $0x498] sm:$0xff]  }
 0x36f   : > { %15996 = vmatprep.subr.bf16.mxu0 %v17243_v51  ;;  %16041 = vmatpush3.bf16.msra.mxu1 %v17248_v56  ;;  %v17313_v51 = vld [vmem:[%s20368_s16 + $0x544] ss:$216 sps:$4 sm:$0xff]  }
 0x370   : > { %16042 = vmatprep.subr.bf16.mxu1 %v17250_v58  ;;  %v17320_v56 = vld [vmem:[%s20326_s7 + $0x468] sm:$0xff]  }
 0x371   : > { %15997 = vmatpush3.bf16.msra.mxu0 %v17246_v54  ;;  %v17318_v54 = vld [vmem:[%s20368_s16 + $0x548] ss:$216 sps:$4 sm:$0xff]  }
 0x372   : > { %15998 = vmatprep.subr.bf16.mxu0 %v17249_v57  ;;  %v17321_v57 = vld [vmem:[%s20326_s7 + $0x4a0] sm:$0xff]   ;;  %v17322_v58 = vld [vmem:[%s20326_s7 + $0x428] sm:$0xff]  }
 0x373   : > { %16043 = vmatpush3.bf16.msra.mxu1 %v17252_v60  ;;  %v17324_v60 = vld [vmem:[%s20326_s7 + $0x4a8] sm:$0xff]  }
 0x374   : > { %13023 = vmatmul.mubr.bf16.gmra.mrb[48].mxu0 %v17244_v52  ;;  %16044 = vmatprep.subr.bf16.mxu1 %v17259_v1  ;;  %v17315_v52 = vld [vmem:[%s20368_s16 + $0x54c] ss:$216 sps:$4 sm:$0xff]  }
 0x375   : > { %13095 = vmatmul.mubr.bf16.gmra.mrb[48].mxu1 %v17245_v53  ;;  %15999 = vmatpush3.bf16.msra.mxu0 %v17251_v59  ;;  %v17317_v53 = vld [vmem:[%s20368_s16 + $0x540] ss:$216 sps:$4 sm:$0xff]  }
 0x376   : > { %13030 = vmatprep.mubr.bf16.mxu0 %v17253_v61  ;;  %13102 = vmatprep.mubr.bf16.mxu1 %v17255_v62  ;;  %v17323_v59 = vld [vmem:[%s20326_s7 + $0x4e8] sm:$0xff]   ;;  %v17325_v61 = vld [vmem:[%s20326_s7 + $0x470] sm:$0xff]   ;;  %v7940_v62 = vld [vmem:[%s20368_s16 + $0x6f0] sm:$0xff] }
 0x377   : > { %16000 = vmatprep.subr.bf16.mxu0 %v17260_v2  ;;  %16045 = vmatpush3.bf16.msra.mxu1 %v17261_v3  ;;  %v15190_v1 = vcombine.low %v7940_v62, %v7940_v62  ;;  %v17328_v3 = vld [vmem:[%s20326_s7 + $0x430] sm:$0xff]  }
 0x378   : > { %16046 = vmatprep.subr.bf16.mxu1 %v17263_v5  ;;  %v17331_v5 = vld [vmem:[%s20326_s7 + $0x4f0] sm:$0xff]  }
 0x379   : > { %16001 = vmatpush3.bf16.msra.mxu0 %v17262_v4 }
 0x37a   : > { %16002 = vmatprep.subr.bf16.mxu0 %v17265_v7  ;;  %v17333_v7 = vld [vmem:[%s20326_s7 + $0x478] sm:$0xff]  }
 0x37b   : > { %16047 = vmatpush3.bf16.msra.mxu1 %v17264_v6  ;;  %v17332_v6 = vld [vmem:[%s20326_s7 + $0x4b0] sm:$0xff]  }
 0x37c   : > { %13031 = vmatmul.mubr.bf16.gmra.mrb[52].mxu0 %v17257_v63  ;;  %16048 = vmatprep.subr.bf16.mxu1 %v17271_v15  ;;  %v15191_v63 = vcombine.high %v7940_v62, %v7940_v62  ;;  %v17343_v15 = vld [vmem:[%s20326_s7 + $0x540] sm:$0xff]   ;;  %v17394_v62 = vld [vmem:[%s20326_s7 + $0x538] sm:$0xff]  }
 0x37d   : > { %13103 = vmatmul.mubr.bf16.gmra.mrb[52].mxu1 %v17258_v0  ;;  %13038 = vmatprep.mubr.bf16.mxu0 %v15187_v10  ;;  %v7941_v0 = vld [vmem:[%s20368_s16 + $0x6f8] sm:$0xff]  ;;  %v17336_v10 = vld [vmem:[%s20326_s7 + $0x4b8] sm:$0xff]  }
 0x37e   : > { %13110 = vmatprep.mubr.bf16.mxu1 %v15189_v11  ;;  %16003 = vmatpush3.bf16.msra.mxu0 %v17268_v12  ;;  %v15193_v2 = vcombine.high %v7941_v0, %v7941_v0  ;;  %v15192_v4 = vcombine.low %v7941_v0, %v7941_v0  ;;  %v17337_v11 = vld [vmem:[%s20368_s16 + $0x40] ss:$216 sps:$4 sm:$0xff]   ;;  %v17339_v12 = vld [vmem:[%s20368_s16 + $0x44] ss:$216 sps:$4 sm:$0xff]  }
 0x37f   : > { %16049 = vmatpush3.bf16.msra.mxu1 %v17272_v16  ;;  %16004 = vmatprep.subr.bf16.mxu0 %v17273_v17  ;;  %v17344_v16 = vld [vmem:[%s20326_s7 + $0x500] sm:$0xff]   ;;  %v17345_v17 = vld [vmem:[%s20326_s7 + $0x548] sm:$0xff]  }
 0x380   : > { %16050 = vmatprep.subr.bf16.mxu1 %v17275_v19  ;;  %v17347_v19 = vld [vmem:[%s20368_s16 + $0x1f4] ss:$216 sps:$4 sm:$0xff]  }
 0x382   : > { %16005 = vmatpush3.bf16.msra.mxu0 %v17274_v18  ;;  %v17346_v18 = vld [vmem:[%s20326_s7 + $0x508] sm:$0xff]  }
 0x383   : > { %16051 = vmatpush3.bf16.msra.mxu1 %v17276_v20  ;;  %16082 = vmatprep.subr.bf16.mxu0 %v17283_v25  ;;  %v17349_v20 = vld [vmem:[%s20368_s16 + $0x1fc] ss:$216 sps:$4 sm:$0xff]   ;;  %v17355_v25 = vld [vmem:[%s20326_s7 + $0x550] sm:$0xff]  }
 0x384   : > { %13039 = vmatmul.mubr.bf16.gmra.mrb[56].mxu0 %v15186_v13  ;;  %16128 = vmatprep.subr.bf16.mxu1 %v17293_v33  ;;  %v17340_v13 = vld [vmem:[%s20368_s16 + $0x48] ss:$216 sps:$4 sm:$0xff]  }
 0x385   : > { %13111 = vmatmul.mubr.bf16.gmra.mrb[56].mxu1 %v15188_v14  ;;  %13150 = vmatprep.mubr.bf16.mxu0 %v17279_v22  ;;  %v17342_v14 = vld [vmem:[%s20368_s16 + $0x4c] ss:$216 sps:$4 sm:$0xff]   ;;  %v17352_v22 = vld [vmem:[%s20368_s16 + $0x1f8] ss:$216 sps:$4 sm:$0xff]   ;;  %v17365_v33 = vld [vmem:[%s20368_s16 + $0x3a8] ss:$216 sps:$4 sm:$0xff]  }
 0x386   : > { %13222 = vmatprep.mubr.bf16.mxu1 %v17282_v24  ;;  %v17354_v24 = vld [vmem:[%s20326_s7 + $0x580] sm:$0xff]  }
 0x38c   : > { %13151 = vmatmul.mubr.bf16.vlgmr.msra.gmra.mrb[60].mxu0 %v17277_v21  ;;  %v17351_v21 = vld [vmem:[%s20368_s16 + $0x1f0] ss:$216 sps:$4 sm:$0xff]  }
 0x38d   : > { %13223 = vmatmul.mubr.bf16.vlgmr.msra.gmra.mrb[60].mxu1 %v17280_v23  ;;  %16083 = vmatpush3.bf16.msra.mxu0 %v17284_v26  ;;  %v17353_v23 = vld [vmem:[%s20326_s7 + $0x5c0] sm:$0xff]   ;;  %v17356_v26 = vld [vmem:[%s20326_s7 + $0x510] sm:$0xff]  }
 0x38e   : > { %16084 = vmatprep.subr.bf16.mxu0 %v17285_v27  ;;  %13158 = vmatprep.mubr.bf16.mxu0 %v17287_v29  ;;  %v17357_v27 = vld [vmem:[%s20326_s7 + $0x5c8] sm:$0xff]  }
 0x38f   : > { %13230 = vmatprep.mubr.bf16.mxu1 %v17289_v30  ;;  %16129 = vmatpush3.bf16.msra.mxu1 %v17294_v34  ;;  %v17359_v29 = vld [vmem:[%s20368_s16 + $0x3a4] ss:$216 sps:$4 sm:$0xff]   ;;  %v17366_v34 = vld [vmem:[%s20326_s7 + $0x518] sm:$0xff]  }
 0x390   : > { %16130 = vmatprep.subr.bf16.mxu1 %v17297_v37  ;;  %v17361_v30 = vld [vmem:[%s20368_s16 + $0x3ac] ss:$216 sps:$4 sm:$0xff]   ;;  %v17369_v37 = vld [vmem:[%s20326_s7 + $0x560] sm:$0xff]  }
 0x391   : > { %16085 = vmatpush3.bf16.msra.mxu0 %v17286_v28  ;;  %v17358_v28 = vld [vmem:[%s20326_s7 + $0x588] sm:$0xff]  }
 0x392   : > { %16086 = vmatprep.subr.bf16.mxu0 %v17295_v35  ;;  %v17367_v35 = vld [vmem:[%s20326_s7 + $0x5d0] sm:$0xff]  }
 0x393   : > { %16131 = vmatpush3.bf16.msra.mxu1 %v17298_v38  ;;  %v17370_v38 = vld [vmem:[%s20326_s7 + $0x5d8] sm:$0xff]  }
 0x394   : > { %13159 = vmatmul.mubr.bf16.gmra.mrb[64].mxu0 %v17291_v31  ;;  %16132 = vmatprep.subr.bf16.mxu1 %v17307_v45  ;;  %v17363_v31 = vld [vmem:[%s20326_s7 + $0x558] sm:$0xff]   ;;  %v17379_v45 = vld [vmem:[%s20326_s7 + $0x5e0] sm:$0xff]  }
 0x395   : > { %13231 = vmatmul.mubr.bf16.gmra.mrb[64].mxu1 %v17292_v32  ;;  %16087 = vmatpush3.bf16.msra.mxu0 %v17296_v36  ;;  %v17364_v32 = vld [vmem:[%s20368_s16 + $0x3a0] ss:$216 sps:$4 sm:$0xff]  }
 0x396   : > { %13166 = vmatprep.mubr.bf16.mxu0 %v17299_v39  ;;  %13238 = vmatprep.mubr.bf16.mxu1 %v17301_v40  ;;  %v17368_v36 = vld [vmem:[%s20326_s7 + $0x590] sm:$0xff]   ;;  %v17371_v39 = vld [vmem:[%s20326_s7 + $0x520] sm:$0xff]   ;;  %v17372_v40 = vld [vmem:[%s20326_s7 + $0x598] sm:$0xff]  }
 0x397   : > { %16088 = vmatprep.subr.bf16.mxu0 %v17303_v41  ;;  %16133 = vmatpush3.bf16.msra.mxu1 %v17308_v46  ;;  %v17373_v41 = vld [vmem:[%s20368_s16 + $0x554] ss:$216 sps:$4 sm:$0xff]   ;;  %v17380_v46 = vld [vmem:[%s20326_s7 + $0x568] sm:$0xff]  }
 0x398   : > { %16134 = vmatprep.subr.bf16.mxu1 %v17310_v48  ;;  %v17382_v48 = vld [vmem:[%s20326_s7 + $0x528] sm:$0xff]  }
 0x399   : > { %16089 = vmatpush3.bf16.msra.mxu0 %v17306_v44  ;;  %v17378_v44 = vld [vmem:[%s20368_s16 + $0x558] ss:$216 sps:$4 sm:$0xff]  }
 0x39a   : > { %16090 = vmatprep.subr.bf16.mxu0 %v17309_v47  ;;  %v17381_v47 = vld [vmem:[%s20326_s7 + $0x5a0] sm:$0xff]  }
 0x39b   : > { %16135 = vmatpush3.bf16.msra.mxu1 %v17312_v50  ;;  %v17384_v50 = vld [vmem:[%s20326_s7 + $0x5a8] sm:$0xff]  }
 0x39c   : > { %13167 = vmatmul.mubr.bf16.gmra.mrb[68].mxu0 %v17304_v42  ;;  %16136 = vmatprep.subr.bf16.mxu1 %v17319_v55  ;;  %v17375_v42 = vld [vmem:[%s20368_s16 + $0x55c] ss:$216 sps:$4 sm:$0xff]  }
 0x39d   : > { %13239 = vmatmul.mubr.bf16.gmra.mrb[68].mxu1 %v17305_v43  ;;  %16091 = vmatpush3.bf16.msra.mxu0 %v17311_v49  ;;  %v17377_v43 = vld [vmem:[%s20368_s16 + $0x550] ss:$216 sps:$4 sm:$0xff]   ;;  %v17383_v49 = vld [vmem:[%s20326_s7 + $0x5e8] sm:$0xff]  }
 0x39e   : > { %13174 = vmatprep.mubr.bf16.mxu0 %v17313_v51  ;;  %13246 = vmatprep.mubr.bf16.mxu1 %v17315_v52  ;;  %v17385_v51 = vld [vmem:[%s20326_s7 + $0x570] sm:$0xff]  }
 0x39f   : > { %16092 = vmatprep.subr.bf16.mxu0 %v17320_v56  ;;  %16137 = vmatpush3.bf16.msra.mxu1 %v17321_v57  ;;  %v7942_v52 = vld [vmem:[%s20368_s16 + $0x700] sm:$0xff] }
 0x3a0   : > { %16138 = vmatprep.subr.bf16.mxu1 %v17323_v59  ;;  %v17388_v56 = vld [vmem:[%s20326_s7 + $0x530] sm:$0xff]   ;;  %v15194_v57 = vcombine.low %v7942_v52, %v7942_v52 }
 0x3a1   : > { %16093 = vmatpush3.bf16.msra.mxu0 %v17322_v58  ;;  %v17391_v59 = vld [vmem:[%s20326_s7 + $0x5f0] sm:$0xff]  }
 0x3a2   : > { %16094 = vmatprep.subr.bf16.mxu0 %v17325_v61  ;;  %v17393_v61 = vld [vmem:[%s20326_s7 + $0x578] sm:$0xff]  }
 0x3a3   : > { %16139 = vmatpush3.bf16.msra.mxu1 %v17324_v60  ;;  %v17392_v60 = vld [vmem:[%s20326_s7 + $0x5b0] sm:$0xff]  }
 0x3a4   : > { %13175 = vmatmul.mubr.bf16.gmra.mrb[72].mxu0 %v17317_v53  ;;  %16140 = vmatprep.subr.bf16.mxu1 %v17331_v5  ;;  %v7943_v53 = vld [vmem:[%s20368_s16 + $0x708] sm:$0xff] }
 0x3a5   : > { %13247 = vmatmul.mubr.bf16.gmra.mrb[72].mxu1 %v17318_v54  ;;  %13182 = vmatprep.mubr.bf16.mxu0 %v15191_v63  ;;  %v15195_v54 = vcombine.high %v7942_v52, %v7942_v52  ;;  %v15197_v55 = vcombine.high %v7943_v53, %v7943_v53  ;;  %v15196_v58 = vcombine.low %v7943_v53, %v7943_v53  ;;  %v17395_v63 = vld [vmem:[%s20326_s7 + $0x5f8] sm:$0xff]  }
 0x3a6   : > { %13254 = vmatprep.mubr.bf16.mxu1 %v15193_v2  ;;  %16095 = vmatpush3.bf16.msra.mxu0 %v17328_v3  ;;  %v17399_v5 = vld [vmem:[%s20368_s16 + $0x54] ss:$216 sps:$4 sm:$0xff]  }
 0x3a7   : > { %16141 = vmatpush3.bf16.msra.mxu1 %v17332_v6  ;;  %16096 = vmatprep.subr.bf16.mxu0 %v17333_v7 }
 0x3a8   : > { %16142 = vmatprep.subr.bf16.mxu1 %v17335_v9 }
 0x3aa   : > { %16097 = vmatpush3.bf16.msra.mxu0 %v17334_v8  ;;  %v17400_v8 = vld [vmem:[%s20368_s16 + $0x58] ss:$216 sps:$4 sm:$0xff]  }
 0x3ab   : > { %16143 = vmatpush3.bf16.msra.mxu1 %v17336_v10  ;;  %16174 = vmatprep.subr.bf16.mxu0 %v17343_v15 }
 0x3ac   : > { %13183 = vmatmul.mubr.bf16.gmra.mrb[76].mxu0 %v15190_v1  ;;  %16220 = vmatprep.subr.bf16.mxu1 %v17353_v23  ;;  %v17396_v1 = vld [vmem:[%s20326_s7 + $0x5b8] sm:$0xff]   ;;  %v17407_v23 = vld [vmem:[%s20368_s16 + $0x204] ss:$216 sps:$4 sm:$0xff]  }
 0x3ad   : > { %13255 = vmatmul.mubr.bf16.gmra.mrb[76].mxu1 %v15192_v4  ;;  %13294 = vmatprep.mubr.bf16.mxu0 %v17339_v12  ;;  %v17397_v4 = vld [vmem:[%s20368_s16 + $0x50] ss:$216 sps:$4 sm:$0xff]   ;;  %v17402_v12 = vld [vmem:[%s20368_s16 + $0x5c] ss:$216 sps:$4 sm:$0xff]  }
 0x3ae   : > { %13366 = vmatprep.mubr.bf16.mxu1 %v17342_v14 }
 0x3b4   : > { %13295 = vmatmul.mubr.bf16.vlgmr.msra.gmra.mrb[80].mxu0 %v17337_v11 }
 0x3b5   : > { %13367 = vmatmul.mubr.bf16.vlgmr.msra.gmra.mrb[80].mxu1 %v17340_v13  ;;  %16175 = vmatpush3.bf16.msra.mxu0 %v17344_v16  ;;  %v17403_v13 = vld [vmem:[%s20326_s7 + $0x640] sm:$0xff]  }
 0x3b6   : > { %16176 = vmatprep.subr.bf16.mxu0 %v17345_v17  ;;  %13302 = vmatprep.mubr.bf16.mxu0 %v17347_v19  ;;  %v17404_v16 = vld [vmem:[%s20326_s7 + $0x600] sm:$0xff]   ;;  %v17405_v19 = vld [vmem:[%s20326_s7 + $0x648] sm:$0xff]  }
 0x3b7   : > { %13374 = vmatprep.mubr.bf16.mxu1 %v17349_v20  ;;  %16221 = vmatpush3.bf16.msra.mxu1 %v17354_v24 }
 0x3b8   : > { %16222 = vmatprep.subr.bf16.mxu1 %v17357_v27  ;;  %v17409_v27 = vld [vmem:[%s20368_s16 + $0x20c] ss:$216 sps:$4 sm:$0xff]  }
 0x3b9   : > { %16177 = vmatpush3.bf16.msra.mxu0 %v17346_v18 }
 0x3ba   : > { %16178 = vmatprep.subr.bf16.mxu0 %v17355_v25 }
 0x3bb   : > { %16223 = vmatpush3.bf16.msra.mxu1 %v17358_v28  ;;  %v17411_v28 = vld [vmem:[%s20368_s16 + $0x200] ss:$216 sps:$4 sm:$0xff]  }
 0x3bc   : > { %13303 = vmatmul.mubr.bf16.gmra.mrb[84].mxu0 %v17351_v21  ;;  %16224 = vmatprep.subr.bf16.mxu1 %v17367_v35  ;;  %v17406_v21 = vld [vmem:[%s20326_s7 + $0x608] sm:$0xff]  }
 0x3bd   : > { %13375 = vmatmul.mubr.bf16.gmra.mrb[84].mxu1 %v17352_v22  ;;  %16179 = vmatpush3.bf16.msra.mxu0 %v17356_v26 }
 0x3be   : > { %13310 = vmatprep.mubr.bf16.mxu0 %v17359_v29  ;;  %13382 = vmatprep.mubr.bf16.mxu1 %v17361_v30  ;;  %v17412_v29 = vld [vmem:[%s20368_s16 + $0x208] ss:$216 sps:$4 sm:$0xff]  }
 0x3bf   : > { %16180 = vmatprep.subr.bf16.mxu0 %v17363_v31  ;;  %16225 = vmatpush3.bf16.msra.mxu1 %v17368_v36  ;;  %v17413_v31 = vld [vmem:[%s20326_s7 + $0x6c0] sm:$0xff]   ;;  %v17415_v36 = vld [vmem:[%s20326_s7 + $0x650] sm:$0xff]  }
 0x3c0   : > { %16226 = vmatprep.subr.bf16.mxu1 %v17370_v38  ;;  %v17416_v38 = vld [vmem:[%s20326_s7 + $0x610] sm:$0xff]  }
 0x3c1   : > { %16181 = vmatpush3.bf16.msra.mxu0 %v17366_v34 }
 0x3c2   : > { %16182 = vmatprep.subr.bf16.mxu0 %v17369_v37 }
 0x3c3   : > { %16227 = vmatpush3.bf16.msra.mxu1 %v17372_v40 }
 0x3c4   : > { %13311 = vmatmul.mubr.bf16.gmra.mrb[88].mxu0 %v17364_v32  ;;  %16228 = vmatprep.subr.bf16.mxu1 %v17379_v45 }
 0x3c5   : > { %13383 = vmatmul.mubr.bf16.gmra.mrb[88].mxu1 %v17365_v33  ;;  %16183 = vmatpush3.bf16.msra.mxu0 %v17371_v39  ;;  %v17414_v33 = vld [vmem:[%s20326_s7 + $0x680] sm:$0xff]  }
 0x3c6   : > { %13318 = vmatprep.mubr.bf16.mxu0 %v17373_v41  ;;  %13390 = vmatprep.mubr.bf16.mxu1 %v17375_v42  ;;  %v17417_v41 = vld [vmem:[%s20326_s7 + $0x6c8] sm:$0xff]  }
 0x3c7   : > { %16184 = vmatprep.subr.bf16.mxu0 %v17380_v46  ;;  %16229 = vmatpush3.bf16.msra.mxu1 %v17381_v47  ;;  %v17419_v47 = vld [vmem:[%s20368_s16 + $0x3b4] ss:$216 sps:$4 sm:$0xff]  }
 0x3c8   : > { %16230 = vmatprep.subr.bf16.mxu1 %v17383_v49 }
 0x3c9   : > { %16185 = vmatpush3.bf16.msra.mxu0 %v17382_v48 }
 0x3ca   : > { %16186 = vmatprep.subr.bf16.mxu0 %v17385_v51 }
 0x3cb   : > { %16231 = vmatpush3.bf16.msra.mxu1 %v17384_v50  ;;  %v17421_v50 = vld [vmem:[%s20368_s16 + $0x3bc] ss:$216 sps:$4 sm:$0xff]  }
 0x3cc   : > { %13319 = vmatmul.mubr.bf16.gmra.mrb[92].mxu0 %v17377_v43  ;;  %16232 = vmatprep.subr.bf16.mxu1 %v17391_v59  ;;  %v17425_v59 = vld [vmem:[%s20368_s16 + $0x3b8] ss:$216 sps:$4 sm:$0xff]  }
 0x3cd   : > { %13391 = vmatmul.mubr.bf16.gmra.mrb[92].mxu1 %v17378_v44  ;;  %13326 = vmatprep.mubr.bf16.mxu0 %v15195_v54  ;;  %v17418_v44 = vld [vmem:[%s20326_s7 + $0x688] sm:$0xff]  }
 0x3ce   : > { %13398 = vmatprep.mubr.bf16.mxu1 %v15197_v55  ;;  %16187 = vmatpush3.bf16.msra.mxu0 %v17388_v56  ;;  %v17423_v55 = vld [vmem:[%s20326_s7 + $0x658] sm:$0xff]  }
 0x3cf   : > { %16233 = vmatpush3.bf16.msra.mxu1 %v17392_v60  ;;  %16188 = vmatprep.subr.bf16.mxu0 %v17393_v61  ;;  %v17426_v60 = vld [vmem:[%s20326_s7 + $0x618] sm:$0xff]  }
 0x3d0   : > { %16234 = vmatprep.subr.bf16.mxu1 %v17395_v63  ;;  %v17427_v63 = vld [vmem:[%s20326_s7 + $0x6d0] sm:$0xff]  }
 0x3d2   : > { %16189 = vmatpush3.bf16.msra.mxu0 %v17394_v62 }
 0x3d3   : > { %16235 = vmatpush3.bf16.msra.mxu1 %v17396_v1  ;;  %16266 = vmatprep.subr.bf16.mxu0 %v17403_v13 }
 0x3d4   : > { %13327 = vmatmul.mubr.bf16.gmra.mrb[96].mxu0 %v15194_v57  ;;  %16312 = vmatprep.subr.bf16.mxu1 %v17413_v31  ;;  %v17442_v31 = vld [vmem:[%s20326_s7 + $0x628] sm:$0xff]  }
 0x3d5   : > { %13399 = vmatmul.mubr.bf16.gmra.mrb[96].mxu1 %v15196_v58  ;;  %13438 = vmatprep.mubr.bf16.mxu0 %v17399_v5  ;;  %v17424_v58 = vld [vmem:[%s20368_s16 + $0x3b0] ss:$216 sps:$4 sm:$0xff]  }
 0x3d6   : > { %13510 = vmatprep.mubr.bf16.mxu1 %v17402_v12  ;;  %v17430_v5 = vld [vmem:[%s20326_s7 + $0x6d8] sm:$0xff]   ;;  %v17433_v12 = vld [vmem:[%s20368_s16 + $0x564] ss:$216 sps:$4 sm:$0xff]  }
 0x3dc   : > { %13439 = vmatmul.mubr.bf16.vlgmr.msra.gmra.mrb[100].mxu0 %v17397_v4  ;;  %v17429_v4 = vld [vmem:[%s20326_s7 + $0x660] sm:$0xff]  }
 0x3dd   : > { %13511 = vmatmul.mubr.bf16.vlgmr.msra.gmra.mrb[100].mxu1 %v17400_v8  ;;  %16267 = vmatpush3.bf16.msra.mxu0 %v17404_v16 }
 0x3de   : > { %16268 = vmatprep.subr.bf16.mxu0 %v17405_v19  ;;  %13446 = vmatprep.mubr.bf16.mxu0 %v17407_v23 }
 0x3df   : > { %13518 = vmatprep.mubr.bf16.mxu1 %v17409_v27  ;;  %16313 = vmatpush3.bf16.msra.mxu1 %v17414_v33 }
 0x3e0   : > { %16314 = vmatprep.subr.bf16.mxu1 %v17417_v41 }
 0x3e1   : > { %16269 = vmatpush3.bf16.msra.mxu0 %v17406_v21  ;;  %v17438_v21 = vld [vmem:[%s20368_s16 + $0x568] ss:$216 sps:$4 sm:$0xff]  }
 0x3e2   : > { %16270 = vmatprep.subr.bf16.mxu0 %v17415_v36  ;;  %v17445_v36 = vld [vmem:[%s20326_s7 + $0x670] sm:$0xff]  }
 0x3e3   : > { %16315 = vmatpush3.bf16.msra.mxu1 %v17418_v44  ;;  %v17448_v44 = vld [vmem:[%s20326_s7 + $0x630] sm:$0xff]  }
 0x3e4   : > { %13447 = vmatmul.mubr.bf16.gmra.mrb[104].mxu0 %v17411_v28  ;;  %16316 = vmatprep.subr.bf16.mxu1 %v17427_v63 }
 0x3e5   : > { %13519 = vmatmul.mubr.bf16.gmra.mrb[104].mxu1 %v17412_v29  ;;  %16271 = vmatpush3.bf16.msra.mxu0 %v17416_v38  ;;  %v17441_v29 = vld [vmem:[%s20326_s7 + $0x6a0] sm:$0xff]  }
 0x3e6   : > { %13454 = vmatprep.mubr.bf16.mxu0 %v17419_v47  ;;  %13526 = vmatprep.mubr.bf16.mxu1 %v17421_v50  ;;  %v7945_v38 = vld [vmem:[%s20368_s16 + $0x718] sm:$0xff] }
 0x3e7   : > { %v15730_v0 = vpop.f32.mrb[0].mxu0  ;;  %16272 = vmatprep.subr.bf16.mxu0 %v17423_v55  ;;  %v17453_v55 = vld [vmem:[%s20326_s7 + $0x678] sm:$0xff]  }
 0x3e8   : > { %v15776_v2 = vpop.f32.mrb[0].mxu1  ;;  %v15731_v3 = vpop.f32.mrb[1].mxu0 }
 0x3e9   : > { %v15732_v6 = vadd.f32 %v15731_v3, %v15730_v0  ;;  %v15777_v7 = vpop.f32.mrb[1].mxu1  ;;  %v15733_v10 = vpop.f32.mrb[2].mxu0  ;;  %16273 = vmatpush3.bf16.msra.mxu0 %v17426_v60  ;;  %v17455_v60 = vld [vmem:[%s20326_s7 + $0x6f8] sm:$0xff]  }
 0x3ea   : > { %v15778_v9 = vadd.f32 %v15777_v7, %v15776_v2  ;;  %v15779_v11 = vpop.f32.mrb[2].mxu1  ;;  %v15734_v14 = vpop.f32.mrb[3].mxu0  ;;  %v17428_v2 = vld [vmem:[%s20326_s7 + $0x690] sm:$0xff]   ;;  %16274 = vmatprep.subr.bf16.mxu0 %v17429_v4  ;;  %v17431_v7 = vld [vmem:[%s20326_s7 + $0x620] sm:$0xff]  }
 0x3eb   : > { %v15735_v17 = vadd.f32 %v15734_v14, %v15733_v10  ;;  %v15780_v18 = vpop.f32.mrb[3].mxu1  ;;  %16317 = vmatpush3.bf16.msra.mxu1 %v17428_v2 }
 0x3ec   : > { %v20625_v15 = vadd.f32 %v15778_v9, %v15732_v6  ;;  %v15781_v20 = vadd.f32 %v15780_v18, %v15779_v11  ;;  %13455 = vmatmul.mubr.bf16.gmra.mrb[108].mxu0 %v17424_v58  ;;  %16318 = vmatprep.subr.bf16.mxu1 %v17430_v5  ;;  %v17432_v9 = vld [vmem:[%s20326_s7 + $0x698] sm:$0xff]   ;;  %v17437_v18 = vld [vmem:[%s20368_s16 + $0x560] ss:$216 sps:$4 sm:$0xff]  }
 0x3ed   : > { %13527 = vmatmul.mubr.bf16.gmra.mrb[108].mxu1 %v17425_v59  ;;  %16275 = vmatpush3.bf16.msra.mxu0 %v17431_v7  ;;  %v17454_v58 = vld [vmem:[%s20326_s7 + $0x638] sm:$0xff]  }
 0x3ee   : > { %v20631_v26 = vadd.f32 %v15781_v20, %v15735_v17  ;;  %v17435_v17 = vld [vmem:[%s20368_s16 + $0x56c] ss:$216 sps:$4 sm:$0xff]   ;;  %13462 = vmatprep.mubr.bf16.mxu0 %v17433_v12 }
 0x3ef   : > { %v15736_v22 = vpop.f32.mrb[4].mxu0  ;;  %16319 = vmatpush3.bf16.msra.mxu1 %v17432_v9  ;;  %13534 = vmatprep.mubr.bf16.mxu1 %v17435_v17  ;;  %v17462_v9 = vld [vmem:[%s20368_s16 + $0x6c] ss:$216 sps:$4 sm:$0xff]  }
 0x3f0   : > { %v15782_v24 = vpop.f32.mrb[4].mxu1  ;;  %v15737_v25 = vpop.f32.mrb[5].mxu0 }
 0x3f1   : > { %v15738_v30 = vadd.f32 %v15737_v25, %v15736_v22  ;;  %v15783_v32 = vpop.f32.mrb[5].mxu1  ;;  %v15739_v35 = vpop.f32.mrb[6].mxu0  ;;  %v17439_v22 = vld [vmem:[%s20326_s7 + $0x6e0] sm:$0xff]   ;;  %v17440_v25 = vld [vmem:[%s20326_s7 + $0x668] sm:$0xff]  }
 0x3f2   : > { %v15784_v34 = vadd.f32 %v15783_v32, %v15782_v24  ;;  %v15785_v37 = vpop.f32.mrb[6].mxu1  ;;  %v15740_v39 = vpop.f32.mrb[7].mxu0  ;;  %16320 = vmatprep.subr.bf16.mxu1 %v17439_v22  ;;  %16276 = vmatprep.subr.bf16.mxu0 %v17440_v25  ;;  %v17443_v32 = vld [vmem:[%s20326_s7 + $0x6e8] sm:$0xff]  }
 0x3f3   : > { %v15741_v42 = vadd.f32 %v15740_v39, %v15739_v35  ;;  %v15786_v43 = vpop.f32.mrb[7].mxu1  ;;  %16321 = vmatpush3.bf16.msra.mxu1 %v17441_v29  ;;  %16277 = vmatpush3.bf16.msra.mxu0 %v17442_v31  ;;  %v17472_v31 = vld [vmem:[%s20368_s16 + $0x218] ss:$216 sps:$4 sm:$0xff]  }
 0x3f4   : > { %v20640_v40 = vadd.f32 %v15784_v34, %v15738_v30  ;;  %v15787_v45 = vadd.f32 %v15786_v43, %v15785_v37  ;;  %13463 = vmatmul.mubr.bf16.gmra.mrb[112].mxu0 %v17437_v18  ;;  %v17444_v34 = vld [vmem:[%s20326_s7 + $0x6a8] sm:$0xff]   ;;  %16322 = vmatprep.subr.bf16.mxu1 %v17443_v32  ;;  %v7944_v37 = vld [vmem:[%s20368_s16 + $0x710] sm:$0xff]  ;;  %v15201_v43 = vcombine.high %v7945_v38, %v7945_v38 }
 0x3f5   : > { %13535 = vmatmul.mubr.bf16.gmra.mrb[112].mxu1 %v17438_v21  ;;  %16278 = vmatprep.subr.bf16.mxu0 %v17445_v36  ;;  %v17465_v18 = vld [vmem:[%s20326_s7 + $0x748] sm:$0xff]  }
 0x3f6   : > { %v20646_v54 = vadd.f32 %v15787_v45, %v15741_v42  ;;  %v15199_v42 = vcombine.high %v7944_v37, %v7944_v37  ;;  %v15198_v45 = vcombine.low %v7944_v37, %v7944_v37  ;;  %13542 = vmatprep.mubr.bf16.mxu1 %v15201_v43  ;;  %v17466_v21 = vld [vmem:[%s20326_s7 + $0x708] sm:$0xff]  }
 0x3f7   : > { %v15742_v46 = vpop.f32.mrb[8].mxu0  ;;  %16323 = vmatpush3.bf16.msra.mxu1 %v17444_v34  ;;  %16279 = vmatpush3.bf16.msra.mxu0 %v17448_v44  ;;  %v17473_v34 = vld [vmem:[%s20326_s7 + $0x7c0] sm:$0xff]   ;;  %v17477_v44 = vld [vmem:[%s20326_s7 + $0x7c8] sm:$0xff]  }
 0x3f8   : > { %v15788_v48 = vpop.f32.mrb[8].mxu1  ;;  %v15743_v49 = vpop.f32.mrb[9].mxu0  ;;  %13470 = vmatprep.mubr.bf16.mxu0 %v15199_v42  ;;  %16280 = vmatprep.subr.bf16.mxu0 %v17453_v55 }
 0x3f9   : > { %v15744_v51 = vadd.f32 %v15743_v49, %v15742_v46  ;;  %v15789_v52 = vpop.f32.mrb[9].mxu1  ;;  %v15745_v53 = vpop.f32.mrb[10].mxu0  ;;  %v15200_v46 = vcombine.low %v7945_v38, %v7945_v38  ;;  %v17475_v38 = vld [vmem:[%s20326_s7 + $0x750] sm:$0xff]  }
 0x3fa   : > { %v15790_v56 = vadd.f32 %v15789_v52, %v15788_v48  ;;  %v15791_v57 = vpop.f32.mrb[10].mxu1  ;;  %v15746_v61 = vpop.f32.mrb[11].mxu0  ;;  %v17451_v48 = vld [vmem:[%s20326_s7 + $0x6f0] sm:$0xff]  }
 0x3fb   : > { %v15747_v0 = vadd.f32 %v15746_v61, %v15745_v53  ;;  %v15792_v1 = vpop.f32.mrb[11].mxu1  ;;  %v17452_v52 = vld [vmem:[%s20326_s7 + $0x6b0] sm:$0xff]   ;;  %16324 = vmatprep.subr.bf16.mxu1 %v17451_v48  ;;  %v17456_v61 = vld [vmem:[%s20326_s7 + $0x6b8] sm:$0xff]   ;;  %16281 = vmatpush3.bf16.msra.mxu0 %v17454_v58 }
 0x3fc   : > { %v20652_v62 = vadd.f32 %v15790_v56, %v15744_v51  ;;  %v15793_v3 = vadd.f32 %v15792_v1, %v15791_v57  ;;  %13471 = vmatmul.mubr.bf16.gmra.mrb[116].mxu0 %v15198_v45  ;;  %16325 = vmatpush3.bf16.msra.mxu1 %v17452_v52 }
 0x3fd   : > { %13543 = vmatmul.mubr.bf16.gmra.mrb[116].mxu1 %v15200_v46  ;;  %16326 = vmatprep.subr.bf16.mxu1 %v17455_v60  ;;  %v17484_v60 = vld [vmem:[%s20368_s16 + $0x3c0] ss:$216 sps:$4 sm:$0xff]  }
 0x3fe   : > { %v20658_v6 = vadd.f32 %v15793_v3, %v15747_v0  ;;  %v17457_v0 = vld [vmem:[%s20368_s16 + $0x60] ss:$216 sps:$4 sm:$0xff]   ;;  %v17459_v3 = vld [vmem:[%s20368_s16 + $0x64] ss:$216 sps:$4 sm:$0xff]   ;;  %13654 = vmatprep.mubr.bf16.mxu1 %v17462_v9 }
 0x3ff   : > { %v15748_v8 = vpop.f32.mrb[12].mxu0  ;;  %13582 = vmatprep.mubr.bf16.mxu0 %v17459_v3  ;;  %v17487_v3 = vld [vmem:[%s20326_s7 + $0x7d0] sm:$0xff]  }
 0x400   : > { %v15794_v10 = vpop.f32.mrb[12].mxu1  ;;  %v15749_v11 = vpop.f32.mrb[13].mxu0  ;;  %16327 = vmatpush3.bf16.msra.mxu1 %v17456_v61  ;;  %v17485_v61 = vld [vmem:[%s20368_s16 + $0x3c8] ss:$216 sps:$4 sm:$0xff]  }
 0x401   : > { %v15750_v13 = vadd.f32 %v15749_v11, %v15748_v8  ;;  %v15795_v14 = vpop.f32.mrb[13].mxu1  ;;  %v15751_v16 = vpop.f32.mrb[14].mxu0  ;;  %v17460_v8 = vld [vmem:[%s20368_s16 + $0x68] ss:$216 sps:$4 sm:$0xff]   ;;  %v17463_v11 = vld [vmem:[%s20326_s7 + $0x740] sm:$0xff]   ;;  %16404 = vmatprep.subr.bf16.mxu1 %v17473_v34 }
 0x402   : > { %v15796_v19 = vadd.f32 %v15795_v14, %v15794_v10  ;;  %v15797_v20 = vpop.f32.mrb[14].mxu1  ;;  %v15752_v24 = vpop.f32.mrb[15].mxu0  ;;  %v17464_v14 = vld [vmem:[%s20326_s7 + $0x700] sm:$0xff]   ;;  %16358 = vmatprep.subr.bf16.mxu0 %v17463_v11 }
 0x403   : > { %v15753_v27 = vadd.f32 %v15752_v24, %v15751_v16  ;;  %v15798_v28 = vpop.f32.mrb[15].mxu1  ;;  %v17467_v24 = vld [vmem:[%s20368_s16 + $0x214] ss:$216 sps:$4 sm:$0xff]  }
 0x404   : > { %v20667_v23 = vadd.f32 %v15796_v19, %v15750_v13  ;;  %v15799_v30 = vadd.f32 %v15798_v28, %v15797_v20  ;;  %13583 = vmatmul.mubr.bf16.vlgmr.msra.gmra.mrb[120].mxu0 %v17457_v0  ;;  %v17471_v28 = vld [vmem:[%s20368_s16 + $0x210] ss:$216 sps:$4 sm:$0xff]  }
 0x405   : > { %13655 = vmatmul.mubr.bf16.vlgmr.msra.gmra.mrb[120].mxu1 %v17460_v8  ;;  %16359 = vmatpush3.bf16.msra.mxu0 %v17464_v14  ;;  %v17486_v0 = vld [vmem:[%s20326_s7 + $0x718] sm:$0xff]  }
 0x406   : > { %v20673_v33 = vadd.f32 %v15799_v30, %v15753_v27  ;;  %16360 = vmatprep.subr.bf16.mxu0 %v17465_v18  ;;  %v17469_v27 = vld [vmem:[%s20368_s16 + $0x21c] ss:$216 sps:$4 sm:$0xff]   ;;  %13590 = vmatprep.mubr.bf16.mxu0 %v17467_v24 }
 0x407   : > { %v15754_v35 = vpop.f32.mrb[16].mxu0  ;;  %13662 = vmatprep.mubr.bf16.mxu1 %v17469_v27  ;;  %v17492_v18 = vld [vmem:[%s20326_s7 + $0x798] sm:$0xff]  }
 0x408   : > { %v15800_v39 = vpop.f32.mrb[16].mxu1  ;;  %v15755_v41 = vpop.f32.mrb[17].mxu0 }
 0x409   : > { %v15801_v47 = vpop.f32.mrb[17].mxu1  ;;  %v15756_v49 = vadd.f32 %v15755_v41, %v15754_v35  ;;  %v15757_v51 = vpop.f32.mrb[18].mxu0  ;;  %16361 = vmatpush3.bf16.msra.mxu0 %v17466_v21  ;;  %v17474_v35 = vld [vmem:[%s20326_s7 + $0x780] sm:$0xff]   ;;  %v17476_v41 = vld [vmem:[%s20326_s7 + $0x710] sm:$0xff]  }
 0x40a   : > { %v15802_v50 = vadd.f32 %v15801_v47, %v15800_v39  ;;  %v15758_v53 = vpop.f32.mrb[19].mxu0  ;;  %v15803_v57 = vpop.f32.mrb[18].mxu1  ;;  %16405 = vmatpush3.bf16.msra.mxu1 %v17474_v35  ;;  %16362 = vmatprep.subr.bf16.mxu0 %v17475_v38  ;;  %v17499_v35 = vld [vmem:[%s20326_s7 + $0x7e0] sm:$0xff]  }
 0x40b   : > { %v15804_v59 = vpop.f32.mrb[19].mxu1  ;;  %16406 = vmatprep.subr.bf16.mxu1 %v17477_v44  ;;  %v17481_v57 = vld [vmem:[%s20368_s16 + $0x3cc] ss:$216 sps:$4 sm:$0xff]  }
 0x40c   : > { %v20683_v56 = vadd.f32 %v15802_v50, %v15756_v49  ;;  %13591 = vmatmul.mubr.bf16.gmra.mrb[124].mxu0 %v17471_v28  ;;  %v17479_v50 = vld [vmem:[%s20368_s16 + $0x3c4] ss:$216 sps:$4 sm:$0xff]   ;;  %v17483_v59 = vld [vmem:[%s20326_s7 + $0x758] sm:$0xff]  }
 0x40d   : > { %13663 = vmatmul.mubr.bf16.gmra.mrb[124].mxu1 %v17472_v31  ;;  %16363 = vmatpush3.bf16.msra.mxu0 %v17476_v41  ;;  %v17498_v31 = vld [vmem:[%s20368_s16 + $0x578] ss:$216 sps:$4 sm:$0xff]  }
 0x40e   : > { %13598 = vmatprep.mubr.bf16.mxu0 %v17479_v50  ;;  %13670 = vmatprep.mubr.bf16.mxu1 %v17481_v57  ;;  %v17503_v44 = vld [vmem:[%s20326_s7 + $0x7e8] sm:$0xff]  }
 0x40f   : > { %v15822_v63 = vpop.f32.mrb[20].mxu0  ;;  %16364 = vmatprep.subr.bf16.mxu0 %v17483_v59  ;;  %v17508_v59 = vld [vmem:[%s20326_s7 + $0x730] sm:$0xff]  }
 0x410   : > { %v15823_v1 = vpop.f32.mrb[21].mxu0  ;;  %v15868_v2 = vpop.f32.mrb[20].mxu1 }
 0x411   : > { %v15824_v4 = vadd.f32 %v15823_v1, %v15822_v63  ;;  %v15825_v5 = vpop.f32.mrb[22].mxu0  ;;  %v15869_v7 = vpop.f32.mrb[21].mxu1  ;;  %16365 = vmatpush3.bf16.msra.mxu0 %v17486_v0  ;;  %v17511_v0 = vld [vmem:[%s20326_s7 + $0x7f0] sm:$0xff]  }
 0x412   : > { %v15870_v10 = vadd.f32 %v15869_v7, %v15868_v2  ;;  %v15826_v13 = vpop.f32.mrb[23].mxu0  ;;  %v15871_v17 = vpop.f32.mrb[22].mxu1  ;;  %v17488_v7 = vld [vmem:[%s20326_s7 + $0x790] sm:$0xff]  }
 0x413   : > { %v12865_v12 = vadd.f32 %v15824_v4, %v20625_v15  ;;  %v15827_v16 = vadd.f32 %v15826_v13, %v15825_v5  ;;  %v15872_v20 = vpop.f32.mrb[23].mxu1 }
 0x414   : > { %v15873_v22 = vadd.f32 %v15872_v20, %v15871_v17  ;;  %13599 = vmatmul.mubr.bf16.gmra.mrb[128].mxu0 %v17484_v60 }
 0x415   : > { %v20696_v19 = vadd.f32 %v15870_v10, %v12865_v12  ;;  %v12868_v15 = vadd.f32 %v15827_v16, %v20631_v26  ;;  %13671 = vmatmul.mubr.bf16.gmra.mrb[128].mxu1 %v17485_v61  ;;  %v17489_v10 = vld [vmem:[%s20326_s7 + $0x760] sm:$0xff]   ;;  %v17490_v12 = vld [vmem:[%s20326_s7 + $0x7d8] sm:$0xff]  }
 0x416   : > { %16366 = vmatprep.subr.bf16.mxu0 %v17489_v10  ;;  %v17491_v16 = vld [vmem:[%s20326_s7 + $0x720] sm:$0xff]   ;;  %v17515_v10 = vld [vmem:[%s20326_s7 + $0x7f8] sm:$0xff]  }
 0x417   : > { %v15828_v25 = vpop.f32.mrb[24].mxu0  ;;  %v20703_v29 = vadd.f32 %v15873_v22, %v12868_v15  ;;  %16367 = vmatpush3.bf16.msra.mxu0 %v17491_v16 }
 0x418   : > { %v15829_v30 = vpop.f32.mrb[25].mxu0  ;;  %v15874_v37 = vpop.f32.mrb[24].mxu1 }
 0x419   : > { %v15830_v32 = vadd.f32 %v15829_v30, %v15828_v25  ;;  %v15831_v26 = vpop.f32.mrb[26].mxu0  ;;  %v15875_v43 = vpop.f32.mrb[25].mxu1  ;;  %v17495_v25 = vld [vmem:[%s20368_s16 + $0x57c] ss:$216 sps:$4 sm:$0xff]   ;;  %v17497_v30 = vld [vmem:[%s20368_s16 + $0x570] ss:$216 sps:$4 sm:$0xff]  }
 0x41a   : > { %v15832_v39 = vpop.f32.mrb[27].mxu0  ;;  %v15876_v45 = vadd.f32 %v15875_v43, %v15874_v37  ;;  %v15877_v46 = vpop.f32.mrb[26].mxu1  ;;  %13678 = vmatprep.mubr.bf16.mxu1 %v17495_v25  ;;  %v17500_v37 = vld [vmem:[%s20326_s7 + $0x768] sm:$0xff]  }
 0x41b   : > { %v12873_v36 = vadd.f32 %v15830_v32, %v20640_v40  ;;  %v15833_v42 = vadd.f32 %v15832_v39, %v15831_v26  ;;  %v17478_v40 = vld [vmem:[%s20326_s7 + $0x788] sm:$0xff]   ;;  %v15878_v48 = vpop.f32.mrb[27].mxu1  ;;  %16368 = vmatprep.subr.bf16.mxu0 %v17500_v37 }
 0x41c   : > { %v15879_v52 = vadd.f32 %v15878_v48, %v15877_v46  ;;  %16407 = vmatpush3.bf16.msra.mxu1 %v17478_v40  ;;  %v17502_v43 = vld [vmem:[%s20326_s7 + $0x728] sm:$0xff]  }
 0x41d   : > { %v12876_v47 = vadd.f32 %v15833_v42, %v20646_v54  ;;  %v20715_v51 = vadd.f32 %v15876_v45, %v12873_v36  ;;  %16408 = vmatprep.subr.bf16.mxu1 %v17487_v3  ;;  %13679 = vmatmul.mubr.bf16.gmra.mrb[132].mxu1 %v17498_v31  ;;  %v17504_v46 = vld [vmem:[%s20326_s7 + $0x7a8] sm:$0xff]  }
 0x41e   : > { %16369 = vmatpush3.bf16.msra.mxu0 %v17502_v43  ;;  %v17532_v43 = vld [vmem:[%s20368_s16 + $0x228] ss:$216 sps:$4 sm:$0xff]  }
 0x41f   : > { %v15834_v49 = vpop.f32.mrb[28].mxu0  ;;  %v20721_v54 = vadd.f32 %v15879_v52, %v12876_v47  ;;  %v7946_v47 = vld [vmem:[%s20368_s16 + $0x720] sm:$0xff]  ;;  %v7947_v52 = vld [vmem:[%s20368_s16 + $0x728] sm:$0xff] }
 0x420   : > { %v15835_v53 = vpop.f32.mrb[29].mxu0  ;;  %v15880_v55 = vpop.f32.mrb[28].mxu1  ;;  %16409 = vmatpush3.bf16.msra.mxu1 %v17488_v7  ;;  %v15203_v50 = vcombine.high %v7946_v47, %v7946_v47  ;;  %v15204_v60 = vcombine.low %v7947_v52, %v7947_v52 }
 0x421   : > { %v15836_v58 = vadd.f32 %v15835_v53, %v15834_v49  ;;  %v15837_v63 = vpop.f32.mrb[30].mxu0  ;;  %v15881_v5 = vpop.f32.mrb[29].mxu1  ;;  %16410 = vmatprep.subr.bf16.mxu1 %v17490_v12  ;;  %v15202_v53 = vcombine.low %v7946_v47, %v7946_v47  ;;  %v17517_v12 = vld [vmem:[%s20368_s16 + $0x70] ss:$216 sps:$4 sm:$0xff]  }
 0x422   : > { %v15838_v2 = vpop.f32.mrb[31].mxu0  ;;  %v15882_v8 = vadd.f32 %v15881_v5, %v15880_v55  ;;  %v15883_v9 = vpop.f32.mrb[30].mxu1  ;;  %v17513_v5 = vld [vmem:[%s20326_s7 + $0x778] sm:$0xff]  }
 0x423   : > { %v12881_v1 = vadd.f32 %v15836_v58, %v20652_v62  ;;  %v15839_v4 = vadd.f32 %v15838_v2, %v15837_v63  ;;  %v15884_v62 = vpop.f32.mrb[31].mxu1  ;;  %v15205_v58 = vcombine.high %v7947_v52, %v7947_v52  ;;  %v17512_v2 = vld [vmem:[%s20326_s7 + $0x7b0] sm:$0xff]  }
 0x424   : > { %v15885_v14 = vadd.f32 %v15884_v62, %v15883_v9  ;;  %16411 = vmatpush3.bf16.msra.mxu1 %v17492_v18  ;;  %v17522_v18 = vld [vmem:[%s20368_s16 + $0x7c] ss:$216 sps:$4 sm:$0xff]  }
 0x425   : > { %v12884_v11 = vadd.f32 %v15839_v4, %v20658_v6  ;;  %v20730_v13 = vadd.f32 %v15882_v8, %v12881_v1  ;;  %v17493_v6 = vld [vmem:[%s20368_s16 + $0x574] ss:$216 sps:$4 sm:$0xff]   ;;  %16412 = vmatprep.subr.bf16.mxu1 %v17499_v35  ;;  %13686 = vmatprep.mubr.bf16.mxu1 %v15205_v58 }
 0x426   : > { %13606 = vmatprep.mubr.bf16.mxu0 %v17493_v6  ;;  %13687 = vmatmul.mubr.bf16.gmra.mrb[136].mxu1 %v15204_v60  ;;  %v17514_v8 = vld [vmem:[%s20326_s7 + $0x738] sm:$0xff]   ;;  %v17538_v60 = vld [vmem:[%s20326_s7 + $0x888] sm:$0xff]  }
 0x427   : > { %v15840_v17 = vpop.f32.mrb[32].mxu0  ;;  %v20734_v20 = vadd.f32 %v15885_v14, %v12884_v11  ;;  %13607 = vmatmul.mubr.bf16.gmra.mrb[132].mxu0 %v17497_v30  ;;  %v17516_v11 = vld [vmem:[%s20326_s7 + $0x7b8] sm:$0xff]   ;;  %13798 = vmatprep.mubr.bf16.mxu1 %v17522_v18  ;;  %v17525_v30 = vld [vmem:[%s20326_s7 + $0x848] sm:$0xff]  }
 0x428   : > { %v15841_v21 = vpop.f32.mrb[33].mxu0  ;;  %v15886_v24 = vpop.f32.mrb[32].mxu1  ;;  %13614 = vmatprep.mubr.bf16.mxu0 %v15203_v50  ;;  %v17519_v14 = vld [vmem:[%s20368_s16 + $0x74] ss:$216 sps:$4 sm:$0xff]  }
 0x429   : > { %v15842_v15 = vadd.f32 %v15841_v21, %v15840_v17  ;;  %v15843_v22 = vpop.f32.mrb[34].mxu0  ;;  %v15887_v28 = vpop.f32.mrb[33].mxu1  ;;  %v17520_v17 = vld [vmem:[%s20368_s16 + $0x78] ss:$216 sps:$4 sm:$0xff]   ;;  %v17536_v50 = vld [vmem:[%s20326_s7 + $0x810] sm:$0xff]  }
 0x42a   : > { %v15844_v27 = vpop.f32.mrb[35].mxu0  ;;  %v15888_v26 = vadd.f32 %v15887_v28, %v15886_v24  ;;  %v15889_v36 = vpop.f32.mrb[34].mxu1  ;;  %v17524_v24 = vld [vmem:[%s20326_s7 + $0x800] sm:$0xff]  }
 0x42b   : > { %v12889_v32 = vadd.f32 %v15842_v15, %v20667_v23  ;;  %v15845_v34 = vadd.f32 %v15844_v27, %v15843_v22  ;;  %v15890_v41 = vpop.f32.mrb[35].mxu1  ;;  %v17501_v23 = vld [vmem:[%s20326_s7 + $0x7a0] sm:$0xff]  }
 0x42c   : > { %v15891_v42 = vadd.f32 %v15890_v41, %v15889_v36  ;;  %16413 = vmatpush3.bf16.msra.mxu1 %v17501_v23  ;;  %v17523_v15 = vld [vmem:[%s20326_s7 + $0x840] sm:$0xff]  }
 0x42d   : > { %v12892_v38 = vadd.f32 %v15845_v34, %v20673_v33  ;;  %v20744_v39 = vadd.f32 %v15888_v26, %v12889_v32  ;;  %16414 = vmatprep.subr.bf16.mxu1 %v17503_v44  ;;  %v17505_v33 = vld [vmem:[%s20326_s7 + $0x770] sm:$0xff]   ;;  %v17526_v34 = vld [vmem:[%s20326_s7 + $0x808] sm:$0xff]  }
 0x42e   : > { %16370 = vmatprep.subr.bf16.mxu0 %v17505_v33 }
 0x42f   : > { %v20749_v45 = vadd.f32 %v15891_v42, %v12892_v38  ;;  %v15846_v48 = vpop.f32.mrb[36].mxu0  ;;  %16371 = vmatpush3.bf16.msra.mxu0 %v17508_v59  ;;  %v17529_v38 = vld [vmem:[%s20368_s16 + $0x22c] ss:$216 sps:$4 sm:$0xff]   ;;  %v17531_v42 = vld [vmem:[%s20368_s16 + $0x220] ss:$216 sps:$4 sm:$0xff]  }
 0x430   : > { %v15892_v40 = vpop.f32.mrb[36].mxu1  ;;  %v15847_v55 = vpop.f32.mrb[37].mxu0  ;;  %16415 = vmatpush3.bf16.msra.mxu1 %v17504_v46  ;;  %13615 = vmatmul.mubr.bf16.gmra.mrb[136].mxu0 %v15202_v53 }
 0x431   : > { %v15893_v49 = vpop.f32.mrb[37].mxu1  ;;  %v15848_v61 = vadd.f32 %v15847_v55, %v15846_v48  ;;  %v15849_v63 = vpop.f32.mrb[38].mxu0  ;;  %16416 = vmatprep.subr.bf16.mxu1 %v17511_v0  ;;  %16372 = vmatprep.subr.bf16.mxu0 %v17513_v5  ;;  %v17535_v48 = vld [vmem:[%s20326_s7 + $0x850] sm:$0xff]  }
 0x432   : > { %v15894_v57 = vadd.f32 %v15893_v49, %v15892_v40  ;;  %v15850_v1 = vpop.f32.mrb[39].mxu0  ;;  %v15895_v4 = vpop.f32.mrb[38].mxu1  ;;  %13726 = vmatprep.mubr.bf16.mxu0 %v17519_v14  ;;  %v17534_v40 = vld [vmem:[%s20326_s7 + $0x880] sm:$0xff]  }
 0x433   : > { %v12897_v3 = vadd.f32 %v15848_v61, %v20683_v56  ;;  %v15896_v7 = vpop.f32.mrb[39].mxu1  ;;  %16373 = vmatpush3.bf16.msra.mxu0 %v17514_v8  ;;  %v17539_v0 = vld [vmem:[%s20368_s16 + $0x3d4] ss:$216 sps:$4 sm:$0xff]   ;;  %v17544_v8 = vld [vmem:[%s20368_s16 + $0x3d0] ss:$216 sps:$4 sm:$0xff]  }
 0x434   : > { %16417 = vmatpush3.bf16.msra.mxu1 %v17512_v2  ;;  %16450 = vmatprep.subr.bf16.mxu0 %v17523_v15  ;;  %v17541_v4 = vld [vmem:[%s20368_s16 + $0x3dc] ss:$216 sps:$4 sm:$0xff]  }
 0x435   : > { %v20761_v9 = vadd.f32 %v15894_v57, %v12897_v3  ;;  %16418 = vmatprep.subr.bf16.mxu1 %v17515_v10  ;;  %v17537_v57 = vld [vmem:[%s20326_s7 + $0x8c8] sm:$0xff]   ;;  %v17543_v7 = vld [vmem:[%s20326_s7 + $0x858] sm:$0xff]  }
 0x437   : > { %v15914_v56 = vpop.f32.mrb[40].mxu0 }
 0x438   : > { %v15960_v62 = vpop.f32.mrb[40].mxu1  ;;  %v15915_v16 = vpop.f32.mrb[41].mxu0  ;;  %16419 = vmatpush3.bf16.msra.mxu1 %v17516_v11  ;;  %13727 = vmatmul.mubr.bf16.vlgmr.msra.gmra.mrb[140].mxu0 %v17517_v12 }
 0x439   : > { %v15916_v21 = vadd.f32 %v15915_v16, %v15914_v56  ;;  %v15917_v6 = vpop.f32.mrb[42].mxu0  ;;  %v15961_v28 = vpop.f32.mrb[41].mxu1  ;;  %16451 = vmatpush3.bf16.msra.mxu0 %v17524_v24  ;;  %v17545_v56 = vld [vmem:[%s20368_s16 + $0x3d8] ss:$216 sps:$4 sm:$0xff]   ;;  %v17547_v16 = vld [vmem:[%s20326_s7 + $0x8d0] sm:$0xff]  }
 0x43a   : > { %v15918_v22 = vpop.f32.mrb[43].mxu0  ;;  %v15962_v31 = vadd.f32 %v15961_v28, %v15960_v62  ;;  %v15963_v32 = vpop.f32.mrb[42].mxu1  ;;  %16452 = vmatprep.subr.bf16.mxu0 %v17525_v30  ;;  %v17546_v62 = vld [vmem:[%s20326_s7 + $0x818] sm:$0xff]  }
 0x43b   : > { %v13009_v25 = vadd.f32 %v15916_v21, %v20696_v19  ;;  %v15919_v27 = vadd.f32 %v15918_v22, %v15917_v6  ;;  %13799 = vmatmul.mubr.bf16.vlgmr.msra.gmra.mrb[140].mxu1 %v17520_v17  ;;  %v15964_v35 = vpop.f32.mrb[43].mxu1  ;;  %v17527_v19 = vld [vmem:[%s20368_s16 + $0x224] ss:$216 sps:$4 sm:$0xff]  }
 0x43c   : > { %v15965_v37 = vadd.f32 %v15964_v35, %v15963_v32  ;;  %13734 = vmatprep.mubr.bf16.mxu0 %v17527_v19  ;;  %13806 = vmatprep.mubr.bf16.mxu1 %v17529_v38  ;;  %v17548_v21 = vld [vmem:[%s20326_s7 + $0x890] sm:$0xff]   ;;  %v17549_v22 = vld [vmem:[%s20326_s7 + $0x860] sm:$0xff]  }
 0x43d   : > { %v13012_v26 = vadd.f32 %v15919_v27, %v20703_v29  ;;  %v20776_v36 = vadd.f32 %v15962_v31, %v13009_v25  ;;  %16453 = vmatpush3.bf16.msra.mxu0 %v17526_v34  ;;  %v17533_v29 = vld [vmem:[%s20326_s7 + $0x8c0] sm:$0xff]   ;;  %v17552_v34 = vld [vmem:[%s20326_s7 + $0x898] sm:$0xff]  }
 0x43e   : > { %16496 = vmatprep.subr.bf16.mxu1 %v17533_v29  ;;  %16454 = vmatprep.subr.bf16.mxu0 %v17535_v48  ;;  %v17551_v31 = vld [vmem:[%s20326_s7 + $0x820] sm:$0xff]   ;;  %v17560_v48 = vld [vmem:[%s20326_s7 + $0x868] sm:$0xff]  }
 0x43f   : > { %v15920_v41 = vpop.f32.mrb[44].mxu0  ;;  %v20781_v44 = vadd.f32 %v15965_v37, %v13012_v26  ;;  %16497 = vmatpush3.bf16.msra.mxu1 %v17534_v40  ;;  %v17553_v37 = vld [vmem:[%s20368_s16 + $0x584] ss:$216 sps:$4 sm:$0xff]  }
 0x440   : > { %v15966_v23 = vpop.f32.mrb[44].mxu1  ;;  %v15921_v46 = vpop.f32.mrb[45].mxu0  ;;  %13735 = vmatmul.mubr.bf16.gmra.mrb[144].mxu0 %v17531_v42  ;;  %16498 = vmatprep.subr.bf16.mxu1 %v17537_v57  ;;  %v17557_v42 = vld [vmem:[%s20368_s16 + $0x580] ss:$216 sps:$4 sm:$0xff]  }
 0x441   : > { %v15922_v33 = vadd.f32 %v15921_v46, %v15920_v41  ;;  %v15923_v47 = vpop.f32.mrb[46].mxu0  ;;  %v15967_v55 = vpop.f32.mrb[45].mxu1  ;;  %16455 = vmatpush3.bf16.msra.mxu0 %v17536_v50  ;;  %13742 = vmatprep.mubr.bf16.mxu0 %v17539_v0  ;;  %v17563_v57 = vld [vmem:[%s20326_s7 + $0x8e8] sm:$0xff]  }
 0x442   : > { %v15924_v49 = vpop.f32.mrb[47].mxu0  ;;  %v15968_v58 = vadd.f32 %v15967_v55, %v15966_v23  ;;  %v15969_v59 = vpop.f32.mrb[46].mxu1  ;;  %16456 = vmatprep.subr.bf16.mxu0 %v17543_v7  ;;  %v17555_v23 = vld [vmem:[%s20368_s16 + $0x58c] ss:$216 sps:$4 sm:$0xff]   ;;  %v7949_v0 = vld [vmem:[%s20368_s16 + $0x738] sm:$0xff] }
 0x443   : > { %v13017_v52 = vadd.f32 %v15922_v33, %v20715_v51  ;;  %v15925_v53 = vadd.f32 %v15924_v49, %v15923_v47  ;;  %13807 = vmatmul.mubr.bf16.gmra.mrb[144].mxu1 %v17532_v43  ;;  %v15970_v63 = vpop.f32.mrb[47].mxu1  ;;  %v17558_v43 = vld [vmem:[%s20368_s16 + $0x588] ss:$216 sps:$4 sm:$0xff]   ;;  %v17559_v33 = vld [vmem:[%s20326_s7 + $0x8e0] sm:$0xff]  }
 0x444   : > { %v15971_v51 = vadd.f32 %v15970_v63, %v15969_v59  ;;  %16499 = vmatpush3.bf16.msra.mxu1 %v17538_v60  ;;  %13814 = vmatprep.mubr.bf16.mxu1 %v17541_v4  ;;  %v17562_v55 = vld [vmem:[%s20326_s7 + $0x828] sm:$0xff]   ;;  %v17565_v60 = vld [vmem:[%s20326_s7 + $0x870] sm:$0xff]   ;;  %v7948_v63 = vld [vmem:[%s20368_s16 + $0x730] sm:$0xff]  ;;  %v15209_v4 = vcombine.high %v7949_v0, %v7949_v0 }
 0x445   : > { %v13020_v61 = vadd.f32 %v15925_v53, %v20721_v54  ;;  %v20792_v1 = vadd.f32 %v15968_v58, %v13017_v52  ;;  %16457 = vmatpush3.bf16.msra.mxu0 %v17546_v62  ;;  %16500 = vmatprep.subr.bf16.mxu1 %v17547_v16  ;;  %v17564_v59 = vld [vmem:[%s20326_s7 + $0x8a8] sm:$0xff]   ;;  %v15206_v7 = vcombine.low %v7948_v63, %v7948_v63 }
 0x446   : > { %16458 = vmatprep.subr.bf16.mxu0 %v17549_v22 }
 0x447   : > { %v15926_v2 = vpop.f32.mrb[48].mxu0  ;;  %v20797_v10 = vadd.f32 %v15971_v51, %v13020_v61 }
 0x448   : > { %v15972_v3 = vpop.f32.mrb[48].mxu1  ;;  %v15927_v5 = vpop.f32.mrb[49].mxu0  ;;  %13743 = vmatmul.mubr.bf16.gmra.mrb[148].mxu0 %v17544_v8  ;;  %16501 = vmatpush3.bf16.msra.mxu1 %v17548_v21 }
 0x449   : > { %v15928_v54 = vadd.f32 %v15927_v5, %v15926_v2  ;;  %v15929_v11 = vpop.f32.mrb[50].mxu0  ;;  %v15973_v18 = vpop.f32.mrb[49].mxu1  ;;  %16459 = vmatpush3.bf16.msra.mxu0 %v17551_v31  ;;  %13750 = vmatprep.mubr.bf16.mxu0 %v17553_v37  ;;  %v17568_v5 = vld [vmem:[%s20326_s7 + $0x830] sm:$0xff]   ;;  %v17583_v37 = vld [vmem:[%s20326_s7 + $0x940] sm:$0xff]  }
 0x44a   : > { %v15930_v14 = vpop.f32.mrb[51].mxu0  ;;  %v15974_v6 = vadd.f32 %v15973_v18, %v15972_v3  ;;  %v15975_v15 = vpop.f32.mrb[50].mxu1  ;;  %16460 = vmatprep.subr.bf16.mxu0 %v17560_v48  ;;  %v15207_v3 = vcombine.high %v7948_v63, %v7948_v63  ;;  %v17580_v31 = vld [vmem:[%s20368_s16 + $0x88] ss:$216 sps:$4 sm:$0xff]   ;;  %v17587_v48 = vld [vmem:[%s20368_s16 + $0x234] ss:$216 sps:$4 sm:$0xff]  }
 0x44b   : > { %v13025_v12 = vadd.f32 %v15928_v54, %v20730_v13  ;;  %v15931_v17 = vadd.f32 %v15930_v14, %v15929_v11  ;;  %13815 = vmatmul.mubr.bf16.gmra.mrb[148].mxu1 %v17545_v56  ;;  %v15976_v25 = vpop.f32.mrb[51].mxu1  ;;  %v17550_v13 = vld [vmem:[%s20326_s7 + $0x8d8] sm:$0xff]   ;;  %v15208_v54 = vcombine.low %v7949_v0, %v7949_v0  ;;  %v17571_v11 = vld [vmem:[%s20326_s7 + $0x8f0] sm:$0xff]  }
 0x44c   : > { %v15977_v28 = vadd.f32 %v15976_v25, %v15975_v15  ;;  %16502 = vmatprep.subr.bf16.mxu1 %v17550_v13  ;;  %13822 = vmatprep.mubr.bf16.mxu1 %v17555_v23  ;;  %v17572_v14 = vld [vmem:[%s20326_s7 + $0x8b0] sm:$0xff]   ;;  %v17575_v15 = vld [vmem:[%s20326_s7 + $0x8f8] sm:$0xff]   ;;  %v17584_v23 = vld [vmem:[%s20326_s7 + $0x900] sm:$0xff]  }
 0x44d   : > { %v13028_v24 = vadd.f32 %v15931_v17, %v20734_v20  ;;  %v20807_v27 = vadd.f32 %v15974_v6, %v13025_v12  ;;  %16503 = vmatpush3.bf16.msra.mxu1 %v17552_v34  ;;  %16461 = vmatpush3.bf16.msra.mxu0 %v17562_v55  ;;  %v17573_v17 = vld [vmem:[%s20326_s7 + $0x878] sm:$0xff]   ;;  %v17595_v63 = vld [vmem:[%s20326_s7 + $0x950] sm:$0xff]  }
 0x44e   : > { %16504 = vmatprep.subr.bf16.mxu1 %v17559_v33  ;;  %16462 = vmatprep.subr.bf16.mxu0 %v17565_v60  ;;  %v17574_v6 = vld [vmem:[%s20326_s7 + $0x838] sm:$0xff]   ;;  %v17586_v33 = vld [vmem:[%s20326_s7 + $0x908] sm:$0xff]   ;;  %v17594_v60 = vld [vmem:[%s20326_s7 + $0x980] sm:$0xff]  }
 0x44f   : > { %v15932_v30 = vpop.f32.mrb[52].mxu0  ;;  %v20811_v26 = vadd.f32 %v15977_v28, %v13028_v24  ;;  %v17576_v24 = vld [vmem:[%s20326_s7 + $0x8b8] sm:$0xff]   ;;  %v17577_v28 = vld [vmem:[%s20368_s16 + $0x80] ss:$216 sps:$4 sm:$0xff]  }
 0x450   : > { %v15933_v32 = vpop.f32.mrb[53].mxu0  ;;  %v15978_v19 = vpop.f32.mrb[52].mxu1  ;;  %13751 = vmatmul.mubr.bf16.gmra.mrb[152].mxu0 %v17557_v42  ;;  %v17592_v55 = vld [vmem:[%s20368_s16 + $0x238] ss:$216 sps:$4 sm:$0xff]  }
 0x451   : > { %v15934_v20 = vadd.f32 %v15933_v32, %v15932_v30  ;;  %v15935_v35 = vpop.f32.mrb[54].mxu0  ;;  %v15979_v41 = vpop.f32.mrb[53].mxu1  ;;  %13758 = vmatprep.mubr.bf16.mxu0 %v15207_v3  ;;  %16463 = vmatpush3.bf16.msra.mxu0 %v17568_v5  ;;  %v17597_v5 = vld [vmem:[%s20326_s7 + $0x9c8] sm:$0xff]  }
 0x452   : > { %v15936_v38 = vpop.f32.mrb[55].mxu0  ;;  %v15980_v40 = vadd.f32 %v15979_v41, %v15978_v19  ;;  %v15981_v47 = vpop.f32.mrb[54].mxu1  ;;  %16464 = vmatprep.subr.bf16.mxu0 %v17573_v17  ;;  %v17601_v17 = vld [vmem:[%s20368_s16 + $0x3ec] ss:$216 sps:$4 sm:$0xff]  }
 0x453   : > { %v13033_v29 = vadd.f32 %v15934_v20, %v20744_v39  ;;  %v15937_v46 = vadd.f32 %v15936_v38, %v15935_v35  ;;  %v15982_v52 = vpop.f32.mrb[55].mxu1  ;;  %13823 = vmatmul.mubr.bf16.gmra.mrb[152].mxu1 %v17558_v43  ;;  %v17561_v39 = vld [vmem:[%s20326_s7 + $0x8a0] sm:$0xff]   ;;  %v17582_v35 = vld [vmem:[%s20368_s16 + $0x8c] ss:$216 sps:$4 sm:$0xff]  }
 0x454   : > { %v15983_v53 = vadd.f32 %v15982_v52, %v15981_v47  ;;  %16505 = vmatpush3.bf16.msra.mxu1 %v17561_v39  ;;  %13830 = vmatprep.mubr.bf16.mxu1 %v15209_v4  ;;  %v17589_v39 = vld [vmem:[%s20368_s16 + $0x23c] ss:$216 sps:$4 sm:$0xff]  }
 0x455   : > { %v13036_v49 = vadd.f32 %v15937_v46, %v20749_v45  ;;  %v20821_v50 = vadd.f32 %v15980_v40, %v13033_v29  ;;  %16506 = vmatprep.subr.bf16.mxu1 %v17563_v57  ;;  %16465 = vmatpush3.bf16.msra.mxu0 %v17574_v6  ;;  %v17585_v29 = vld [vmem:[%s20326_s7 + $0x948] sm:$0xff]   ;;  %v17603_v6 = vld [vmem:[%s20326_s7 + $0x958] sm:$0xff]  }
 0x456   : > { %16542 = vmatprep.subr.bf16.mxu0 %v17583_v37 }
 0x457   : > { %v20826_v58 = vadd.f32 %v15983_v53, %v13036_v49  ;;  %v15938_v61 = vpop.f32.mrb[56].mxu0  ;;  %v17591_v53 = vld [vmem:[%s20368_s16 + $0x230] ss:$216 sps:$4 sm:$0xff]  }
 0x458   : > { %v15984_v45 = vpop.f32.mrb[56].mxu1  ;;  %v15939_v51 = vpop.f32.mrb[57].mxu0  ;;  %16507 = vmatpush3.bf16.msra.mxu1 %v17564_v59  ;;  %13759 = vmatmul.mubr.bf16.gmra.mrb[156].mxu0 %v15206_v7  ;;  %v17593_v59 = vld [vmem:[%s20326_s7 + $0x9c0] sm:$0xff]  }
 0x459   : > { %v15985_v2 = vpop.f32.mrb[57].mxu1  ;;  %v15941_v8 = vpop.f32.mrb[58].mxu0  ;;  %v15940_v56 = vadd.f32 %v15939_v51, %v15938_v61  ;;  %16508 = vmatprep.subr.bf16.mxu1 %v17571_v11  ;;  %v17596_v51 = vld [vmem:[%s20326_s7 + $0x910] sm:$0xff]  }
 0x45a   : > { %v15942_v62 = vpop.f32.mrb[59].mxu0  ;;  %v15986_v12 = vadd.f32 %v15985_v2, %v15984_v45  ;;  %v15987_v16 = vpop.f32.mrb[58].mxu1 }
 0x45b   : > { %13831 = vmatmul.mubr.bf16.gmra.mrb[156].mxu1 %v15208_v54  ;;  %v13041_v18 = vadd.f32 %v15940_v56, %v20761_v9  ;;  %v15988_v21 = vpop.f32.mrb[59].mxu1  ;;  %v17579_v9 = vld [vmem:[%s20368_s16 + $0x84] ss:$216 sps:$4 sm:$0xff]  }
 0x45c   : > { %16509 = vmatpush3.bf16.msra.mxu1 %v17572_v14  ;;  %13870 = vmatprep.mubr.bf16.mxu0 %v17579_v9  ;;  %v17598_v54 = vld [vmem:[%s20326_s7 + $0x988] sm:$0xff]   ;;  %v17606_v9 = vld [vmem:[%s20326_s7 + $0x918] sm:$0xff]  }
 0x45d   : > { %v20839_v22 = vadd.f32 %v15986_v12, %v13041_v18  ;;  %16510 = vmatprep.subr.bf16.mxu1 %v17575_v15  ;;  %13942 = vmatprep.mubr.bf16.mxu1 %v17582_v35  ;;  %v17599_v62 = vld [vmem:[%s20368_s16 + $0x3e4] ss:$216 sps:$4 sm:$0xff]  }
 0x45e   : > { %v17608_v35 = vld [vmem:[%s20326_s7 + $0x990] sm:$0xff]  }
 0x45f   : > { %v16006_v25 = vpop.f32.mrb[60].mxu0 }
 0x460   : > { %v16052_v13 = vpop.f32.mrb[60].mxu1  ;;  %v16007_v30 = vpop.f32.mrb[61].mxu0  ;;  %16511 = vmatpush3.bf16.msra.mxu1 %v17576_v24  ;;  %13871 = vmatmul.mubr.bf16.vlgmr.msra.gmra.mrb[160].mxu0 %v17577_v28  ;;  %v17605_v28 = vld [vmem:[%s20368_s16 + $0x3e8] ss:$216 sps:$4 sm:$0xff]  }
 0x461   : > { %v16008_v32 = vadd.f32 %v16007_v30, %v16006_v25  ;;  %v16009_v34 = vpop.f32.mrb[62].mxu0  ;;  %v16053_v20 = vpop.f32.mrb[61].mxu1  ;;  %16543 = vmatpush3.bf16.msra.mxu0 %v17584_v23  ;;  %13878 = vmatprep.mubr.bf16.mxu0 %v17587_v48  ;;  %v17610_v23 = vld [vmem:[%s20326_s7 + $0x9d8] sm:$0xff]  }
 0x462   : > { %v16054_v19 = vadd.f32 %v16053_v20, %v16052_v13  ;;  %v16010_v41 = vpop.f32.mrb[63].mxu0  ;;  %v16055_v43 = vpop.f32.mrb[62].mxu1  ;;  %16544 = vmatprep.subr.bf16.mxu0 %v17585_v29  ;;  %16588 = vmatprep.subr.bf16.mxu1 %v17593_v59  ;;  %v17604_v13 = vld [vmem:[%s20368_s16 + $0x3e0] ss:$216 sps:$4 sm:$0xff]  }
 0x463   : > { %v13153_v38 = vadd.f32 %v16008_v32, %v20776_v36  ;;  %v16011_v42 = vadd.f32 %v16010_v41, %v16009_v34  ;;  %13943 = vmatmul.mubr.bf16.vlgmr.msra.gmra.mrb[160].mxu1 %v17580_v31  ;;  %v16056_v40 = vpop.f32.mrb[63].mxu1  ;;  %v17607_v32 = vld [vmem:[%s20326_s7 + $0x9d0] sm:$0xff]   ;;  %v17618_v59 = vld [vmem:[%s20368_s16 + $0x598] ss:$216 sps:$4 sm:$0xff]  }
 0x464   : > { %v16057_v47 = vadd.f32 %v16056_v40, %v16055_v43  ;;  %13950 = vmatprep.mubr.bf16.mxu1 %v17589_v39  ;;  %16589 = vmatpush3.bf16.msra.mxu1 %v17594_v60  ;;  %v17612_v40 = vld [vmem:[%s20326_s7 + $0x998] sm:$0xff]  }
 0x465   : > { %v20850_v46 = vadd.f32 %v16054_v19, %v13153_v38  ;;  %v13156_v36 = vadd.f32 %v16011_v42, %v20781_v44  ;;  %16545 = vmatpush3.bf16.msra.mxu0 %v17586_v33  ;;  %16590 = vmatprep.subr.bf16.mxu1 %v17597_v5  ;;  %v17609_v38 = vld [vmem:[%s20326_s7 + $0x960] sm:$0xff]   ;;  %v17623_v5 = vld [vmem:[%s20326_s7 + $0x9e8] sm:$0xff]  }
 0x466   : > { %16546 = vmatprep.subr.bf16.mxu0 %v17595_v63  ;;  %v17611_v42 = vld [vmem:[%s20326_s7 + $0x920] sm:$0xff]   ;;  %v17620_v63 = vld [vmem:[%s20326_s7 + $0x968] sm:$0xff]  }
 0x467   : > { %v16012_v49 = vpop.f32.mrb[64].mxu0  ;;  %v20858_v57 = vadd.f32 %v16057_v47, %v13156_v36  ;;  %v17613_v47 = vld [vmem:[%s20368_s16 + $0x594] ss:$216 sps:$4 sm:$0xff]   ;;  %v17617_v39 = vld [vmem:[%s20368_s16 + $0x590] ss:$216 sps:$4 sm:$0xff]  }
 0x468   : > { %v16058_v52 = vpop.f32.mrb[64].mxu1  ;;  %v16013_v45 = vpop.f32.mrb[65].mxu0  ;;  %13879 = vmatmul.mubr.bf16.gmra.mrb[164].mxu0 %v17591_v53  ;;  %16591 = vmatpush3.bf16.msra.mxu1 %v17598_v54 }
 0x469   : > { %v16014_v44 = vadd.f32 %v16013_v45, %v16012_v49  ;;  %v16015_v61 = vpop.f32.mrb[66].mxu0  ;;  %v16059_v4 = vpop.f32.mrb[65].mxu1  ;;  %16547 = vmatpush3.bf16.msra.mxu0 %v17596_v51  ;;  %13886 = vmatprep.mubr.bf16.mxu0 %v17599_v62 }
 0x46a   : > { %v16016_v0 = vpop.f32.mrb[67].mxu0  ;;  %v16060_v7 = vadd.f32 %v16059_v4, %v16058_v52  ;;  %v16061_v8 = vpop.f32.mrb[66].mxu1  ;;  %16548 = vmatprep.subr.bf16.mxu0 %v17603_v6  ;;  %16592 = vmatprep.subr.bf16.mxu1 %v17607_v32  ;;  %v17615_v52 = vld [vmem:[%s20368_s16 + $0x59c] ss:$216 sps:$4 sm:$0xff]  }
 0x46b   : > { %v13161_v2 = vadd.f32 %v16014_v44, %v20792_v1  ;;  %v16017_v3 = vadd.f32 %v16016_v0, %v16015_v61  ;;  %13951 = vmatmul.mubr.bf16.gmra.mrb[164].mxu1 %v17592_v55  ;;  %v16062_v56 = vpop.f32.mrb[67].mxu1  ;;  %v17619_v44 = vld [vmem:[%s20326_s7 + $0x9e0] sm:$0xff]   ;;  %v17622_v4 = vld [vmem:[%s20326_s7 + $0x928] sm:$0xff]  }
 0x46c   : > { %v16063_v1 = vadd.f32 %v16062_v56, %v16061_v8  ;;  %13958 = vmatprep.mubr.bf16.mxu1 %v17601_v17  ;;  %16593 = vmatpush3.bf16.msra.mxu1 %v17608_v35  ;;  %v17624_v8 = vld [vmem:[%s20326_s7 + $0x9a8] sm:$0xff]   ;;  %v7951_v56 = vld [vmem:[%s20368_s16 + $0x748] sm:$0xff] }
 0x46d   : > { %v13164_v11 = vadd.f32 %v16017_v3, %v20797_v10  ;;  %v20869_v12 = vadd.f32 %v16060_v7, %v13161_v2  ;;  %16549 = vmatpush3.bf16.msra.mxu0 %v17606_v9  ;;  %16594 = vmatprep.subr.bf16.mxu1 %v17610_v23  ;;  %v17621_v3 = vld [vmem:[%s20326_s7 + $0x9a0] sm:$0xff]   ;;  %v17628_v17 = vld [vmem:[%s20326_s7 + $0x930] sm:$0xff]   ;;  %v17633_v9 = vld [vmem:[%s20326_s7 + $0x978] sm:$0xff]  }
 0x46e   : > { %16550 = vmatprep.subr.bf16.mxu0 %v17609_v38  ;;  %v17635_v35 = vld [vmem:[%s20326_s7 + $0x9f8] sm:$0xff]  }
 0x46f   : > { %v16018_v14 = vpop.f32.mrb[68].mxu0  ;;  %v20873_v10 = vadd.f32 %v16063_v1, %v13164_v11  ;;  %v7950_v11 = vld [vmem:[%s20368_s16 + $0x740] sm:$0xff]  ;;  %v17636_v38 = vld [vmem:[%s20326_s7 + $0x9b8] sm:$0xff]  }
 0x470   : > { %v16064_v16 = vpop.f32.mrb[68].mxu1  ;;  %v16019_v18 = vpop.f32.mrb[69].mxu0  ;;  %13887 = vmatmul.mubr.bf16.gmra.mrb[168].mxu0 %v17604_v13  ;;  %16595 = vmatpush3.bf16.msra.mxu1 %v17612_v40  ;;  %v17632_v13 = vld [vmem:[%s20326_s7 + $0x9b0] sm:$0xff]  }
 0x471   : > { %v16065_v21 = vpop.f32.mrb[69].mxu1  ;;  %v16020_v15 = vadd.f32 %v16019_v18, %v16018_v14  ;;  %v16021_v24 = vpop.f32.mrb[70].mxu0  ;;  %16551 = vmatpush3.bf16.msra.mxu0 %v17611_v42  ;;  %13894 = vmatprep.mubr.bf16.mxu0 %v17613_v47  ;;  %v15211_v14 = vcombine.high %v7950_v11, %v7950_v11  ;;  %v15210_v18 = vcombine.low %v7950_v11, %v7950_v11  ;;  %v17639_v42 = vld [vmem:[%s20368_s16 + $0x94] ss:$216 sps:$4 sm:$0xff]  }
 0x472   : > { %v16066_v25 = vadd.f32 %v16065_v21, %v16064_v16  ;;  %v16022_v31 = vpop.f32.mrb[71].mxu0  ;;  %v16067_v20 = vpop.f32.mrb[70].mxu1  ;;  %16596 = vmatprep.subr.bf16.mxu1 %v17619_v44  ;;  %16552 = vmatprep.subr.bf16.mxu0 %v17620_v63  ;;  %v15213_v16 = vcombine.high %v7951_v56, %v7951_v56  ;;  %v15212_v21 = vcombine.low %v7951_v56, %v7951_v56  ;;  %v17642_v47 = vld [vmem:[%s20368_s16 + $0x9c] ss:$216 sps:$4 sm:$0xff]  }
 0x473   : > { %v13169_v30 = vadd.f32 %v16020_v15, %v20807_v27  ;;  %v16023_v34 = vadd.f32 %v16022_v31, %v16021_v24  ;;  %13959 = vmatmul.mubr.bf16.gmra.mrb[168].mxu1 %v17605_v28  ;;  %v16068_v37 = vpop.f32.mrb[71].mxu1  ;;  %v17631_v15 = vld [vmem:[%s20326_s7 + $0x9f0] sm:$0xff]   ;;  %v17646_v44 = vld [vmem:[%s20326_s7 + $0xa08] sm:$0xff]  }
 0x474   : > { %v16069_v27 = vadd.f32 %v16068_v37, %v16067_v20  ;;  %13966 = vmatprep.mubr.bf16.mxu1 %v17615_v52  ;;  %16597 = vmatpush3.bf16.msra.mxu1 %v17621_v3  ;;  %v17647_v63 = vld [vmem:[%s20368_s16 + $0x244] ss:$216 sps:$4 sm:$0xff]   ;;  %v17651_v3 = vld [vmem:[%s20368_s16 + $0x240] ss:$216 sps:$4 sm:$0xff]  }
 0x475   : > { %v20881_v19 = vadd.f32 %v16066_v25, %v13169_v30  ;;  %v13172_v41 = vadd.f32 %v16023_v34, %v20811_v26  ;;  %16553 = vmatpush3.bf16.msra.mxu0 %v17622_v4  ;;  %16598 = vmatprep.subr.bf16.mxu1 %v17623_v5  ;;  %v17634_v34 = vld [vmem:[%s20326_s7 + $0x938] sm:$0xff]  }
 0x476   : > { %v17652_v5 = vld [vmem:[%s20368_s16 + $0x248] ss:$216 sps:$4 sm:$0xff]  }
 0x477   : > { %v20887_v43 = vadd.f32 %v16069_v27, %v13172_v41  ;;  %v16024_v29 = vpop.f32.mrb[72].mxu0 }
 0x478   : > { %v16025_v33 = vpop.f32.mrb[73].mxu0  ;;  %v16070_v36 = vpop.f32.mrb[72].mxu1  ;;  %13895 = vmatmul.mubr.bf16.gmra.mrb[172].mxu0 %v17617_v39  ;;  %16599 = vmatpush3.bf16.msra.mxu1 %v17624_v8  ;;  %v17644_v39 = vld [vmem:[%s20326_s7 + $0xa00] sm:$0xff]  }
 0x479   : > { %v16026_v48 = vadd.f32 %v16025_v33, %v16024_v29  ;;  %v16027_v26 = vpop.f32.mrb[74].mxu0  ;;  %v16071_v49 = vpop.f32.mrb[73].mxu1  ;;  %13902 = vmatprep.mubr.bf16.mxu0 %v15211_v14  ;;  %16600 = vmatprep.subr.bf16.mxu1 %v17631_v15  ;;  %v17656_v14 = vld [vmem:[%s20326_s7 + $0xa10] sm:$0xff]  }
 0x47a   : > { %v16028_v53 = vpop.f32.mrb[75].mxu0  ;;  %v16072_v55 = vadd.f32 %v16071_v49, %v16070_v36  ;;  %v16073_v61 = vpop.f32.mrb[74].mxu1  ;;  %v17640_v36 = vld [vmem:[%s20368_s16 + $0x98] ss:$216 sps:$4 sm:$0xff]  }
 0x47b   : > { %v13177_v45 = vadd.f32 %v16026_v48, %v20821_v50  ;;  %v16029_v60 = vadd.f32 %v16028_v53, %v16027_v26  ;;  %13967 = vmatmul.mubr.bf16.gmra.mrb[172].mxu1 %v17618_v59  ;;  %v16074_v2 = vpop.f32.mrb[75].mxu1  ;;  %v17643_v26 = vld [vmem:[%s20326_s7 + $0xa40] sm:$0xff]   ;;  %v17645_v59 = vld [vmem:[%s20326_s7 + $0xa48] sm:$0xff]  }
 0x47c   : > { %v16075_v50 = vadd.f32 %v16074_v2, %v16073_v61  ;;  %13974 = vmatprep.mubr.bf16.mxu1 %v15213_v16  ;;  %16601 = vmatpush3.bf16.msra.mxu1 %v17632_v13  ;;  %v17649_v2 = vld [vmem:[%s20368_s16 + $0x24c] ss:$216 sps:$4 sm:$0xff]  }
 0x47d   : > { %v13180_v0 = vadd.f32 %v16029_v60, %v20826_v58  ;;  %v20898_v51 = vadd.f32 %v16072_v55, %v13177_v45  ;;  %v17625_v58 = vld [vmem:[%s20326_s7 + $0x970] sm:$0xff]   ;;  %16602 = vmatprep.subr.bf16.mxu1 %v17635_v35 }
 0x47e   : > { %16554 = vmatprep.subr.bf16.mxu0 %v17625_v58  ;;  %v17654_v58 = vld [vmem:[%s20326_s7 + $0xa80] sm:$0xff]  }
 0x47f   : > { %v20903_v7 = vadd.f32 %v16075_v50, %v13180_v0  ;;  %v16030_v54 = vpop.f32.mrb[76].mxu0  ;;  %16555 = vmatpush3.bf16.msra.mxu0 %v17628_v17  ;;  %v17659_v13 = vld [vmem:[%s20368_s16 + $0x3f4] ss:$216 sps:$4 sm:$0xff]   ;;  %v17664_v35 = vld [vmem:[%s20368_s16 + $0x3f0] ss:$216 sps:$4 sm:$0xff]  }
 0x480   : > { %v16031_v62 = vpop.f32.mrb[77].mxu0  ;;  %v16076_v1 = vpop.f32.mrb[76].mxu1  ;;  %13903 = vmatmul.mubr.bf16.gmra.mrb[176].mxu0 %v15210_v18  ;;  %16556 = vmatprep.subr.bf16.mxu0 %v17633_v9  ;;  %v17657_v18 = vld [vmem:[%s20326_s7 + $0xac8] sm:$0xff]  }
 0x481   : > { %v16033_v6 = vpop.f32.mrb[78].mxu0  ;;  %v16032_v24 = vadd.f32 %v16031_v62, %v16030_v54  ;;  %v16077_v28 = vpop.f32.mrb[77].mxu1  ;;  %16603 = vmatpush3.bf16.msra.mxu1 %v17636_v38  ;;  %14014 = vmatprep.mubr.bf16.mxu0 %v17639_v42  ;;  %v17653_v54 = vld [vmem:[%s20326_s7 + $0xac0] sm:$0xff]   ;;  %v17655_v62 = vld [vmem:[%s20326_s7 + $0xa50] sm:$0xff]  }
 0x482   : > { %v16034_v25 = vpop.f32.mrb[79].mxu0  ;;  %v16078_v31 = vadd.f32 %v16077_v28, %v16076_v1  ;;  %v16079_v32 = vpop.f32.mrb[78].mxu1  ;;  %16680 = vmatprep.subr.bf16.mxu1 %v17653_v54  ;;  %v17665_v38 = vld [vmem:[%s20368_s16 + $0x3f8] ss:$216 sps:$4 sm:$0xff]   ;;  %v17667_v42 = vld [vmem:[%s20326_s7 + $0xad0] sm:$0xff]  }
 0x483   : > { %13975 = vmatmul.mubr.bf16.gmra.mrb[176].mxu1 %v15212_v21  ;;  %v13185_v30 = vadd.f32 %v16032_v24, %v20839_v22  ;;  %v16080_v20 = vpop.f32.mrb[79].mxu1  ;;  %16557 = vmatpush3.bf16.msra.mxu0 %v17634_v34  ;;  %v17637_v22 = vld [vmem:[%s20368_s16 + $0x90] ss:$216 sps:$4 sm:$0xff]   ;;  %v17661_v32 = vld [vmem:[%s20368_s16 + $0x3fc] ss:$216 sps:$4 sm:$0xff]  }
 0x484   : > { %14086 = vmatprep.mubr.bf16.mxu1 %v17642_v47  ;;  %16634 = vmatprep.subr.bf16.mxu0 %v17643_v26  ;;  %v17663_v20 = vld [vmem:[%s20326_s7 + $0xa58] sm:$0xff]  }
 0x485   : > { %v20916_v37 = vadd.f32 %v16078_v31, %v13185_v30 }
 0x487   : > { %v16098_v41 = vpop.f32.mrb[80].mxu0 }
 0x488   : > { %v16099_v27 = vpop.f32.mrb[81].mxu0  ;;  %v16144_v23 = vpop.f32.mrb[80].mxu1  ;;  %14015 = vmatmul.mubr.bf16.vlgmr.msra.gmra.mrb[180].mxu0 %v17637_v22  ;;  %v17666_v22 = vld [vmem:[%s20326_s7 + $0xa18] sm:$0xff]  }
 0x489   : > { %v16100_v29 = vadd.f32 %v16099_v27, %v16098_v41  ;;  %v16101_v40 = vpop.f32.mrb[82].mxu0  ;;  %v16145_v33 = vpop.f32.mrb[81].mxu1  ;;  %16635 = vmatpush3.bf16.msra.mxu0 %v17644_v39  ;;  %14022 = vmatprep.mubr.bf16.mxu0 %v17647_v63 }
 0x48a   : > { %v16146_v48 = vadd.f32 %v16145_v33, %v16144_v23  ;;  %v16102_v52 = vpop.f32.mrb[83].mxu0  ;;  %v16147_v55 = vpop.f32.mrb[82].mxu1  ;;  %16636 = vmatprep.subr.bf16.mxu0 %v17645_v59  ;;  %v17668_v33 = vld [vmem:[%s20326_s7 + $0xa90] sm:$0xff]   ;;  %v17672_v59 = vld [vmem:[%s20326_s7 + $0xa98] sm:$0xff]  }
 0x48b   : > { %v13297_v49 = vadd.f32 %v16100_v29, %v20850_v46  ;;  %v16103_v53 = vadd.f32 %v16102_v52, %v16101_v40  ;;  %14087 = vmatmul.mubr.bf16.vlgmr.msra.gmra.mrb[180].mxu1 %v17640_v36  ;;  %v16148_v60 = vpop.f32.mrb[83].mxu1 }
 0x48c   : > { %v16149_v61 = vadd.f32 %v16148_v60, %v16147_v55  ;;  %14094 = vmatprep.mubr.bf16.mxu1 %v17649_v2  ;;  %16681 = vmatpush3.bf16.msra.mxu1 %v17654_v58  ;;  %v17679_v58 = vld [vmem:[%s20326_s7 + $0xae0] sm:$0xff]  }
 0x48d   : > { %v20927_v45 = vadd.f32 %v16146_v48, %v13297_v49  ;;  %v13300_v46 = vadd.f32 %v16103_v53, %v20858_v57  ;;  %16637 = vmatpush3.bf16.msra.mxu0 %v17646_v44  ;;  %16682 = vmatprep.subr.bf16.mxu1 %v17657_v18  ;;  %v17669_v48 = vld [vmem:[%s20326_s7 + $0xa60] sm:$0xff]   ;;  %v17670_v49 = vld [vmem:[%s20326_s7 + $0xad8] sm:$0xff]   ;;  %v17683_v18 = vld [vmem:[%s20326_s7 + $0xae8] sm:$0xff]  }
 0x48e   : > { %16638 = vmatprep.subr.bf16.mxu0 %v17655_v62  ;;  %v17671_v53 = vld [vmem:[%s20326_s7 + $0xa20] sm:$0xff]  }
 0x48f   : > { %v16104_v0 = vpop.f32.mrb[84].mxu0  ;;  %v20934_v50 = vadd.f32 %v16149_v61, %v13300_v46 }
 0x490   : > { %v16105_v4 = vpop.f32.mrb[85].mxu0  ;;  %v16150_v56 = vpop.f32.mrb[84].mxu1  ;;  %14023 = vmatmul.mubr.bf16.gmra.mrb[184].mxu0 %v17651_v3 }
 0x491   : > { %v16106_v8 = vadd.f32 %v16105_v4, %v16104_v0  ;;  %v16107_v57 = vpop.f32.mrb[86].mxu0  ;;  %v16151_v17 = vpop.f32.mrb[85].mxu1  ;;  %16639 = vmatpush3.bf16.msra.mxu0 %v17656_v14  ;;  %14030 = vmatprep.mubr.bf16.mxu0 %v17659_v13  ;;  %v17675_v0 = vld [vmem:[%s20368_s16 + $0x5ac] ss:$216 sps:$4 sm:$0xff]   ;;  %v17677_v4 = vld [vmem:[%s20368_s16 + $0x5a0] ss:$216 sps:$4 sm:$0xff]  }
 0x492   : > { %v16108_v1 = vpop.f32.mrb[87].mxu0  ;;  %v16152_v21 = vadd.f32 %v16151_v17, %v16150_v56  ;;  %v16153_v6 = vpop.f32.mrb[86].mxu1  ;;  %16640 = vmatprep.subr.bf16.mxu0 %v17663_v20  ;;  %v17680_v56 = vld [vmem:[%s20326_s7 + $0xa68] sm:$0xff]   ;;  %v17688_v20 = vld [vmem:[%s20326_s7 + $0xa30] sm:$0xff]  }
 0x493   : > { %v13305_v11 = vadd.f32 %v16106_v8, %v20869_v12  ;;  %14095 = vmatmul.mubr.bf16.gmra.mrb[184].mxu1 %v17652_v5  ;;  %v16109_v16 = vadd.f32 %v16108_v1, %v16107_v57  ;;  %v17658_v12 = vld [vmem:[%s20326_s7 + $0xa88] sm:$0xff]   ;;  %v16154_v24 = vpop.f32.mrb[87].mxu1 }
 0x494   : > { %v16155_v9 = vadd.f32 %v16154_v24, %v16153_v6  ;;  %16683 = vmatpush3.bf16.msra.mxu1 %v17658_v12  ;;  %14102 = vmatprep.mubr.bf16.mxu1 %v17661_v32  ;;  %v17678_v5 = vld [vmem:[%s20368_s16 + $0x5a8] ss:$216 sps:$4 sm:$0xff]  }
 0x495   : > { %v13308_v15 = vadd.f32 %v16109_v16, %v20873_v10  ;;  %v20946_v28 = vadd.f32 %v16152_v21, %v13305_v11  ;;  %16641 = vmatpush3.bf16.msra.mxu0 %v17666_v22  ;;  %16684 = vmatprep.subr.bf16.mxu1 %v17667_v42  ;;  %v17682_v17 = vld [vmem:[%s20326_s7 + $0xa28] sm:$0xff]   ;;  %v17691_v22 = vld [vmem:[%s20326_s7 + $0xaf0] sm:$0xff]  }
 0x496   : > { %16642 = vmatprep.subr.bf16.mxu0 %v17669_v48  ;;  %v17684_v6 = vld [vmem:[%s20326_s7 + $0xaa8] sm:$0xff]   ;;  %v17695_v48 = vld [vmem:[%s20326_s7 + $0xaf8] sm:$0xff]  }
 0x497   : > { %v16110_v25 = vpop.f32.mrb[88].mxu0  ;;  %v20952_v10 = vadd.f32 %v16155_v9, %v13308_v15  ;;  %v7952_v15 = vld [vmem:[%s20368_s16 + $0x750] sm:$0xff]  ;;  %v7953_v9 = vld [vmem:[%s20368_s16 + $0x758] sm:$0xff] }
 0x498   : > { %v16111_v30 = vpop.f32.mrb[89].mxu0  ;;  %v16156_v31 = vpop.f32.mrb[88].mxu1  ;;  %14031 = vmatmul.mubr.bf16.gmra.mrb[188].mxu0 %v17664_v35  ;;  %16685 = vmatpush3.bf16.msra.mxu1 %v17668_v33  ;;  %v15215_v13 = vcombine.high %v7952_v15, %v7952_v15  ;;  %v15216_v35 = vcombine.low %v7953_v9, %v7953_v9 }
 0x499   : > { %v16112_v34 = vadd.f32 %v16111_v30, %v16110_v25  ;;  %v16113_v41 = vpop.f32.mrb[90].mxu0  ;;  %v16157_v40 = vpop.f32.mrb[89].mxu1  ;;  %16686 = vmatprep.subr.bf16.mxu1 %v17670_v49  ;;  %16643 = vmatpush3.bf16.msra.mxu0 %v17671_v53  ;;  %v15214_v30 = vcombine.low %v7952_v15, %v7952_v15  ;;  %v17697_v49 = vld [vmem:[%s20368_s16 + $0xa0] ss:$216 sps:$4 sm:$0xff]  }
 0x49a   : > { %v16114_v23 = vpop.f32.mrb[91].mxu0  ;;  %v16158_v36 = vadd.f32 %v16157_v40, %v16156_v31  ;;  %v16159_v47 = vpop.f32.mrb[90].mxu1  ;;  %16644 = vmatprep.subr.bf16.mxu0 %v17680_v56  ;;  %v17693_v40 = vld [vmem:[%s20326_s7 + $0xa78] sm:$0xff]  }
 0x49b   : > { %v13313_v27 = vadd.f32 %v16112_v34, %v20881_v19  ;;  %v16115_v29 = vadd.f32 %v16114_v23, %v16113_v41  ;;  %14103 = vmatmul.mubr.bf16.gmra.mrb[188].mxu1 %v17665_v38  ;;  %v16160_v19 = vpop.f32.mrb[91].mxu1  ;;  %v15217_v34 = vcombine.high %v7953_v9, %v7953_v9  ;;  %v17692_v23 = vld [vmem:[%s20326_s7 + $0xab0] sm:$0xff]  }
 0x49c   : > { %v16161_v39 = vadd.f32 %v16160_v19, %v16159_v47  ;;  %16687 = vmatpush3.bf16.msra.mxu1 %v17672_v59  ;;  %14110 = vmatprep.mubr.bf16.mxu1 %v17675_v0  ;;  %v17702_v59 = vld [vmem:[%s20368_s16 + $0xac] ss:$216 sps:$4 sm:$0xff]  }
 0x49d   : > { %v13316_v26 = vadd.f32 %v16115_v29, %v20887_v43  ;;  %v20961_v52 = vadd.f32 %v16158_v36, %v13313_v27  ;;  %v17673_v43 = vld [vmem:[%s20368_s16 + $0x5a4] ss:$216 sps:$4 sm:$0xff]   ;;  %16688 = vmatprep.subr.bf16.mxu1 %v17679_v58  ;;  %16645 = vmatpush3.bf16.msra.mxu0 %v17682_v17  ;;  %v17694_v36 = vld [vmem:[%s20326_s7 + $0xa38] sm:$0xff]  }
 0x49e   : > { %14038 = vmatprep.mubr.bf16.mxu0 %v17673_v43  ;;  %v17712_v17 = vld [vmem:[%s20368_s16 + $0x258] ss:$216 sps:$4 sm:$0xff]  }
 0x49f   : > { %v16116_v55 = vpop.f32.mrb[92].mxu0  ;;  %v20965_v60 = vadd.f32 %v16161_v39, %v13316_v26  ;;  %v17696_v26 = vld [vmem:[%s20326_s7 + $0xab8] sm:$0xff]   ;;  %v17699_v39 = vld [vmem:[%s20368_s16 + $0xa4] ss:$216 sps:$4 sm:$0xff]  }
 0x4a0   : > { %v16117_v44 = vpop.f32.mrb[93].mxu0  ;;  %v16162_v63 = vpop.f32.mrb[92].mxu1  ;;  %14039 = vmatmul.mubr.bf16.gmra.mrb[192].mxu0 %v17677_v4  ;;  %v17705_v4 = vld [vmem:[%s20326_s7 + $0xb48] sm:$0xff]  }
 0x4a1   : > { %v16118_v46 = vadd.f32 %v16117_v44, %v16116_v55  ;;  %v16119_v61 = vpop.f32.mrb[94].mxu0  ;;  %v16163_v3 = vpop.f32.mrb[93].mxu1  ;;  %14046 = vmatprep.mubr.bf16.mxu0 %v15215_v13  ;;  %v17700_v55 = vld [vmem:[%s20368_s16 + $0xa8] ss:$216 sps:$4 sm:$0xff]  }
 0x4a2   : > { %v16120_v2 = vpop.f32.mrb[95].mxu0  ;;  %v16164_v57 = vadd.f32 %v16163_v3, %v16162_v63  ;;  %v16165_v11 = vpop.f32.mrb[94].mxu1  ;;  %v17704_v63 = vld [vmem:[%s20326_s7 + $0xb00] sm:$0xff]   ;;  %v17716_v13 = vld [vmem:[%s20326_s7 + $0xb10] sm:$0xff]  }
 0x4a3   : > { %v13321_v8 = vadd.f32 %v16118_v46, %v20898_v51  ;;  %v16121_v54 = vadd.f32 %v16120_v2, %v16119_v61  ;;  %14111 = vmatmul.mubr.bf16.gmra.mrb[192].mxu1 %v17678_v5  ;;  %v16166_v14 = vpop.f32.mrb[95].mxu1  ;;  %v17681_v51 = vld [vmem:[%s20326_s7 + $0xaa0] sm:$0xff]  }
 0x4a4   : > { %v16167_v16 = vadd.f32 %v16166_v14, %v16165_v11  ;;  %16689 = vmatpush3.bf16.msra.mxu1 %v17681_v51  ;;  %14118 = vmatprep.mubr.bf16.mxu1 %v15217_v34  ;;  %v17703_v46 = vld [vmem:[%s20326_s7 + $0xb40] sm:$0xff]  }
 0x4a5   : > { %v13324_v62 = vadd.f32 %v16121_v54, %v20903_v7  ;;  %v20975_v1 = vadd.f32 %v16164_v57, %v13321_v8  ;;  %16690 = vmatprep.subr.bf16.mxu1 %v17683_v18  ;;  %v17685_v7 = vld [vmem:[%s20326_s7 + $0xa70] sm:$0xff]   ;;  %v17706_v54 = vld [vmem:[%s20326_s7 + $0xb08] sm:$0xff]  }
 0x4a6   : > { %16646 = vmatprep.subr.bf16.mxu0 %v17685_v7 }
 0x4a7   : > { %v20980_v21 = vadd.f32 %v16167_v16, %v13324_v62  ;;  %v16122_v24 = vpop.f32.mrb[96].mxu0  ;;  %16647 = vmatpush3.bf16.msra.mxu0 %v17688_v20  ;;  %v17709_v62 = vld [vmem:[%s20368_s16 + $0x25c] ss:$216 sps:$4 sm:$0xff]   ;;  %v17711_v16 = vld [vmem:[%s20368_s16 + $0x250] ss:$216 sps:$4 sm:$0xff]  }
 0x4a8   : > { %v16168_v12 = vpop.f32.mrb[96].mxu1  ;;  %v16123_v31 = vpop.f32.mrb[97].mxu0  ;;  %16691 = vmatpush3.bf16.msra.mxu1 %v17684_v6  ;;  %14047 = vmatmul.mubr.bf16.gmra.mrb[196].mxu0 %v15214_v30 }
 0x4a9   : > { %v16169_v25 = vpop.f32.mrb[97].mxu1  ;;  %v16124_v38 = vadd.f32 %v16123_v31, %v16122_v24  ;;  %v16125_v41 = vpop.f32.mrb[98].mxu0  ;;  %16692 = vmatprep.subr.bf16.mxu1 %v17691_v22  ;;  %16648 = vmatprep.subr.bf16.mxu0 %v17693_v40  ;;  %v17715_v24 = vld [vmem:[%s20326_s7 + $0xb50] sm:$0xff]  }
 0x4aa   : > { %v16170_v32 = vadd.f32 %v16169_v25, %v16168_v12  ;;  %v16126_v27 = vpop.f32.mrb[99].mxu0  ;;  %v16171_v29 = vpop.f32.mrb[98].mxu1  ;;  %14158 = vmatprep.mubr.bf16.mxu0 %v17699_v39  ;;  %v17714_v12 = vld [vmem:[%s20326_s7 + $0xb80] sm:$0xff]  }
 0x4ab   : > { %v13329_v42 = vadd.f32 %v16124_v38, %v20916_v37  ;;  %14119 = vmatmul.mubr.bf16.gmra.mrb[196].mxu1 %v15216_v35  ;;  %v16172_v33 = vpop.f32.mrb[99].mxu1  ;;  %16649 = vmatpush3.bf16.msra.mxu0 %v17694_v36  ;;  %v17718_v35 = vld [vmem:[%s20326_s7 + $0xb88] sm:$0xff]  }
 0x4ac   : > { %16693 = vmatpush3.bf16.msra.mxu1 %v17692_v23  ;;  %14230 = vmatprep.mubr.bf16.mxu1 %v17702_v59  ;;  %v17719_v22 = vld [vmem:[%s20368_s16 + $0x404] ss:$216 sps:$4 sm:$0xff]   ;;  %v17723_v33 = vld [vmem:[%s20326_s7 + $0xb58] sm:$0xff]   ;;  %v17724_v36 = vld [vmem:[%s20368_s16 + $0x400] ss:$216 sps:$4 sm:$0xff]  }
 0x4ad   : > { %v20992_v47 = vadd.f32 %v16170_v32, %v13329_v42  ;;  %16694 = vmatprep.subr.bf16.mxu1 %v17695_v48  ;;  %16726 = vmatprep.subr.bf16.mxu0 %v17703_v46  ;;  %v17717_v32 = vld [vmem:[%s20326_s7 + $0xbc8] sm:$0xff]  }
 0x4ae   : > { %v17721_v29 = vld [vmem:[%s20368_s16 + $0x40c] ss:$216 sps:$4 sm:$0xff]  }
 0x4af   : > { %v16190_v37 = vpop.f32.mrb[100].mxu0 }
 0x4b0   : > { %v16236_v19 = vpop.f32.mrb[100].mxu1  ;;  %v16191_v53 = vpop.f32.mrb[101].mxu0  ;;  %16695 = vmatpush3.bf16.msra.mxu1 %v17696_v26  ;;  %14159 = vmatmul.mubr.bf16.vlgmr.msra.gmra.mrb[200].mxu0 %v17697_v49 }
 0x4b1   : > { %v16192_v44 = vadd.f32 %v16191_v53, %v16190_v37  ;;  %v16193_v43 = vpop.f32.mrb[102].mxu0  ;;  %v16237_v3 = vpop.f32.mrb[101].mxu1  ;;  %16727 = vmatpush3.bf16.msra.mxu0 %v17704_v63  ;;  %v17725_v37 = vld [vmem:[%s20368_s16 + $0x408] ss:$216 sps:$4 sm:$0xff]  }
 0x4b2   : > { %v16194_v61 = vpop.f32.mrb[103].mxu0  ;;  %v16238_v5 = vadd.f32 %v16237_v3, %v16236_v19  ;;  %v16239_v8 = vpop.f32.mrb[102].mxu1  ;;  %16728 = vmatprep.subr.bf16.mxu0 %v17705_v4  ;;  %v17726_v19 = vld [vmem:[%s20326_s7 + $0xb18] sm:$0xff]   ;;  %v17727_v53 = vld [vmem:[%s20326_s7 + $0xbd0] sm:$0xff]  }
 0x4b3   : > { %v13441_v0 = vadd.f32 %v16192_v44, %v20927_v45  ;;  %v16195_v2 = vadd.f32 %v16194_v61, %v16193_v43  ;;  %14231 = vmatmul.mubr.bf16.vlgmr.msra.gmra.mrb[200].mxu1 %v17700_v55  ;;  %v16240_v58 = vpop.f32.mrb[103].mxu1  ;;  %v17707_v45 = vld [vmem:[%s20368_s16 + $0x254] ss:$216 sps:$4 sm:$0xff]  }
 0x4b4   : > { %v16241_v56 = vadd.f32 %v16240_v58, %v16239_v8  ;;  %14166 = vmatprep.mubr.bf16.mxu0 %v17707_v45  ;;  %14238 = vmatprep.mubr.bf16.mxu1 %v17709_v62  ;;  %v17728_v44 = vld [vmem:[%s20326_s7 + $0xb90] sm:$0xff]   ;;  %v17729_v61 = vld [vmem:[%s20326_s7 + $0xb60] sm:$0xff]  }
 0x4b5   : > { %v13444_v57 = vadd.f32 %v16195_v2, %v20934_v50  ;;  %v21007_v11 = vadd.f32 %v16238_v5, %v13441_v0  ;;  %16729 = vmatpush3.bf16.msra.mxu0 %v17706_v54  ;;  %v17713_v50 = vld [vmem:[%s20326_s7 + $0xbc0] sm:$0xff]   ;;  %v17732_v54 = vld [vmem:[%s20326_s7 + $0xb98] sm:$0xff]  }
 0x4b6   : > { %16772 = vmatprep.subr.bf16.mxu1 %v17713_v50  ;;  %16730 = vmatprep.subr.bf16.mxu0 %v17715_v24  ;;  %v17731_v5 = vld [vmem:[%s20326_s7 + $0xb20] sm:$0xff]   ;;  %v17740_v24 = vld [vmem:[%s20326_s7 + $0xb68] sm:$0xff]  }
 0x4b7   : > { %v16196_v14 = vpop.f32.mrb[104].mxu0  ;;  %v21012_v18 = vadd.f32 %v16241_v56, %v13444_v57  ;;  %16773 = vmatpush3.bf16.msra.mxu1 %v17714_v12  ;;  %v17733_v56 = vld [vmem:[%s20368_s16 + $0x5b4] ss:$216 sps:$4 sm:$0xff]  }
 0x4b8   : > { %v16242_v51 = vpop.f32.mrb[104].mxu1  ;;  %v16197_v6 = vpop.f32.mrb[105].mxu0  ;;  %14167 = vmatmul.mubr.bf16.gmra.mrb[204].mxu0 %v17711_v16  ;;  %16774 = vmatprep.subr.bf16.mxu1 %v17717_v32  ;;  %v17737_v16 = vld [vmem:[%s20368_s16 + $0x5b0] ss:$216 sps:$4 sm:$0xff]   ;;  %v17743_v32 = vld [vmem:[%s20326_s7 + $0xbe8] sm:$0xff]  }
 0x4b9   : > { %v16198_v7 = vadd.f32 %v16197_v6, %v16196_v14  ;;  %v16199_v15 = vpop.f32.mrb[106].mxu0  ;;  %v16243_v31 = vpop.f32.mrb[105].mxu1  ;;  %16731 = vmatpush3.bf16.msra.mxu0 %v17716_v13  ;;  %14174 = vmatprep.mubr.bf16.mxu0 %v17719_v22  ;;  %v7955_v22 = vld [vmem:[%s20368_s16 + $0x768] sm:$0xff] }
 0x4ba   : > { %v16200_v25 = vpop.f32.mrb[107].mxu0  ;;  %v16244_v34 = vadd.f32 %v16243_v31, %v16242_v51  ;;  %v16245_v20 = vpop.f32.mrb[106].mxu1  ;;  %16732 = vmatprep.subr.bf16.mxu0 %v17723_v33  ;;  %v17735_v51 = vld [vmem:[%s20368_s16 + $0x5bc] ss:$216 sps:$4 sm:$0xff]  }
 0x4bb   : > { %v13449_v9 = vadd.f32 %v16198_v7, %v20946_v28  ;;  %v16201_v30 = vadd.f32 %v16200_v25, %v16199_v15  ;;  %14239 = vmatmul.mubr.bf16.gmra.mrb[204].mxu1 %v17712_v17  ;;  %v16246_v41 = vpop.f32.mrb[107].mxu1  ;;  %v17738_v17 = vld [vmem:[%s20368_s16 + $0x5b8] ss:$216 sps:$4 sm:$0xff]  }
 0x4bc   : > { %v16247_v28 = vadd.f32 %v16246_v41, %v16245_v20  ;;  %16775 = vmatpush3.bf16.msra.mxu1 %v17718_v35  ;;  %14246 = vmatprep.mubr.bf16.mxu1 %v17721_v29  ;;  %v17739_v7 = vld [vmem:[%s20326_s7 + $0xbe0] sm:$0xff]   ;;  %v17742_v31 = vld [vmem:[%s20326_s7 + $0xb28] sm:$0xff]   ;;  %v17745_v35 = vld [vmem:[%s20326_s7 + $0xb70] sm:$0xff]   ;;  %v15221_v29 = vcombine.high %v7955_v22, %v7955_v22 }
 0x4bd   : > { %v13452_v38 = vadd.f32 %v16201_v30, %v20952_v10  ;;  %v21023_v27 = vadd.f32 %v16244_v34, %v13449_v9  ;;  %16733 = vmatpush3.bf16.msra.mxu0 %v17726_v19  ;;  %16776 = vmatprep.subr.bf16.mxu1 %v17727_v53  ;;  %v17744_v20 = vld [vmem:[%s20326_s7 + $0xba8] sm:$0xff]  }
 0x4be   : > { %16734 = vmatprep.subr.bf16.mxu0 %v17729_v61  ;;  %v7954_v41 = vld [vmem:[%s20368_s16 + $0x760] sm:$0xff] }
 0x4bf   : > { %v16202_v23 = vpop.f32.mrb[108].mxu0  ;;  %v21028_v48 = vadd.f32 %v16247_v28, %v13452_v38  ;;  %v15218_v33 = vcombine.low %v7954_v41, %v7954_v41 }
 0x4c0   : > { %v16248_v42 = vpop.f32.mrb[108].mxu1  ;;  %v16203_v40 = vpop.f32.mrb[109].mxu0  ;;  %14175 = vmatmul.mubr.bf16.gmra.mrb[208].mxu0 %v17724_v36  ;;  %16777 = vmatpush3.bf16.msra.mxu1 %v17728_v44 }
 0x4c1   : > { %v16204_v10 = vadd.f32 %v16203_v40, %v16202_v23  ;;  %v16205_v26 = vpop.f32.mrb[110].mxu0  ;;  %v16249_v59 = vpop.f32.mrb[109].mxu1  ;;  %16735 = vmatpush3.bf16.msra.mxu0 %v17731_v5  ;;  %14182 = vmatprep.mubr.bf16.mxu0 %v17733_v56  ;;  %v17748_v40 = vld [vmem:[%s20326_s7 + $0xb30] sm:$0xff]   ;;  %v17760_v5 = vld [vmem:[%s20368_s16 + $0xb8] ss:$216 sps:$4 sm:$0xff]  }
 0x4c2   : > { %v16206_v39 = vpop.f32.mrb[111].mxu0  ;;  %v16250_v43 = vadd.f32 %v16249_v59, %v16248_v42  ;;  %v16251_v46 = vpop.f32.mrb[110].mxu1  ;;  %16736 = vmatprep.subr.bf16.mxu0 %v17740_v24  ;;  %v15219_v42 = vcombine.high %v7954_v41, %v7954_v41  ;;  %v17763_v56 = vld [vmem:[%s20326_s7 + $0xc40] sm:$0xff]   ;;  %v17775_v41 = vld [vmem:[%s20326_s7 + $0xc50] sm:$0xff]  }
 0x4c3   : > { %v13457_v49 = vadd.f32 %v16204_v10, %v20961_v52  ;;  %v16207_v55 = vadd.f32 %v16206_v39, %v16205_v26  ;;  %14247 = vmatmul.mubr.bf16.gmra.mrb[208].mxu1 %v17725_v37  ;;  %v16252_v0 = vpop.f32.mrb[111].mxu1  ;;  %v17730_v52 = vld [vmem:[%s20326_s7 + $0xbd8] sm:$0xff]   ;;  %v15220_v10 = vcombine.low %v7955_v22, %v7955_v22  ;;  %v17751_v26 = vld [vmem:[%s20326_s7 + $0xbf0] sm:$0xff]  }
 0x4c4   : > { %v16253_v3 = vadd.f32 %v16252_v0, %v16251_v46  ;;  %16778 = vmatprep.subr.bf16.mxu1 %v17730_v52  ;;  %14254 = vmatprep.mubr.bf16.mxu1 %v17735_v51  ;;  %v17752_v39 = vld [vmem:[%s20326_s7 + $0xbb0] sm:$0xff]   ;;  %v17755_v46 = vld [vmem:[%s20326_s7 + $0xbf8] sm:$0xff]   ;;  %v17764_v51 = vld [vmem:[%s20326_s7 + $0xc00] sm:$0xff]  }
 0x4c5   : > { %v13460_v63 = vadd.f32 %v16207_v55, %v20965_v60  ;;  %v21038_v2 = vadd.f32 %v16250_v43, %v13457_v49  ;;  %16779 = vmatpush3.bf16.msra.mxu1 %v17732_v54  ;;  %16737 = vmatpush3.bf16.msra.mxu0 %v17742_v31  ;;  %v17753_v55 = vld [vmem:[%s20326_s7 + $0xb78] sm:$0xff]   ;;  %v17767_v24 = vld [vmem:[%s20368_s16 + $0x264] ss:$216 sps:$4 sm:$0xff]  }
 0x4c6   : > { %16780 = vmatprep.subr.bf16.mxu1 %v17739_v7  ;;  %16738 = vmatprep.subr.bf16.mxu0 %v17745_v35  ;;  %v17754_v43 = vld [vmem:[%s20326_s7 + $0xb38] sm:$0xff]   ;;  %v17766_v7 = vld [vmem:[%s20326_s7 + $0xc08] sm:$0xff]   ;;  %v17774_v35 = vld [vmem:[%s20326_s7 + $0xc80] sm:$0xff]  }
 0x4c7   : > { %v16208_v4 = vpop.f32.mrb[112].mxu0  ;;  %v21042_v57 = vadd.f32 %v16253_v3, %v13460_v63  ;;  %v17756_v63 = vld [vmem:[%s20326_s7 + $0xbb8] sm:$0xff]  }
 0x4c8   : > { %v16209_v8 = vpop.f32.mrb[113].mxu0  ;;  %v16254_v45 = vpop.f32.mrb[112].mxu1  ;;  %14183 = vmatmul.mubr.bf16.gmra.mrb[212].mxu0 %v17737_v16  ;;  %v17757_v3 = vld [vmem:[%s20368_s16 + $0xb0] ss:$216 sps:$4 sm:$0xff]  }
 0x4c9   : > { %v16210_v60 = vadd.f32 %v16209_v8, %v16208_v4  ;;  %v16211_v58 = vpop.f32.mrb[114].mxu0  ;;  %v16255_v14 = vpop.f32.mrb[113].mxu1  ;;  %14190 = vmatprep.mubr.bf16.mxu0 %v15219_v42  ;;  %16739 = vmatpush3.bf16.msra.mxu0 %v17748_v40  ;;  %v17772_v31 = vld [vmem:[%s20368_s16 + $0x268] ss:$216 sps:$4 sm:$0xff]  }
 0x4ca   : > { %v16212_v62 = vpop.f32.mrb[115].mxu0  ;;  %v16256_v12 = vadd.f32 %v16255_v14, %v16254_v45  ;;  %v16257_v15 = vpop.f32.mrb[114].mxu1  ;;  %16740 = vmatprep.subr.bf16.mxu0 %v17753_v55  ;;  %v17777_v40 = vld [vmem:[%s20326_s7 + $0xcc8] sm:$0xff]  }
 0x4cb   : > { %v13465_v50 = vadd.f32 %v16210_v60, %v20975_v1  ;;  %v16213_v6 = vadd.f32 %v16212_v62, %v16211_v58  ;;  %v16258_v9 = vpop.f32.mrb[115].mxu1  ;;  %14255 = vmatmul.mubr.bf16.gmra.mrb[212].mxu1 %v17738_v17  ;;  %v17741_v1 = vld [vmem:[%s20326_s7 + $0xba0] sm:$0xff]  }
 0x4cc   : > { %v16259_v30 = vadd.f32 %v16258_v9, %v16257_v15  ;;  %16781 = vmatpush3.bf16.msra.mxu1 %v17741_v1  ;;  %14262 = vmatprep.mubr.bf16.mxu1 %v15221_v29  ;;  %v17762_v58 = vld [vmem:[%s20368_s16 + $0xbc] ss:$216 sps:$4 sm:$0xff]   ;;  %v17769_v1 = vld [vmem:[%s20368_s16 + $0x26c] ss:$216 sps:$4 sm:$0xff]  }
 0x4cd   : > { %v13468_v25 = vadd.f32 %v16213_v6, %v20980_v21  ;;  %v21052_v13 = vadd.f32 %v16256_v12, %v13465_v50  ;;  %16782 = vmatprep.subr.bf16.mxu1 %v17743_v32  ;;  %16741 = vmatpush3.bf16.msra.mxu0 %v17754_v43  ;;  %v17765_v50 = vld [vmem:[%s20326_s7 + $0xc48] sm:$0xff]   ;;  %v17783_v43 = vld [vmem:[%s20326_s7 + $0xc58] sm:$0xff]  }
 0x4ce   : > { %16818 = vmatprep.subr.bf16.mxu0 %v17763_v56  ;;  %v17781_v55 = vld [vmem:[%s20368_s16 + $0x41c] ss:$216 sps:$4 sm:$0xff]  }
 0x4cf   : > { %v21057_v34 = vadd.f32 %v16259_v30, %v13468_v25  ;;  %v16214_v38 = vpop.f32.mrb[116].mxu0  ;;  %v17771_v30 = vld [vmem:[%s20368_s16 + $0x260] ss:$216 sps:$4 sm:$0xff]  }
 0x4d0   : > { %v16260_v21 = vpop.f32.mrb[116].mxu1  ;;  %v16215_v28 = vpop.f32.mrb[117].mxu0  ;;  %16783 = vmatpush3.bf16.msra.mxu1 %v17744_v20  ;;  %14191 = vmatmul.mubr.bf16.gmra.mrb[216].mxu0 %v15218_v33  ;;  %v17773_v20 = vld [vmem:[%s20326_s7 + $0xcc0] sm:$0xff]  }
 0x4d1   : > { %v16261_v23 = vpop.f32.mrb[117].mxu1  ;;  %v16217_v36 = vpop.f32.mrb[118].mxu0  ;;  %v16216_v37 = vadd.f32 %v16215_v28, %v16214_v38  ;;  %16784 = vmatprep.subr.bf16.mxu1 %v17751_v26  ;;  %v17776_v28 = vld [vmem:[%s20326_s7 + $0xc10] sm:$0xff]  }
 0x4d2   : > { %v16218_v19 = vpop.f32.mrb[119].mxu0  ;;  %v16262_v49 = vadd.f32 %v16261_v23, %v16260_v21  ;;  %v16263_v53 = vpop.f32.mrb[118].mxu1 }
 0x4d3   : > { %14263 = vmatmul.mubr.bf16.gmra.mrb[216].mxu1 %v15220_v10  ;;  %v13473_v59 = vadd.f32 %v16216_v37, %v20992_v47  ;;  %v16264_v44 = vpop.f32.mrb[119].mxu1  ;;  %v17759_v47 = vld [vmem:[%s20368_s16 + $0xb4] ss:$216 sps:$4 sm:$0xff]   ;;  %v17778_v10 = vld [vmem:[%s20326_s7 + $0xc88] sm:$0xff]  }
 0x4d4   : > { %16785 = vmatpush3.bf16.msra.mxu1 %v17752_v39  ;;  %14302 = vmatprep.mubr.bf16.mxu0 %v17759_v47  ;;  %v17779_v19 = vld [vmem:[%s20368_s16 + $0x414] ss:$216 sps:$4 sm:$0xff]  }
 0x4d5   : > { %v21070_v61 = vadd.f32 %v16262_v49, %v13473_v59  ;;  %16786 = vmatprep.subr.bf16.mxu1 %v17755_v46  ;;  %14374 = vmatprep.mubr.bf16.mxu1 %v17762_v58  ;;  %v17786_v47 = vld [vmem:[%s20326_s7 + $0xc18] sm:$0xff]   ;;  %v17788_v58 = vld [vmem:[%s20326_s7 + $0xc90] sm:$0xff]  }
 0x4d7   : > { %v16282_v0 = vpop.f32.mrb[120].mxu0 }
 0x4d8   : > { %v16328_v52 = vpop.f32.mrb[120].mxu1  ;;  %v16283_v4 = vpop.f32.mrb[121].mxu0  ;;  %16787 = vmatpush3.bf16.msra.mxu1 %v17756_v63  ;;  %14303 = vmatmul.mubr.bf16.vlgmr.msra.gmra.mrb[220].mxu0 %v17757_v3  ;;  %v17785_v3 = vld [vmem:[%s20368_s16 + $0x418] ss:$216 sps:$4 sm:$0xff]  }
 0x4d9   : > { %v16284_v8 = vadd.f32 %v16283_v4, %v16282_v0  ;;  %v16285_v54 = vpop.f32.mrb[122].mxu0  ;;  %v16329_v60 = vpop.f32.mrb[121].mxu1  ;;  %16819 = vmatpush3.bf16.msra.mxu0 %v17764_v51  ;;  %14310 = vmatprep.mubr.bf16.mxu0 %v17767_v24  ;;  %v17790_v51 = vld [vmem:[%s20326_s7 + $0xcd8] sm:$0xff]  }
 0x4da   : > { %v16330_v45 = vadd.f32 %v16329_v60, %v16328_v52  ;;  %v16286_v14 = vpop.f32.mrb[123].mxu0  ;;  %v16331_v17 = vpop.f32.mrb[122].mxu1  ;;  %16820 = vmatprep.subr.bf16.mxu0 %v17765_v50  ;;  %16864 = vmatprep.subr.bf16.mxu1 %v17773_v20  ;;  %v17784_v52 = vld [vmem:[%s20368_s16 + $0x410] ss:$216 sps:$4 sm:$0xff]  }
 0x4db   : > { %v13585_v62 = vadd.f32 %v16284_v8, %v21007_v11  ;;  %v16287_v16 = vadd.f32 %v16286_v14, %v16285_v54  ;;  %14375 = vmatmul.mubr.bf16.vlgmr.msra.gmra.mrb[220].mxu1 %v17760_v5  ;;  %v16332_v12 = vpop.f32.mrb[123].mxu1  ;;  %v17787_v8 = vld [vmem:[%s20326_s7 + $0xcd0] sm:$0xff]  }
 0x4dc   : > { %v16333_v15 = vadd.f32 %v16332_v12, %v16331_v17  ;;  %14382 = vmatprep.mubr.bf16.mxu1 %v17769_v1  ;;  %16865 = vmatpush3.bf16.msra.mxu1 %v17774_v35  ;;  %v17792_v12 = vld [vmem:[%s20326_s7 + $0xc98] sm:$0xff]   ;;  %v17797_v1 = vld [vmem:[%s20368_s16 + $0x5c0] ss:$216 sps:$4 sm:$0xff]  }
 0x4dd   : > { %v21081_v6 = vadd.f32 %v16330_v45, %v13585_v62  ;;  %v13588_v11 = vadd.f32 %v16287_v16, %v21012_v18  ;;  %16821 = vmatpush3.bf16.msra.mxu0 %v17766_v7  ;;  %16866 = vmatprep.subr.bf16.mxu1 %v17777_v40  ;;  %v17789_v62 = vld [vmem:[%s20326_s7 + $0xc60] sm:$0xff]   ;;  %v17798_v20 = vld [vmem:[%s20368_s16 + $0x5c8] ss:$216 sps:$4 sm:$0xff]  }
 0x4de   : > { %16822 = vmatprep.subr.bf16.mxu0 %v17775_v41  ;;  %v17791_v16 = vld [vmem:[%s20326_s7 + $0xc20] sm:$0xff]   ;;  %v17800_v41 = vld [vmem:[%s20326_s7 + $0xc68] sm:$0xff]  }
 0x4df   : > { %v16288_v25 = vpop.f32.mrb[124].mxu0  ;;  %v21089_v32 = vadd.f32 %v16333_v15, %v13588_v11  ;;  %v17793_v15 = vld [vmem:[%s20368_s16 + $0x5c4] ss:$216 sps:$4 sm:$0xff]  }
 0x4e0   : > { %v16334_v9 = vpop.f32.mrb[124].mxu1  ;;  %v16289_v21 = vpop.f32.mrb[125].mxu0  ;;  %14311 = vmatmul.mubr.bf16.gmra.mrb[224].mxu0 %v17771_v30  ;;  %16867 = vmatpush3.bf16.msra.mxu1 %v17778_v10  ;;  %v17803_v40 = vld [vmem:[%s20326_s7 + $0xce8] sm:$0xff]  }
 0x4e1   : > { %v16290_v18 = vadd.f32 %v16289_v21, %v16288_v25  ;;  %v16291_v38 = vpop.f32.mrb[126].mxu0  ;;  %v16335_v29 = vpop.f32.mrb[125].mxu1  ;;  %16823 = vmatpush3.bf16.msra.mxu0 %v17776_v28  ;;  %14318 = vmatprep.mubr.bf16.mxu0 %v17779_v19 }
 0x4e2   : > { %v16292_v22 = vpop.f32.mrb[127].mxu0  ;;  %v16336_v33 = vadd.f32 %v16335_v29, %v16334_v9  ;;  %v16337_v36 = vpop.f32.mrb[126].mxu1  ;;  %16824 = vmatprep.subr.bf16.mxu0 %v17783_v43  ;;  %16868 = vmatprep.subr.bf16.mxu1 %v17787_v8  ;;  %v17795_v9 = vld [vmem:[%s20368_s16 + $0x5cc] ss:$216 sps:$4 sm:$0xff]  }
 0x4e3   : > { %v13593_v23 = vadd.f32 %v16290_v18, %v21023_v27  ;;  %v16293_v42 = vadd.f32 %v16292_v22, %v16291_v38  ;;  %14383 = vmatmul.mubr.bf16.gmra.mrb[224].mxu1 %v17772_v31  ;;  %v16338_v37 = vpop.f32.mrb[127].mxu1  ;;  %v17799_v18 = vld [vmem:[%s20326_s7 + $0xce0] sm:$0xff]   ;;  %v17802_v29 = vld [vmem:[%s20326_s7 + $0xc28] sm:$0xff]  }
 0x4e4   : > { %v16339_v27 = vadd.f32 %v16338_v37, %v16337_v36  ;;  %14390 = vmatprep.mubr.bf16.mxu1 %v17781_v55  ;;  %16869 = vmatpush3.bf16.msra.mxu1 %v17788_v58  ;;  %v17804_v36 = vld [vmem:[%s20326_s7 + $0xca8] sm:$0xff]   ;;  %v17808_v55 = vld [vmem:[%s20326_s7 + $0xc30] sm:$0xff]   ;;  %v17815_v58 = vld [vmem:[%s20326_s7 + $0xcf8] sm:$0xff]  }
 0x4e5   : > { %v13596_v26 = vadd.f32 %v16293_v42, %v21028_v48  ;;  %v21100_v49 = vadd.f32 %v16336_v33, %v13593_v23  ;;  %16825 = vmatpush3.bf16.msra.mxu0 %v17786_v47  ;;  %16870 = vmatprep.subr.bf16.mxu1 %v17790_v51  ;;  %v17801_v42 = vld [vmem:[%s20326_s7 + $0xca0] sm:$0xff]   ;;  %v17813_v47 = vld [vmem:[%s20326_s7 + $0xc78] sm:$0xff]  }
 0x4e6   : > { %16826 = vmatprep.subr.bf16.mxu0 %v17789_v62  ;;  %v7957_v37 = vld [vmem:[%s20368_s16 + $0x778] sm:$0xff]  ;;  %v17816_v62 = vld [vmem:[%s20326_s7 + $0xcb8] sm:$0xff]  }
 0x4e7   : > { %v16294_v39 = vpop.f32.mrb[128].mxu0  ;;  %v21104_v48 = vadd.f32 %v16339_v27, %v13596_v26  ;;  %v7956_v26 = vld [vmem:[%s20368_s16 + $0x770] sm:$0xff] }
 0x4e8   : > { %v16340_v53 = vpop.f32.mrb[128].mxu1  ;;  %v16295_v59 = vpop.f32.mrb[129].mxu0  ;;  %14319 = vmatmul.mubr.bf16.gmra.mrb[228].mxu0 %v17784_v52  ;;  %16871 = vmatpush3.bf16.msra.mxu1 %v17792_v12  ;;  %v17812_v52 = vld [vmem:[%s20326_s7 + $0xcb0] sm:$0xff]  }
 0x4e9   : > { %v16341_v44 = vpop.f32.mrb[129].mxu1  ;;  %v16296_v46 = vadd.f32 %v16295_v59, %v16294_v39  ;;  %v16297_v63 = vpop.f32.mrb[130].mxu0  ;;  %16827 = vmatpush3.bf16.msra.mxu0 %v17791_v16  ;;  %14326 = vmatprep.mubr.bf16.mxu0 %v17793_v15  ;;  %v15223_v39 = vcombine.high %v7956_v26, %v7956_v26  ;;  %v15222_v59 = vcombine.low %v7956_v26, %v7956_v26  ;;  %v17819_v16 = vld [vmem:[%s20368_s16 + $0xc4] ss:$216 sps:$4 sm:$0xff]  }
 0x4ea   : > { %v16342_v0 = vadd.f32 %v16341_v44, %v16340_v53  ;;  %v16298_v5 = vpop.f32.mrb[131].mxu0  ;;  %v16343_v60 = vpop.f32.mrb[130].mxu1  ;;  %16872 = vmatprep.subr.bf16.mxu1 %v17799_v18  ;;  %16828 = vmatprep.subr.bf16.mxu0 %v17800_v41  ;;  %v15225_v53 = vcombine.high %v7957_v37, %v7957_v37  ;;  %v15224_v44 = vcombine.low %v7957_v37, %v7957_v37  ;;  %v17822_v15 = vld [vmem:[%s20368_s16 + $0xcc] ss:$216 sps:$4 sm:$0xff]  }
 0x4eb   : > { %v13601_v4 = vadd.f32 %v16296_v46, %v21038_v2  ;;  %v16299_v54 = vadd.f32 %v16298_v5, %v16297_v63  ;;  %14391 = vmatmul.mubr.bf16.gmra.mrb[228].mxu1 %v17785_v3  ;;  %v16344_v56 = vpop.f32.mrb[131].mxu1  ;;  %v17811_v46 = vld [vmem:[%s20326_s7 + $0xcf0] sm:$0xff]   ;;  %v17826_v18 = vld [vmem:[%s20326_s7 + $0xd08] sm:$0xff]  }
 0x4ec   : > { %v16345_v2 = vadd.f32 %v16344_v56, %v16343_v60  ;;  %14398 = vmatprep.mubr.bf16.mxu1 %v17795_v9  ;;  %16873 = vmatpush3.bf16.msra.mxu1 %v17801_v42  ;;  %v17827_v41 = vld [vmem:[%s20368_s16 + $0x274] ss:$216 sps:$4 sm:$0xff]   ;;  %v17831_v42 = vld [vmem:[%s20368_s16 + $0x270] ss:$216 sps:$4 sm:$0xff]  }
 0x4ed   : > { %v21112_v45 = vadd.f32 %v16342_v0, %v13601_v4  ;;  %v13604_v14 = vadd.f32 %v16299_v54, %v21042_v57  ;;  %16829 = vmatpush3.bf16.msra.mxu0 %v17802_v29  ;;  %16874 = vmatprep.subr.bf16.mxu1 %v17803_v40  ;;  %v17814_v54 = vld [vmem:[%s20326_s7 + $0xc38] sm:$0xff]  }
 0x4ee   : > { %v17832_v40 = vld [vmem:[%s20368_s16 + $0x278] ss:$216 sps:$4 sm:$0xff]  }
 0x4ef   : > { %v21118_v17 = vadd.f32 %v16345_v2, %v13604_v14 }
 0x4f0   : > { %v16346_v11 = vpop.f32.mrb[132].mxu1  ;;  %14327 = vmatmul.mubr.bf16.gmra.mrb[232].mxu0 %v17797_v1  ;;  %16875 = vmatpush3.bf16.msra.mxu1 %v17804_v36  ;;  %v17824_v1 = vld [vmem:[%s20326_s7 + $0xd00] sm:$0xff]  }
 0x4f1   : > { %v16347_v25 = vpop.f32.mrb[133].mxu1  ;;  %14334 = vmatprep.mubr.bf16.mxu0 %v15223_v39  ;;  %16876 = vmatprep.subr.bf16.mxu1 %v17811_v46  ;;  %v17840_v46 = vld [vmem:[%s20368_s16 + $0x420] ss:$216 sps:$4 sm:$0xff]  }
 0x4f2   : > { %v16348_v31 = vadd.f32 %v16347_v25, %v16346_v11  ;;  %v16349_v38 = vpop.f32.mrb[134].mxu1  ;;  %v17820_v11 = vld [vmem:[%s20368_s16 + $0xc8] ss:$216 sps:$4 sm:$0xff]  }
 0x4f3   : > { %14399 = vmatmul.mubr.bf16.gmra.mrb[232].mxu1 %v17798_v20  ;;  %v16350_v23 = vpop.f32.mrb[135].mxu1  ;;  %v17825_v20 = vld [vmem:[%s20326_s7 + $0xd48] sm:$0xff]  }
 0x4f4   : > { %14406 = vmatprep.mubr.bf16.mxu1 %v15225_v53  ;;  %16877 = vmatpush3.bf16.msra.mxu1 %v17812_v52 }
 0x4f5   : > { %16878 = vmatprep.subr.bf16.mxu1 %v17815_v58 }
 0x4f8   : > { %14335 = vmatmul.mubr.bf16.gmra.mrb[236].mxu0 %v15222_v59  ;;  %16879 = vmatpush3.bf16.msra.mxu1 %v17816_v62 }
 0x4f9   : > { %v16352_v27 = vpop.f32.mrb[136].mxu1  ;;  %14446 = vmatprep.mubr.bf16.mxu0 %v17819_v16 }
 0x4fa   : > { %v16300_v50 = vpop.f32.mrb[132].mxu0  ;;  %v16353_v3 = vpop.f32.mrb[137].mxu1 }
 0x4fb   : > { %v16301_v7 = vpop.f32.mrb[133].mxu0  ;;  %14407 = vmatmul.mubr.bf16.gmra.mrb[236].mxu1 %v15224_v44  ;;  %v16354_v5 = vadd.f32 %v16353_v3, %v16352_v27  ;;  %v16355_v8 = vpop.f32.mrb[138].mxu1  ;;  %v17835_v27 = vld [vmem:[%s20368_s16 + $0x424] ss:$216 sps:$4 sm:$0xff]   ;;  %v17839_v44 = vld [vmem:[%s20326_s7 + $0xd58] sm:$0xff]  }
 0x4fc   : > { %v16302_v24 = vadd.f32 %v16301_v7, %v16300_v50  ;;  %v16303_v57 = vpop.f32.mrb[134].mxu0  ;;  %v16356_v60 = vpop.f32.mrb[139].mxu1  ;;  %14518 = vmatprep.mubr.bf16.mxu1 %v17822_v15  ;;  %v17844_v8 = vld [vmem:[%s20326_s7 + $0xd20] sm:$0xff]   ;;  %v17852_v15 = vld [vmem:[%s20326_s7 + $0xd28] sm:$0xff]  }
 0x4fd   : > { %v16304_v30 = vpop.f32.mrb[135].mxu0 }
 0x4fe   : > { %v13609_v21 = vadd.f32 %v16302_v24, %v21052_v13  ;;  %v16305_v35 = vadd.f32 %v16304_v30, %v16303_v57  ;;  %v16351_v13 = vadd.f32 %v16350_v23, %v16349_v38  ;;  %v17823_v57 = vld [vmem:[%s20326_s7 + $0xd40] sm:$0xff]  }
 0x4ff   : > { %16956 = vmatprep.subr.bf16.mxu1 %v17823_v57  ;;  %v17829_v23 = vld [vmem:[%s20368_s16 + $0x27c] ss:$216 sps:$4 sm:$0xff]  }
 0x500   : > { %v13612_v22 = vadd.f32 %v16305_v35, %v21057_v34  ;;  %v21129_v28 = vadd.f32 %v16348_v31, %v13609_v21  ;;  %v17805_v34 = vld [vmem:[%s20326_s7 + $0xc70] sm:$0xff]  }
 0x501   : > { %16830 = vmatprep.subr.bf16.mxu0 %v17805_v34  ;;  %v17834_v34 = vld [vmem:[%s20326_s7 + $0xd10] sm:$0xff]  }
 0x502   : > { %v21134_v33 = vadd.f32 %v16351_v13, %v13612_v22  ;;  %16831 = vmatpush3.bf16.msra.mxu0 %v17808_v55  ;;  %v17837_v55 = vld [vmem:[%s20368_s16 + $0x42c] ss:$216 sps:$4 sm:$0xff]  }
 0x503   : > { %v16306_v10 = vpop.f32.mrb[136].mxu0  ;;  %16832 = vmatprep.subr.bf16.mxu0 %v17813_v47  ;;  %14519 = vmatmul.mubr.bf16.vlgmr.msra.gmra.mrb[240].mxu1 %v17820_v11  ;;  %v17843_v47 = vld [vmem:[%s20326_s7 + $0xd60] sm:$0xff]  }
 0x504   : > { %v16307_v19 = vpop.f32.mrb[137].mxu0  ;;  %16964 = vmatpush3.bf16.msra.mxu1 %v17824_v1  ;;  %14526 = vmatprep.mubr.bf16.mxu1 %v17829_v23  ;;  %v17858_v23 = vld [vmem:[%s20326_s7 + $0xd30] sm:$0xff]  }
 0x505   : > { %v16309_v43 = vpop.f32.mrb[138].mxu0  ;;  %v16308_v63 = vadd.f32 %v16307_v19, %v16306_v10  ;;  %16957 = vmatprep.subr.bf16.mxu1 %v17825_v20 }
 0x506   : > { %v16310_v0 = vpop.f32.mrb[139].mxu0  ;;  %16833 = vmatpush3.bf16.msra.mxu0 %v17814_v54 }
 0x507   : > { %v13617_v4 = vadd.f32 %v16308_v63, %v21070_v61  ;;  %v17817_v61 = vld [vmem:[%s20368_s16 + $0xc0] ss:$216 sps:$4 sm:$0xff]   ;;  %16910 = vmatprep.subr.bf16.mxu0 %v17823_v57  ;;  %v17842_v0 = vld [vmem:[%s20326_s7 + $0xd18] sm:$0xff]  }
 0x508   : > { %16965 = vmatpush3.bf16.msra.mxu1 %v17826_v18  ;;  %v17841_v63 = vld [vmem:[%s20368_s16 + $0x428] ss:$216 sps:$4 sm:$0xff]  }
 0x509   : > { %v21147_v56 = vadd.f32 %v16354_v5, %v13617_v4  ;;  %14447 = vmatmul.mubr.bf16.vlgmr.msra.gmra.mrb[240].mxu0 %v17817_v61  ;;  %v17847_v61 = vld [vmem:[%s20368_s16 + $0x5dc] ss:$216 sps:$4 sm:$0xff]  }
 0x50a   : > { %16911 = vmatpush3.bf16.msra.mxu0 %v17824_v1  ;;  %14454 = vmatprep.mubr.bf16.mxu0 %v17827_v41  ;;  %v17853_v1 = vld [vmem:[%s20326_s7 + $0xd70] sm:$0xff]  }
 0x50b   : > { %v16374_v14 = vpop.f32.mrb[140].mxu0  ;;  %16912 = vmatprep.subr.bf16.mxu0 %v17825_v20  ;;  %14527 = vmatmul.mubr.bf16.gmra.mrb[244].mxu1 %v17832_v40  ;;  %v7959_v20 = vld [vmem:[%s20368_s16 + $0x788] sm:$0xff] }
 0x50c   : > { %v16375_v2 = vpop.f32.mrb[141].mxu0  ;;  %14534 = vmatprep.mubr.bf16.mxu1 %v17837_v55  ;;  %v17859_v40 = vld [vmem:[%s20326_s7 + $0xd78] sm:$0xff]   ;;  %v15228_v55 = vcombine.low %v7959_v20, %v7959_v20 }
 0x50d   : > { %v16376_v50 = vadd.f32 %v16375_v2, %v16374_v14  ;;  %v16377_v12 = vpop.f32.mrb[142].mxu0 }
 0x50e   : > { %v16420_v51 = vpop.f32.mrb[140].mxu1  ;;  %v16378_v9 = vpop.f32.mrb[143].mxu0  ;;  %16913 = vmatpush3.bf16.msra.mxu0 %v17826_v18 }
 0x50f   : > { %v16421_v7 = vpop.f32.mrb[141].mxu1  ;;  %v13729_v25 = vadd.f32 %v16376_v50, %v21081_v6  ;;  %v16379_v30 = vadd.f32 %v16378_v9, %v16377_v12  ;;  %v17849_v9 = vld [vmem:[%s20368_s16 + $0x5d0] ss:$216 sps:$4 sm:$0xff]  }
 0x510   : > { %v16422_v24 = vadd.f32 %v16421_v7, %v16420_v51  ;;  %v16423_v31 = vpop.f32.mrb[142].mxu1  ;;  %v17851_v7 = vld [vmem:[%s20326_s7 + $0xd68] sm:$0xff]  }
 0x511   : > { %v16424_v35 = vpop.f32.mrb[143].mxu1  ;;  %v13732_v6 = vadd.f32 %v16379_v30, %v21089_v32  ;;  %v17833_v32 = vld [vmem:[%s20326_s7 + $0xd50] sm:$0xff]   ;;  %14455 = vmatmul.mubr.bf16.gmra.mrb[244].mxu0 %v17831_v42 }
 0x512   : > { %v21158_v21 = vadd.f32 %v16422_v24, %v13729_v25  ;;  %v16425_v38 = vadd.f32 %v16424_v35, %v16423_v31  ;;  %16914 = vmatprep.subr.bf16.mxu0 %v17833_v32  ;;  %16958 = vmatprep.subr.bf16.mxu1 %v17833_v32  ;;  %v7958_v30 = vld [vmem:[%s20368_s16 + $0x780] sm:$0xff] }
 0x513   : > { %v16380_v22 = vpop.f32.mrb[144].mxu0  ;;  %14462 = vmatprep.mubr.bf16.mxu0 %v17835_v27  ;;  %16915 = vmatpush3.bf16.msra.mxu0 %v17834_v34  ;;  %v17860_v27 = vld [vmem:[%s20326_s7 + $0xd38] sm:$0xff]  }
 0x514   : > { %v21165_v13 = vadd.f32 %v16425_v38, %v13732_v6  ;;  %v16381_v29 = vpop.f32.mrb[145].mxu0  ;;  %16916 = vmatprep.subr.bf16.mxu0 %v17839_v44  ;;  %16966 = vmatpush3.bf16.msra.mxu1 %v17834_v34  ;;  %v15227_v6 = vcombine.high %v7958_v30, %v7958_v30  ;;  %v15229_v38 = vcombine.high %v7959_v20, %v7959_v20 }
 0x515   : > { %v16382_v36 = vadd.f32 %v16381_v29, %v16380_v22  ;;  %v16383_v10 = vpop.f32.mrb[146].mxu0  ;;  %16959 = vmatprep.subr.bf16.mxu1 %v17839_v44  ;;  %14535 = vmatmul.mubr.bf16.gmra.mrb[248].mxu1 %v17841_v63  ;;  %v17863_v44 = vld [vmem:[%s20368_s16 + $0xd4] ss:$216 sps:$4 sm:$0xff]  }
 0x516   : > { %v16426_v37 = vpop.f32.mrb[144].mxu1  ;;  %v16384_v19 = vpop.f32.mrb[147].mxu0  ;;  %14542 = vmatprep.mubr.bf16.mxu1 %v17847_v61  ;;  %v17869_v61 = vld [vmem:[%s20368_s16 + $0x284] ss:$216 sps:$4 sm:$0xff]  }
 0x517   : > { %v13737_v26 = vadd.f32 %v16382_v36, %v21100_v49  ;;  %v16385_v39 = vadd.f32 %v16384_v19, %v16383_v10  ;;  %v16427_v53 = vpop.f32.mrb[145].mxu1  ;;  %16917 = vmatpush3.bf16.msra.mxu0 %v17842_v0 }
 0x518   : > { %v16428_v59 = vadd.f32 %v16427_v53, %v16426_v37  ;;  %v16429_v43 = vpop.f32.mrb[146].mxu1  ;;  %16918 = vmatprep.subr.bf16.mxu0 %v17843_v47  ;;  %16967 = vmatpush3.bf16.msra.mxu1 %v17842_v0 }
 0x519   : > { %v13740_v49 = vadd.f32 %v16385_v39, %v21104_v48  ;;  %v16430_v3 = vpop.f32.mrb[147].mxu1  ;;  %v17845_v48 = vld [vmem:[%s20368_s16 + $0x5d4] ss:$216 sps:$4 sm:$0xff]   ;;  %14463 = vmatmul.mubr.bf16.gmra.mrb[248].mxu0 %v17840_v46  ;;  %16960 = vmatprep.subr.bf16.mxu1 %v17843_v47 }
 0x51a   : > { %v21178_v52 = vadd.f32 %v16428_v59, %v13737_v26  ;;  %v16431_v4 = vadd.f32 %v16430_v3, %v16429_v43  ;;  %14470 = vmatprep.mubr.bf16.mxu0 %v17845_v48  ;;  %v7960_v48 = vld [vmem:[%s20368_s16 + $0x790] sm:$0xff] }
 0x51b   : > { %v16386_v5 = vpop.f32.mrb[148].mxu0  ;;  %16919 = vmatpush3.bf16.msra.mxu0 %v17844_v8 }
 0x51c   : > { %v16387_v54 = vpop.f32.mrb[149].mxu0  ;;  %v21183_v60 = vadd.f32 %v16431_v4, %v13740_v49  ;;  %16968 = vmatpush3.bf16.msra.mxu1 %v17844_v8  ;;  %16920 = vmatprep.subr.bf16.mxu0 %v17851_v7  ;;  %v17866_v49 = vld [vmem:[%s20368_s16 + $0x5e4] ss:$216 sps:$4 sm:$0xff]  }
 0x51d   : > { %v16388_v58 = vadd.f32 %v16387_v54, %v16386_v5  ;;  %v16389_v62 = vpop.f32.mrb[150].mxu0  ;;  %16961 = vmatprep.subr.bf16.mxu1 %v17851_v7 }
 0x51e   : > { %v16432_v14 = vpop.f32.mrb[148].mxu1  ;;  %v16390_v2 = vpop.f32.mrb[151].mxu0 }
 0x51f   : > { %v16433_v51 = vpop.f32.mrb[149].mxu1  ;;  %v13745_v16 = vadd.f32 %v16388_v58, %v21112_v45  ;;  %v16391_v50 = vadd.f32 %v16390_v2, %v16389_v62  ;;  %v17850_v45 = vld [vmem:[%s20368_s16 + $0x5d8] ss:$216 sps:$4 sm:$0xff]   ;;  %16921 = vmatpush3.bf16.msra.mxu0 %v17852_v15  ;;  %v15231_v2 = vcombine.high %v7960_v48, %v7960_v48 }
 0x520   : > { %v16434_v12 = vadd.f32 %v16433_v51, %v16432_v14  ;;  %v16435_v11 = vpop.f32.mrb[150].mxu1  ;;  %16969 = vmatpush3.bf16.msra.mxu1 %v17852_v15  ;;  %16922 = vmatprep.subr.bf16.mxu0 %v17853_v1  ;;  %v17861_v58 = vld [vmem:[%s20368_s16 + $0xd0] ss:$216 sps:$4 sm:$0xff]   ;;  %v17864_v62 = vld [vmem:[%s20368_s16 + $0x5e0] ss:$216 sps:$4 sm:$0xff]  }
 0x521   : > { %v13748_v24 = vadd.f32 %v16391_v50, %v21118_v17  ;;  %v16436_v25 = vpop.f32.mrb[151].mxu1  ;;  %14471 = vmatmul.mubr.bf16.gmra.mrb[252].mxu0 %v17849_v9  ;;  %14543 = vmatmul.mubr.bf16.gmra.mrb[252].mxu1 %v17850_v45 }
 0x522   : > { %v21190_v57 = vadd.f32 %v16434_v12, %v13745_v16  ;;  %v16437_v31 = vadd.f32 %v16436_v25, %v16435_v11  ;;  %14478 = vmatprep.mubr.bf16.mxu0 %v15227_v6  ;;  %14550 = vmatprep.mubr.bf16.mxu1 %v15229_v38 }
 0x523   : > { %v16392_v35 = vpop.f32.mrb[152].mxu0  ;;  %16923 = vmatpush3.bf16.msra.mxu0 %v17858_v23  ;;  %16962 = vmatprep.subr.bf16.mxu1 %v17853_v1 }
 0x524   : > { %v21197_v18 = vadd.f32 %v16437_v31, %v13748_v24  ;;  %v16393_v17 = vpop.f32.mrb[153].mxu0  ;;  %16970 = vmatpush3.bf16.msra.mxu1 %v17858_v23  ;;  %16924 = vmatprep.subr.bf16.mxu0 %v17859_v40  ;;  %v15230_v31 = vcombine.low %v7960_v48, %v7960_v48 }
 0x525   : > { %v16394_v41 = vadd.f32 %v16393_v17, %v16392_v35  ;;  %v16395_v22 = vpop.f32.mrb[154].mxu0  ;;  %16963 = vmatprep.subr.bf16.mxu1 %v17859_v40  ;;  %v17874_v17 = vld [vmem:[%s20368_s16 + $0x434] ss:$216 sps:$4 sm:$0xff]  }
 0x526   : > { %v16438_v42 = vpop.f32.mrb[152].mxu1  ;;  %v16396_v29 = vpop.f32.mrb[155].mxu0 }
 0x527   : > { %v13753_v36 = vadd.f32 %v16394_v41, %v21129_v28  ;;  %v16397_v32 = vadd.f32 %v16396_v29, %v16395_v22  ;;  %v16439_v10 = vpop.f32.mrb[153].mxu1  ;;  %v15226_v28 = vcombine.low %v7958_v30, %v7958_v30  ;;  %16925 = vmatpush3.bf16.msra.mxu0 %v17860_v27  ;;  %v17867_v30 = vld [vmem:[%s20368_s16 + $0x280] ss:$216 sps:$4 sm:$0xff]  }
 0x528   : > { %v16440_v34 = vadd.f32 %v16439_v10, %v16438_v42  ;;  %v16441_v26 = vpop.f32.mrb[154].mxu1  ;;  %16971 = vmatpush3.bf16.msra.mxu1 %v17860_v27 }
 0x529   : > { %v13756_v37 = vadd.f32 %v16397_v32, %v21134_v33  ;;  %v16442_v19 = vpop.f32.mrb[155].mxu1  ;;  %14479 = vmatmul.mubr.bf16.gmra.mrb[0].mxu0 %v15226_v28  ;;  %14551 = vmatmul.mubr.bf16.gmra.mrb[0].mxu1 %v15228_v55 }
 0x52a   : > { %v21204_v39 = vadd.f32 %v16440_v34, %v13753_v36  ;;  %v16443_v53 = vadd.f32 %v16442_v19, %v16441_v26  ;;  %14590 = vmatprep.mubr.bf16.mxu0 %v17863_v44  ;;  %14614 = vmatprep.mubr.bf16.mxu1 %v17866_v49  ;;  %v17872_v26 = vld [vmem:[%s20368_s16 + $0x430] ss:$216 sps:$4 sm:$0xff]  }
 0x52b   : > { %v16398_v33 = vpop.f32.mrb[156].mxu0 }
 0x52c   : > { %v21206_v59 = vadd.f32 %v16443_v53, %v13756_v37  ;;  %v16399_v63 = vpop.f32.mrb[157].mxu0 }
 0x52d   : > { %v16400_v47 = vadd.f32 %v16399_v63, %v16398_v33  ;;  %v16401_v4 = vpop.f32.mrb[158].mxu0 }
 0x52e   : > { %v16444_v43 = vpop.f32.mrb[156].mxu1  ;;  %v16402_v8 = vpop.f32.mrb[159].mxu0 }
 0x52f   : > { %v16445_v46 = vpop.f32.mrb[157].mxu1  ;;  %v13761_v54 = vadd.f32 %v16400_v47, %v21147_v56 }
 0x530   : > { %v16446_v0 = vadd.f32 %v16445_v46, %v16444_v43  ;;  %v16447_v3 = vpop.f32.mrb[158].mxu1 }
 0x531   : > { %v16448_v5 = vpop.f32.mrb[159].mxu1  ;;  %14591 = vmatmul.mubr.bf16.vlgmr.msra.gmra.mrb[4].mxu0 %v17861_v58  ;;  %14615 = vmatmul.mubr.bf16.vlgmr.msra.gmra.mrb[4].mxu1 %v17864_v62 }
 0x532   : > { %v21214_v14 = vadd.f32 %v16446_v0, %v13761_v54  ;;  %14598 = vmatprep.mubr.bf16.mxu0 %v17869_v61  ;;  %14622 = vmatprep.mubr.bf16.mxu1 %v15231_v2 }
 0x533   : > { %v16466_v51 = vpop.f32.mrb[160].mxu0 }
 0x534   : > { %v16467_v50 = vpop.f32.mrb[161].mxu0 }
 0x535   : > { %v16468_v7 = vadd.f32 %v16467_v50, %v16466_v51  ;;  %v16469_v11 = vpop.f32.mrb[162].mxu0 }
 0x536   : > { %v16512_v16 = vpop.f32.mrb[160].mxu1  ;;  %v16470_v56 = vpop.f32.mrb[163].mxu0 }
 0x537   : > { %v16513_v12 = vpop.f32.mrb[161].mxu1  ;;  %v13873_v9 = vadd.f32 %v16468_v7, %v21158_v21  ;;  %v16471_v45 = vadd.f32 %v16470_v56, %v16469_v11 }
 0x538   : > { %v16514_v15 = vadd.f32 %v16513_v12, %v16512_v16  ;;  %v16515_v24 = vpop.f32.mrb[162].mxu1 }
 0x539   : > { %v16516_v25 = vpop.f32.mrb[163].mxu1  ;;  %v13876_v20 = vadd.f32 %v16471_v45, %v21165_v13  ;;  %14599 = vmatmul.mubr.bf16.gmra.mrb[8].mxu0 %v17867_v30  ;;  %14623 = vmatmul.mubr.bf16.gmra.mrb[8].mxu1 %v15230_v31 }
 0x53a   : > { %v16517_v1 = vadd.f32 %v16516_v25, %v16515_v24  ;;  %v21220_v35 = vadd.f32 %v16514_v15, %v13873_v9  ;;  %14606 = vmatprep.mubr.bf16.mxu0 %v17874_v17 }
 0x53b   : > { %v16472_v38 = vpop.f32.mrb[164].mxu0 }
 0x53c   : > { %v21223_v6 = vadd.f32 %v16517_v1, %v13876_v20  ;;  %v16473_v22 = vpop.f32.mrb[165].mxu0 }
 0x53d   : > { %v16474_v42 = vadd.f32 %v16473_v22, %v16472_v38  ;;  %v16475_v21 = vpop.f32.mrb[166].mxu0 }
 0x53e   : > { %v16518_v41 = vpop.f32.mrb[164].mxu1  ;;  %v16476_v36 = vpop.f32.mrb[167].mxu0 }
 0x53f   : > { %v16519_v23 = vpop.f32.mrb[165].mxu1  ;;  %v13881_v13 = vadd.f32 %v16474_v42, %v21178_v52  ;;  %v16477_v10 = vadd.f32 %v16476_v36, %v16475_v21 }
 0x540   : > { %v16520_v29 = vadd.f32 %v16519_v23, %v16518_v41  ;;  %v16521_v40 = vpop.f32.mrb[166].mxu1 }
 0x541   : > { %v16522_v32 = vpop.f32.mrb[167].mxu1  ;;  %v13884_v37 = vadd.f32 %v16477_v10, %v21183_v60  ;;  %14607 = vmatmul.mubr.bf16.gmra.mrb[12].mxu0 %v17872_v26 }
 0x542   : > { %v16523_v34 = vadd.f32 %v16522_v32, %v16521_v40  ;;  %v21228_v19 = vadd.f32 %v16520_v29, %v13881_v13 }
 0x543   : > { %v16478_v53 = vpop.f32.mrb[168].mxu0 }
 0x544   : > { %v21230_v27 = vadd.f32 %v16523_v34, %v13884_v37  ;;  %v16479_v55 = vpop.f32.mrb[169].mxu0 }
 0x545   : > { %v16480_v49 = vadd.f32 %v16479_v55, %v16478_v53  ;;  %v16481_v43 = vpop.f32.mrb[170].mxu0 }
 0x546   : > { %v16524_v28 = vpop.f32.mrb[168].mxu1  ;;  %v16482_v63 = vpop.f32.mrb[171].mxu0 }
 0x547   : > { %v16525_v44 = vpop.f32.mrb[169].mxu1  ;;  %v13889_v0 = vadd.f32 %v16480_v49, %v21190_v57  ;;  %v16483_v3 = vadd.f32 %v16482_v63, %v16481_v43 }
 0x548   : > { %v16526_v33 = vadd.f32 %v16525_v44, %v16524_v28  ;;  %v16527_v46 = vpop.f32.mrb[170].mxu1 }
 0x549   : > { %v16528_v52 = vpop.f32.mrb[171].mxu1  ;;  %v13892_v60 = vadd.f32 %v16483_v3, %v21197_v18 }
 0x54a   : > { %v16529_v47 = vadd.f32 %v16528_v52, %v16527_v46  ;;  %v21234_v4 = vadd.f32 %v16526_v33, %v13889_v0 }
 0x54b   : > { %v16484_v8 = vpop.f32.mrb[172].mxu0 }
 0x54c   : > { %v21236_v5 = vadd.f32 %v16529_v47, %v13892_v60  ;;  %v16485_v54 = vpop.f32.mrb[173].mxu0 }
 0x54d   : > { %v16486_v58 = vadd.f32 %v16485_v54, %v16484_v8  ;;  %v16487_v62 = vpop.f32.mrb[174].mxu0 }
 0x54e   : > { %v16530_v48 = vpop.f32.mrb[172].mxu1  ;;  %v16488_v2 = vpop.f32.mrb[175].mxu0 }
 0x54f   : > { %v16531_v61 = vpop.f32.mrb[173].mxu1  ;;  %v13897_v50 = vadd.f32 %v16486_v58, %v21204_v39  ;;  %v16489_v57 = vadd.f32 %v16488_v2, %v16487_v62 }
 0x550   : > { %v16532_v51 = vadd.f32 %v16531_v61, %v16530_v48  ;;  %v16533_v16 = vpop.f32.mrb[174].mxu1 }
 0x551   : > { %v16534_v12 = vpop.f32.mrb[175].mxu1  ;;  %v13900_v18 = vadd.f32 %v16489_v57, %v21206_v59 }
 0x552   : > { %v16535_v7 = vadd.f32 %v16534_v12, %v16533_v16  ;;  %v21240_v11 = vadd.f32 %v16532_v51, %v13897_v50 }
 0x553   : > { %v16490_v56 = vpop.f32.mrb[176].mxu0 }
 0x554   : > { %v21242_v15 = vadd.f32 %v16535_v7, %v13900_v18  ;;  %v16491_v9 = vpop.f32.mrb[177].mxu0 }
 0x555   : > { %v16492_v30 = vadd.f32 %v16491_v9, %v16490_v56  ;;  %v16493_v31 = vpop.f32.mrb[178].mxu0 }
 0x556   : > { %v16536_v24 = vpop.f32.mrb[176].mxu1  ;;  %v16494_v17 = vpop.f32.mrb[179].mxu0 }
 0x557   : > { %v16537_v25 = vpop.f32.mrb[177].mxu1  ;;  %v13905_v39 = vadd.f32 %v16492_v30, %v21214_v14 }
 0x558   : > { %v16538_v45 = vadd.f32 %v16537_v25, %v16536_v24  ;;  %v16539_v1 = vpop.f32.mrb[178].mxu1 }
 0x559   : > { %v16540_v20 = vpop.f32.mrb[179].mxu1 }
 0x55a   : > { %v21245_v38 = vadd.f32 %v16538_v45, %v13905_v39 }
 0x55b   : > { %v16558_v41 = vpop.f32.mrb[180].mxu0 }
 0x55c   : > { %v16559_v22 = vpop.f32.mrb[181].mxu0 }
 0x55d   : > { %v16560_v42 = vadd.f32 %v16559_v22, %v16558_v41  ;;  %v16561_v21 = vpop.f32.mrb[182].mxu0 }
 0x55e   : > { %v16604_v59 = vpop.f32.mrb[180].mxu1  ;;  %v16562_v36 = vpop.f32.mrb[183].mxu0 }
 0x55f   : > { %v16605_v23 = vpop.f32.mrb[181].mxu1  ;;  %v14017_v13 = vadd.f32 %v16560_v42, %v21220_v35  ;;  %v16563_v10 = vadd.f32 %v16562_v36, %v16561_v21 }
 0x560   : > { %v16606_v29 = vadd.f32 %v16605_v23, %v16604_v59  ;;  %v16607_v40 = vpop.f32.mrb[182].mxu1 }
 0x561   : > { %v16608_v32 = vpop.f32.mrb[183].mxu1  ;;  %v14020_v26 = vadd.f32 %v16563_v10, %v21223_v6 }
 0x562   : > { %v16609_v34 = vadd.f32 %v16608_v32, %v16607_v40  ;;  %v21249_v37 = vadd.f32 %v16606_v29, %v14017_v13 }
 0x563   : > { %v16564_v53 = vpop.f32.mrb[184].mxu0 }
 0x564   : > { %v21251_v14 = vadd.f32 %v16609_v34, %v14020_v26  ;;  %v16565_v55 = vpop.f32.mrb[185].mxu0 }
 0x565   : > { %v16566_v49 = vadd.f32 %v16565_v55, %v16564_v53  ;;  %v16567_v43 = vpop.f32.mrb[186].mxu0 }
 0x566   : > { %v16610_v28 = vpop.f32.mrb[184].mxu1  ;;  %v16568_v63 = vpop.f32.mrb[187].mxu0 }
 0x567   : > { %v16611_v44 = vpop.f32.mrb[185].mxu1  ;;  %v14025_v35 = vadd.f32 %v16566_v49, %v21228_v19  ;;  %v16569_v0 = vadd.f32 %v16568_v63, %v16567_v43 }
 0x568   : > { %v16612_v33 = vadd.f32 %v16611_v44, %v16610_v28  ;;  %v16613_v46 = vpop.f32.mrb[186].mxu1 }
 0x569   : > { %v16614_v52 = vpop.f32.mrb[187].mxu1  ;;  %v14028_v6 = vadd.f32 %v16569_v0, %v21230_v27 }
 0x56a   : > { %v16615_v3 = vadd.f32 %v16614_v52, %v16613_v46  ;;  %v21255_v47 = vadd.f32 %v16612_v33, %v14025_v35 }
 0x56b   : > { %v16570_v8 = vpop.f32.mrb[188].mxu0 }
 0x56c   : > { %v21257_v60 = vadd.f32 %v16615_v3, %v14028_v6  ;;  %v16571_v48 = vpop.f32.mrb[189].mxu0 }
 0x56d   : > { %v16572_v62 = vadd.f32 %v16571_v48, %v16570_v8  ;;  %v16573_v61 = vpop.f32.mrb[190].mxu0 }
 0x56e   : > { %v16616_v54 = vpop.f32.mrb[188].mxu1  ;;  %v16574_v16 = vpop.f32.mrb[191].mxu0 }
 0x56f   : > { %v16617_v58 = vpop.f32.mrb[189].mxu1  ;;  %v14033_v19 = vadd.f32 %v16572_v62, %v21234_v4  ;;  %v16575_v57 = vadd.f32 %v16574_v16, %v16573_v61 }
 0x570   : > { %v16618_v2 = vadd.f32 %v16617_v58, %v16616_v54  ;;  %v16619_v51 = vpop.f32.mrb[190].mxu1 }
 0x571   : > { %v16620_v50 = vpop.f32.mrb[191].mxu1  ;;  %v14036_v27 = vadd.f32 %v16575_v57, %v21236_v5 }
 0x572   : > { %v16621_v12 = vadd.f32 %v16620_v50, %v16619_v51  ;;  %v21261_v7 = vadd.f32 %v16618_v2, %v14033_v19 }
 0x573   : > { %v16576_v24 = vpop.f32.mrb[192].mxu0 }
 0x574   : > { %v21263_v18 = vadd.f32 %v16621_v12, %v14036_v27  ;;  %v16577_v25 = vpop.f32.mrb[193].mxu0 }
 0x575   : > { %v16578_v45 = vadd.f32 %v16577_v25, %v16576_v24  ;;  %v16579_v1 = vpop.f32.mrb[194].mxu0 }
 0x576   : > { %v16622_v56 = vpop.f32.mrb[192].mxu1  ;;  %v16580_v20 = vpop.f32.mrb[195].mxu0 }
 0x577   : > { %v16623_v9 = vpop.f32.mrb[193].mxu1  ;;  %v14041_v4 = vadd.f32 %v16578_v45, %v21240_v11  ;;  %v16581_v39 = vadd.f32 %v16580_v20, %v16579_v1 }
 0x578   : > { %v16624_v30 = vadd.f32 %v16623_v9, %v16622_v56  ;;  %v16625_v31 = vpop.f32.mrb[194].mxu1 }
 0x579   : > { %v16626_v17 = vpop.f32.mrb[195].mxu1  ;;  %v14044_v5 = vadd.f32 %v16581_v39, %v21242_v15 }
 0x57a   : > { %v16627_v41 = vadd.f32 %v16626_v17, %v16625_v31  ;;  %v21267_v59 = vadd.f32 %v16624_v30, %v14041_v4 }
 0x57b   : > { %v16582_v23 = vpop.f32.mrb[196].mxu0 }
 0x57c   : > { %v21269_v22 = vadd.f32 %v16627_v41, %v14044_v5  ;;  %v16583_v21 = vpop.f32.mrb[197].mxu0 }
 0x57d   : > { %v16584_v40 = vadd.f32 %v16583_v21, %v16582_v23  ;;  %v16585_v36 = vpop.f32.mrb[198].mxu0 }
 0x57e   : > { %v16628_v42 = vpop.f32.mrb[196].mxu1  ;;  %v16586_v10 = vpop.f32.mrb[199].mxu0 }
 0x57f   : > { %v16629_v29 = vpop.f32.mrb[197].mxu1  ;;  %v14049_v11 = vadd.f32 %v16584_v40, %v21245_v38 }
 0x580   : > { %v16630_v32 = vadd.f32 %v16629_v29, %v16628_v42  ;;  %v16631_v13 = vpop.f32.mrb[198].mxu1 }
 0x581   : > { %v16632_v34 = vpop.f32.mrb[199].mxu1 }
 0x582   : > { %v21272_v26 = vadd.f32 %v16630_v32, %v14049_v11 }
 0x583   : > { %v16650_v53 = vpop.f32.mrb[200].mxu0 }
 0x584   : > { %v16651_v15 = vpop.f32.mrb[201].mxu0 }
 0x585   : > { %v16652_v55 = vadd.f32 %v16651_v15, %v16650_v53  ;;  %v16653_v44 = vpop.f32.mrb[202].mxu0 }
 0x586   : > { %v16696_v28 = vpop.f32.mrb[200].mxu1  ;;  %v16654_v43 = vpop.f32.mrb[203].mxu0 }
 0x587   : > { %v16697_v49 = vpop.f32.mrb[201].mxu1  ;;  %v14161_v63 = vadd.f32 %v16652_v55, %v21249_v37  ;;  %v16655_v52 = vadd.f32 %v16654_v43, %v16653_v44 }
 0x588   : > { %v16698_v33 = vadd.f32 %v16697_v49, %v16696_v28  ;;  %v16699_v46 = vpop.f32.mrb[202].mxu1 }
 0x589   : > { %v16700_v35 = vpop.f32.mrb[203].mxu1  ;;  %v14164_v3 = vadd.f32 %v16655_v52, %v21251_v14 }
 0x58a   : > { %v16701_v0 = vadd.f32 %v16700_v35, %v16699_v46  ;;  %v21276_v6 = vadd.f32 %v16698_v33, %v14161_v63 }
 0x58b   : > { %v16656_v8 = vpop.f32.mrb[204].mxu0 }
 0x58c   : > { %v21278_v38 = vadd.f32 %v16701_v0, %v14164_v3  ;;  %v16657_v54 = vpop.f32.mrb[205].mxu0 }
 0x58d   : > { %v16658_v58 = vadd.f32 %v16657_v54, %v16656_v8  ;;  %v16659_v62 = vpop.f32.mrb[206].mxu0 }
 0x58e   : > { %v16702_v48 = vpop.f32.mrb[204].mxu1  ;;  %v16660_v2 = vpop.f32.mrb[207].mxu0 }
 0x58f   : > { %v16703_v61 = vpop.f32.mrb[205].mxu1  ;;  %v14169_v37 = vadd.f32 %v16658_v58, %v21255_v47  ;;  %v16661_v50 = vadd.f32 %v16660_v2, %v16659_v62 }
 0x590   : > { %v16704_v51 = vadd.f32 %v16703_v61, %v16702_v48  ;;  %v16705_v16 = vpop.f32.mrb[206].mxu1 }
 0x591   : > { %v16706_v19 = vpop.f32.mrb[207].mxu1  ;;  %v14172_v14 = vadd.f32 %v16661_v50, %v21257_v60 }
 0x592   : > { %v16707_v57 = vadd.f32 %v16706_v19, %v16705_v16  ;;  %v21282_v12 = vadd.f32 %v16704_v51, %v14169_v37 }
 0x593   : > { %v16662_v24 = vpop.f32.mrb[208].mxu0 }
 0x594   : > { %v21284_v27 = vadd.f32 %v16707_v57, %v14172_v14  ;;  %v16663_v56 = vpop.f32.mrb[209].mxu0 }
 0x595   : > { %v16664_v9 = vadd.f32 %v16663_v56, %v16662_v24  ;;  %v16665_v45 = vpop.f32.mrb[210].mxu0 }
 0x596   : > { %v16708_v25 = vpop.f32.mrb[208].mxu1  ;;  %v16666_v30 = vpop.f32.mrb[211].mxu0 }
 0x597   : > { %v16709_v1 = vpop.f32.mrb[209].mxu1  ;;  %v14177_v47 = vadd.f32 %v16664_v9, %v21261_v7  ;;  %v16667_v17 = vadd.f32 %v16666_v30, %v16665_v45 }
 0x598   : > { %v16710_v31 = vadd.f32 %v16709_v1, %v16708_v25  ;;  %v16711_v20 = vpop.f32.mrb[210].mxu1 }
 0x599   : > { %v16712_v4 = vpop.f32.mrb[211].mxu1  ;;  %v14180_v60 = vadd.f32 %v16667_v17, %v21263_v18 }
 0x59a   : > { %v16713_v39 = vadd.f32 %v16712_v4, %v16711_v20  ;;  %v21288_v41 = vadd.f32 %v16710_v31, %v14177_v47 }
 0x59b   : > { %v16668_v23 = vpop.f32.mrb[212].mxu0 }
 0x59c   : > { %v21290_v5 = vadd.f32 %v16713_v39, %v14180_v60  ;;  %v16669_v42 = vpop.f32.mrb[213].mxu0 }
 0x59d   : > { %v16670_v29 = vadd.f32 %v16669_v42, %v16668_v23  ;;  %v16671_v40 = vpop.f32.mrb[214].mxu0 }
 0x59e   : > { %v16714_v21 = vpop.f32.mrb[212].mxu1  ;;  %v16672_v32 = vpop.f32.mrb[215].mxu0 }
 0x59f   : > { %v16715_v36 = vpop.f32.mrb[213].mxu1  ;;  %v14185_v7 = vadd.f32 %v16670_v29, %v21267_v59  ;;  %v16673_v34 = vadd.f32 %v16672_v32, %v16671_v40 }
 0x5a0   : > { %v16716_v13 = vadd.f32 %v16715_v36, %v16714_v21  ;;  %v16717_v10 = vpop.f32.mrb[214].mxu1 }
 0x5a1   : > { %v16718_v11 = vpop.f32.mrb[215].mxu1  ;;  %v14188_v18 = vadd.f32 %v16673_v34, %v21269_v22 }
 0x5a2   : > { %v16719_v53 = vadd.f32 %v16718_v11, %v16717_v10  ;;  %v21294_v15 = vadd.f32 %v16716_v13, %v14185_v7 }
 0x5a3   : > { %v16674_v44 = vpop.f32.mrb[216].mxu0 }
 0x5a4   : > { %v21296_v28 = vadd.f32 %v16719_v53, %v14188_v18  ;;  %v16675_v43 = vpop.f32.mrb[217].mxu0 }
 0x5a5   : > { %v16676_v63 = vadd.f32 %v16675_v43, %v16674_v44  ;;  %v16677_v52 = vpop.f32.mrb[218].mxu0 }
 0x5a6   : > { %v16720_v55 = vpop.f32.mrb[216].mxu1  ;;  %v16678_v0 = vpop.f32.mrb[219].mxu0 }
 0x5a7   : > { %v16721_v49 = vpop.f32.mrb[217].mxu1  ;;  %v14193_v59 = vadd.f32 %v16676_v63, %v21272_v26 }
 0x5a8   : > { %v16722_v33 = vadd.f32 %v16721_v49, %v16720_v55  ;;  %v16723_v46 = vpop.f32.mrb[218].mxu1 }
 0x5a9   : > { %v16724_v35 = vpop.f32.mrb[219].mxu1 }
 0x5aa   : > { %v21299_v3 = vadd.f32 %v16722_v33, %v14193_v59 }
 0x5ab   : > { %v16742_v8 = vpop.f32.mrb[220].mxu0 }
 0x5ac   : > { %v16743_v54 = vpop.f32.mrb[221].mxu0 }
 0x5ad   : > { %v16744_v58 = vadd.f32 %v16743_v54, %v16742_v8  ;;  %v16745_v62 = vpop.f32.mrb[222].mxu0 }
 0x5ae   : > { %v16788_v22 = vpop.f32.mrb[220].mxu1  ;;  %v16746_v51 = vpop.f32.mrb[223].mxu0 }
 0x5af   : > { %v16789_v48 = vpop.f32.mrb[221].mxu1  ;;  %v14305_v37 = vadd.f32 %v16744_v58, %v21276_v6  ;;  %v16747_v50 = vadd.f32 %v16746_v51, %v16745_v62 }
 0x5b0   : > { %v16790_v61 = vadd.f32 %v16789_v48, %v16788_v22  ;;  %v16791_v2 = vpop.f32.mrb[222].mxu1 }
 0x5b1   : > { %v16792_v16 = vpop.f32.mrb[223].mxu1  ;;  %v14308_v57 = vadd.f32 %v16747_v50, %v21278_v38 }
 0x5b2   : > { %v16793_v19 = vadd.f32 %v16792_v16, %v16791_v2  ;;  %v21303_v14 = vadd.f32 %v16790_v61, %v14305_v37 }
 0x5b3   : > { %v16748_v24 = vpop.f32.mrb[224].mxu0 }
 0x5b4   : > { %v21305_v26 = vadd.f32 %v16793_v19, %v14308_v57  ;;  %v16749_v25 = vpop.f32.mrb[225].mxu0 }
 0x5b5   : > { %v16750_v45 = vadd.f32 %v16749_v25, %v16748_v24  ;;  %v16751_v1 = vpop.f32.mrb[226].mxu0 }
 0x5b6   : > { %v16794_v56 = vpop.f32.mrb[224].mxu1  ;;  %v16752_v20 = vpop.f32.mrb[227].mxu0 }
 0x5b7   : > { %v16795_v9 = vpop.f32.mrb[225].mxu1  ;;  %v14313_v6 = vadd.f32 %v16750_v45, %v21282_v12  ;;  %v16753_v17 = vadd.f32 %v16752_v20, %v16751_v1 }
 0x5b8   : > { %v16796_v30 = vadd.f32 %v16795_v9, %v16794_v56  ;;  %v16797_v31 = vpop.f32.mrb[226].mxu1 }
 0x5b9   : > { %v16798_v47 = vpop.f32.mrb[227].mxu1  ;;  %v14316_v38 = vadd.f32 %v16753_v17, %v21284_v27 }
 0x5ba   : > { %v16799_v4 = vadd.f32 %v16798_v47, %v16797_v31  ;;  %v21309_v39 = vadd.f32 %v16796_v30, %v14313_v6 }
 0x5bb   : > { %v16754_v23 = vpop.f32.mrb[228].mxu0 }
 0x5bc   : > { %v21311_v60 = vadd.f32 %v16799_v4, %v14316_v38  ;;  %v16755_v21 = vpop.f32.mrb[229].mxu0 }
 0x5bd   : > { %v16756_v40 = vadd.f32 %v16755_v21, %v16754_v23  ;;  %v16757_v36 = vpop.f32.mrb[230].mxu0 }
 0x5be   : > { %v16800_v42 = vpop.f32.mrb[228].mxu1  ;;  %v16758_v10 = vpop.f32.mrb[231].mxu0 }
 0x5bf   : > { %v16801_v29 = vpop.f32.mrb[229].mxu1  ;;  %v14321_v12 = vadd.f32 %v16756_v40, %v21288_v41  ;;  %v16759_v34 = vadd.f32 %v16758_v10, %v16757_v36 }
 0x5c0   : > { %v16802_v32 = vadd.f32 %v16801_v29, %v16800_v42  ;;  %v16803_v13 = vpop.f32.mrb[230].mxu1 }
 0x5c1   : > { %v16804_v7 = vpop.f32.mrb[231].mxu1  ;;  %v14324_v27 = vadd.f32 %v16759_v34, %v21290_v5 }
 0x5c2   : > { %v16805_v11 = vadd.f32 %v16804_v7, %v16803_v13  ;;  %v21315_v53 = vadd.f32 %v16802_v32, %v14321_v12 }
 0x5c3   : > { %v16760_v55 = vpop.f32.mrb[232].mxu0 }
 0x5c4   : > { %v21317_v18 = vadd.f32 %v16805_v11, %v14324_v27  ;;  %v16761_v44 = vpop.f32.mrb[233].mxu0 }
 0x5c5   : > { %v16762_v43 = vadd.f32 %v16761_v44, %v16760_v55  ;;  %v16763_v33 = vpop.f32.mrb[234].mxu0 }
 0x5c6   : > { %v16806_v49 = vpop.f32.mrb[232].mxu1  ;;  %v16764_v63 = vpop.f32.mrb[235].mxu0 }
 0x5c7   : > { %v16807_v46 = vpop.f32.mrb[233].mxu1  ;;  %v14329_v0 = vadd.f32 %v16762_v43, %v21294_v15  ;;  %v16765_v41 = vadd.f32 %v16764_v63, %v16763_v33 }
 0x5c8   : > { %v16808_v52 = vadd.f32 %v16807_v46, %v16806_v49  ;;  %v16809_v35 = vpop.f32.mrb[234].mxu1 }
 0x5c9   : > { %v16810_v59 = vpop.f32.mrb[235].mxu1  ;;  %v14332_v5 = vadd.f32 %v16765_v41, %v21296_v28 }
 0x5ca   : > { %v16811_v8 = vadd.f32 %v16810_v59, %v16809_v35  ;;  %v21321_v22 = vadd.f32 %v16808_v52, %v14329_v0 }
 0x5cb   : > { %v16766_v58 = vpop.f32.mrb[236].mxu0 }
 0x5cc   : > { %v21323_v54 = vadd.f32 %v16811_v8, %v14332_v5  ;;  %v16767_v61 = vpop.f32.mrb[237].mxu0 }
 0x5cd   : > { %v16768_v16 = vadd.f32 %v16767_v61, %v16766_v58  ;;  %v16769_v37 = vpop.f32.mrb[238].mxu0 }
 0x5ce   : > { %v16812_v48 = vpop.f32.mrb[236].mxu1  ;;  %v16770_v19 = vpop.f32.mrb[239].mxu0 }
 0x5cf   : > { %v16813_v62 = vpop.f32.mrb[237].mxu1  ;;  %v14337_v15 = vadd.f32 %v16768_v16, %v21299_v3 }
 0x5d0   : > { %v16814_v2 = vadd.f32 %v16813_v62, %v16812_v48  ;;  %v16815_v51 = vpop.f32.mrb[238].mxu1 }
 0x5d1   : > { %v16816_v50 = vpop.f32.mrb[239].mxu1 }
 0x5d2   : > { %v21326_v57 = vadd.f32 %v16814_v2, %v14337_v15 }
 0x5d6   : > { %v16880_v28 = vpop.f32.mrb[240].mxu1 }
 0x5d7   : > { %v16881_v25 = vpop.f32.mrb[241].mxu1 }
 0x5d8   : > { %v16882_v1 = vadd.f32 %v16881_v25, %v16880_v28  ;;  %v16883_v30 = vpop.f32.mrb[242].mxu1 }
 0x5d9   : > { %v16884_v20 = vpop.f32.mrb[243].mxu1 }
 0x5da   : > { %v16885_v17 = vadd.f32 %v16884_v20, %v16883_v30 }
 0x5dc   : > { %v16834_v24 = vpop.f32.mrb[240].mxu0 }
 0x5dd   : > { %v16835_v56 = vpop.f32.mrb[241].mxu0 }
 0x5de   : > { %v16836_v9 = vadd.f32 %v16835_v56, %v16834_v24  ;;  %v16837_v45 = vpop.f32.mrb[242].mxu0  ;;  %v16886_v42 = vpop.f32.mrb[244].mxu1 }
 0x5df   : > { %v16838_v31 = vpop.f32.mrb[243].mxu0  ;;  %v16887_v29 = vpop.f32.mrb[245].mxu1 }
 0x5e0   : > { %v14449_v47 = vadd.f32 %v16836_v9, %v21303_v14  ;;  %v16839_v6 = vadd.f32 %v16838_v31, %v16837_v45  ;;  %v16888_v32 = vadd.f32 %v16887_v29, %v16886_v42  ;;  %v16889_v13 = vpop.f32.mrb[246].mxu1 }
 0x5e1   : > { %v16890_v7 = vpop.f32.mrb[247].mxu1 }
 0x5e2   : > { %v14452_v4 = vadd.f32 %v16839_v6, %v21305_v26  ;;  %v21330_v38 = vadd.f32 %v16882_v1, %v14449_v47  ;;  %v16891_v34 = vadd.f32 %v16890_v7, %v16889_v13 }
 0x5e4   : > { %v21332_v3 = vadd.f32 %v16885_v17, %v14452_v4  ;;  %v16840_v23 = vpop.f32.mrb[244].mxu0 }
 0x5e5   : > { %v16841_v21 = vpop.f32.mrb[245].mxu0 }
 0x5e6   : > { %v16842_v40 = vadd.f32 %v16841_v21, %v16840_v23  ;;  %v16843_v36 = vpop.f32.mrb[246].mxu0 }
 0x5e7   : > { %v16844_v10 = vpop.f32.mrb[247].mxu0 }
 0x5e8   : > { %v14457_v14 = vadd.f32 %v16842_v40, %v21309_v39  ;;  %v16845_v12 = vadd.f32 %v16844_v10, %v16843_v36  ;;  %v16892_v44 = vpop.f32.mrb[248].mxu1 }
 0x5e9   : > { %v16893_v43 = vpop.f32.mrb[249].mxu1 }
 0x5ea   : > { %v14460_v26 = vadd.f32 %v16845_v12, %v21311_v60  ;;  %v21336_v11 = vadd.f32 %v16888_v32, %v14457_v14  ;;  %v16894_v63 = vadd.f32 %v16893_v43, %v16892_v44  ;;  %v16895_v52 = vpop.f32.mrb[250].mxu1 }
 0x5eb   : > { %v16896_v0 = vpop.f32.mrb[251].mxu1 }
 0x5ec   : > { %v21338_v27 = vadd.f32 %v16891_v34, %v14460_v26  ;;  %v16846_v55 = vpop.f32.mrb[248].mxu0  ;;  %v16897_v59 = vadd.f32 %v16896_v0, %v16895_v52 }
 0x5ed   : > { %v16847_v49 = vpop.f32.mrb[249].mxu0 }
 0x5ee   : > { %v16848_v33 = vadd.f32 %v16847_v49, %v16846_v55  ;;  %v16849_v46 = vpop.f32.mrb[250].mxu0 }
 0x5ef   : > { %v16850_v35 = vpop.f32.mrb[251].mxu0 }
 0x5f0   : > { %v14465_v39 = vadd.f32 %v16848_v33, %v21315_v53  ;;  %v16851_v41 = vadd.f32 %v16850_v35, %v16849_v46 }
 0x5f2   : > { %v14468_v60 = vadd.f32 %v16851_v41, %v21317_v18  ;;  %v21342_v8 = vadd.f32 %v16894_v63, %v14465_v39 }
 0x5f4   : > { %v21344_v5 = vadd.f32 %v16897_v59, %v14468_v60  ;;  %v16852_v48 = vpop.f32.mrb[252].mxu0  ;;  %v16898_v58 = vpop.f32.mrb[252].mxu1 }
 0x5f5   : > { %v16853_v62 = vpop.f32.mrb[253].mxu0  ;;  %v16899_v61 = vpop.f32.mrb[253].mxu1 }
 0x5f6   : > { %v16854_v2 = vadd.f32 %v16853_v62, %v16852_v48  ;;  %v16855_v51 = vpop.f32.mrb[254].mxu0  ;;  %v16900_v16 = vadd.f32 %v16899_v61, %v16898_v58  ;;  %v16901_v37 = vpop.f32.mrb[254].mxu1 }
 0x5f7   : > { %v16856_v50 = vpop.f32.mrb[255].mxu0  ;;  %v16902_v19 = vpop.f32.mrb[255].mxu1 }
 0x5f8   : > { %v14473_v53 = vadd.f32 %v16854_v2, %v21321_v22  ;;  %v16857_v15 = vadd.f32 %v16856_v50, %v16855_v51  ;;  %v16903_v24 = vadd.f32 %v16902_v19, %v16901_v37 }
 0x5fa   : > { %v14476_v18 = vadd.f32 %v16857_v15, %v21323_v54  ;;  %v14545_v28 = vadd.f32 %v16900_v16, %v14473_v53 }
 0x5fc   : > { %v14548_v56 = vadd.f32 %v16903_v24, %v14476_v18  ;;  %v16858_v25 = vpop.f32.mrb[0].mxu0  ;;  %v16904_v9 = vpop.f32.mrb[0].mxu1 }
 0x5fd   : > { %v16859_v45 = vpop.f32.mrb[1].mxu0  ;;  %v16905_v1 = vpop.f32.mrb[1].mxu1 }
 0x5fe   : > { %v16860_v30 = vadd.f32 %v16859_v45, %v16858_v25  ;;  %v16861_v31 = vpop.f32.mrb[2].mxu0  ;;  %v16906_v20 = vadd.f32 %v16905_v1, %v16904_v9  ;;  %v16907_v47 = vpop.f32.mrb[2].mxu1 }
 0x5ff   : > { %v16862_v6 = vpop.f32.mrb[3].mxu0  ;;  %v16908_v17 = vpop.f32.mrb[3].mxu1 }
 0x600   : > { %v14481_v4 = vadd.f32 %v16860_v30, %v21326_v57 }
 0x602   : > { %v14553_v23 = vadd.f32 %v16906_v20, %v14481_v4 }
 0x604   : > { %v16926_v22 = vpop.f32.mrb[4].mxu0  ;;  %v16944_v42 = vpop.f32.mrb[4].mxu1 }
 0x605   : > { %v16927_v21 = vpop.f32.mrb[5].mxu0  ;;  %v16945_v29 = vpop.f32.mrb[5].mxu1 }
 0x606   : > { %v16928_v54 = vadd.f32 %v16927_v21, %v16926_v22  ;;  %v16946_v40 = vadd.f32 %v16945_v29, %v16944_v42  ;;  %v16929_v36 = vpop.f32.mrb[6].mxu0  ;;  %v16947_v32 = vpop.f32.mrb[6].mxu1 }
 0x607   : > { %v16930_v13 = vpop.f32.mrb[7].mxu0  ;;  %v16948_v10 = vpop.f32.mrb[7].mxu1 }
 0x608   : > { %v14593_v7 = vadd.f32 %v16928_v54, %v21330_v38  ;;  %v14617_v14 = vadd.f32 %v16946_v40, %v14545_v28  ;;  %v16931_v12 = vadd.f32 %v16930_v13, %v16929_v36  ;;  %v16949_v34 = vadd.f32 %v16948_v10, %v16947_v32 }
 0x60a   : > { %v14596_v26 = vadd.f32 %v16931_v12, %v21332_v3  ;;  %v14620_v55 = vadd.f32 %v16949_v34, %v14548_v56  ;;  %14634 = vst [vmem:[#allocation2] sm:$0xff] (!%p15664_p4), %v14593_v7  ;;  %14640 = vst [vmem:[#allocation2 + $0x30] sm:$0xff] (!%p15664_p4), %v14617_v14 }
 0x60c   : > { %v16932_v57 = vpop.f32.mrb[8].mxu0  ;;  %v16950_v44 = vpop.f32.mrb[8].mxu1  ;;  %14635 = vst [vmem:[#allocation2 + $0x8] sm:$0xff] (!%p15664_p4), %v14596_v26  ;;  %14641 = vst [vmem:[#allocation2 + $0x38] sm:$0xff] (!%p15664_p4), %v14620_v55 }
 0x60d   : > { %v16933_v49 = vpop.f32.mrb[9].mxu0  ;;  %v16951_v43 = vpop.f32.mrb[9].mxu1 }
 0x60e   : > { %v16934_v33 = vadd.f32 %v16933_v49, %v16932_v57  ;;  %v16952_v46 = vadd.f32 %v16951_v43, %v16950_v44  ;;  %v16935_v63 = vpop.f32.mrb[10].mxu0  ;;  %v16953_v52 = vpop.f32.mrb[10].mxu1 }
 0x60f   : > { %v16936_v35 = vpop.f32.mrb[11].mxu0  ;;  %v16954_v0 = vpop.f32.mrb[11].mxu1 }
 0x610   : > { %v14601_v39 = vadd.f32 %v16934_v33, %v21336_v11  ;;  %v14625_v38 = vadd.f32 %v16952_v46, %v14553_v23  ;;  %v16937_v41 = vadd.f32 %v16936_v35, %v16935_v63 }
 0x612   : > { %v14604_v59 = vadd.f32 %v16937_v41, %v21338_v27  ;;  %14636 = vst [vmem:[#allocation2 + $0x10] sm:$0xff] (!%p15664_p4), %v14601_v39  ;;  %14642 = vst [vmem:[#allocation2 + $0x40] sm:$0xff] (!%p15664_p4), %v14625_v38 }
 0x614   : > { %v16938_v60 = vpop.f32.mrb[12].mxu0  ;;  %14633 = sbr.rel (%p15664_p4) target bundleno = 1565 (0x61d), region = 111  ;;  %14637 = vst [vmem:[#allocation2 + $0x18] sm:$0xff] (!%p15664_p4), %v14604_v59 }
 0x615   : > { %v16939_v3 = vpop.f32.mrb[13].mxu0 }
 0x616   : > { %v16940_v48 = vadd.f32 %v16939_v3, %v16938_v60  ;;  %v16941_v58 = vpop.f32.mrb[14].mxu0 }
 0x617   : > { %v16942_v62 = vpop.f32.mrb[15].mxu0 }
 0x618   : > { %v14609_v61 = vadd.f32 %v16940_v48, %v21342_v8  ;;  %v16943_v2 = vadd.f32 %v16942_v62, %v16941_v58 }
 0x61a   : > { %v14612_v51 = vadd.f32 %v16943_v2, %v21344_v5  ;;  %14638 = vst [vmem:[#allocation2 + $0x20] sm:$0xff] (!%p15664_p4), %v14609_v61 }
 0x61c   : > { %14639 = vst [vmem:[#allocation2 + $0x28] sm:$0xff] %v14612_v51 }
 0x61d PF: > { %p15665_p5 = scmp.le.s32.totalorder %s17945_s18, 0 }
 0x61e   : > { %v14647_v11 = vld [vmem:[#allocation2] sm:$0xff] (!%p15665_p5)  ;;  %v14648_v27 = vld [vmem:[#allocation2 + $0x8] sm:$0xff] (!%p15665_p5)  ;;  %v14649_v8 = vld [vmem:[#allocation2 + $0x10] sm:$0xff] (!%p15665_p5) }
 0x61f   : > { %14646 = sbr.rel (%p15665_p5) target bundleno = 1575 (0x627), region = 115  ;;  %v14656_v5 = vadd.f32 (!%p15665_p5), %v14647_v11, %v14593_v7  ;;  %v14657_v16 = vadd.f32 (!%p15665_p5), %v14648_v27, %v14596_v26  ;;  %v14658_v37 = vadd.f32 (!%p15665_p5), %v14649_v8, %v14601_v39  ;;  %v14650_v50 = vld [vmem:[#allocation2 + $0x18] sm:$0xff] (!%p15665_p5)  ;;  %v14653_v28 = vld [vmem:[#allocation2 + $0x30] sm:$0xff] (!%p15665_p5)  ;;  %v14655_v25 = vld [vmem:[#allocation2 + $0x40] sm:$0xff] (!%p15665_p5) }
 0x620   : > { %v14659_v15 = vadd.f32 (!%p15665_p5), %v14650_v50, %v14604_v59  ;;  %v14654_v56 = vld [vmem:[#allocation2 + $0x38] sm:$0xff] (!%p15665_p5)  ;;  %v14662_v9 = vadd.f32 (!%p15665_p5), %v14653_v28, %v14617_v14  ;;  %v14664_v1 = vadd.f32 (!%p15665_p5), %v14655_v25, %v14625_v38 }
 0x621   : > { %14665 = vst [vmem:[#allocation2] sm:$0xff] (!%p15665_p5), %v14656_v5  ;;  %14666 = vst [vmem:[#allocation2 + $0x8] sm:$0xff] (!%p15665_p5), %v14657_v16  ;;  %v14663_v45 = vadd.f32 (!%p15665_p5), %v14654_v56, %v14620_v55 }
 0x622   : > { %14667 = vst [vmem:[#allocation2 + $0x10] sm:$0xff] (!%p15665_p5), %v14658_v37  ;;  %14668 = vst [vmem:[#allocation2 + $0x18] sm:$0xff] (!%p15665_p5), %v14659_v15 }
 0x623   : > { %v14651_v19 = vld [vmem:[#allocation2 + $0x20] sm:$0xff] (!%p15665_p5)  ;;  %v14652_v53 = vld [vmem:[#allocation2 + $0x28] sm:$0xff] (!%p15665_p5)  ;;  %14671 = vst [vmem:[#allocation2 + $0x30] sm:$0xff] (!%p15665_p5), %v14662_v9  ;;  %14672 = vst [vmem:[#allocation2 + $0x38] sm:$0xff] (!%p15665_p5), %v14663_v45 }
 0x624   : > { %v14660_v24 = vadd.f32 (!%p15665_p5), %v14651_v19, %v14609_v61  ;;  %v14661_v18 = vadd.f32 (!%p15665_p5), %v14652_v53, %v14612_v51  ;;  %14673 = vst [vmem:[#allocation2 + $0x40] sm:$0xff] (!%p15665_p5), %v14664_v1 }
 0x626   : > { %14669 = vst [vmem:[#allocation2 + $0x20] sm:$0xff] %v14660_v24  ;;  %14670 = vst [vmem:[#allocation2 + $0x28] sm:$0xff] %v14661_v18 }
 0x627 PF: > { %p15666_p6 = scmp.ne.s32.totalorder %s17945_s18, 2 }
 0x628   : > { %v15667_v20 = vld [vmem:[%s7715_s26] ss:$0 sm:$0xff] (!%p15666_p6) }
 0x629   : > { %14677 = sbr.rel (%p15666_p6) target bundleno = 1589 (0x635), region = 119  ;;  %v14678_v30 = vld [vmem:[#allocation2] sm:$0xff] (!%p15666_p6)  ;;  %v14679_v31 = vld [vmem:[#allocation2 + $0x8] sm:$0xff] (!%p15666_p6) }
 0x62a   : > { %v14694_v47 = vadd.f32 (!%p15666_p6), %v15667_v20, %v14678_v30  ;;  %v14695_v6 = vadd.f32 (!%p15666_p6), %v15667_v20, %v14679_v31  ;;  %v14680_v17 = vld [vmem:[#allocation2 + $0x10] sm:$0xff] (!%p15666_p6)  ;;  %v14681_v4 = vld [vmem:[#allocation2 + $0x18] sm:$0xff] (!%p15666_p6) }
 0x62b   : > { %v14696_v22 = vadd.f32 (!%p15666_p6), %v15667_v20, %v14680_v17  ;;  %v14697_v42 = vadd.f32 (!%p15666_p6), %v15667_v20, %v14681_v4  ;;  %v14684_v54 = vld [vmem:[#allocation2 + $0x30] sm:$0xff] (!%p15666_p6)  ;;  %v14685_v40 = vld [vmem:[#allocation2 + $0x38] sm:$0xff] (!%p15666_p6) }
 0x62c   : > { %v14703_v36 = vmax.f32 (!%p15666_p6), %v14694_v47, 0.0  ;;  %v14704_v32 = vmax.f32 (!%p15666_p6), %v14695_v6, 0.0  ;;  %v14700_v10 = vadd.f32 (!%p15666_p6), %v15667_v20, %v14684_v54  ;;  %v14686_v7 = vld [vmem:[#allocation2 + $0x40] sm:$0xff] (!%p15666_p6)  ;;  %v14701_v26 = vadd.f32 (!%p15666_p6), %v15667_v20, %v14685_v40 }
 0x62d   : > { %v14682_v23 = vld [vmem:[#allocation2 + $0x20] sm:$0xff] (!%p15666_p6)  ;;  %v14683_v21 = vld [vmem:[#allocation2 + $0x28] sm:$0xff] (!%p15666_p6)  ;;  %v14705_v14 = vmax.f32 (!%p15666_p6), %v14696_v22, 0.0  ;;  %v14706_v12 = vmax.f32 (!%p15666_p6), %v14697_v42, 0.0  ;;  %v14702_v49 = vadd.f32 (!%p15666_p6), %v15667_v20, %v14686_v7 }
 0x62e   : > { %v14698_v29 = vadd.f32 (!%p15666_p6), %v15667_v20, %v14682_v23  ;;  %v14699_v13 = vadd.f32 (!%p15666_p6), %v15667_v20, %v14683_v21  ;;  %v15694_v55 = vpack.c.bf16 (!%p15666_p6), %v14704_v32, %v14703_v36  ;;  %v14709_v44 = vmax.f32 (!%p15666_p6), %v14700_v10, 0.0 }
 0x62f   : > { %v15699_v43 = vpack.c.bf16 (!%p15666_p6), %v14706_v12, %v14705_v14  ;;  %v14710_v33 = vmax.f32 (!%p15666_p6), %v14701_v26, 0.0  ;;  %v14711_v63 = vmax.f32 (!%p15666_p6), %v14702_v49, 0.0 }
 0x630   : > { %v14707_v34 = vmax.f32 %v14698_v29, 0.0  ;;  %v14708_v57 = vmax.f32 %v14699_v13, 0.0  ;;  %15695 = vst [vmem:[%s21356_s4] sm:$0xff] %v15694_v55  }
 0x631   : > { %15711 = vst [vmem:[%s21356_s4 + $0x8] sm:$0xff] %v15699_v43   ;;  %v15709_v52 = vpack.c.bf16 %v14710_v33, %v14709_v44  ;;  %v15690_v35 = vpack.c.bf16 %v14711_v63, %v14711_v63 }
 0x632   : > { %v15704_v46 = vpack.c.bf16 %v14708_v57, %v14707_v34 }
 0x633   : > { %15713 = vst [vmem:[%s21356_s4 + $0x18] sm:$0xff] %v15709_v52   ;;  %14757 = vst [vmem:[%s21356_s4 + $0x20] sm:$0xf] %v15690_v35 }
 0x634   : > { %15712 = vst [vmem:[%s21356_s4 + $0x10] sm:$0xff] %v15704_v46  }
 0x635 PF: > { %14764 = sbr.rel (!%p18077_p12) target bundleno = 1600 (0x640), region = 123  ;;  %s15677_s18 = sshll.u32 (%p18077_p12), %s17949_s19, 2 }
 0x636   : > { %s14769_s0 = scalar_lea.vmem (%p18077_p12), %s21422_s3, %s15677_s18 }
 0x638   : > { %v14789_v38 = vld [vmem:[%s21356_s4 + $0x8] sm:$0xf] (%p18077_p12)  ;;  %v14791_v41 = vld [vmem:[%s21356_s4 + $0xc] sm:$0xf] (%p18077_p12) }
 0x639   : > { %14790 = vst [vmem:[%s14769_s0 + $0x10] sm:$0xf] (%p18077_p12), %v14789_v38  ;;  %14792 = vst [vmem:[%s14769_s0 + $0x18] sm:$0xf] (%p18077_p12), %v14791_v41 }
 0x63a   : > { %v14797_v3 = vld [vmem:[%s21356_s4 + $0x18] sm:$0xf] (%p18077_p12)  ;;  %v14799_v48 = vld [vmem:[%s21356_s4 + $0x1c] sm:$0xf] (%p18077_p12)  ;;  %v14801_v58 = vld [vmem:[%s21356_s4 + $0x20] sm:$0xf] (%p18077_p12) }
 0x63b   : > { %v14793_v59 = vld [vmem:[%s21356_s4 + $0x10] sm:$0xf] (%p18077_p12)  ;;  %v14795_v60 = vld [vmem:[%s21356_s4 + $0x14] sm:$0xf] (%p18077_p12)  ;;  %14798 = vst [vmem:[%s14769_s0 + $0x30] sm:$0xf] (%p18077_p12), %v14797_v3 }
 0x63c   : > { %v14785_v0 = vld [vmem:[%s21356_s4] sm:$0xf]  ;;  %v14787_v39 = vld [vmem:[%s21356_s4 + $0x4] sm:$0xf]  ;;  %14794 = vst [vmem:[%s14769_s0 + $0x20] sm:$0xf] %v14793_v59 }
 0x63d   : > { %14786 = vst [vmem:[%s14769_s0] sm:$0xf] %v14785_v0  ;;  %14788 = vst [vmem:[%s14769_s0 + $0x8] sm:$0xf] %v14787_v39 }
 0x63e   : > { %14796 = vst [vmem:[%s14769_s0 + $0x28] sm:$0xf] %v14795_v60  ;;  %14800 = vst [vmem:[%s14769_s0 + $0x38] sm:$0xf] %v14799_v48 }
 0x63f   : > { %14802 = vst [vmem:[%s14769_s0 + $0x40] sm:$0xf] %v14801_v58 }
 0x640 PF: > { %s13_s22 = sadd.s32 1, %s17961_s22   ;;  %s21428_s12 = smov %s17925_s13 }
 0x641   : > { %p10_p7 = scmp.ge.s32.totalorder %s13_s22, 8   ;;  %s21429_s13 = smov %s18075_s9 }
 0x642   : > { %s21430_s14 = smov %s17933_s15  ;;  %s21431_s15 = smov %s18072_s8 }
 0x643   : > { %s21432_s16 = smov %s17941_s17  ;;  %s21433_s17 = smov %s18058_s30 }
 0x644   : > { %s21434_s18 = smov %s17953_s20  ;;  %s21435_s19 = smov %s17957_s21 }
 0x645   : > { %s21436_s20 = smov %s21439_s24  ;;  %s21437_s21 = smov %s21443_s25 }
 0x646   :  { %12 = sbr.rel (!%p10_p7) target bundleno = 8 (0x8), region = 210 }

// kernel: cnn_r_backbone.5
= control target key start
LH: loop header
LB: loop body
LE: loop exit
PB: predicated region body
PF: predicated region fallthrough
CT: control target
= control target key end

     0   :  { %s6614_s21 = smov 0   ;;  %s6616_s22 = smov 0   ;;  %s7423_s0 = inlined_call_operand.vmem [shape: bf16[8,9216], index: 0, kind: input, shape index: {}]   ;;  %s7424_s1 = inlined_call_operand.vmem [shape: bf16[9216,160], index: 1, kind: input, shape index: {}]   ;;  %s7425_s2 = inlined_call_operand.vmem [shape: f32[1,160], index: 2, kind: input, shape index: {}]   ;;  %s7426_s3 = inlined_call_operand.vmem [shape: f32[160,10], index: 3, kind: input, shape index: {}]   ;;  %s7427_s4 = inlined_call_operand.vmem [shape: f32[1,10], index: 4, kind: input, shape index: {}]   ;;  %s7428_s5 = inlined_call_operand.vmem [shape: f32[8,160], index: 5, kind: output, shape index: {0}]   ;;  %s7429_s6 = inlined_call_operand.vmem [shape: f32[8,10], index: 6, kind: output, shape index: {1}]  }
   0x1   :  { %s6618_s23 = smov 0  }
   0x2 LB: > { %s26_s24 = sadd.s32 1, %s6572_s22  ;;  %p4907_p0 = scmp.ge.s32.totalorder %s6576_s23, 1  ;;  %s6576_s23 = sphi %s6618_s23, %s17_s23   ;;  %s6572_s22 = sphi %s6616_s22, %s7431_s22   ;;  %s6568_s21 = sphi %s6614_s21, %s7430_s21  }
   0x3   : > { %p27_p1 = scmp.ge.s32.totalorder %s26_s24, 2  ;;  %p246_p2 = scmp.lt.s32.totalorder %s6576_s23, 3 }
   0x5   : > { %s7433_s24 = smov (%p27_p1, %s26_s24), 0  ;;  %p247_p3 = pnand %p4907_p0, %p246_p2 }
   0x6   : > { %s300_s25 = smul.u32 (!%p247_p3), 576, %s6568_s21  ;;  %p5523_p6 = scmp.ne.s32.totalorder (!%p247_p3), %s6568_s21, 0 }
   0x7   : > { %250 = sbr.rel (%p247_p3) target bundleno = 1079 (0x437), region = 40 }
   0x8   : > { %p301_p4 = scmp.lt.s32.totalorder (!%p247_p3), %s300_s25, 1151  ;;  %s290_s30 = smul.u32 (!%p247_p3), 36, %s6568_s21 }
   0xa   : > { %p293_p5 = scmp.lt.s32.totalorder (!%p247_p3), %s290_s30, 71 }
   0xe   : > { %s7435_s25 = smov (!%p301_p4, %s300_s25), 1151  ;;  %s7437_s30 = smov (!%p293_p5, %s290_s30), 71 }
   0xf   : > { %s5532_s26 = sshll.u32 %s7435_s25, 3  ;;  %s4908_s7 = sshll.u32 %s7437_s30, 2  ;;  %vm4659_vm0 = vcmask (!%p5523_p6), 261120  }
  0x10   : > { %s6638_s29 = scalar_lea.vmem %s7424_s1, %s5532_s26  ;;  %s6688_s10 = scalar_lea.vmem %s7423_s0, %s4908_s7 }
  0x11   : > { %v5654_v0 = vld [vmem:[%s6638_s29 + $0x4] ss:$8 sps:$4 sm:$0xff]   ;;  %v5658_v2 = vld [vmem:[%s6638_s29] ss:$8 sps:$4 sm:$0xff]   ;;  %v5660_v4 = vld [vmem:[%s6638_s29 + $0x14] ss:$8 sps:$4 sm:$0xff]  }
  0x12   : > { %v5656_v1 = vld [vmem:[%s6638_s29 + $0x904] ss:$8 sps:$4 sm:$0xff]   ;;  %3916 = vmatprep.subr.bf16.mxu1 %v5654_v0  ;;  %v5659_v3 = vld [vmem:[%s6638_s29 + $0x900] ss:$8 sps:$4 sm:$0xff]   ;;  %v5662_v5 = vld [vmem:[%s6638_s29 + $0x914] ss:$8 sps:$4 sm:$0xff]  }
  0x13   : > { %4285 = vmatprep.subr.bf16.mxu0 %v5656_v1  ;;  %3917 = vmatpush1.bf16.msra.mxu1 %v5658_v2  ;;  %v5664_v6 = vld [vmem:[%s6638_s29 + $0x10] ss:$8 sps:$4 sm:$0xff]   ;;  %v5666_v8 = vld [vmem:[%s6638_s29 + $0x24] ss:$8 sps:$4 sm:$0xff]   ;;  %v5670_v10 = vld [vmem:[%s6638_s29 + $0x20] ss:$8 sps:$4 sm:$0xff]  }
  0x14   : > { %4286 = vmatpush1.bf16.msra.mxu0 %v5659_v3  ;;  %3918 = vmatprep.subr.bf16.mxu1 %v5660_v4  ;;  %v5665_v7 = vld [vmem:[%s6638_s29 + $0x910] ss:$8 sps:$4 sm:$0xff]   ;;  %v5668_v9 = vld [vmem:[%s6638_s29 + $0x924] ss:$8 sps:$4 sm:$0xff]   ;;  %v5671_v11 = vld [vmem:[%s6638_s29 + $0x920] ss:$8 sps:$4 sm:$0xff]  }
  0x15   : > { %4287 = vmatprep.subr.bf16.mxu0 %v5662_v5  ;;  %v5672_v12 = vld [vmem:[%s6638_s29 + $0x34] ss:$8 sps:$4 sm:$0xff]   ;;  %v5676_v14 = vld [vmem:[%s6638_s29 + $0x30] ss:$8 sps:$4 sm:$0xff]   ;;  %v5678_v16 = vld [vmem:[%s6638_s29 + $0x44] ss:$8 sps:$4 sm:$0xff]  }
  0x16   : > { %v5674_v13 = vld [vmem:[%s6638_s29 + $0x934] ss:$8 sps:$4 sm:$0xff]   ;;  %v5677_v15 = vld [vmem:[%s6638_s29 + $0x930] ss:$8 sps:$4 sm:$0xff]   ;;  %v5680_v17 = vld [vmem:[%s6638_s29 + $0x944] ss:$8 sps:$4 sm:$0xff]  }
  0x17   : > { %3919 = vmatpush1.bf16.msra.mxu1 %v5664_v6  ;;  %v5682_v18 = vld [vmem:[%s6638_s29 + $0x40] ss:$8 sps:$4 sm:$0xff]   ;;  %v5684_v20 = vld [vmem:[%s6638_s29 + $0x54] ss:$8 sps:$4 sm:$0xff]   ;;  %v5688_v22 = vld [vmem:[%s6638_s29 + $0x50] ss:$8 sps:$4 sm:$0xff]  }
  0x18   : > { %4288 = vmatpush1.bf16.msra.mxu0 %v5665_v7  ;;  %3920 = vmatprep.subr.bf16.mxu1 %v5666_v8  ;;  %v5683_v19 = vld [vmem:[%s6638_s29 + $0x940] ss:$8 sps:$4 sm:$0xff]   ;;  %v5686_v21 = vld [vmem:[%s6638_s29 + $0x954] ss:$8 sps:$4 sm:$0xff]   ;;  %v5689_v23 = vld [vmem:[%s6638_s29 + $0x950] ss:$8 sps:$4 sm:$0xff]  }
  0x19   : > { %4289 = vmatprep.subr.bf16.mxu0 %v5668_v9  ;;  %v5690_v24 = vld [vmem:[%s6638_s29 + $0x64] ss:$8 sps:$4 sm:$0xff]   ;;  %v5694_v26 = vld [vmem:[%s6638_s29 + $0x60] ss:$8 sps:$4 sm:$0xff]   ;;  %v5696_v28 = vld [vmem:[%s6638_s29 + $0x74] ss:$8 sps:$4 sm:$0xff]  }
  0x1a   : > { %v5692_v25 = vld [vmem:[%s6638_s29 + $0x964] ss:$8 sps:$4 sm:$0xff]   ;;  %v5695_v27 = vld [vmem:[%s6638_s29 + $0x960] ss:$8 sps:$4 sm:$0xff]   ;;  %v5698_v29 = vld [vmem:[%s6638_s29 + $0x974] ss:$8 sps:$4 sm:$0xff]  }
  0x1b   : > { %3921 = vmatpush1.bf16.msra.mxu1 %v5670_v10  ;;  %v5700_v30 = vld [vmem:[%s6638_s29 + $0x70] ss:$8 sps:$4 sm:$0xff]   ;;  %v5702_v32 = vld [vmem:[%s6638_s29 + $0x84] ss:$8 sps:$4 sm:$0xff]   ;;  %v5706_v34 = vld [vmem:[%s6638_s29 + $0x80] ss:$8 sps:$4 sm:$0xff]  }
  0x1c   : > { %4290 = vmatpush1.bf16.msra.mxu0 %v5671_v11  ;;  %3922 = vmatprep.subr.bf16.mxu1 %v5672_v12  ;;  %v5701_v31 = vld [vmem:[%s6638_s29 + $0x970] ss:$8 sps:$4 sm:$0xff]   ;;  %v5704_v33 = vld [vmem:[%s6638_s29 + $0x984] ss:$8 sps:$4 sm:$0xff]   ;;  %v5707_v35 = vld [vmem:[%s6638_s29 + $0x980] ss:$8 sps:$4 sm:$0xff]  }
  0x1d   : > { %4291 = vmatprep.subr.bf16.mxu0 %v5674_v13  ;;  %v5708_v36 = vld [vmem:[%s6638_s29 + $0x94] ss:$8 sps:$4 sm:$0xff]   ;;  %v5712_v38 = vld [vmem:[%s6638_s29 + $0x90] ss:$8 sps:$4 sm:$0xff]   ;;  %v5714_v40 = vld [vmem:[%s6638_s29 + $0xa4] ss:$8 sps:$4 sm:$0xff]  }
  0x1e   : > { %v5710_v37 = vld [vmem:[%s6638_s29 + $0x994] ss:$8 sps:$4 sm:$0xff]   ;;  %v5713_v39 = vld [vmem:[%s6638_s29 + $0x990] ss:$8 sps:$4 sm:$0xff]   ;;  %v5716_v41 = vld [vmem:[%s6638_s29 + $0x9a4] ss:$8 sps:$4 sm:$0xff]  }
  0x1f   : > { %3923 = vmatpush1.bf16.msra.mxu1 %v5676_v14  ;;  %v5718_v42 = vld [vmem:[%s6638_s29 + $0xa0] ss:$8 sps:$4 sm:$0xff]   ;;  %v5720_v44 = vld [vmem:[%s6638_s29 + $0xb4] ss:$8 sps:$4 sm:$0xff]   ;;  %v5724_v47 = vld [vmem:[%s6638_s29 + $0xb0] ss:$8 sps:$4 sm:$0xff]  }
  0x20   : > { %4292 = vmatpush1.bf16.msra.mxu0 %v5677_v15  ;;  %3924 = vmatprep.subr.bf16.mxu1 %v5678_v16  ;;  %v5719_v43 = vld [vmem:[%s6638_s29 + $0x9a0] ss:$8 sps:$4 sm:$0xff]   ;;  %v5722_v45 = vld [vmem:[%s6638_s29 + $0x9b4] ss:$8 sps:$4 sm:$0xff]   ;;  %v5725_v49 = vld [vmem:[%s6638_s29 + $0x9b0] ss:$8 sps:$4 sm:$0xff]  }
  0x21   : > { %4293 = vmatprep.subr.bf16.mxu0 %v5680_v17  ;;  %v316_v46 = vld [vmem:[%s6688_s10] sm:$0xff]  ;;  %v325_v50 = vld [vmem:[%s6688_s10 + $0x48] sm:$0xff]  ;;  %v5732_v56 = vld [vmem:[%s6638_s29 + $0xd4] ss:$8 sps:$4 sm:$0xff]  }
  0x22   : > { %v4912_v48 = vcombine.high %v316_v46, %v316_v46  ;;  %v5726_v51 = vld [vmem:[%s6638_s29 + $0xc4] ss:$8 sps:$4 sm:$0xff]   ;;  %v4930_v53 = vcombine.high %v325_v50, %v325_v50  ;;  %v5730_v54 = vld [vmem:[%s6638_s29 + $0xc0] ss:$8 sps:$4 sm:$0xff]   ;;  %v5734_v57 = vld [vmem:[%s6638_s29 + $0x9d4] ss:$8 sps:$4 sm:$0xff]   ;;  %v4911_v6 = vcombine.low %v316_v46, %v316_v46  ;;  %v4929_v7 = vcombine.low %v325_v50, %v325_v50 }
  0x23   : > { %3925 = vmatpush1.bf16.msra.mxu1 %v5682_v18  ;;  %v5728_v52 = vld [vmem:[%s6638_s29 + $0x9c4] ss:$8 sps:$4 sm:$0xff]   ;;  %v5731_v55 = vld [vmem:[%s6638_s29 + $0x9c0] ss:$8 sps:$4 sm:$0xff]   ;;  %v5736_v58 = vld [vmem:[%s6638_s29 + $0xd0] ss:$8 sps:$4 sm:$0xff]  }
  0x24   : > { %4294 = vmatpush1.bf16.msra.mxu0 %v5683_v19  ;;  %3926 = vmatprep.subr.bf16.mxu1 %v5684_v20  ;;  %v5737_v59 = vld [vmem:[%s6638_s29 + $0x9d0] ss:$8 sps:$4 sm:$0xff]   ;;  %v5738_v60 = vld [vmem:[%s6638_s29 + $0xe4] ss:$8 sps:$4 sm:$0xff]   ;;  %v5742_v62 = vld [vmem:[%s6638_s29 + $0xe0] ss:$8 sps:$4 sm:$0xff]  }
  0x25   : > { %4295 = vmatprep.subr.bf16.mxu0 %v5686_v21  ;;  %3948 = vmatprep.mubr.bf16.mxu1 %v4912_v48  ;;  %v5740_v61 = vld [vmem:[%s6638_s29 + $0x9e4] ss:$8 sps:$4 sm:$0xff]   ;;  %v5743_v63 = vld [vmem:[%s6638_s29 + $0x9e0] ss:$8 sps:$4 sm:$0xff]   ;;  %v5744_v0 = vld [vmem:[%s6638_s29 + $0xf4] ss:$8 sps:$4 sm:$0xff]  }
  0x26   : > { %4317 = vmatprep.mubr.bf16.mxu0 %v4930_v53  ;;  %v5746_v1 = vld [vmem:[%s6638_s29 + $0x9f4] ss:$8 sps:$4 sm:$0xff]   ;;  %v5748_v2 = vld [vmem:[%s6638_s29 + $0xf0] ss:$8 sps:$4 sm:$0xff]   ;;  %v5754_v4 = vld [vmem:[%s6638_s29 + $0x104] ss:$8 sps:$4 sm:$0xff]  }
  0x27   : > { %3927 = vmatpush1.bf16.msra.mxu1 %v5688_v22  ;;  %v5749_v3 = vld [vmem:[%s6638_s29 + $0x9f0] ss:$8 sps:$4 sm:$0xff]   ;;  %v5759_v5 = vld [vmem:[%s6638_s29 + $0xa04] ss:$8 sps:$4 sm:$0xff]   ;;  %v5752_v8 = vld [vmem:[%s6638_s29 + $0x100] ss:$8 sps:$4 sm:$0xff]  }
  0x28   : > { %4296 = vmatpush1.bf16.msra.mxu0 %v5689_v23  ;;  %3928 = vmatprep.subr.bf16.mxu1 %v5690_v24  ;;  %v5757_v9 = vld [vmem:[%s6638_s29 + $0xa00] ss:$8 sps:$4 sm:$0xff]   ;;  %v5762_v10 = vld [vmem:[%s6638_s29 + $0x114] ss:$8 sps:$4 sm:$0xff]   ;;  %v5760_v12 = vld [vmem:[%s6638_s29 + $0x110] ss:$8 sps:$4 sm:$0xff]  }
  0x29   : > { %4297 = vmatprep.subr.bf16.mxu0 %v5692_v25  ;;  %v5765_v11 = vld [vmem:[%s6638_s29 + $0xa14] ss:$8 sps:$4 sm:$0xff]   ;;  %v5763_v13 = vld [vmem:[%s6638_s29 + $0xa10] ss:$8 sps:$4 sm:$0xff]   ;;  %v5768_v14 = vld [vmem:[%s6638_s29 + $0x124] ss:$8 sps:$4 sm:$0xff]  }
  0x2a   : > { %v5771_v15 = vld [vmem:[%s6638_s29 + $0xa24] ss:$8 sps:$4 sm:$0xff]   ;;  %v5766_v16 = vld [vmem:[%s6638_s29 + $0x120] ss:$8 sps:$4 sm:$0xff]   ;;  %v5774_v18 = vld [vmem:[%s6638_s29 + $0x134] ss:$8 sps:$4 sm:$0xff]  }
  0x2b   : > { %3929 = vmatpush1.bf16.msra.mxu1 %v5694_v26  ;;  %v5769_v17 = vld [vmem:[%s6638_s29 + $0xa20] ss:$8 sps:$4 sm:$0xff]   ;;  %v5777_v19 = vld [vmem:[%s6638_s29 + $0xa34] ss:$8 sps:$4 sm:$0xff]   ;;  %v5772_v20 = vld [vmem:[%s6638_s29 + $0x130] ss:$8 sps:$4 sm:$0xff]  }
  0x2c   : > { %4298 = vmatpush1.bf16.msra.mxu0 %v5695_v27  ;;  %3930 = vmatprep.subr.bf16.mxu1 %v5696_v28  ;;  %v5775_v21 = vld [vmem:[%s6638_s29 + $0xa30] ss:$8 sps:$4 sm:$0xff]   ;;  %v5780_v22 = vld [vmem:[%s6638_s29 + $0x144] ss:$8 sps:$4 sm:$0xff]   ;;  %v5778_v24 = vld [vmem:[%s6638_s29 + $0x140] ss:$8 sps:$4 sm:$0xff]  }
  0x2d   : > { %4299 = vmatprep.subr.bf16.mxu0 %v5698_v29  ;;  %v5783_v23 = vld [vmem:[%s6638_s29 + $0xa44] ss:$8 sps:$4 sm:$0xff]   ;;  %v5781_v25 = vld [vmem:[%s6638_s29 + $0xa40] ss:$8 sps:$4 sm:$0xff]   ;;  %v5786_v26 = vld [vmem:[%s6638_s29 + $0x154] ss:$8 sps:$4 sm:$0xff]  }
  0x2e   : > { %v5789_v27 = vld [vmem:[%s6638_s29 + $0xa54] ss:$8 sps:$4 sm:$0xff]   ;;  %v5784_v28 = vld [vmem:[%s6638_s29 + $0x150] ss:$8 sps:$4 sm:$0xff]   ;;  %v5816_v50 = vld [vmem:[%s6638_s29 + $0x1a4] ss:$8 sps:$4 sm:$0xff]  }
  0x2f   : > { %3931 = vmatpush1.bf16.msra.mxu1 %v5700_v30  ;;  %v5787_v29 = vld [vmem:[%s6638_s29 + $0xa50] ss:$8 sps:$4 sm:$0xff]   ;;  %v5792_v30 = vld [vmem:[%s6638_s29 + $0x164] ss:$8 sps:$4 sm:$0xff]   ;;  %v5810_v46 = vld [vmem:[%s6638_s29 + $0x194] ss:$8 sps:$4 sm:$0xff]  }
  0x30   : > { %4300 = vmatpush1.bf16.msra.mxu0 %v5701_v31  ;;  %3932 = vmatprep.subr.bf16.mxu1 %v5702_v32  ;;  %v5795_v31 = vld [vmem:[%s6638_s29 + $0xa64] ss:$8 sps:$4 sm:$0xff]   ;;  %v5808_v48 = vld [vmem:[%s6638_s29 + $0x190] ss:$8 sps:$4 sm:$0xff]   ;;  %v5817_v53 = vld [vmem:[%s6638_s29 + $0xaa0] ss:$8 sps:$4 sm:$0xff]  }
  0x31   : > { %4301 = vmatprep.subr.bf16.mxu0 %v5704_v33  ;;  %v6739_v32 = vld [vmem:[%s6688_s10 + $0x8] sm:$0xff] }
  0x32   : > { %v5790_v33 = vld [vmem:[%s6638_s29 + $0x160] ss:$8 sps:$4 sm:$0xff]  }
  0x33   : > { %3933 = vmatpush1.bf16.msra.mxu1 %v5706_v34  ;;  %v5793_v34 = vld [vmem:[%s6638_s29 + $0xa60] ss:$8 sps:$4 sm:$0xff]  }
  0x34   : > { %4302 = vmatpush1.bf16.msra.mxu0 %v5707_v35  ;;  %3934 = vmatprep.subr.bf16.mxu1 %v5708_v36  ;;  %v4914_v35 = vcombine.high %v6739_v32, %v6739_v32  ;;  %v6746_v36 = vld [vmem:[%s6688_s10 + $0x50] sm:$0xff] }
  0x35   : > { %4303 = vmatprep.subr.bf16.mxu0 %v5710_v37  ;;  %v5798_v37 = vld [vmem:[%s6638_s29 + $0x174] ss:$8 sps:$4 sm:$0xff]  }
  0x37   : > { %3935 = vmatpush1.bf16.msra.mxu1 %v5712_v38  ;;  %v4932_v38 = vcombine.high %v6746_v36, %v6746_v36 }
  0x38   : > { %4304 = vmatpush1.bf16.msra.mxu0 %v5713_v39  ;;  %3936 = vmatprep.subr.bf16.mxu1 %v5714_v40  ;;  %v5801_v39 = vld [vmem:[%s6638_s29 + $0xa74] ss:$8 sps:$4 sm:$0xff]   ;;  %v5796_v40 = vld [vmem:[%s6638_s29 + $0x170] ss:$8 sps:$4 sm:$0xff]  }
  0x39   : > { %4305 = vmatprep.subr.bf16.mxu0 %v5716_v41  ;;  %v5799_v41 = vld [vmem:[%s6638_s29 + $0xa70] ss:$8 sps:$4 sm:$0xff]  }
  0x3b   : > { %3937 = vmatpush1.bf16.msra.mxu1 %v5718_v42  ;;  %v5804_v42 = vld [vmem:[%s6638_s29 + $0x184] ss:$8 sps:$4 sm:$0xff]  }
  0x3c   : > { %4306 = vmatpush1.bf16.msra.mxu0 %v5719_v43  ;;  %3938 = vmatprep.subr.bf16.mxu1 %v5720_v44  ;;  %v5807_v43 = vld [vmem:[%s6638_s29 + $0xa84] ss:$8 sps:$4 sm:$0xff]   ;;  %v5802_v44 = vld [vmem:[%s6638_s29 + $0x180] ss:$8 sps:$4 sm:$0xff]  }
  0x3d   : > { %4307 = vmatprep.subr.bf16.mxu0 %v5722_v45  ;;  %v5805_v45 = vld [vmem:[%s6638_s29 + $0xa80] ss:$8 sps:$4 sm:$0xff]  }
  0x3f   : > { %3939 = vmatpush1.bf16.msra.mxu1 %v5724_v47  ;;  %v5813_v47 = vld [vmem:[%s6638_s29 + $0xa94] ss:$8 sps:$4 sm:$0xff]  }
  0x40   : > { %4308 = vmatpush1.bf16.msra.mxu0 %v5725_v49  ;;  %3940 = vmatprep.subr.bf16.mxu1 %v5726_v51  ;;  %v5811_v49 = vld [vmem:[%s6638_s29 + $0xa90] ss:$8 sps:$4 sm:$0xff]   ;;  %v5819_v51 = vld [vmem:[%s6638_s29 + $0xaa4] ss:$8 sps:$4 sm:$0xff]  }
  0x41   : > { %4309 = vmatprep.subr.bf16.mxu0 %v5728_v52  ;;  %v5814_v52 = vld [vmem:[%s6638_s29 + $0x1a0] ss:$8 sps:$4 sm:$0xff]  }
  0x43   : > { %3941 = vmatpush1.bf16.msra.mxu1 %v5730_v54  ;;  %v5822_v54 = vld [vmem:[%s6638_s29 + $0x1b4] ss:$8 sps:$4 sm:$0xff]  }
  0x44   : > { %4310 = vmatpush1.bf16.msra.mxu0 %v5731_v55  ;;  %3942 = vmatprep.subr.bf16.mxu1 %v5732_v56  ;;  %v5825_v55 = vld [vmem:[%s6638_s29 + $0xab4] ss:$8 sps:$4 sm:$0xff]   ;;  %v5820_v56 = vld [vmem:[%s6638_s29 + $0x1b0] ss:$8 sps:$4 sm:$0xff]  }
  0x45   : > { %4311 = vmatprep.subr.bf16.mxu0 %v5734_v57  ;;  %v5823_v57 = vld [vmem:[%s6638_s29 + $0xab0] ss:$8 sps:$4 sm:$0xff]  }
  0x47   : > { %3943 = vmatpush1.bf16.msra.mxu1 %v5736_v58  ;;  %v5828_v58 = vld [vmem:[%s6638_s29 + $0x1c4] ss:$8 sps:$4 sm:$0xff]  }
  0x48   : > { %4312 = vmatpush1.bf16.msra.mxu0 %v5737_v59  ;;  %3944 = vmatprep.subr.bf16.mxu1 %v5738_v60  ;;  %v5831_v59 = vld [vmem:[%s6638_s29 + $0xac4] ss:$8 sps:$4 sm:$0xff]   ;;  %v5826_v60 = vld [vmem:[%s6638_s29 + $0x1c0] ss:$8 sps:$4 sm:$0xff]  }
  0x49   : > { %4313 = vmatprep.subr.bf16.mxu0 %v5740_v61  ;;  %v5829_v61 = vld [vmem:[%s6638_s29 + $0xac0] ss:$8 sps:$4 sm:$0xff]  }
  0x4b   : > { %3945 = vmatpush1.bf16.msra.mxu1 %v5742_v62  ;;  %v5834_v62 = vld [vmem:[%s6638_s29 + $0x1d4] ss:$8 sps:$4 sm:$0xff]  }
  0x4c   : > { %4314 = vmatpush1.bf16.msra.mxu0 %v5743_v63  ;;  %3946 = vmatprep.subr.bf16.mxu1 %v5744_v0  ;;  %v5837_v63 = vld [vmem:[%s6638_s29 + $0xad4] ss:$8 sps:$4 sm:$0xff]   ;;  %v5832_v0 = vld [vmem:[%s6638_s29 + $0x1d0] ss:$8 sps:$4 sm:$0xff]  }
  0x4d   : > { %4315 = vmatprep.subr.bf16.mxu0 %v5746_v1  ;;  %v5835_v1 = vld [vmem:[%s6638_s29 + $0xad0] ss:$8 sps:$4 sm:$0xff]  }
  0x4f   : > { %3947 = vmatpush1.bf16.msra.mxu1 %v5748_v2  ;;  %v5840_v2 = vld [vmem:[%s6638_s29 + $0x1e4] ss:$8 sps:$4 sm:$0xff]  }
  0x50   : > { %4316 = vmatpush1.bf16.msra.mxu0 %v5749_v3  ;;  %3957 = vmatprep.subr.bf16.mxu1 %v5754_v4  ;;  %v5843_v3 = vld [vmem:[%s6638_s29 + $0xae4] ss:$8 sps:$4 sm:$0xff]   ;;  %v5838_v4 = vld [vmem:[%s6638_s29 + $0x1e0] ss:$8 sps:$4 sm:$0xff]  }
  0x51   : > { %4326 = vmatprep.subr.bf16.mxu0 %v5759_v5  ;;  %v5841_v5 = vld [vmem:[%s6638_s29 + $0xae0] ss:$8 sps:$4 sm:$0xff]  }
  0x52   : > { %3949 = vmatmul.mubr.bf16.vlgmr.msra.gmra.mrb[0].mxu1 %v4911_v6  ;;  %v5846_v6 = vld [vmem:[%s6638_s29 + $0x1f4] ss:$8 sps:$4 sm:$0xff]  }
  0x53   : > { %4318 = vmatmul.mubr.bf16.vlgmr.msra.gmra.mrb[0].mxu0 %v4929_v7  ;;  %3958 = vmatpush1.bf16.msra.mxu1 %v5752_v8  ;;  %v5849_v7 = vld [vmem:[%s6638_s29 + $0xaf4] ss:$8 sps:$4 sm:$0xff]   ;;  %v5844_v8 = vld [vmem:[%s6638_s29 + $0x1f0] ss:$8 sps:$4 sm:$0xff]  }
  0x54   : > { %4327 = vmatpush1.bf16.msra.mxu0 %v5757_v9  ;;  %3959 = vmatprep.subr.bf16.mxu1 %v5762_v10  ;;  %v5847_v9 = vld [vmem:[%s6638_s29 + $0xaf0] ss:$8 sps:$4 sm:$0xff]   ;;  %v5854_v10 = vld [vmem:[%s6638_s29 + $0x204] ss:$8 sps:$4 sm:$0xff]  }
  0x55   : > { %4328 = vmatprep.subr.bf16.mxu0 %v5765_v11  ;;  %3989 = vmatprep.mubr.bf16.mxu1 %v4914_v35  ;;  %v5859_v11 = vld [vmem:[%s6638_s29 + $0xb04] ss:$8 sps:$4 sm:$0xff]   ;;  %v5881_v35 = vld [vmem:[%s6638_s29 + $0xb40] ss:$8 sps:$4 sm:$0xff]  }
  0x56   : > { %4358 = vmatprep.mubr.bf16.mxu0 %v4932_v38  ;;  %v5884_v38 = vld [vmem:[%s6638_s29 + $0x250] ss:$8 sps:$4 sm:$0xff]  }
  0x57   : > { %3960 = vmatpush1.bf16.msra.mxu1 %v5760_v12  ;;  %v4913_v12 = vcombine.low %v6739_v32, %v6739_v32  ;;  %v5880_v32 = vld [vmem:[%s6638_s29 + $0x244] ss:$8 sps:$4 sm:$0xff]  }
  0x58   : > { %4329 = vmatpush1.bf16.msra.mxu0 %v5763_v13  ;;  %3961 = vmatprep.subr.bf16.mxu1 %v5768_v14  ;;  %v5852_v13 = vld [vmem:[%s6638_s29 + $0x200] ss:$8 sps:$4 sm:$0xff]   ;;  %v4931_v14 = vcombine.low %v6746_v36, %v6746_v36  ;;  %v5886_v36 = vld [vmem:[%s6638_s29 + $0x254] ss:$8 sps:$4 sm:$0xff]  }
  0x59   : > { %4330 = vmatprep.subr.bf16.mxu0 %v5771_v15  ;;  %v5857_v15 = vld [vmem:[%s6638_s29 + $0xb00] ss:$8 sps:$4 sm:$0xff]  }
  0x5b   : > { %3962 = vmatpush1.bf16.msra.mxu1 %v5766_v16  ;;  %v5862_v16 = vld [vmem:[%s6638_s29 + $0x214] ss:$8 sps:$4 sm:$0xff]  }
  0x5c   : > { %4331 = vmatpush1.bf16.msra.mxu0 %v5769_v17  ;;  %3963 = vmatprep.subr.bf16.mxu1 %v5774_v18  ;;  %v5865_v17 = vld [vmem:[%s6638_s29 + $0xb14] ss:$8 sps:$4 sm:$0xff]  }
  0x5d   : > { %4332 = vmatprep.subr.bf16.mxu0 %v5777_v19  ;;  %v6797_v18 = vld [vmem:[%s6688_s10 + $0x10] sm:$0xff] }
  0x5e   : > { %v4916_v19 = vcombine.high %v6797_v18, %v6797_v18 }
  0x5f   : > { %3964 = vmatpush1.bf16.msra.mxu1 %v5772_v20  ;;  %v6802_v20 = vld [vmem:[%s6688_s10 + $0x58] sm:$0xff] }
  0x60   : > { %4333 = vmatpush1.bf16.msra.mxu0 %v5775_v21  ;;  %3965 = vmatprep.subr.bf16.mxu1 %v5780_v22  ;;  %v5860_v21 = vld [vmem:[%s6638_s29 + $0x210] ss:$8 sps:$4 sm:$0xff]  }
  0x61   : > { %4334 = vmatprep.subr.bf16.mxu0 %v5783_v23  ;;  %v5863_v22 = vld [vmem:[%s6638_s29 + $0xb10] ss:$8 sps:$4 sm:$0xff]   ;;  %v4934_v23 = vcombine.high %v6802_v20, %v6802_v20 }
  0x63   : > { %3966 = vmatpush1.bf16.msra.mxu1 %v5778_v24  ;;  %v5868_v24 = vld [vmem:[%s6638_s29 + $0x224] ss:$8 sps:$4 sm:$0xff]  }
  0x64   : > { %4335 = vmatpush1.bf16.msra.mxu0 %v5781_v25  ;;  %3967 = vmatprep.subr.bf16.mxu1 %v5786_v26  ;;  %v5871_v25 = vld [vmem:[%s6638_s29 + $0xb24] ss:$8 sps:$4 sm:$0xff]   ;;  %v5866_v26 = vld [vmem:[%s6638_s29 + $0x220] ss:$8 sps:$4 sm:$0xff]  }
  0x65   : > { %4336 = vmatprep.subr.bf16.mxu0 %v5789_v27  ;;  %v5869_v27 = vld [vmem:[%s6638_s29 + $0xb20] ss:$8 sps:$4 sm:$0xff]  }
  0x67   : > { %3968 = vmatpush1.bf16.msra.mxu1 %v5784_v28  ;;  %v5874_v28 = vld [vmem:[%s6638_s29 + $0x234] ss:$8 sps:$4 sm:$0xff]  }
  0x68   : > { %4337 = vmatpush1.bf16.msra.mxu0 %v5787_v29  ;;  %3969 = vmatprep.subr.bf16.mxu1 %v5792_v30  ;;  %v5877_v29 = vld [vmem:[%s6638_s29 + $0xb34] ss:$8 sps:$4 sm:$0xff]   ;;  %v5872_v30 = vld [vmem:[%s6638_s29 + $0x230] ss:$8 sps:$4 sm:$0xff]  }
  0x69   : > { %4338 = vmatprep.subr.bf16.mxu0 %v5795_v31  ;;  %v5875_v31 = vld [vmem:[%s6638_s29 + $0xb30] ss:$8 sps:$4 sm:$0xff]  }
  0x6b   : > { %3970 = vmatpush1.bf16.msra.mxu1 %v5790_v33  ;;  %v5883_v33 = vld [vmem:[%s6638_s29 + $0xb44] ss:$8 sps:$4 sm:$0xff]  }
  0x6c   : > { %4339 = vmatpush1.bf16.msra.mxu0 %v5793_v34  ;;  %3971 = vmatprep.subr.bf16.mxu1 %v5798_v37  ;;  %v5878_v34 = vld [vmem:[%s6638_s29 + $0x240] ss:$8 sps:$4 sm:$0xff]   ;;  %v5889_v37 = vld [vmem:[%s6638_s29 + $0xb54] ss:$8 sps:$4 sm:$0xff]  }
  0x6d   : > { %4340 = vmatprep.subr.bf16.mxu0 %v5801_v39  ;;  %v5887_v39 = vld [vmem:[%s6638_s29 + $0xb50] ss:$8 sps:$4 sm:$0xff]  }
  0x6f   : > { %3972 = vmatpush1.bf16.msra.mxu1 %v5796_v40  ;;  %v5892_v40 = vld [vmem:[%s6638_s29 + $0x264] ss:$8 sps:$4 sm:$0xff]  }
  0x70   : > { %4341 = vmatpush1.bf16.msra.mxu0 %v5799_v41  ;;  %3973 = vmatprep.subr.bf16.mxu1 %v5804_v42  ;;  %v5895_v41 = vld [vmem:[%s6638_s29 + $0xb64] ss:$8 sps:$4 sm:$0xff]   ;;  %v5890_v42 = vld [vmem:[%s6638_s29 + $0x260] ss:$8 sps:$4 sm:$0xff]  }
  0x71   : > { %4342 = vmatprep.subr.bf16.mxu0 %v5807_v43  ;;  %v5893_v43 = vld [vmem:[%s6638_s29 + $0xb60] ss:$8 sps:$4 sm:$0xff]  }
  0x73   : > { %3974 = vmatpush1.bf16.msra.mxu1 %v5802_v44  ;;  %v5898_v44 = vld [vmem:[%s6638_s29 + $0x274] ss:$8 sps:$4 sm:$0xff]  }
  0x74   : > { %4343 = vmatpush1.bf16.msra.mxu0 %v5805_v45  ;;  %3975 = vmatprep.subr.bf16.mxu1 %v5810_v46  ;;  %v5901_v45 = vld [vmem:[%s6638_s29 + $0xb74] ss:$8 sps:$4 sm:$0xff]   ;;  %v5896_v46 = vld [vmem:[%s6638_s29 + $0x270] ss:$8 sps:$4 sm:$0xff]  }
  0x75   : > { %4344 = vmatprep.subr.bf16.mxu0 %v5813_v47  ;;  %v5899_v47 = vld [vmem:[%s6638_s29 + $0xb70] ss:$8 sps:$4 sm:$0xff]  }
  0x77   : > { %3976 = vmatpush1.bf16.msra.mxu1 %v5808_v48  ;;  %v5904_v48 = vld [vmem:[%s6638_s29 + $0x284] ss:$8 sps:$4 sm:$0xff]  }
  0x78   : > { %4345 = vmatpush1.bf16.msra.mxu0 %v5811_v49  ;;  %3977 = vmatprep.subr.bf16.mxu1 %v5816_v50  ;;  %v5907_v49 = vld [vmem:[%s6638_s29 + $0xb84] ss:$8 sps:$4 sm:$0xff]   ;;  %v5902_v50 = vld [vmem:[%s6638_s29 + $0x280] ss:$8 sps:$4 sm:$0xff]  }
  0x79   : > { %4346 = vmatprep.subr.bf16.mxu0 %v5819_v51  ;;  %v5905_v51 = vld [vmem:[%s6638_s29 + $0xb80] ss:$8 sps:$4 sm:$0xff]  }
  0x7b   : > { %3978 = vmatpush1.bf16.msra.mxu1 %v5814_v52  ;;  %v5910_v52 = vld [vmem:[%s6638_s29 + $0x294] ss:$8 sps:$4 sm:$0xff]  }
  0x7c   : > { %4347 = vmatpush1.bf16.msra.mxu0 %v5817_v53  ;;  %3979 = vmatprep.subr.bf16.mxu1 %v5822_v54  ;;  %v5913_v53 = vld [vmem:[%s6638_s29 + $0xb94] ss:$8 sps:$4 sm:$0xff]   ;;  %v5908_v54 = vld [vmem:[%s6638_s29 + $0x290] ss:$8 sps:$4 sm:$0xff]  }
  0x7d   : > { %4348 = vmatprep.subr.bf16.mxu0 %v5825_v55  ;;  %v5911_v55 = vld [vmem:[%s6638_s29 + $0xb90] ss:$8 sps:$4 sm:$0xff]  }
  0x7f   : > { %3980 = vmatpush1.bf16.msra.mxu1 %v5820_v56  ;;  %v5916_v56 = vld [vmem:[%s6638_s29 + $0x2a4] ss:$8 sps:$4 sm:$0xff]  }
  0x80   : > { %4349 = vmatpush1.bf16.msra.mxu0 %v5823_v57  ;;  %3981 = vmatprep.subr.bf16.mxu1 %v5828_v58  ;;  %v5919_v57 = vld [vmem:[%s6638_s29 + $0xba4] ss:$8 sps:$4 sm:$0xff]   ;;  %v5914_v58 = vld [vmem:[%s6638_s29 + $0x2a0] ss:$8 sps:$4 sm:$0xff]  }
  0x81   : > { %4350 = vmatprep.subr.bf16.mxu0 %v5831_v59  ;;  %v5917_v59 = vld [vmem:[%s6638_s29 + $0xba0] ss:$8 sps:$4 sm:$0xff]  }
  0x83   : > { %3982 = vmatpush1.bf16.msra.mxu1 %v5826_v60  ;;  %v5922_v60 = vld [vmem:[%s6638_s29 + $0x2b4] ss:$8 sps:$4 sm:$0xff]  }
  0x84   : > { %4351 = vmatpush1.bf16.msra.mxu0 %v5829_v61  ;;  %3983 = vmatprep.subr.bf16.mxu1 %v5834_v62  ;;  %v5925_v61 = vld [vmem:[%s6638_s29 + $0xbb4] ss:$8 sps:$4 sm:$0xff]   ;;  %v5920_v62 = vld [vmem:[%s6638_s29 + $0x2b0] ss:$8 sps:$4 sm:$0xff]  }
  0x85   : > { %4352 = vmatprep.subr.bf16.mxu0 %v5837_v63  ;;  %v5923_v63 = vld [vmem:[%s6638_s29 + $0xbb0] ss:$8 sps:$4 sm:$0xff]  }
  0x87   : > { %3984 = vmatpush1.bf16.msra.mxu1 %v5832_v0  ;;  %v5928_v0 = vld [vmem:[%s6638_s29 + $0x2c4] ss:$8 sps:$4 sm:$0xff]  }
  0x88   : > { %4353 = vmatpush1.bf16.msra.mxu0 %v5835_v1  ;;  %3985 = vmatprep.subr.bf16.mxu1 %v5840_v2  ;;  %v5931_v1 = vld [vmem:[%s6638_s29 + $0xbc4] ss:$8 sps:$4 sm:$0xff]   ;;  %v5926_v2 = vld [vmem:[%s6638_s29 + $0x2c0] ss:$8 sps:$4 sm:$0xff]  }
  0x89   : > { %4354 = vmatprep.subr.bf16.mxu0 %v5843_v3  ;;  %v5929_v3 = vld [vmem:[%s6638_s29 + $0xbc0] ss:$8 sps:$4 sm:$0xff]  }
  0x8b   : > { %3986 = vmatpush1.bf16.msra.mxu1 %v5838_v4  ;;  %v5934_v4 = vld [vmem:[%s6638_s29 + $0x2d4] ss:$8 sps:$4 sm:$0xff]  }
  0x8c   : > { %4355 = vmatpush1.bf16.msra.mxu0 %v5841_v5  ;;  %3987 = vmatprep.subr.bf16.mxu1 %v5846_v6  ;;  %v5937_v5 = vld [vmem:[%s6638_s29 + $0xbd4] ss:$8 sps:$4 sm:$0xff]   ;;  %v5932_v6 = vld [vmem:[%s6638_s29 + $0x2d0] ss:$8 sps:$4 sm:$0xff]  }
  0x8d   : > { %4356 = vmatprep.subr.bf16.mxu0 %v5849_v7  ;;  %v5935_v7 = vld [vmem:[%s6638_s29 + $0xbd0] ss:$8 sps:$4 sm:$0xff]  }
  0x8f   : > { %3988 = vmatpush1.bf16.msra.mxu1 %v5844_v8  ;;  %v5940_v8 = vld [vmem:[%s6638_s29 + $0x2e4] ss:$8 sps:$4 sm:$0xff]  }
  0x90   : > { %4357 = vmatpush1.bf16.msra.mxu0 %v5847_v9  ;;  %3998 = vmatprep.subr.bf16.mxu1 %v5854_v10  ;;  %v5943_v9 = vld [vmem:[%s6638_s29 + $0xbe4] ss:$8 sps:$4 sm:$0xff]   ;;  %v5938_v10 = vld [vmem:[%s6638_s29 + $0x2e0] ss:$8 sps:$4 sm:$0xff]  }
  0x91   : > { %4367 = vmatprep.subr.bf16.mxu0 %v5859_v11  ;;  %v5941_v11 = vld [vmem:[%s6638_s29 + $0xbe0] ss:$8 sps:$4 sm:$0xff]  }
  0x92   : > { %3990 = vmatmul.mubr.bf16.vlgmr.msra.gmra.mrb[0].mxu1 %v4913_v12  ;;  %v5946_v12 = vld [vmem:[%s6638_s29 + $0x2f4] ss:$8 sps:$4 sm:$0xff]  }
  0x93   : > { %4359 = vmatmul.mubr.bf16.vlgmr.msra.gmra.mrb[0].mxu0 %v4931_v14  ;;  %3999 = vmatpush1.bf16.msra.mxu1 %v5852_v13  ;;  %v5949_v13 = vld [vmem:[%s6638_s29 + $0xbf4] ss:$8 sps:$4 sm:$0xff]   ;;  %v5944_v14 = vld [vmem:[%s6638_s29 + $0x2f0] ss:$8 sps:$4 sm:$0xff]  }
  0x94   : > { %4368 = vmatpush1.bf16.msra.mxu0 %v5857_v15  ;;  %4000 = vmatprep.subr.bf16.mxu1 %v5862_v16  ;;  %v5947_v15 = vld [vmem:[%s6638_s29 + $0xbf0] ss:$8 sps:$4 sm:$0xff]   ;;  %v5954_v16 = vld [vmem:[%s6638_s29 + $0x304] ss:$8 sps:$4 sm:$0xff]  }
  0x95   : > { %4369 = vmatprep.subr.bf16.mxu0 %v5865_v17  ;;  %4030 = vmatprep.mubr.bf16.mxu1 %v4916_v19  ;;  %v5959_v17 = vld [vmem:[%s6638_s29 + $0xc04] ss:$8 sps:$4 sm:$0xff]   ;;  %v5952_v19 = vld [vmem:[%s6638_s29 + $0x300] ss:$8 sps:$4 sm:$0xff]  }
  0x96   : > { %4399 = vmatprep.mubr.bf16.mxu0 %v4934_v23  ;;  %v4933_v23 = vcombine.low %v6802_v20, %v6802_v20 }
  0x97   : > { %4001 = vmatpush1.bf16.msra.mxu1 %v5860_v21  ;;  %v5957_v21 = vld [vmem:[%s6638_s29 + $0xc00] ss:$8 sps:$4 sm:$0xff]  }
  0x98   : > { %4370 = vmatpush1.bf16.msra.mxu0 %v5863_v22  ;;  %4002 = vmatprep.subr.bf16.mxu1 %v5868_v24  ;;  %v4915_v22 = vcombine.low %v6797_v18, %v6797_v18  ;;  %v6873_v24 = vld [vmem:[%s6688_s10 + $0x18] sm:$0xff] }
  0x99   : > { %4371 = vmatprep.subr.bf16.mxu0 %v5871_v25  ;;  %v6876_v25 = vld [vmem:[%s6688_s10 + $0x60] sm:$0xff]  ;;  %v4918_v18 = vcombine.high %v6873_v24, %v6873_v24 }
  0x9a   : > { %v4936_v20 = vcombine.high %v6876_v25, %v6876_v25 }
  0x9b   : > { %4003 = vmatpush1.bf16.msra.mxu1 %v5866_v26  ;;  %v5962_v26 = vld [vmem:[%s6638_s29 + $0x314] ss:$8 sps:$4 sm:$0xff]  }
  0x9c   : > { %4372 = vmatpush1.bf16.msra.mxu0 %v5869_v27  ;;  %4004 = vmatprep.subr.bf16.mxu1 %v5874_v28  ;;  %v5965_v27 = vld [vmem:[%s6638_s29 + $0xc14] ss:$8 sps:$4 sm:$0xff]   ;;  %v5960_v28 = vld [vmem:[%s6638_s29 + $0x310] ss:$8 sps:$4 sm:$0xff]  }
  0x9d   : > { %4373 = vmatprep.subr.bf16.mxu0 %v5877_v29  ;;  %v5963_v29 = vld [vmem:[%s6638_s29 + $0xc10] ss:$8 sps:$4 sm:$0xff]  }
  0x9f   : > { %4005 = vmatpush1.bf16.msra.mxu1 %v5872_v30  ;;  %v5968_v30 = vld [vmem:[%s6638_s29 + $0x324] ss:$8 sps:$4 sm:$0xff]  }
  0xa0   : > { %4374 = vmatpush1.bf16.msra.mxu0 %v5875_v31  ;;  %4006 = vmatprep.subr.bf16.mxu1 %v5880_v32  ;;  %v5971_v31 = vld [vmem:[%s6638_s29 + $0xc24] ss:$8 sps:$4 sm:$0xff]   ;;  %v5966_v32 = vld [vmem:[%s6638_s29 + $0x320] ss:$8 sps:$4 sm:$0xff]  }
  0xa1   : > { %4375 = vmatprep.subr.bf16.mxu0 %v5883_v33  ;;  %v5969_v33 = vld [vmem:[%s6638_s29 + $0xc20] ss:$8 sps:$4 sm:$0xff]  }
  0xa3   : > { %4007 = vmatpush1.bf16.msra.mxu1 %v5878_v34  ;;  %v5974_v34 = vld [vmem:[%s6638_s29 + $0x334] ss:$8 sps:$4 sm:$0xff]  }
  0xa4   : > { %4376 = vmatpush1.bf16.msra.mxu0 %v5881_v35  ;;  %4008 = vmatprep.subr.bf16.mxu1 %v5886_v36  ;;  %v5977_v35 = vld [vmem:[%s6638_s29 + $0xc34] ss:$8 sps:$4 sm:$0xff]   ;;  %v5972_v36 = vld [vmem:[%s6638_s29 + $0x330] ss:$8 sps:$4 sm:$0xff]  }
  0xa5   : > { %4377 = vmatprep.subr.bf16.mxu0 %v5889_v37  ;;  %v5975_v37 = vld [vmem:[%s6638_s29 + $0xc30] ss:$8 sps:$4 sm:$0xff]  }
  0xa7   : > { %4009 = vmatpush1.bf16.msra.mxu1 %v5884_v38  ;;  %v5980_v38 = vld [vmem:[%s6638_s29 + $0x344] ss:$8 sps:$4 sm:$0xff]  }
  0xa8   : > { %4378 = vmatpush1.bf16.msra.mxu0 %v5887_v39  ;;  %4010 = vmatprep.subr.bf16.mxu1 %v5892_v40  ;;  %v5983_v39 = vld [vmem:[%s6638_s29 + $0xc44] ss:$8 sps:$4 sm:$0xff]   ;;  %v5978_v40 = vld [vmem:[%s6638_s29 + $0x340] ss:$8 sps:$4 sm:$0xff]  }
  0xa9   : > { %4379 = vmatprep.subr.bf16.mxu0 %v5895_v41  ;;  %v5981_v41 = vld [vmem:[%s6638_s29 + $0xc40] ss:$8 sps:$4 sm:$0xff]  }
  0xab   : > { %4011 = vmatpush1.bf16.msra.mxu1 %v5890_v42  ;;  %v5986_v42 = vld [vmem:[%s6638_s29 + $0x354] ss:$8 sps:$4 sm:$0xff]  }
  0xac   : > { %4380 = vmatpush1.bf16.msra.mxu0 %v5893_v43  ;;  %4012 = vmatprep.subr.bf16.mxu1 %v5898_v44  ;;  %v5989_v43 = vld [vmem:[%s6638_s29 + $0xc54] ss:$8 sps:$4 sm:$0xff]   ;;  %v5984_v44 = vld [vmem:[%s6638_s29 + $0x350] ss:$8 sps:$4 sm:$0xff]  }
  0xad   : > { %4381 = vmatprep.subr.bf16.mxu0 %v5901_v45  ;;  %v5987_v45 = vld [vmem:[%s6638_s29 + $0xc50] ss:$8 sps:$4 sm:$0xff]  }
  0xaf   : > { %4013 = vmatpush1.bf16.msra.mxu1 %v5896_v46  ;;  %v5992_v46 = vld [vmem:[%s6638_s29 + $0x364] ss:$8 sps:$4 sm:$0xff]  }
  0xb0   : > { %4382 = vmatpush1.bf16.msra.mxu0 %v5899_v47  ;;  %4014 = vmatprep.subr.bf16.mxu1 %v5904_v48  ;;  %v5995_v47 = vld [vmem:[%s6638_s29 + $0xc64] ss:$8 sps:$4 sm:$0xff]   ;;  %v5990_v48 = vld [vmem:[%s6638_s29 + $0x360] ss:$8 sps:$4 sm:$0xff]  }
  0xb1   : > { %4383 = vmatprep.subr.bf16.mxu0 %v5907_v49  ;;  %v5993_v49 = vld [vmem:[%s6638_s29 + $0xc60] ss:$8 sps:$4 sm:$0xff]  }
  0xb3   : > { %4015 = vmatpush1.bf16.msra.mxu1 %v5902_v50  ;;  %v5998_v50 = vld [vmem:[%s6638_s29 + $0x374] ss:$8 sps:$4 sm:$0xff]  }
  0xb4   : > { %4384 = vmatpush1.bf16.msra.mxu0 %v5905_v51  ;;  %4016 = vmatprep.subr.bf16.mxu1 %v5910_v52  ;;  %v6001_v51 = vld [vmem:[%s6638_s29 + $0xc74] ss:$8 sps:$4 sm:$0xff]   ;;  %v5996_v52 = vld [vmem:[%s6638_s29 + $0x370] ss:$8 sps:$4 sm:$0xff]  }
  0xb5   : > { %4385 = vmatprep.subr.bf16.mxu0 %v5913_v53  ;;  %v5999_v53 = vld [vmem:[%s6638_s29 + $0xc70] ss:$8 sps:$4 sm:$0xff]  }
  0xb7   : > { %4017 = vmatpush1.bf16.msra.mxu1 %v5908_v54  ;;  %v6004_v54 = vld [vmem:[%s6638_s29 + $0x384] ss:$8 sps:$4 sm:$0xff]  }
  0xb8   : > { %4386 = vmatpush1.bf16.msra.mxu0 %v5911_v55  ;;  %4018 = vmatprep.subr.bf16.mxu1 %v5916_v56  ;;  %v6007_v55 = vld [vmem:[%s6638_s29 + $0xc84] ss:$8 sps:$4 sm:$0xff]   ;;  %v6002_v56 = vld [vmem:[%s6638_s29 + $0x380] ss:$8 sps:$4 sm:$0xff]  }
  0xb9   : > { %4387 = vmatprep.subr.bf16.mxu0 %v5919_v57  ;;  %v6005_v57 = vld [vmem:[%s6638_s29 + $0xc80] ss:$8 sps:$4 sm:$0xff]  }
  0xbb   : > { %4019 = vmatpush1.bf16.msra.mxu1 %v5914_v58  ;;  %v6010_v58 = vld [vmem:[%s6638_s29 + $0x394] ss:$8 sps:$4 sm:$0xff]  }
  0xbc   : > { %4388 = vmatpush1.bf16.msra.mxu0 %v5917_v59  ;;  %4020 = vmatprep.subr.bf16.mxu1 %v5922_v60  ;;  %v6013_v59 = vld [vmem:[%s6638_s29 + $0xc94] ss:$8 sps:$4 sm:$0xff]   ;;  %v6008_v60 = vld [vmem:[%s6638_s29 + $0x390] ss:$8 sps:$4 sm:$0xff]  }
  0xbd   : > { %4389 = vmatprep.subr.bf16.mxu0 %v5925_v61  ;;  %v6011_v61 = vld [vmem:[%s6638_s29 + $0xc90] ss:$8 sps:$4 sm:$0xff]  }
  0xbf   : > { %4021 = vmatpush1.bf16.msra.mxu1 %v5920_v62  ;;  %v6016_v62 = vld [vmem:[%s6638_s29 + $0x3a4] ss:$8 sps:$4 sm:$0xff]  }
  0xc0   : > { %4390 = vmatpush1.bf16.msra.mxu0 %v5923_v63  ;;  %4022 = vmatprep.subr.bf16.mxu1 %v5928_v0  ;;  %v6019_v63 = vld [vmem:[%s6638_s29 + $0xca4] ss:$8 sps:$4 sm:$0xff]   ;;  %v6014_v0 = vld [vmem:[%s6638_s29 + $0x3a0] ss:$8 sps:$4 sm:$0xff]  }
  0xc1   : > { %4391 = vmatprep.subr.bf16.mxu0 %v5931_v1  ;;  %v6017_v1 = vld [vmem:[%s6638_s29 + $0xca0] ss:$8 sps:$4 sm:$0xff]  }
  0xc3   : > { %4023 = vmatpush1.bf16.msra.mxu1 %v5926_v2  ;;  %v6022_v2 = vld [vmem:[%s6638_s29 + $0x3b4] ss:$8 sps:$4 sm:$0xff]  }
  0xc4   : > { %4392 = vmatpush1.bf16.msra.mxu0 %v5929_v3  ;;  %4024 = vmatprep.subr.bf16.mxu1 %v5934_v4  ;;  %v6025_v3 = vld [vmem:[%s6638_s29 + $0xcb4] ss:$8 sps:$4 sm:$0xff]   ;;  %v6020_v4 = vld [vmem:[%s6638_s29 + $0x3b0] ss:$8 sps:$4 sm:$0xff]  }
  0xc5   : > { %4393 = vmatprep.subr.bf16.mxu0 %v5937_v5  ;;  %v6023_v5 = vld [vmem:[%s6638_s29 + $0xcb0] ss:$8 sps:$4 sm:$0xff]  }
  0xc7   : > { %4025 = vmatpush1.bf16.msra.mxu1 %v5932_v6  ;;  %v6028_v6 = vld [vmem:[%s6638_s29 + $0x3c4] ss:$8 sps:$4 sm:$0xff]  }
  0xc8   : > { %4394 = vmatpush1.bf16.msra.mxu0 %v5935_v7  ;;  %4026 = vmatprep.subr.bf16.mxu1 %v5940_v8  ;;  %v6031_v7 = vld [vmem:[%s6638_s29 + $0xcc4] ss:$8 sps:$4 sm:$0xff]   ;;  %v6026_v8 = vld [vmem:[%s6638_s29 + $0x3c0] ss:$8 sps:$4 sm:$0xff]  }
  0xc9   : > { %4395 = vmatprep.subr.bf16.mxu0 %v5943_v9  ;;  %v6029_v9 = vld [vmem:[%s6638_s29 + $0xcc0] ss:$8 sps:$4 sm:$0xff]  }
  0xcb   : > { %4027 = vmatpush1.bf16.msra.mxu1 %v5938_v10  ;;  %v6034_v10 = vld [vmem:[%s6638_s29 + $0x3d4] ss:$8 sps:$4 sm:$0xff]  }
  0xcc   : > { %4396 = vmatpush1.bf16.msra.mxu0 %v5941_v11  ;;  %4028 = vmatprep.subr.bf16.mxu1 %v5946_v12  ;;  %v6037_v11 = vld [vmem:[%s6638_s29 + $0xcd4] ss:$8 sps:$4 sm:$0xff]   ;;  %v6032_v12 = vld [vmem:[%s6638_s29 + $0x3d0] ss:$8 sps:$4 sm:$0xff]  }
  0xcd   : > { %4397 = vmatprep.subr.bf16.mxu0 %v5949_v13  ;;  %v6035_v13 = vld [vmem:[%s6638_s29 + $0xcd0] ss:$8 sps:$4 sm:$0xff]  }
  0xcf   : > { %4029 = vmatpush1.bf16.msra.mxu1 %v5944_v14  ;;  %v6040_v14 = vld [vmem:[%s6638_s29 + $0x3e4] ss:$8 sps:$4 sm:$0xff]  }
  0xd0   : > { %4398 = vmatpush1.bf16.msra.mxu0 %v5947_v15  ;;  %4039 = vmatprep.subr.bf16.mxu1 %v5954_v16  ;;  %v6043_v15 = vld [vmem:[%s6638_s29 + $0xce4] ss:$8 sps:$4 sm:$0xff]   ;;  %v6038_v16 = vld [vmem:[%s6638_s29 + $0x3e0] ss:$8 sps:$4 sm:$0xff]  }
  0xd1   : > { %4408 = vmatprep.subr.bf16.mxu0 %v5959_v17  ;;  %v6041_v17 = vld [vmem:[%s6638_s29 + $0xce0] ss:$8 sps:$4 sm:$0xff]  }
  0xd2   : > { %4031 = vmatmul.mubr.bf16.vlgmr.msra.gmra.mrb[0].mxu1 %v4915_v22  ;;  %v6044_v22 = vld [vmem:[%s6638_s29 + $0x3f0] ss:$8 sps:$4 sm:$0xff]  }
  0xd3   : > { %4400 = vmatmul.mubr.bf16.vlgmr.msra.gmra.mrb[0].mxu0 %v4933_v23  ;;  %4040 = vmatpush1.bf16.msra.mxu1 %v5952_v19  ;;  %v6046_v19 = vld [vmem:[%s6638_s29 + $0x3f4] ss:$8 sps:$4 sm:$0xff]   ;;  %v6047_v23 = vld [vmem:[%s6638_s29 + $0xcf0] ss:$8 sps:$4 sm:$0xff]  }
  0xd4   : > { %4409 = vmatpush1.bf16.msra.mxu0 %v5957_v21  ;;  %4041 = vmatprep.subr.bf16.mxu1 %v5962_v26  ;;  %v6049_v21 = vld [vmem:[%s6638_s29 + $0xcf4] ss:$8 sps:$4 sm:$0xff]   ;;  %v6054_v26 = vld [vmem:[%s6638_s29 + $0x404] ss:$8 sps:$4 sm:$0xff]  }
  0xd5   : > { %4410 = vmatprep.subr.bf16.mxu0 %v5965_v27  ;;  %4071 = vmatprep.mubr.bf16.mxu1 %v4918_v18  ;;  %v6059_v27 = vld [vmem:[%s6638_s29 + $0xd04] ss:$8 sps:$4 sm:$0xff]  }
  0xd6   : > { %4440 = vmatprep.mubr.bf16.mxu0 %v4936_v20  ;;  %v6945_v18 = vld [vmem:[%s6688_s10 + $0x20] sm:$0xff]  ;;  %v4917_v20 = vcombine.low %v6873_v24, %v6873_v24 }
  0xd7   : > { %4042 = vmatpush1.bf16.msra.mxu1 %v5960_v28  ;;  %v4935_v28 = vcombine.low %v6876_v25, %v6876_v25  ;;  %v4920_v24 = vcombine.high %v6945_v18, %v6945_v18 }
  0xd8   : > { %4411 = vmatpush1.bf16.msra.mxu0 %v5963_v29  ;;  %4043 = vmatprep.subr.bf16.mxu1 %v5968_v30  ;;  %v6952_v29 = vld [vmem:[%s6688_s10 + $0x68] sm:$0xff] }
  0xd9   : > { %4412 = vmatprep.subr.bf16.mxu0 %v5971_v31  ;;  %v6052_v30 = vld [vmem:[%s6638_s29 + $0x400] ss:$8 sps:$4 sm:$0xff]   ;;  %v4938_v25 = vcombine.high %v6952_v29, %v6952_v29 }
  0xda   : > { %v6057_v31 = vld [vmem:[%s6638_s29 + $0xd00] ss:$8 sps:$4 sm:$0xff]  }
  0xdb   : > { %4044 = vmatpush1.bf16.msra.mxu1 %v5966_v32  ;;  %v6062_v32 = vld [vmem:[%s6638_s29 + $0x414] ss:$8 sps:$4 sm:$0xff]  }
  0xdc   : > { %4413 = vmatpush1.bf16.msra.mxu0 %v5969_v33  ;;  %4045 = vmatprep.subr.bf16.mxu1 %v5974_v34  ;;  %v6065_v33 = vld [vmem:[%s6638_s29 + $0xd14] ss:$8 sps:$4 sm:$0xff]   ;;  %v6060_v34 = vld [vmem:[%s6638_s29 + $0x410] ss:$8 sps:$4 sm:$0xff]  }
  0xdd   : > { %4414 = vmatprep.subr.bf16.mxu0 %v5977_v35  ;;  %v6063_v35 = vld [vmem:[%s6638_s29 + $0xd10] ss:$8 sps:$4 sm:$0xff]  }
  0xdf   : > { %4046 = vmatpush1.bf16.msra.mxu1 %v5972_v36  ;;  %v6068_v36 = vld [vmem:[%s6638_s29 + $0x424] ss:$8 sps:$4 sm:$0xff]  }
  0xe0   : > { %4415 = vmatpush1.bf16.msra.mxu0 %v5975_v37  ;;  %4047 = vmatprep.subr.bf16.mxu1 %v5980_v38  ;;  %v6071_v37 = vld [vmem:[%s6638_s29 + $0xd24] ss:$8 sps:$4 sm:$0xff]   ;;  %v6066_v38 = vld [vmem:[%s6638_s29 + $0x420] ss:$8 sps:$4 sm:$0xff]  }
  0xe1   : > { %4416 = vmatprep.subr.bf16.mxu0 %v5983_v39  ;;  %v6069_v39 = vld [vmem:[%s6638_s29 + $0xd20] ss:$8 sps:$4 sm:$0xff]  }
  0xe3   : > { %4048 = vmatpush1.bf16.msra.mxu1 %v5978_v40  ;;  %v6074_v40 = vld [vmem:[%s6638_s29 + $0x434] ss:$8 sps:$4 sm:$0xff]  }
  0xe4   : > { %4417 = vmatpush1.bf16.msra.mxu0 %v5981_v41  ;;  %4049 = vmatprep.subr.bf16.mxu1 %v5986_v42  ;;  %v6077_v41 = vld [vmem:[%s6638_s29 + $0xd34] ss:$8 sps:$4 sm:$0xff]   ;;  %v6072_v42 = vld [vmem:[%s6638_s29 + $0x430] ss:$8 sps:$4 sm:$0xff]  }
  0xe5   : > { %4418 = vmatprep.subr.bf16.mxu0 %v5989_v43  ;;  %v6075_v43 = vld [vmem:[%s6638_s29 + $0xd30] ss:$8 sps:$4 sm:$0xff]  }
  0xe7   : > { %4050 = vmatpush1.bf16.msra.mxu1 %v5984_v44  ;;  %v6080_v44 = vld [vmem:[%s6638_s29 + $0x444] ss:$8 sps:$4 sm:$0xff]  }
  0xe8   : > { %4419 = vmatpush1.bf16.msra.mxu0 %v5987_v45  ;;  %4051 = vmatprep.subr.bf16.mxu1 %v5992_v46  ;;  %v6083_v45 = vld [vmem:[%s6638_s29 + $0xd44] ss:$8 sps:$4 sm:$0xff]   ;;  %v6078_v46 = vld [vmem:[%s6638_s29 + $0x440] ss:$8 sps:$4 sm:$0xff]  }
  0xe9   : > { %4420 = vmatprep.subr.bf16.mxu0 %v5995_v47  ;;  %v6081_v47 = vld [vmem:[%s6638_s29 + $0xd40] ss:$8 sps:$4 sm:$0xff]  }
  0xeb   : > { %4052 = vmatpush1.bf16.msra.mxu1 %v5990_v48  ;;  %v6086_v48 = vld [vmem:[%s6638_s29 + $0x454] ss:$8 sps:$4 sm:$0xff]  }
  0xec   : > { %4421 = vmatpush1.bf16.msra.mxu0 %v5993_v49  ;;  %4053 = vmatprep.subr.bf16.mxu1 %v5998_v50  ;;  %v6089_v49 = vld [vmem:[%s6638_s29 + $0xd54] ss:$8 sps:$4 sm:$0xff]   ;;  %v6084_v50 = vld [vmem:[%s6638_s29 + $0x450] ss:$8 sps:$4 sm:$0xff]  }
  0xed   : > { %4422 = vmatprep.subr.bf16.mxu0 %v6001_v51  ;;  %v6087_v51 = vld [vmem:[%s6638_s29 + $0xd50] ss:$8 sps:$4 sm:$0xff]  }
  0xef   : > { %4054 = vmatpush1.bf16.msra.mxu1 %v5996_v52  ;;  %v6092_v52 = vld [vmem:[%s6638_s29 + $0x464] ss:$8 sps:$4 sm:$0xff]  }
  0xf0   : > { %4423 = vmatpush1.bf16.msra.mxu0 %v5999_v53  ;;  %4055 = vmatprep.subr.bf16.mxu1 %v6004_v54  ;;  %v6095_v53 = vld [vmem:[%s6638_s29 + $0xd64] ss:$8 sps:$4 sm:$0xff]   ;;  %v6090_v54 = vld [vmem:[%s6638_s29 + $0x460] ss:$8 sps:$4 sm:$0xff]  }
  0xf1   : > { %4424 = vmatprep.subr.bf16.mxu0 %v6007_v55  ;;  %v6093_v55 = vld [vmem:[%s6638_s29 + $0xd60] ss:$8 sps:$4 sm:$0xff]  }
  0xf3   : > { %4056 = vmatpush1.bf16.msra.mxu1 %v6002_v56  ;;  %v6098_v56 = vld [vmem:[%s6638_s29 + $0x474] ss:$8 sps:$4 sm:$0xff]  }
  0xf4   : > { %4425 = vmatpush1.bf16.msra.mxu0 %v6005_v57  ;;  %4057 = vmatprep.subr.bf16.mxu1 %v6010_v58  ;;  %v6101_v57 = vld [vmem:[%s6638_s29 + $0xd74] ss:$8 sps:$4 sm:$0xff]   ;;  %v6096_v58 = vld [vmem:[%s6638_s29 + $0x470] ss:$8 sps:$4 sm:$0xff]  }
  0xf5   : > { %4426 = vmatprep.subr.bf16.mxu0 %v6013_v59  ;;  %v6099_v59 = vld [vmem:[%s6638_s29 + $0xd70] ss:$8 sps:$4 sm:$0xff]  }
  0xf7   : > { %4058 = vmatpush1.bf16.msra.mxu1 %v6008_v60  ;;  %v6104_v60 = vld [vmem:[%s6638_s29 + $0x484] ss:$8 sps:$4 sm:$0xff]  }
  0xf8   : > { %4427 = vmatpush1.bf16.msra.mxu0 %v6011_v61  ;;  %4059 = vmatprep.subr.bf16.mxu1 %v6016_v62  ;;  %v6107_v61 = vld [vmem:[%s6638_s29 + $0xd84] ss:$8 sps:$4 sm:$0xff]   ;;  %v6102_v62 = vld [vmem:[%s6638_s29 + $0x480] ss:$8 sps:$4 sm:$0xff]  }
  0xf9   : > { %4428 = vmatprep.subr.bf16.mxu0 %v6019_v63  ;;  %v6105_v63 = vld [vmem:[%s6638_s29 + $0xd80] ss:$8 sps:$4 sm:$0xff]  }
  0xfb   : > { %4060 = vmatpush1.bf16.msra.mxu1 %v6014_v0  ;;  %v6110_v0 = vld [vmem:[%s6638_s29 + $0x494] ss:$8 sps:$4 sm:$0xff]  }
  0xfc   : > { %4429 = vmatpush1.bf16.msra.mxu0 %v6017_v1  ;;  %4061 = vmatprep.subr.bf16.mxu1 %v6022_v2  ;;  %v6113_v1 = vld [vmem:[%s6638_s29 + $0xd94] ss:$8 sps:$4 sm:$0xff]   ;;  %v6108_v2 = vld [vmem:[%s6638_s29 + $0x490] ss:$8 sps:$4 sm:$0xff]  }
  0xfd   : > { %4430 = vmatprep.subr.bf16.mxu0 %v6025_v3  ;;  %v6111_v3 = vld [vmem:[%s6638_s29 + $0xd90] ss:$8 sps:$4 sm:$0xff]  }
  0xff   : > { %4062 = vmatpush1.bf16.msra.mxu1 %v6020_v4  ;;  %v6116_v4 = vld [vmem:[%s6638_s29 + $0x4a4] ss:$8 sps:$4 sm:$0xff]  }
 0x100   : > { %4431 = vmatpush1.bf16.msra.mxu0 %v6023_v5  ;;  %4063 = vmatprep.subr.bf16.mxu1 %v6028_v6  ;;  %v6119_v5 = vld [vmem:[%s6638_s29 + $0xda4] ss:$8 sps:$4 sm:$0xff]   ;;  %v6114_v6 = vld [vmem:[%s6638_s29 + $0x4a0] ss:$8 sps:$4 sm:$0xff]  }
 0x101   : > { %4432 = vmatprep.subr.bf16.mxu0 %v6031_v7  ;;  %v6117_v7 = vld [vmem:[%s6638_s29 + $0xda0] ss:$8 sps:$4 sm:$0xff]  }
 0x103   : > { %4064 = vmatpush1.bf16.msra.mxu1 %v6026_v8  ;;  %v6122_v8 = vld [vmem:[%s6638_s29 + $0x4b4] ss:$8 sps:$4 sm:$0xff]  }
 0x104   : > { %4433 = vmatpush1.bf16.msra.mxu0 %v6029_v9  ;;  %4065 = vmatprep.subr.bf16.mxu1 %v6034_v10  ;;  %v6125_v9 = vld [vmem:[%s6638_s29 + $0xdb4] ss:$8 sps:$4 sm:$0xff]   ;;  %v6120_v10 = vld [vmem:[%s6638_s29 + $0x4b0] ss:$8 sps:$4 sm:$0xff]  }
 0x105   : > { %4434 = vmatprep.subr.bf16.mxu0 %v6037_v11  ;;  %v6123_v11 = vld [vmem:[%s6638_s29 + $0xdb0] ss:$8 sps:$4 sm:$0xff]  }
 0x107   : > { %4066 = vmatpush1.bf16.msra.mxu1 %v6032_v12  ;;  %v6128_v12 = vld [vmem:[%s6638_s29 + $0x4c4] ss:$8 sps:$4 sm:$0xff]  }
 0x108   : > { %4435 = vmatpush1.bf16.msra.mxu0 %v6035_v13  ;;  %4067 = vmatprep.subr.bf16.mxu1 %v6040_v14  ;;  %v6131_v13 = vld [vmem:[%s6638_s29 + $0xdc4] ss:$8 sps:$4 sm:$0xff]   ;;  %v6126_v14 = vld [vmem:[%s6638_s29 + $0x4c0] ss:$8 sps:$4 sm:$0xff]  }
 0x109   : > { %4436 = vmatprep.subr.bf16.mxu0 %v6043_v15  ;;  %v6129_v15 = vld [vmem:[%s6638_s29 + $0xdc0] ss:$8 sps:$4 sm:$0xff]  }
 0x10b   : > { %4068 = vmatpush1.bf16.msra.mxu1 %v6038_v16  ;;  %v6134_v16 = vld [vmem:[%s6638_s29 + $0x4d4] ss:$8 sps:$4 sm:$0xff]  }
 0x10c   : > { %4437 = vmatpush1.bf16.msra.mxu0 %v6041_v17  ;;  %4069 = vmatprep.subr.bf16.mxu1 %v6046_v19  ;;  %v6137_v17 = vld [vmem:[%s6638_s29 + $0xdd4] ss:$8 sps:$4 sm:$0xff]   ;;  %v6132_v19 = vld [vmem:[%s6638_s29 + $0x4d0] ss:$8 sps:$4 sm:$0xff]  }
 0x10d   : > { %4438 = vmatprep.subr.bf16.mxu0 %v6049_v21  ;;  %v6135_v21 = vld [vmem:[%s6638_s29 + $0xdd0] ss:$8 sps:$4 sm:$0xff]  }
 0x10f   : > { %4070 = vmatpush1.bf16.msra.mxu1 %v6044_v22  ;;  %v6140_v22 = vld [vmem:[%s6638_s29 + $0x4e4] ss:$8 sps:$4 sm:$0xff]  }
 0x110   : > { %4439 = vmatpush1.bf16.msra.mxu0 %v6047_v23  ;;  %4080 = vmatprep.subr.bf16.mxu1 %v6054_v26  ;;  %v6143_v23 = vld [vmem:[%s6638_s29 + $0xde4] ss:$8 sps:$4 sm:$0xff]   ;;  %v6138_v26 = vld [vmem:[%s6638_s29 + $0x4e0] ss:$8 sps:$4 sm:$0xff]  }
 0x111   : > { %4449 = vmatprep.subr.bf16.mxu0 %v6059_v27  ;;  %v6141_v27 = vld [vmem:[%s6638_s29 + $0xde0] ss:$8 sps:$4 sm:$0xff]  }
 0x112   : > { %4072 = vmatmul.mubr.bf16.vlgmr.msra.gmra.mrb[0].mxu1 %v4917_v20  ;;  %v6146_v20 = vld [vmem:[%s6638_s29 + $0x4f4] ss:$8 sps:$4 sm:$0xff]  }
 0x113   : > { %4441 = vmatmul.mubr.bf16.vlgmr.msra.gmra.mrb[0].mxu0 %v4935_v28  ;;  %4081 = vmatpush1.bf16.msra.mxu1 %v6052_v30  ;;  %v6149_v28 = vld [vmem:[%s6638_s29 + $0xdf4] ss:$8 sps:$4 sm:$0xff]   ;;  %v6144_v30 = vld [vmem:[%s6638_s29 + $0x4f0] ss:$8 sps:$4 sm:$0xff]  }
 0x114   : > { %4450 = vmatpush1.bf16.msra.mxu0 %v6057_v31  ;;  %4082 = vmatprep.subr.bf16.mxu1 %v6062_v32  ;;  %v6147_v31 = vld [vmem:[%s6638_s29 + $0xdf0] ss:$8 sps:$4 sm:$0xff]   ;;  %v6154_v32 = vld [vmem:[%s6638_s29 + $0x504] ss:$8 sps:$4 sm:$0xff]  }
 0x115   : > { %4451 = vmatprep.subr.bf16.mxu0 %v6065_v33  ;;  %4112 = vmatprep.mubr.bf16.mxu1 %v4920_v24  ;;  %v6159_v33 = vld [vmem:[%s6638_s29 + $0xe04] ss:$8 sps:$4 sm:$0xff]  }
 0x116   : > { %4481 = vmatprep.mubr.bf16.mxu0 %v4938_v25  ;;  %v7023_v24 = vld [vmem:[%s6688_s10 + $0x28] sm:$0xff]  ;;  %v7026_v25 = vld [vmem:[%s6688_s10 + $0x70] sm:$0xff] }
 0x117   : > { %4083 = vmatpush1.bf16.msra.mxu1 %v6060_v34  ;;  %v4919_v34 = vcombine.low %v6945_v18, %v6945_v18  ;;  %v4940_v18 = vcombine.high %v7026_v25, %v7026_v25 }
 0x118   : > { %4452 = vmatpush1.bf16.msra.mxu0 %v6063_v35  ;;  %4084 = vmatprep.subr.bf16.mxu1 %v6068_v36  ;;  %v4937_v35 = vcombine.low %v6952_v29, %v6952_v29  ;;  %v6152_v36 = vld [vmem:[%s6638_s29 + $0x500] ss:$8 sps:$4 sm:$0xff]   ;;  %v6160_v29 = vld [vmem:[%s6638_s29 + $0x510] ss:$8 sps:$4 sm:$0xff]  }
 0x119   : > { %4453 = vmatprep.subr.bf16.mxu0 %v6071_v37  ;;  %v6157_v37 = vld [vmem:[%s6638_s29 + $0xe00] ss:$8 sps:$4 sm:$0xff]  }
 0x11b   : > { %4085 = vmatpush1.bf16.msra.mxu1 %v6066_v38  ;;  %v6162_v38 = vld [vmem:[%s6638_s29 + $0x514] ss:$8 sps:$4 sm:$0xff]  }
 0x11c   : > { %4454 = vmatpush1.bf16.msra.mxu0 %v6069_v39  ;;  %4086 = vmatprep.subr.bf16.mxu1 %v6074_v40  ;;  %v6165_v39 = vld [vmem:[%s6638_s29 + $0xe14] ss:$8 sps:$4 sm:$0xff]   ;;  %v4922_v40 = vcombine.high %v7023_v24, %v7023_v24 }
 0x11d   : > { %4455 = vmatprep.subr.bf16.mxu0 %v6077_v41  ;;  %v6163_v41 = vld [vmem:[%s6638_s29 + $0xe10] ss:$8 sps:$4 sm:$0xff]  }
 0x11f   : > { %4087 = vmatpush1.bf16.msra.mxu1 %v6072_v42  ;;  %v6168_v42 = vld [vmem:[%s6638_s29 + $0x524] ss:$8 sps:$4 sm:$0xff]  }
 0x120   : > { %4456 = vmatpush1.bf16.msra.mxu0 %v6075_v43  ;;  %4088 = vmatprep.subr.bf16.mxu1 %v6080_v44  ;;  %v6171_v43 = vld [vmem:[%s6638_s29 + $0xe24] ss:$8 sps:$4 sm:$0xff]   ;;  %v6166_v44 = vld [vmem:[%s6638_s29 + $0x520] ss:$8 sps:$4 sm:$0xff]  }
 0x121   : > { %4457 = vmatprep.subr.bf16.mxu0 %v6083_v45  ;;  %v6169_v45 = vld [vmem:[%s6638_s29 + $0xe20] ss:$8 sps:$4 sm:$0xff]  }
 0x123   : > { %4089 = vmatpush1.bf16.msra.mxu1 %v6078_v46  ;;  %v6174_v46 = vld [vmem:[%s6638_s29 + $0x534] ss:$8 sps:$4 sm:$0xff]  }
 0x124   : > { %4458 = vmatpush1.bf16.msra.mxu0 %v6081_v47  ;;  %4090 = vmatprep.subr.bf16.mxu1 %v6086_v48  ;;  %v6177_v47 = vld [vmem:[%s6638_s29 + $0xe34] ss:$8 sps:$4 sm:$0xff]   ;;  %v6172_v48 = vld [vmem:[%s6638_s29 + $0x530] ss:$8 sps:$4 sm:$0xff]  }
 0x125   : > { %4459 = vmatprep.subr.bf16.mxu0 %v6089_v49  ;;  %v6175_v49 = vld [vmem:[%s6638_s29 + $0xe30] ss:$8 sps:$4 sm:$0xff]  }
 0x127   : > { %4091 = vmatpush1.bf16.msra.mxu1 %v6084_v50  ;;  %v6180_v50 = vld [vmem:[%s6638_s29 + $0x544] ss:$8 sps:$4 sm:$0xff]  }
 0x128   : > { %4460 = vmatpush1.bf16.msra.mxu0 %v6087_v51  ;;  %4092 = vmatprep.subr.bf16.mxu1 %v6092_v52  ;;  %v6183_v51 = vld [vmem:[%s6638_s29 + $0xe44] ss:$8 sps:$4 sm:$0xff]   ;;  %v6178_v52 = vld [vmem:[%s6638_s29 + $0x540] ss:$8 sps:$4 sm:$0xff]  }
 0x129   : > { %4461 = vmatprep.subr.bf16.mxu0 %v6095_v53  ;;  %v6181_v53 = vld [vmem:[%s6638_s29 + $0xe40] ss:$8 sps:$4 sm:$0xff]  }
 0x12b   : > { %4093 = vmatpush1.bf16.msra.mxu1 %v6090_v54  ;;  %v6186_v54 = vld [vmem:[%s6638_s29 + $0x554] ss:$8 sps:$4 sm:$0xff]  }
 0x12c   : > { %4462 = vmatpush1.bf16.msra.mxu0 %v6093_v55  ;;  %4094 = vmatprep.subr.bf16.mxu1 %v6098_v56  ;;  %v6189_v55 = vld [vmem:[%s6638_s29 + $0xe54] ss:$8 sps:$4 sm:$0xff]   ;;  %v6184_v56 = vld [vmem:[%s6638_s29 + $0x550] ss:$8 sps:$4 sm:$0xff]  }
 0x12d   : > { %4463 = vmatprep.subr.bf16.mxu0 %v6101_v57  ;;  %v6187_v57 = vld [vmem:[%s6638_s29 + $0xe50] ss:$8 sps:$4 sm:$0xff]  }
 0x12f   : > { %4095 = vmatpush1.bf16.msra.mxu1 %v6096_v58  ;;  %v6192_v58 = vld [vmem:[%s6638_s29 + $0x564] ss:$8 sps:$4 sm:$0xff]  }
 0x130   : > { %4464 = vmatpush1.bf16.msra.mxu0 %v6099_v59  ;;  %4096 = vmatprep.subr.bf16.mxu1 %v6104_v60  ;;  %v6195_v59 = vld [vmem:[%s6638_s29 + $0xe64] ss:$8 sps:$4 sm:$0xff]   ;;  %v6190_v60 = vld [vmem:[%s6638_s29 + $0x560] ss:$8 sps:$4 sm:$0xff]  }
 0x131   : > { %4465 = vmatprep.subr.bf16.mxu0 %v6107_v61  ;;  %v6193_v61 = vld [vmem:[%s6638_s29 + $0xe60] ss:$8 sps:$4 sm:$0xff]  }
 0x133   : > { %4097 = vmatpush1.bf16.msra.mxu1 %v6102_v62  ;;  %v6198_v62 = vld [vmem:[%s6638_s29 + $0x574] ss:$8 sps:$4 sm:$0xff]  }
 0x134   : > { %4466 = vmatpush1.bf16.msra.mxu0 %v6105_v63  ;;  %4098 = vmatprep.subr.bf16.mxu1 %v6110_v0  ;;  %v6201_v63 = vld [vmem:[%s6638_s29 + $0xe74] ss:$8 sps:$4 sm:$0xff]   ;;  %v6196_v0 = vld [vmem:[%s6638_s29 + $0x570] ss:$8 sps:$4 sm:$0xff]  }
 0x135   : > { %4467 = vmatprep.subr.bf16.mxu0 %v6113_v1  ;;  %v6199_v1 = vld [vmem:[%s6638_s29 + $0xe70] ss:$8 sps:$4 sm:$0xff]  }
 0x137   : > { %4099 = vmatpush1.bf16.msra.mxu1 %v6108_v2  ;;  %v6204_v2 = vld [vmem:[%s6638_s29 + $0x584] ss:$8 sps:$4 sm:$0xff]  }
 0x138   : > { %4468 = vmatpush1.bf16.msra.mxu0 %v6111_v3  ;;  %4100 = vmatprep.subr.bf16.mxu1 %v6116_v4  ;;  %v6207_v3 = vld [vmem:[%s6638_s29 + $0xe84] ss:$8 sps:$4 sm:$0xff]   ;;  %v6202_v4 = vld [vmem:[%s6638_s29 + $0x580] ss:$8 sps:$4 sm:$0xff]  }
 0x139   : > { %4469 = vmatprep.subr.bf16.mxu0 %v6119_v5  ;;  %v6205_v5 = vld [vmem:[%s6638_s29 + $0xe80] ss:$8 sps:$4 sm:$0xff]  }
 0x13b   : > { %4101 = vmatpush1.bf16.msra.mxu1 %v6114_v6  ;;  %v6210_v6 = vld [vmem:[%s6638_s29 + $0x594] ss:$8 sps:$4 sm:$0xff]  }
 0x13c   : > { %4470 = vmatpush1.bf16.msra.mxu0 %v6117_v7  ;;  %4102 = vmatprep.subr.bf16.mxu1 %v6122_v8  ;;  %v6213_v7 = vld [vmem:[%s6638_s29 + $0xe94] ss:$8 sps:$4 sm:$0xff]   ;;  %v6208_v8 = vld [vmem:[%s6638_s29 + $0x590] ss:$8 sps:$4 sm:$0xff]  }
 0x13d   : > { %4471 = vmatprep.subr.bf16.mxu0 %v6125_v9  ;;  %v6211_v9 = vld [vmem:[%s6638_s29 + $0xe90] ss:$8 sps:$4 sm:$0xff]  }
 0x13f   : > { %4103 = vmatpush1.bf16.msra.mxu1 %v6120_v10  ;;  %v6216_v10 = vld [vmem:[%s6638_s29 + $0x5a4] ss:$8 sps:$4 sm:$0xff]  }
 0x140   : > { %4472 = vmatpush1.bf16.msra.mxu0 %v6123_v11  ;;  %4104 = vmatprep.subr.bf16.mxu1 %v6128_v12  ;;  %v6219_v11 = vld [vmem:[%s6638_s29 + $0xea4] ss:$8 sps:$4 sm:$0xff]   ;;  %v6214_v12 = vld [vmem:[%s6638_s29 + $0x5a0] ss:$8 sps:$4 sm:$0xff]  }
 0x141   : > { %4473 = vmatprep.subr.bf16.mxu0 %v6131_v13  ;;  %v6217_v13 = vld [vmem:[%s6638_s29 + $0xea0] ss:$8 sps:$4 sm:$0xff]  }
 0x143   : > { %4105 = vmatpush1.bf16.msra.mxu1 %v6126_v14  ;;  %v6222_v14 = vld [vmem:[%s6638_s29 + $0x5b4] ss:$8 sps:$4 sm:$0xff]  }
 0x144   : > { %4474 = vmatpush1.bf16.msra.mxu0 %v6129_v15  ;;  %4106 = vmatprep.subr.bf16.mxu1 %v6134_v16  ;;  %v6225_v15 = vld [vmem:[%s6638_s29 + $0xeb4] ss:$8 sps:$4 sm:$0xff]   ;;  %v6220_v16 = vld [vmem:[%s6638_s29 + $0x5b0] ss:$8 sps:$4 sm:$0xff]  }
 0x145   : > { %4475 = vmatprep.subr.bf16.mxu0 %v6137_v17  ;;  %v6223_v17 = vld [vmem:[%s6638_s29 + $0xeb0] ss:$8 sps:$4 sm:$0xff]  }
 0x147   : > { %4107 = vmatpush1.bf16.msra.mxu1 %v6132_v19  ;;  %v6228_v19 = vld [vmem:[%s6638_s29 + $0x5c4] ss:$8 sps:$4 sm:$0xff]  }
 0x148   : > { %4476 = vmatpush1.bf16.msra.mxu0 %v6135_v21  ;;  %4108 = vmatprep.subr.bf16.mxu1 %v6140_v22  ;;  %v6231_v21 = vld [vmem:[%s6638_s29 + $0xec4] ss:$8 sps:$4 sm:$0xff]   ;;  %v6226_v22 = vld [vmem:[%s6638_s29 + $0x5c0] ss:$8 sps:$4 sm:$0xff]  }
 0x149   : > { %4477 = vmatprep.subr.bf16.mxu0 %v6143_v23  ;;  %v6229_v23 = vld [vmem:[%s6638_s29 + $0xec0] ss:$8 sps:$4 sm:$0xff]  }
 0x14b   : > { %4109 = vmatpush1.bf16.msra.mxu1 %v6138_v26  ;;  %v6234_v26 = vld [vmem:[%s6638_s29 + $0x5d4] ss:$8 sps:$4 sm:$0xff]  }
 0x14c   : > { %4478 = vmatpush1.bf16.msra.mxu0 %v6141_v27  ;;  %4110 = vmatprep.subr.bf16.mxu1 %v6146_v20  ;;  %v6237_v27 = vld [vmem:[%s6638_s29 + $0xed4] ss:$8 sps:$4 sm:$0xff]   ;;  %v6232_v20 = vld [vmem:[%s6638_s29 + $0x5d0] ss:$8 sps:$4 sm:$0xff]  }
 0x14d   : > { %4479 = vmatprep.subr.bf16.mxu0 %v6149_v28  ;;  %v6235_v28 = vld [vmem:[%s6638_s29 + $0xed0] ss:$8 sps:$4 sm:$0xff]  }
 0x14f   : > { %4111 = vmatpush1.bf16.msra.mxu1 %v6144_v30  ;;  %v6240_v30 = vld [vmem:[%s6638_s29 + $0x5e4] ss:$8 sps:$4 sm:$0xff]  }
 0x150   : > { %4480 = vmatpush1.bf16.msra.mxu0 %v6147_v31  ;;  %4121 = vmatprep.subr.bf16.mxu1 %v6154_v32  ;;  %v6243_v31 = vld [vmem:[%s6638_s29 + $0xee4] ss:$8 sps:$4 sm:$0xff]   ;;  %v6238_v32 = vld [vmem:[%s6638_s29 + $0x5e0] ss:$8 sps:$4 sm:$0xff]  }
 0x151   : > { %4490 = vmatprep.subr.bf16.mxu0 %v6159_v33  ;;  %v6241_v33 = vld [vmem:[%s6638_s29 + $0xee0] ss:$8 sps:$4 sm:$0xff]  }
 0x152   : > { %4113 = vmatmul.mubr.bf16.vlgmr.msra.gmra.mrb[0].mxu1 %v4919_v34  ;;  %v6246_v34 = vld [vmem:[%s6638_s29 + $0x5f4] ss:$8 sps:$4 sm:$0xff]  }
 0x153   : > { %4482 = vmatmul.mubr.bf16.vlgmr.msra.gmra.mrb[0].mxu0 %v4937_v35  ;;  %4122 = vmatpush1.bf16.msra.mxu1 %v6152_v36  ;;  %v6249_v35 = vld [vmem:[%s6638_s29 + $0xef4] ss:$8 sps:$4 sm:$0xff]   ;;  %v6244_v36 = vld [vmem:[%s6638_s29 + $0x5f0] ss:$8 sps:$4 sm:$0xff]  }
 0x154   : > { %4491 = vmatpush1.bf16.msra.mxu0 %v6157_v37  ;;  %4123 = vmatprep.subr.bf16.mxu1 %v6162_v38  ;;  %v6247_v37 = vld [vmem:[%s6638_s29 + $0xef0] ss:$8 sps:$4 sm:$0xff]   ;;  %v6254_v38 = vld [vmem:[%s6638_s29 + $0x604] ss:$8 sps:$4 sm:$0xff]  }
 0x155   : > { %4492 = vmatprep.subr.bf16.mxu0 %v6165_v39  ;;  %4153 = vmatprep.mubr.bf16.mxu1 %v4922_v40  ;;  %v6259_v39 = vld [vmem:[%s6638_s29 + $0xf04] ss:$8 sps:$4 sm:$0xff]   ;;  %v4921_v40 = vcombine.low %v7023_v24, %v7023_v24 }
 0x156   : > { %4522 = vmatprep.mubr.bf16.mxu0 %v4940_v18  ;;  %v4939_v18 = vcombine.low %v7026_v25, %v7026_v25 }
 0x157   : > { %4124 = vmatpush1.bf16.msra.mxu1 %v6160_v29  ;;  %v7105_v29 = vld [vmem:[%s6688_s10 + $0x30] sm:$0xff] }
 0x158   : > { %4493 = vmatpush1.bf16.msra.mxu0 %v6163_v41  ;;  %4125 = vmatprep.subr.bf16.mxu1 %v6168_v42  ;;  %v7108_v41 = vld [vmem:[%s6688_s10 + $0x78] sm:$0xff]  ;;  %v6252_v42 = vld [vmem:[%s6638_s29 + $0x600] ss:$8 sps:$4 sm:$0xff]   ;;  %v4924_v24 = vcombine.high %v7105_v29, %v7105_v29 }
 0x159   : > { %4494 = vmatprep.subr.bf16.mxu0 %v6171_v43  ;;  %v6257_v43 = vld [vmem:[%s6638_s29 + $0xf00] ss:$8 sps:$4 sm:$0xff]   ;;  %v4942_v25 = vcombine.high %v7108_v41, %v7108_v41 }
 0x15b   : > { %4126 = vmatpush1.bf16.msra.mxu1 %v6166_v44  ;;  %v6262_v44 = vld [vmem:[%s6638_s29 + $0x614] ss:$8 sps:$4 sm:$0xff]  }
 0x15c   : > { %4495 = vmatpush1.bf16.msra.mxu0 %v6169_v45  ;;  %4127 = vmatprep.subr.bf16.mxu1 %v6174_v46  ;;  %v6265_v45 = vld [vmem:[%s6638_s29 + $0xf14] ss:$8 sps:$4 sm:$0xff]   ;;  %v6260_v46 = vld [vmem:[%s6638_s29 + $0x610] ss:$8 sps:$4 sm:$0xff]  }
 0x15d   : > { %4496 = vmatprep.subr.bf16.mxu0 %v6177_v47  ;;  %v6263_v47 = vld [vmem:[%s6638_s29 + $0xf10] ss:$8 sps:$4 sm:$0xff]  }
 0x15f   : > { %4128 = vmatpush1.bf16.msra.mxu1 %v6172_v48  ;;  %v6268_v48 = vld [vmem:[%s6638_s29 + $0x624] ss:$8 sps:$4 sm:$0xff]  }
 0x160   : > { %4497 = vmatpush1.bf16.msra.mxu0 %v6175_v49  ;;  %4129 = vmatprep.subr.bf16.mxu1 %v6180_v50  ;;  %v6271_v49 = vld [vmem:[%s6638_s29 + $0xf24] ss:$8 sps:$4 sm:$0xff]   ;;  %v6266_v50 = vld [vmem:[%s6638_s29 + $0x620] ss:$8 sps:$4 sm:$0xff]  }
 0x161   : > { %4498 = vmatprep.subr.bf16.mxu0 %v6183_v51  ;;  %v6269_v51 = vld [vmem:[%s6638_s29 + $0xf20] ss:$8 sps:$4 sm:$0xff]  }
 0x163   : > { %4130 = vmatpush1.bf16.msra.mxu1 %v6178_v52  ;;  %v6274_v52 = vld [vmem:[%s6638_s29 + $0x634] ss:$8 sps:$4 sm:$0xff]  }
 0x164   : > { %4499 = vmatpush1.bf16.msra.mxu0 %v6181_v53  ;;  %4131 = vmatprep.subr.bf16.mxu1 %v6186_v54  ;;  %v6277_v53 = vld [vmem:[%s6638_s29 + $0xf34] ss:$8 sps:$4 sm:$0xff]   ;;  %v6272_v54 = vld [vmem:[%s6638_s29 + $0x630] ss:$8 sps:$4 sm:$0xff]  }
 0x165   : > { %4500 = vmatprep.subr.bf16.mxu0 %v6189_v55  ;;  %v6275_v55 = vld [vmem:[%s6638_s29 + $0xf30] ss:$8 sps:$4 sm:$0xff]  }
 0x167   : > { %4132 = vmatpush1.bf16.msra.mxu1 %v6184_v56  ;;  %v6280_v56 = vld [vmem:[%s6638_s29 + $0x644] ss:$8 sps:$4 sm:$0xff]  }
 0x168   : > { %4501 = vmatpush1.bf16.msra.mxu0 %v6187_v57  ;;  %4133 = vmatprep.subr.bf16.mxu1 %v6192_v58  ;;  %v6283_v57 = vld [vmem:[%s6638_s29 + $0xf44] ss:$8 sps:$4 sm:$0xff]   ;;  %v6278_v58 = vld [vmem:[%s6638_s29 + $0x640] ss:$8 sps:$4 sm:$0xff]  }
 0x169   : > { %4502 = vmatprep.subr.bf16.mxu0 %v6195_v59  ;;  %v6281_v59 = vld [vmem:[%s6638_s29 + $0xf40] ss:$8 sps:$4 sm:$0xff]  }
 0x16b   : > { %4134 = vmatpush1.bf16.msra.mxu1 %v6190_v60  ;;  %v6286_v60 = vld [vmem:[%s6638_s29 + $0x654] ss:$8 sps:$4 sm:$0xff]  }
 0x16c   : > { %4503 = vmatpush1.bf16.msra.mxu0 %v6193_v61  ;;  %4135 = vmatprep.subr.bf16.mxu1 %v6198_v62  ;;  %v6289_v61 = vld [vmem:[%s6638_s29 + $0xf54] ss:$8 sps:$4 sm:$0xff]   ;;  %v6284_v62 = vld [vmem:[%s6638_s29 + $0x650] ss:$8 sps:$4 sm:$0xff]  }
 0x16d   : > { %4504 = vmatprep.subr.bf16.mxu0 %v6201_v63  ;;  %v6287_v63 = vld [vmem:[%s6638_s29 + $0xf50] ss:$8 sps:$4 sm:$0xff]  }
 0x16f   : > { %4136 = vmatpush1.bf16.msra.mxu1 %v6196_v0  ;;  %v6292_v0 = vld [vmem:[%s6638_s29 + $0x664] ss:$8 sps:$4 sm:$0xff]  }
 0x170   : > { %4505 = vmatpush1.bf16.msra.mxu0 %v6199_v1  ;;  %4137 = vmatprep.subr.bf16.mxu1 %v6204_v2  ;;  %v6295_v1 = vld [vmem:[%s6638_s29 + $0xf64] ss:$8 sps:$4 sm:$0xff]   ;;  %v6290_v2 = vld [vmem:[%s6638_s29 + $0x660] ss:$8 sps:$4 sm:$0xff]  }
 0x171   : > { %4506 = vmatprep.subr.bf16.mxu0 %v6207_v3  ;;  %v6293_v3 = vld [vmem:[%s6638_s29 + $0xf60] ss:$8 sps:$4 sm:$0xff]  }
 0x173   : > { %4138 = vmatpush1.bf16.msra.mxu1 %v6202_v4  ;;  %v6298_v4 = vld [vmem:[%s6638_s29 + $0x674] ss:$8 sps:$4 sm:$0xff]  }
 0x174   : > { %4507 = vmatpush1.bf16.msra.mxu0 %v6205_v5  ;;  %4139 = vmatprep.subr.bf16.mxu1 %v6210_v6  ;;  %v6301_v5 = vld [vmem:[%s6638_s29 + $0xf74] ss:$8 sps:$4 sm:$0xff]   ;;  %v6296_v6 = vld [vmem:[%s6638_s29 + $0x670] ss:$8 sps:$4 sm:$0xff]  }
 0x175   : > { %4508 = vmatprep.subr.bf16.mxu0 %v6213_v7  ;;  %v6299_v7 = vld [vmem:[%s6638_s29 + $0xf70] ss:$8 sps:$4 sm:$0xff]  }
 0x177   : > { %4140 = vmatpush1.bf16.msra.mxu1 %v6208_v8  ;;  %v6304_v8 = vld [vmem:[%s6638_s29 + $0x684] ss:$8 sps:$4 sm:$0xff]  }
 0x178   : > { %4509 = vmatpush1.bf16.msra.mxu0 %v6211_v9  ;;  %4141 = vmatprep.subr.bf16.mxu1 %v6216_v10  ;;  %v6307_v9 = vld [vmem:[%s6638_s29 + $0xf84] ss:$8 sps:$4 sm:$0xff]   ;;  %v6302_v10 = vld [vmem:[%s6638_s29 + $0x680] ss:$8 sps:$4 sm:$0xff]  }
 0x179   : > { %4510 = vmatprep.subr.bf16.mxu0 %v6219_v11  ;;  %v6305_v11 = vld [vmem:[%s6638_s29 + $0xf80] ss:$8 sps:$4 sm:$0xff]  }
 0x17b   : > { %4142 = vmatpush1.bf16.msra.mxu1 %v6214_v12  ;;  %v6310_v12 = vld [vmem:[%s6638_s29 + $0x694] ss:$8 sps:$4 sm:$0xff]  }
 0x17c   : > { %4511 = vmatpush1.bf16.msra.mxu0 %v6217_v13  ;;  %4143 = vmatprep.subr.bf16.mxu1 %v6222_v14  ;;  %v6313_v13 = vld [vmem:[%s6638_s29 + $0xf94] ss:$8 sps:$4 sm:$0xff]   ;;  %v6308_v14 = vld [vmem:[%s6638_s29 + $0x690] ss:$8 sps:$4 sm:$0xff]  }
 0x17d   : > { %4512 = vmatprep.subr.bf16.mxu0 %v6225_v15  ;;  %v6311_v15 = vld [vmem:[%s6638_s29 + $0xf90] ss:$8 sps:$4 sm:$0xff]  }
 0x17f   : > { %4144 = vmatpush1.bf16.msra.mxu1 %v6220_v16  ;;  %v6316_v16 = vld [vmem:[%s6638_s29 + $0x6a4] ss:$8 sps:$4 sm:$0xff]  }
 0x180   : > { %4513 = vmatpush1.bf16.msra.mxu0 %v6223_v17  ;;  %4145 = vmatprep.subr.bf16.mxu1 %v6228_v19  ;;  %v6319_v17 = vld [vmem:[%s6638_s29 + $0xfa4] ss:$8 sps:$4 sm:$0xff]   ;;  %v6314_v19 = vld [vmem:[%s6638_s29 + $0x6a0] ss:$8 sps:$4 sm:$0xff]  }
 0x181   : > { %4514 = vmatprep.subr.bf16.mxu0 %v6231_v21  ;;  %v6317_v21 = vld [vmem:[%s6638_s29 + $0xfa0] ss:$8 sps:$4 sm:$0xff]  }
 0x183   : > { %4146 = vmatpush1.bf16.msra.mxu1 %v6226_v22  ;;  %v6322_v22 = vld [vmem:[%s6638_s29 + $0x6b4] ss:$8 sps:$4 sm:$0xff]  }
 0x184   : > { %4515 = vmatpush1.bf16.msra.mxu0 %v6229_v23  ;;  %4147 = vmatprep.subr.bf16.mxu1 %v6234_v26  ;;  %v6325_v23 = vld [vmem:[%s6638_s29 + $0xfb4] ss:$8 sps:$4 sm:$0xff]   ;;  %v6320_v26 = vld [vmem:[%s6638_s29 + $0x6b0] ss:$8 sps:$4 sm:$0xff]  }
 0x185   : > { %4516 = vmatprep.subr.bf16.mxu0 %v6237_v27  ;;  %v6323_v27 = vld [vmem:[%s6638_s29 + $0xfb0] ss:$8 sps:$4 sm:$0xff]  }
 0x187   : > { %4148 = vmatpush1.bf16.msra.mxu1 %v6232_v20  ;;  %v6328_v20 = vld [vmem:[%s6638_s29 + $0x6c4] ss:$8 sps:$4 sm:$0xff]  }
 0x188   : > { %4517 = vmatpush1.bf16.msra.mxu0 %v6235_v28  ;;  %4149 = vmatprep.subr.bf16.mxu1 %v6240_v30  ;;  %v6331_v28 = vld [vmem:[%s6638_s29 + $0xfc4] ss:$8 sps:$4 sm:$0xff]   ;;  %v6326_v30 = vld [vmem:[%s6638_s29 + $0x6c0] ss:$8 sps:$4 sm:$0xff]  }
 0x189   : > { %4518 = vmatprep.subr.bf16.mxu0 %v6243_v31  ;;  %v6329_v31 = vld [vmem:[%s6638_s29 + $0xfc0] ss:$8 sps:$4 sm:$0xff]  }
 0x18b   : > { %4150 = vmatpush1.bf16.msra.mxu1 %v6238_v32  ;;  %v6334_v32 = vld [vmem:[%s6638_s29 + $0x6d4] ss:$8 sps:$4 sm:$0xff]  }
 0x18c   : > { %4519 = vmatpush1.bf16.msra.mxu0 %v6241_v33  ;;  %4151 = vmatprep.subr.bf16.mxu1 %v6246_v34  ;;  %v6337_v33 = vld [vmem:[%s6638_s29 + $0xfd4] ss:$8 sps:$4 sm:$0xff]   ;;  %v6332_v34 = vld [vmem:[%s6638_s29 + $0x6d0] ss:$8 sps:$4 sm:$0xff]  }
 0x18d   : > { %4520 = vmatprep.subr.bf16.mxu0 %v6249_v35  ;;  %v6335_v35 = vld [vmem:[%s6638_s29 + $0xfd0] ss:$8 sps:$4 sm:$0xff]  }
 0x18f   : > { %4152 = vmatpush1.bf16.msra.mxu1 %v6244_v36  ;;  %v6340_v36 = vld [vmem:[%s6638_s29 + $0x6e4] ss:$8 sps:$4 sm:$0xff]  }
 0x190   : > { %4521 = vmatpush1.bf16.msra.mxu0 %v6247_v37  ;;  %4162 = vmatprep.subr.bf16.mxu1 %v6254_v38  ;;  %v6343_v37 = vld [vmem:[%s6638_s29 + $0xfe4] ss:$8 sps:$4 sm:$0xff]   ;;  %v6338_v38 = vld [vmem:[%s6638_s29 + $0x6e0] ss:$8 sps:$4 sm:$0xff]  }
 0x191   : > { %4531 = vmatprep.subr.bf16.mxu0 %v6259_v39  ;;  %v6341_v39 = vld [vmem:[%s6638_s29 + $0xfe0] ss:$8 sps:$4 sm:$0xff]  }
 0x192   : > { %4154 = vmatmul.mubr.bf16.vlgmr.msra.gmra.mrb[0].mxu1 %v4921_v40  ;;  %v6346_v40 = vld [vmem:[%s6638_s29 + $0x6f4] ss:$8 sps:$4 sm:$0xff]  }
 0x193   : > { %4523 = vmatmul.mubr.bf16.vlgmr.msra.gmra.mrb[0].mxu0 %v4939_v18  ;;  %4163 = vmatpush1.bf16.msra.mxu1 %v6252_v42  ;;  %v6349_v18 = vld [vmem:[%s6638_s29 + $0xff4] ss:$8 sps:$4 sm:$0xff]   ;;  %v6344_v42 = vld [vmem:[%s6638_s29 + $0x6f0] ss:$8 sps:$4 sm:$0xff]  }
 0x194   : > { %4532 = vmatpush1.bf16.msra.mxu0 %v6257_v43  ;;  %4164 = vmatprep.subr.bf16.mxu1 %v6262_v44  ;;  %v6347_v43 = vld [vmem:[%s6638_s29 + $0xff0] ss:$8 sps:$4 sm:$0xff]   ;;  %v6354_v44 = vld [vmem:[%s6638_s29 + $0x704] ss:$8 sps:$4 sm:$0xff]  }
 0x195   : > { %4533 = vmatprep.subr.bf16.mxu0 %v6265_v45  ;;  %4194 = vmatprep.mubr.bf16.mxu1 %v4924_v24  ;;  %v6359_v45 = vld [vmem:[%s6638_s29 + $0x1004] ss:$8 sps:$4 sm:$0xff]   ;;  %v4923_v24 = vcombine.low %v7105_v29, %v7105_v29 }
 0x196   : > { %4563 = vmatprep.mubr.bf16.mxu0 %v4942_v25  ;;  %v4941_v25 = vcombine.low %v7108_v41, %v7108_v41 }
 0x197   : > { %4165 = vmatpush1.bf16.msra.mxu1 %v6260_v46  ;;  %v7183_v46 = vld [vmem:[%s6688_s10 + $0x38] sm:$0xff] }
 0x198   : > { %4534 = vmatpush1.bf16.msra.mxu0 %v6263_v47  ;;  %4166 = vmatprep.subr.bf16.mxu1 %v6268_v48  ;;  %v7186_v47 = vld [vmem:[%s6688_s10 + $0x80] sm:$0xff]  ;;  %v4926_v29 = vcombine.high %v7183_v46, %v7183_v46 }
 0x199   : > { %4535 = vmatprep.subr.bf16.mxu0 %v6271_v49  ;;  %v6352_v48 = vld [vmem:[%s6638_s29 + $0x700] ss:$8 sps:$4 sm:$0xff]   ;;  %v4944_v41 = vcombine.high %v7186_v47, %v7186_v47 }
 0x19a   : > { %v6357_v49 = vld [vmem:[%s6638_s29 + $0x1000] ss:$8 sps:$4 sm:$0xff]  }
 0x19b   : > { %4167 = vmatpush1.bf16.msra.mxu1 %v6266_v50  ;;  %v6362_v50 = vld [vmem:[%s6638_s29 + $0x714] ss:$8 sps:$4 sm:$0xff]  }
 0x19c   : > { %4536 = vmatpush1.bf16.msra.mxu0 %v6269_v51  ;;  %4168 = vmatprep.subr.bf16.mxu1 %v6274_v52  ;;  %v6365_v51 = vld [vmem:[%s6638_s29 + $0x1014] ss:$8 sps:$4 sm:$0xff]   ;;  %v6360_v52 = vld [vmem:[%s6638_s29 + $0x710] ss:$8 sps:$4 sm:$0xff]  }
 0x19d   : > { %4537 = vmatprep.subr.bf16.mxu0 %v6277_v53  ;;  %v6363_v53 = vld [vmem:[%s6638_s29 + $0x1010] ss:$8 sps:$4 sm:$0xff]  }
 0x19f   : > { %4169 = vmatpush1.bf16.msra.mxu1 %v6272_v54  ;;  %v6368_v54 = vld [vmem:[%s6638_s29 + $0x724] ss:$8 sps:$4 sm:$0xff]  }
 0x1a0   : > { %4538 = vmatpush1.bf16.msra.mxu0 %v6275_v55  ;;  %4170 = vmatprep.subr.bf16.mxu1 %v6280_v56  ;;  %v6371_v55 = vld [vmem:[%s6638_s29 + $0x1024] ss:$8 sps:$4 sm:$0xff]   ;;  %v6366_v56 = vld [vmem:[%s6638_s29 + $0x720] ss:$8 sps:$4 sm:$0xff]  }
 0x1a1   : > { %4539 = vmatprep.subr.bf16.mxu0 %v6283_v57  ;;  %v6369_v57 = vld [vmem:[%s6638_s29 + $0x1020] ss:$8 sps:$4 sm:$0xff]  }
 0x1a3   : > { %4171 = vmatpush1.bf16.msra.mxu1 %v6278_v58  ;;  %v6374_v58 = vld [vmem:[%s6638_s29 + $0x734] ss:$8 sps:$4 sm:$0xff]  }
 0x1a4   : > { %4540 = vmatpush1.bf16.msra.mxu0 %v6281_v59  ;;  %4172 = vmatprep.subr.bf16.mxu1 %v6286_v60  ;;  %v6377_v59 = vld [vmem:[%s6638_s29 + $0x1034] ss:$8 sps:$4 sm:$0xff]   ;;  %v6372_v60 = vld [vmem:[%s6638_s29 + $0x730] ss:$8 sps:$4 sm:$0xff]  }
 0x1a5   : > { %4541 = vmatprep.subr.bf16.mxu0 %v6289_v61  ;;  %v6375_v61 = vld [vmem:[%s6638_s29 + $0x1030] ss:$8 sps:$4 sm:$0xff]  }
 0x1a7   : > { %4173 = vmatpush1.bf16.msra.mxu1 %v6284_v62  ;;  %v6380_v62 = vld [vmem:[%s6638_s29 + $0x744] ss:$8 sps:$4 sm:$0xff]  }
 0x1a8   : > { %4542 = vmatpush1.bf16.msra.mxu0 %v6287_v63  ;;  %4174 = vmatprep.subr.bf16.mxu1 %v6292_v0  ;;  %v6383_v63 = vld [vmem:[%s6638_s29 + $0x1044] ss:$8 sps:$4 sm:$0xff]   ;;  %v6378_v0 = vld [vmem:[%s6638_s29 + $0x740] ss:$8 sps:$4 sm:$0xff]  }
 0x1a9   : > { %4543 = vmatprep.subr.bf16.mxu0 %v6295_v1  ;;  %v6381_v1 = vld [vmem:[%s6638_s29 + $0x1040] ss:$8 sps:$4 sm:$0xff]  }
 0x1ab   : > { %4175 = vmatpush1.bf16.msra.mxu1 %v6290_v2  ;;  %v6386_v2 = vld [vmem:[%s6638_s29 + $0x754] ss:$8 sps:$4 sm:$0xff]  }
 0x1ac   : > { %4544 = vmatpush1.bf16.msra.mxu0 %v6293_v3  ;;  %4176 = vmatprep.subr.bf16.mxu1 %v6298_v4  ;;  %v6389_v3 = vld [vmem:[%s6638_s29 + $0x1054] ss:$8 sps:$4 sm:$0xff]   ;;  %v6384_v4 = vld [vmem:[%s6638_s29 + $0x750] ss:$8 sps:$4 sm:$0xff]  }
 0x1ad   : > { %4545 = vmatprep.subr.bf16.mxu0 %v6301_v5  ;;  %v6387_v5 = vld [vmem:[%s6638_s29 + $0x1050] ss:$8 sps:$4 sm:$0xff]  }
 0x1af   : > { %4177 = vmatpush1.bf16.msra.mxu1 %v6296_v6  ;;  %v6392_v6 = vld [vmem:[%s6638_s29 + $0x764] ss:$8 sps:$4 sm:$0xff]  }
 0x1b0   : > { %4546 = vmatpush1.bf16.msra.mxu0 %v6299_v7  ;;  %4178 = vmatprep.subr.bf16.mxu1 %v6304_v8  ;;  %v6395_v7 = vld [vmem:[%s6638_s29 + $0x1064] ss:$8 sps:$4 sm:$0xff]   ;;  %v6390_v8 = vld [vmem:[%s6638_s29 + $0x760] ss:$8 sps:$4 sm:$0xff]  }
 0x1b1   : > { %4547 = vmatprep.subr.bf16.mxu0 %v6307_v9  ;;  %v6393_v9 = vld [vmem:[%s6638_s29 + $0x1060] ss:$8 sps:$4 sm:$0xff]  }
 0x1b3   : > { %4179 = vmatpush1.bf16.msra.mxu1 %v6302_v10  ;;  %v6398_v10 = vld [vmem:[%s6638_s29 + $0x774] ss:$8 sps:$4 sm:$0xff]  }
 0x1b4   : > { %4548 = vmatpush1.bf16.msra.mxu0 %v6305_v11  ;;  %4180 = vmatprep.subr.bf16.mxu1 %v6310_v12  ;;  %v6401_v11 = vld [vmem:[%s6638_s29 + $0x1074] ss:$8 sps:$4 sm:$0xff]   ;;  %v6396_v12 = vld [vmem:[%s6638_s29 + $0x770] ss:$8 sps:$4 sm:$0xff]  }
 0x1b5   : > { %4549 = vmatprep.subr.bf16.mxu0 %v6313_v13  ;;  %v6399_v13 = vld [vmem:[%s6638_s29 + $0x1070] ss:$8 sps:$4 sm:$0xff]  }
 0x1b7   : > { %4181 = vmatpush1.bf16.msra.mxu1 %v6308_v14  ;;  %v6404_v14 = vld [vmem:[%s6638_s29 + $0x784] ss:$8 sps:$4 sm:$0xff]  }
 0x1b8   : > { %4550 = vmatpush1.bf16.msra.mxu0 %v6311_v15  ;;  %4182 = vmatprep.subr.bf16.mxu1 %v6316_v16  ;;  %v6407_v15 = vld [vmem:[%s6638_s29 + $0x1084] ss:$8 sps:$4 sm:$0xff]   ;;  %v6402_v16 = vld [vmem:[%s6638_s29 + $0x780] ss:$8 sps:$4 sm:$0xff]  }
 0x1b9   : > { %4551 = vmatprep.subr.bf16.mxu0 %v6319_v17  ;;  %v6405_v17 = vld [vmem:[%s6638_s29 + $0x1080] ss:$8 sps:$4 sm:$0xff]  }
 0x1bb   : > { %4183 = vmatpush1.bf16.msra.mxu1 %v6314_v19  ;;  %v6410_v19 = vld [vmem:[%s6638_s29 + $0x794] ss:$8 sps:$4 sm:$0xff]  }
 0x1bc   : > { %4552 = vmatpush1.bf16.msra.mxu0 %v6317_v21  ;;  %4184 = vmatprep.subr.bf16.mxu1 %v6322_v22  ;;  %v6413_v21 = vld [vmem:[%s6638_s29 + $0x1094] ss:$8 sps:$4 sm:$0xff]   ;;  %v6408_v22 = vld [vmem:[%s6638_s29 + $0x790] ss:$8 sps:$4 sm:$0xff]  }
 0x1bd   : > { %4553 = vmatprep.subr.bf16.mxu0 %v6325_v23  ;;  %v6411_v23 = vld [vmem:[%s6638_s29 + $0x1090] ss:$8 sps:$4 sm:$0xff]  }
 0x1bf   : > { %4185 = vmatpush1.bf16.msra.mxu1 %v6320_v26  ;;  %v6416_v26 = vld [vmem:[%s6638_s29 + $0x7a4] ss:$8 sps:$4 sm:$0xff]  }
 0x1c0   : > { %4554 = vmatpush1.bf16.msra.mxu0 %v6323_v27  ;;  %4186 = vmatprep.subr.bf16.mxu1 %v6328_v20  ;;  %v6419_v27 = vld [vmem:[%s6638_s29 + $0x10a4] ss:$8 sps:$4 sm:$0xff]   ;;  %v6414_v20 = vld [vmem:[%s6638_s29 + $0x7a0] ss:$8 sps:$4 sm:$0xff]  }
 0x1c1   : > { %4555 = vmatprep.subr.bf16.mxu0 %v6331_v28  ;;  %v6417_v28 = vld [vmem:[%s6638_s29 + $0x10a0] ss:$8 sps:$4 sm:$0xff]  }
 0x1c3   : > { %4187 = vmatpush1.bf16.msra.mxu1 %v6326_v30  ;;  %v6422_v30 = vld [vmem:[%s6638_s29 + $0x7b4] ss:$8 sps:$4 sm:$0xff]  }
 0x1c4   : > { %4556 = vmatpush1.bf16.msra.mxu0 %v6329_v31  ;;  %4188 = vmatprep.subr.bf16.mxu1 %v6334_v32  ;;  %v6425_v31 = vld [vmem:[%s6638_s29 + $0x10b4] ss:$8 sps:$4 sm:$0xff]   ;;  %v6420_v32 = vld [vmem:[%s6638_s29 + $0x7b0] ss:$8 sps:$4 sm:$0xff]  }
 0x1c5   : > { %4557 = vmatprep.subr.bf16.mxu0 %v6337_v33  ;;  %v6423_v33 = vld [vmem:[%s6638_s29 + $0x10b0] ss:$8 sps:$4 sm:$0xff]  }
 0x1c7   : > { %4189 = vmatpush1.bf16.msra.mxu1 %v6332_v34  ;;  %v6428_v34 = vld [vmem:[%s6638_s29 + $0x7c4] ss:$8 sps:$4 sm:$0xff]  }
 0x1c8   : > { %4558 = vmatpush1.bf16.msra.mxu0 %v6335_v35  ;;  %4190 = vmatprep.subr.bf16.mxu1 %v6340_v36  ;;  %v6431_v35 = vld [vmem:[%s6638_s29 + $0x10c4] ss:$8 sps:$4 sm:$0xff]   ;;  %v6426_v36 = vld [vmem:[%s6638_s29 + $0x7c0] ss:$8 sps:$4 sm:$0xff]  }
 0x1c9   : > { %4559 = vmatprep.subr.bf16.mxu0 %v6343_v37  ;;  %v6429_v37 = vld [vmem:[%s6638_s29 + $0x10c0] ss:$8 sps:$4 sm:$0xff]  }
 0x1cb   : > { %4191 = vmatpush1.bf16.msra.mxu1 %v6338_v38  ;;  %v6434_v38 = vld [vmem:[%s6638_s29 + $0x7d4] ss:$8 sps:$4 sm:$0xff]  }
 0x1cc   : > { %4560 = vmatpush1.bf16.msra.mxu0 %v6341_v39  ;;  %4192 = vmatprep.subr.bf16.mxu1 %v6346_v40  ;;  %v6437_v39 = vld [vmem:[%s6638_s29 + $0x10d4] ss:$8 sps:$4 sm:$0xff]   ;;  %v6432_v40 = vld [vmem:[%s6638_s29 + $0x7d0] ss:$8 sps:$4 sm:$0xff]  }
 0x1cd   : > { %4561 = vmatprep.subr.bf16.mxu0 %v6349_v18  ;;  %v6435_v18 = vld [vmem:[%s6638_s29 + $0x10d0] ss:$8 sps:$4 sm:$0xff]  }
 0x1cf   : > { %4193 = vmatpush1.bf16.msra.mxu1 %v6344_v42  ;;  %v6440_v42 = vld [vmem:[%s6638_s29 + $0x7e4] ss:$8 sps:$4 sm:$0xff]  }
 0x1d0   : > { %4562 = vmatpush1.bf16.msra.mxu0 %v6347_v43  ;;  %4203 = vmatprep.subr.bf16.mxu1 %v6354_v44  ;;  %v6443_v43 = vld [vmem:[%s6638_s29 + $0x10e4] ss:$8 sps:$4 sm:$0xff]   ;;  %v6438_v44 = vld [vmem:[%s6638_s29 + $0x7e0] ss:$8 sps:$4 sm:$0xff]  }
 0x1d1   : > { %4572 = vmatprep.subr.bf16.mxu0 %v6359_v45  ;;  %v6441_v45 = vld [vmem:[%s6638_s29 + $0x10e0] ss:$8 sps:$4 sm:$0xff]  }
 0x1d2   : > { %4195 = vmatmul.mubr.bf16.vlgmr.msra.gmra.mrb[0].mxu1 %v4923_v24  ;;  %v6446_v24 = vld [vmem:[%s6638_s29 + $0x7f4] ss:$8 sps:$4 sm:$0xff]  }
 0x1d3   : > { %4564 = vmatmul.mubr.bf16.vlgmr.msra.gmra.mrb[0].mxu0 %v4941_v25  ;;  %4204 = vmatpush1.bf16.msra.mxu1 %v6352_v48  ;;  %v6449_v25 = vld [vmem:[%s6638_s29 + $0x10f4] ss:$8 sps:$4 sm:$0xff]   ;;  %v6444_v48 = vld [vmem:[%s6638_s29 + $0x7f0] ss:$8 sps:$4 sm:$0xff]  }
 0x1d4   : > { %4573 = vmatpush1.bf16.msra.mxu0 %v6357_v49  ;;  %4205 = vmatprep.subr.bf16.mxu1 %v6362_v50  ;;  %v6447_v49 = vld [vmem:[%s6638_s29 + $0x10f0] ss:$8 sps:$4 sm:$0xff]   ;;  %v6454_v50 = vld [vmem:[%s6638_s29 + $0x804] ss:$8 sps:$4 sm:$0xff]  }
 0x1d5   : > { %4574 = vmatprep.subr.bf16.mxu0 %v6365_v51  ;;  %4235 = vmatprep.mubr.bf16.mxu1 %v4926_v29  ;;  %v6459_v51 = vld [vmem:[%s6638_s29 + $0x1104] ss:$8 sps:$4 sm:$0xff]   ;;  %v4925_v29 = vcombine.low %v7183_v46, %v7183_v46 }
 0x1d6   : > { %4604 = vmatprep.mubr.bf16.mxu0 %v4944_v41  ;;  %v4943_v41 = vcombine.low %v7186_v47, %v7186_v47 }
 0x1d7   : > { %4206 = vmatpush1.bf16.msra.mxu1 %v6360_v52  ;;  %v7261_v52 = vld [vmem:[%s6688_s10 + $0x40] sm:$0xff] }
 0x1d8   : > { %4575 = vmatpush1.bf16.msra.mxu0 %v6363_v53  ;;  %4207 = vmatprep.subr.bf16.mxu1 %v6368_v54  ;;  %v7264_v53 = vld [vmem:[%s6688_s10 + $0x88] sm:$0xff]  ;;  %v4928_v46 = vcombine.high %v7261_v52, %v7261_v52 }
 0x1d9   : > { %4576 = vmatprep.subr.bf16.mxu0 %v6371_v55  ;;  %v6452_v54 = vld [vmem:[%s6638_s29 + $0x800] ss:$8 sps:$4 sm:$0xff]   ;;  %v4946_v47 = vcombine.high %v7264_v53, %v7264_v53 }
 0x1da   : > { %v6457_v55 = vld [vmem:[%s6638_s29 + $0x1100] ss:$8 sps:$4 sm:$0xff]  }
 0x1db   : > { %4208 = vmatpush1.bf16.msra.mxu1 %v6366_v56  ;;  %v6462_v56 = vld [vmem:[%s6638_s29 + $0x814] ss:$8 sps:$4 sm:$0xff]  }
 0x1dc   : > { %4577 = vmatpush1.bf16.msra.mxu0 %v6369_v57  ;;  %4209 = vmatprep.subr.bf16.mxu1 %v6374_v58  ;;  %v6465_v57 = vld [vmem:[%s6638_s29 + $0x1114] ss:$8 sps:$4 sm:$0xff]   ;;  %v6460_v58 = vld [vmem:[%s6638_s29 + $0x810] ss:$8 sps:$4 sm:$0xff]  }
 0x1dd   : > { %4578 = vmatprep.subr.bf16.mxu0 %v6377_v59  ;;  %v6463_v59 = vld [vmem:[%s6638_s29 + $0x1110] ss:$8 sps:$4 sm:$0xff]  }
 0x1df   : > { %4210 = vmatpush1.bf16.msra.mxu1 %v6372_v60  ;;  %v6468_v60 = vld [vmem:[%s6638_s29 + $0x824] ss:$8 sps:$4 sm:$0xff]  }
 0x1e0   : > { %4579 = vmatpush1.bf16.msra.mxu0 %v6375_v61  ;;  %4211 = vmatprep.subr.bf16.mxu1 %v6380_v62  ;;  %v6471_v61 = vld [vmem:[%s6638_s29 + $0x1124] ss:$8 sps:$4 sm:$0xff]   ;;  %v6466_v62 = vld [vmem:[%s6638_s29 + $0x820] ss:$8 sps:$4 sm:$0xff]  }
 0x1e1   : > { %4580 = vmatprep.subr.bf16.mxu0 %v6383_v63  ;;  %v6469_v63 = vld [vmem:[%s6638_s29 + $0x1120] ss:$8 sps:$4 sm:$0xff]  }
 0x1e3   : > { %4212 = vmatpush1.bf16.msra.mxu1 %v6378_v0  ;;  %v6474_v0 = vld [vmem:[%s6638_s29 + $0x834] ss:$8 sps:$4 sm:$0xff]  }
 0x1e4   : > { %4581 = vmatpush1.bf16.msra.mxu0 %v6381_v1  ;;  %4213 = vmatprep.subr.bf16.mxu1 %v6386_v2  ;;  %v6477_v1 = vld [vmem:[%s6638_s29 + $0x1134] ss:$8 sps:$4 sm:$0xff]   ;;  %v6472_v2 = vld [vmem:[%s6638_s29 + $0x830] ss:$8 sps:$4 sm:$0xff]  }
 0x1e5   : > { %4582 = vmatprep.subr.bf16.mxu0 %v6389_v3  ;;  %v6475_v3 = vld [vmem:[%s6638_s29 + $0x1130] ss:$8 sps:$4 sm:$0xff]  }
 0x1e7   : > { %4214 = vmatpush1.bf16.msra.mxu1 %v6384_v4  ;;  %v6480_v4 = vld [vmem:[%s6638_s29 + $0x844] ss:$8 sps:$4 sm:$0xff]  }
 0x1e8   : > { %4583 = vmatpush1.bf16.msra.mxu0 %v6387_v5  ;;  %4215 = vmatprep.subr.bf16.mxu1 %v6392_v6  ;;  %v6483_v5 = vld [vmem:[%s6638_s29 + $0x1144] ss:$8 sps:$4 sm:$0xff]   ;;  %v6478_v6 = vld [vmem:[%s6638_s29 + $0x840] ss:$8 sps:$4 sm:$0xff]  }
 0x1e9   : > { %4584 = vmatprep.subr.bf16.mxu0 %v6395_v7  ;;  %v6481_v7 = vld [vmem:[%s6638_s29 + $0x1140] ss:$8 sps:$4 sm:$0xff]  }
 0x1eb   : > { %4216 = vmatpush1.bf16.msra.mxu1 %v6390_v8  ;;  %v6486_v8 = vld [vmem:[%s6638_s29 + $0x854] ss:$8 sps:$4 sm:$0xff]  }
 0x1ec   : > { %4585 = vmatpush1.bf16.msra.mxu0 %v6393_v9  ;;  %4217 = vmatprep.subr.bf16.mxu1 %v6398_v10  ;;  %v6489_v9 = vld [vmem:[%s6638_s29 + $0x1154] ss:$8 sps:$4 sm:$0xff]   ;;  %v6484_v10 = vld [vmem:[%s6638_s29 + $0x850] ss:$8 sps:$4 sm:$0xff]  }
 0x1ed   : > { %4586 = vmatprep.subr.bf16.mxu0 %v6401_v11  ;;  %v6487_v11 = vld [vmem:[%s6638_s29 + $0x1150] ss:$8 sps:$4 sm:$0xff]  }
 0x1ef   : > { %4218 = vmatpush1.bf16.msra.mxu1 %v6396_v12  ;;  %v6492_v12 = vld [vmem:[%s6638_s29 + $0x864] ss:$8 sps:$4 sm:$0xff]  }
 0x1f0   : > { %4587 = vmatpush1.bf16.msra.mxu0 %v6399_v13  ;;  %4219 = vmatprep.subr.bf16.mxu1 %v6404_v14  ;;  %v6495_v13 = vld [vmem:[%s6638_s29 + $0x1164] ss:$8 sps:$4 sm:$0xff]   ;;  %v6490_v14 = vld [vmem:[%s6638_s29 + $0x860] ss:$8 sps:$4 sm:$0xff]  }
 0x1f1   : > { %4588 = vmatprep.subr.bf16.mxu0 %v6407_v15  ;;  %v6493_v15 = vld [vmem:[%s6638_s29 + $0x1160] ss:$8 sps:$4 sm:$0xff]  }
 0x1f3   : > { %4220 = vmatpush1.bf16.msra.mxu1 %v6402_v16  ;;  %v6498_v16 = vld [vmem:[%s6638_s29 + $0x874] ss:$8 sps:$4 sm:$0xff]  }
 0x1f4   : > { %4589 = vmatpush1.bf16.msra.mxu0 %v6405_v17  ;;  %4221 = vmatprep.subr.bf16.mxu1 %v6410_v19  ;;  %v6501_v17 = vld [vmem:[%s6638_s29 + $0x1174] ss:$8 sps:$4 sm:$0xff]   ;;  %v6496_v19 = vld [vmem:[%s6638_s29 + $0x870] ss:$8 sps:$4 sm:$0xff]  }
 0x1f5   : > { %4590 = vmatprep.subr.bf16.mxu0 %v6413_v21  ;;  %v6499_v21 = vld [vmem:[%s6638_s29 + $0x1170] ss:$8 sps:$4 sm:$0xff]  }
 0x1f7   : > { %4222 = vmatpush1.bf16.msra.mxu1 %v6408_v22  ;;  %v6504_v22 = vld [vmem:[%s6638_s29 + $0x884] ss:$8 sps:$4 sm:$0xff]  }
 0x1f8   : > { %4591 = vmatpush1.bf16.msra.mxu0 %v6411_v23  ;;  %4223 = vmatprep.subr.bf16.mxu1 %v6416_v26  ;;  %v6507_v23 = vld [vmem:[%s6638_s29 + $0x1184] ss:$8 sps:$4 sm:$0xff]   ;;  %v6502_v26 = vld [vmem:[%s6638_s29 + $0x880] ss:$8 sps:$4 sm:$0xff]  }
 0x1f9   : > { %4592 = vmatprep.subr.bf16.mxu0 %v6419_v27  ;;  %v6505_v27 = vld [vmem:[%s6638_s29 + $0x1180] ss:$8 sps:$4 sm:$0xff]  }
 0x1fb   : > { %4224 = vmatpush1.bf16.msra.mxu1 %v6414_v20  ;;  %v6510_v20 = vld [vmem:[%s6638_s29 + $0x894] ss:$8 sps:$4 sm:$0xff]  }
 0x1fc   : > { %4593 = vmatpush1.bf16.msra.mxu0 %v6417_v28  ;;  %4225 = vmatprep.subr.bf16.mxu1 %v6422_v30  ;;  %v6513_v28 = vld [vmem:[%s6638_s29 + $0x1194] ss:$8 sps:$4 sm:$0xff]   ;;  %v6508_v30 = vld [vmem:[%s6638_s29 + $0x890] ss:$8 sps:$4 sm:$0xff]  }
 0x1fd   : > { %4594 = vmatprep.subr.bf16.mxu0 %v6425_v31  ;;  %v6511_v31 = vld [vmem:[%s6638_s29 + $0x1190] ss:$8 sps:$4 sm:$0xff]  }
 0x1ff   : > { %4226 = vmatpush1.bf16.msra.mxu1 %v6420_v32  ;;  %v6516_v32 = vld [vmem:[%s6638_s29 + $0x8a4] ss:$8 sps:$4 sm:$0xff]  }
 0x200   : > { %4595 = vmatpush1.bf16.msra.mxu0 %v6423_v33  ;;  %4227 = vmatprep.subr.bf16.mxu1 %v6428_v34  ;;  %v6519_v33 = vld [vmem:[%s6638_s29 + $0x11a4] ss:$8 sps:$4 sm:$0xff]   ;;  %v6514_v34 = vld [vmem:[%s6638_s29 + $0x8a0] ss:$8 sps:$4 sm:$0xff]  }
 0x201   : > { %4596 = vmatprep.subr.bf16.mxu0 %v6431_v35  ;;  %v6517_v35 = vld [vmem:[%s6638_s29 + $0x11a0] ss:$8 sps:$4 sm:$0xff]  }
 0x203   : > { %4228 = vmatpush1.bf16.msra.mxu1 %v6426_v36  ;;  %v6522_v36 = vld [vmem:[%s6638_s29 + $0x8b4] ss:$8 sps:$4 sm:$0xff]  }
 0x204   : > { %4597 = vmatpush1.bf16.msra.mxu0 %v6429_v37  ;;  %4229 = vmatprep.subr.bf16.mxu1 %v6434_v38  ;;  %v6525_v37 = vld [vmem:[%s6638_s29 + $0x11b4] ss:$8 sps:$4 sm:$0xff]   ;;  %v6520_v38 = vld [vmem:[%s6638_s29 + $0x8b0] ss:$8 sps:$4 sm:$0xff]  }
 0x205   : > { %4598 = vmatprep.subr.bf16.mxu0 %v6437_v39  ;;  %v6523_v39 = vld [vmem:[%s6638_s29 + $0x11b0] ss:$8 sps:$4 sm:$0xff]  }
 0x207   : > { %4230 = vmatpush1.bf16.msra.mxu1 %v6432_v40  ;;  %v6528_v40 = vld [vmem:[%s6638_s29 + $0x8c4] ss:$8 sps:$4 sm:$0xff]  }
 0x208   : > { %4599 = vmatpush1.bf16.msra.mxu0 %v6435_v18  ;;  %4231 = vmatprep.subr.bf16.mxu1 %v6440_v42  ;;  %v6531_v18 = vld [vmem:[%s6638_s29 + $0x11c4] ss:$8 sps:$4 sm:$0xff]   ;;  %v6526_v42 = vld [vmem:[%s6638_s29 + $0x8c0] ss:$8 sps:$4 sm:$0xff]  }
 0x209   : > { %4600 = vmatprep.subr.bf16.mxu0 %v6443_v43  ;;  %v6529_v43 = vld [vmem:[%s6638_s29 + $0x11c0] ss:$8 sps:$4 sm:$0xff]  }
 0x20b   : > { %4232 = vmatpush1.bf16.msra.mxu1 %v6438_v44  ;;  %v6534_v44 = vld [vmem:[%s6638_s29 + $0x8d4] ss:$8 sps:$4 sm:$0xff]  }
 0x20c   : > { %4601 = vmatpush1.bf16.msra.mxu0 %v6441_v45  ;;  %4233 = vmatprep.subr.bf16.mxu1 %v6446_v24  ;;  %v6537_v45 = vld [vmem:[%s6638_s29 + $0x11d4] ss:$8 sps:$4 sm:$0xff]   ;;  %v6532_v24 = vld [vmem:[%s6638_s29 + $0x8d0] ss:$8 sps:$4 sm:$0xff]  }
 0x20d   : > { %4602 = vmatprep.subr.bf16.mxu0 %v6449_v25  ;;  %v6535_v25 = vld [vmem:[%s6638_s29 + $0x11d0] ss:$8 sps:$4 sm:$0xff]  }
 0x20f   : > { %4234 = vmatpush1.bf16.msra.mxu1 %v6444_v48  ;;  %v6540_v48 = vld [vmem:[%s6638_s29 + $0x8e4] ss:$8 sps:$4 sm:$0xff]  }
 0x210   : > { %4603 = vmatpush1.bf16.msra.mxu0 %v6447_v49  ;;  %4244 = vmatprep.subr.bf16.mxu1 %v6454_v50  ;;  %v6543_v49 = vld [vmem:[%s6638_s29 + $0x11e4] ss:$8 sps:$4 sm:$0xff]   ;;  %v6538_v50 = vld [vmem:[%s6638_s29 + $0x8e0] ss:$8 sps:$4 sm:$0xff]  }
 0x211   : > { %4613 = vmatprep.subr.bf16.mxu0 %v6459_v51  ;;  %v6541_v51 = vld [vmem:[%s6638_s29 + $0x11e0] ss:$8 sps:$4 sm:$0xff]  }
 0x212   : > { %4236 = vmatmul.mubr.bf16.vlgmr.msra.gmra.mrb[0].mxu1 %v4925_v29  ;;  %v6546_v29 = vld [vmem:[%s6638_s29 + $0x8f4] ss:$8 sps:$4 sm:$0xff]  }
 0x213   : > { %4605 = vmatmul.mubr.bf16.vlgmr.msra.gmra.mrb[0].mxu0 %v4943_v41  ;;  %4245 = vmatpush1.bf16.msra.mxu1 %v6452_v54  ;;  %v6549_v41 = vld [vmem:[%s6638_s29 + $0x11f4] ss:$8 sps:$4 sm:$0xff]   ;;  %v6544_v54 = vld [vmem:[%s6638_s29 + $0x8f0] ss:$8 sps:$4 sm:$0xff]  }
 0x214   : > { %4614 = vmatpush1.bf16.msra.mxu0 %v6457_v55  ;;  %4246 = vmatprep.subr.bf16.mxu1 %v6462_v56  ;;  %v6547_v55 = vld [vmem:[%s6638_s29 + $0x11f0] ss:$8 sps:$4 sm:$0xff]   ;;  %v4927_v56 = vcombine.low %v7261_v52, %v7261_v52 }
 0x215   : > { %4615 = vmatprep.subr.bf16.mxu0 %v6465_v57  ;;  %4276 = vmatprep.mubr.bf16.mxu1 %v4928_v46  ;;  %v4945_v57 = vcombine.low %v7264_v53, %v7264_v53 }
 0x216   : > { %4645 = vmatprep.mubr.bf16.mxu0 %v4946_v47 }
 0x217   : > { %4247 = vmatpush1.bf16.msra.mxu1 %v6460_v58 }
 0x218   : > { %4616 = vmatpush1.bf16.msra.mxu0 %v6463_v59  ;;  %4248 = vmatprep.subr.bf16.mxu1 %v6468_v60 }
 0x219   : > { %4617 = vmatprep.subr.bf16.mxu0 %v6471_v61 }
 0x21b   : > { %4249 = vmatpush1.bf16.msra.mxu1 %v6466_v62 }
 0x21c   : > { %4618 = vmatpush1.bf16.msra.mxu0 %v6469_v63  ;;  %4250 = vmatprep.subr.bf16.mxu1 %v6474_v0 }
 0x21d   : > { %4619 = vmatprep.subr.bf16.mxu0 %v6477_v1 }
 0x21f   : > { %4251 = vmatpush1.bf16.msra.mxu1 %v6472_v2 }
 0x220   : > { %4620 = vmatpush1.bf16.msra.mxu0 %v6475_v3  ;;  %4252 = vmatprep.subr.bf16.mxu1 %v6480_v4 }
 0x221   : > { %4621 = vmatprep.subr.bf16.mxu0 %v6483_v5 }
 0x223   : > { %4253 = vmatpush1.bf16.msra.mxu1 %v6478_v6 }
 0x224   : > { %4622 = vmatpush1.bf16.msra.mxu0 %v6481_v7  ;;  %4254 = vmatprep.subr.bf16.mxu1 %v6486_v8 }
 0x225   : > { %4623 = vmatprep.subr.bf16.mxu0 %v6489_v9 }
 0x227   : > { %4255 = vmatpush1.bf16.msra.mxu1 %v6484_v10 }
 0x228   : > { %4624 = vmatpush1.bf16.msra.mxu0 %v6487_v11  ;;  %4256 = vmatprep.subr.bf16.mxu1 %v6492_v12 }
 0x229   : > { %4625 = vmatprep.subr.bf16.mxu0 %v6495_v13 }
 0x22b   : > { %4257 = vmatpush1.bf16.msra.mxu1 %v6490_v14 }
 0x22c   : > { %4626 = vmatpush1.bf16.msra.mxu0 %v6493_v15  ;;  %4258 = vmatprep.subr.bf16.mxu1 %v6498_v16 }
 0x22d   : > { %4627 = vmatprep.subr.bf16.mxu0 %v6501_v17 }
 0x22f   : > { %4259 = vmatpush1.bf16.msra.mxu1 %v6496_v19 }
 0x230   : > { %4628 = vmatpush1.bf16.msra.mxu0 %v6499_v21  ;;  %4260 = vmatprep.subr.bf16.mxu1 %v6504_v22 }
 0x231   : > { %4629 = vmatprep.subr.bf16.mxu0 %v6507_v23 }
 0x233   : > { %4261 = vmatpush1.bf16.msra.mxu1 %v6502_v26 }
 0x234   : > { %4630 = vmatpush1.bf16.msra.mxu0 %v6505_v27  ;;  %4262 = vmatprep.subr.bf16.mxu1 %v6510_v20 }
 0x235   : > { %4631 = vmatprep.subr.bf16.mxu0 %v6513_v28 }
 0x237   : > { %4263 = vmatpush1.bf16.msra.mxu1 %v6508_v30 }
 0x238   : > { %4632 = vmatpush1.bf16.msra.mxu0 %v6511_v31  ;;  %4264 = vmatprep.subr.bf16.mxu1 %v6516_v32 }
 0x239   : > { %4633 = vmatprep.subr.bf16.mxu0 %v6519_v33 }
 0x23b   : > { %4265 = vmatpush1.bf16.msra.mxu1 %v6514_v34 }
 0x23c   : > { %4634 = vmatpush1.bf16.msra.mxu0 %v6517_v35  ;;  %4266 = vmatprep.subr.bf16.mxu1 %v6522_v36 }
 0x23d   : > { %4635 = vmatprep.subr.bf16.mxu0 %v6525_v37 }
 0x23f   : > { %4267 = vmatpush1.bf16.msra.mxu1 %v6520_v38 }
 0x240   : > { %4636 = vmatpush1.bf16.msra.mxu0 %v6523_v39  ;;  %4268 = vmatprep.subr.bf16.mxu1 %v6528_v40 }
 0x241   : > { %4637 = vmatprep.subr.bf16.mxu0 %v6531_v18 }
 0x243   : > { %4269 = vmatpush1.bf16.msra.mxu1 %v6526_v42 }
 0x244   : > { %4638 = vmatpush1.bf16.msra.mxu0 %v6529_v43  ;;  %4270 = vmatprep.subr.bf16.mxu1 %v6534_v44 }
 0x245   : > { %4639 = vmatprep.subr.bf16.mxu0 %v6537_v45 }
 0x247   : > { %4271 = vmatpush1.bf16.msra.mxu1 %v6532_v24 }
 0x248   : > { %4640 = vmatpush1.bf16.msra.mxu0 %v6535_v25  ;;  %4272 = vmatprep.subr.bf16.mxu1 %v6540_v48 }
 0x249   : > { %4641 = vmatprep.subr.bf16.mxu0 %v6543_v49 }
 0x24b   : > { %4273 = vmatpush1.bf16.msra.mxu1 %v6538_v50 }
 0x24c   : > { %4642 = vmatpush1.bf16.msra.mxu0 %v6541_v51  ;;  %4274 = vmatprep.subr.bf16.mxu1 %v6546_v29 }
 0x24d   : > { %4643 = vmatprep.subr.bf16.mxu0 %v6549_v41 }
 0x24f   : > { %4275 = vmatpush1.bf16.msra.mxu1 %v6544_v54 }
 0x250   : > { %4644 = vmatpush1.bf16.msra.mxu0 %v6547_v55 }
 0x252   : > { %4277 = vmatmul.mubr.bf16.vlgmr.msra.gmra.mrb[0].mxu1 %v4927_v56 }
 0x253   : > { %4646 = vmatmul.mubr.bf16.vlgmr.msra.gmra.mrb[0].mxu0 %v4945_v57 }
 0x323   : > { %4657 = sbr.rel (%p5523_p6) target bundleno = 811 (0x32b), region = 44 }
 0x325   : > { %v4278_v46 = vpop.f32.mrb[0].mxu1 }
 0x326   : > { %v4647_v47 = vpop.f32.mrb[0].mxu0  ;;  %v4280_v59 = vpop.f32.mrb[1].mxu1 }
 0x327   : > { %v5563_v58 = vadd.f32 %v4647_v47, %v4278_v46  ;;  %v4649_v60 = vpop.f32.mrb[1].mxu0  ;;  %v4282_v62 = vpop.f32.mrb[2].mxu1 }
 0x328   : > { %v5564_v61 = vadd.f32 %v4649_v60, %v4280_v59  ;;  %v4651_v63 = vpop.f32.mrb[2].mxu0  ;;  %v4283_v0 = vpop.f32.mrb[3].mxu1 }
 0x329   : > { %v4652_v1 = vpop.f32.mrb[3].mxu0  ;;  %4658 = vst [vmem:[#allocation2] sm:$0xff] (!%p5523_p6), %v5563_v58 }
 0x32a   : > { %4660 = vst.msk [vmem:[#allocation2 + $0x8] sm:$0xff] %vm4659_vm0, %v5564_v61 }
 0x32b PF: > { %p5524_p7 = scmp.le.s32.totalorder %s6568_s21, 0 }
 0x32c   : > { %vm4670_vm1 = vcmask (!%p5524_p7), 261120  }
 0x32d   : > { %4664 = sbr.rel (%p5524_p7) target bundleno = 821 (0x335), region = 48 }
 0x331   : > { %v4665_v52 = vld [vmem:[#allocation2] sm:$0xff] (!%p5524_p7)  ;;  %v4666_v53 = vld [vmem:[#allocation2 + $0x8] sm:$0xff] (!%p5524_p7) }
 0x332   : > { %v4667_v2 = vadd.f32 (!%p5524_p7), %v5563_v58, %v4665_v52  ;;  %v4668_v3 = vadd.f32 (!%p5524_p7), %v5564_v61, %v4666_v53 }
 0x334   : > { %4669 = vst [vmem:[#allocation2] sm:$0xff] %v4667_v2  ;;  %4671 = vst.msk [vmem:[#allocation2 + $0x8] sm:$0xff] %vm4670_vm1, %v4668_v3 }
 0x335 PF: > { %p5525_p8 = scmp.ne.s32.totalorder %s6568_s21, 1 }
 0x336   : > { %v4695_v4 = vld [vmem:[%s7426_s3] sm:$0xff] (!%p5525_p8)  ;;  %v4696_v5 = vld [vmem:[%s7426_s3 + $0x8] sm:$0xff] (!%p5525_p8)  ;;  %v4697_v6 = vld [vmem:[%s7426_s3 + $0x10] sm:$0xff] (!%p5525_p8)  ;;  %v4680_v7 = vlaneseq (!%p5525_p8)  ;;  %v6578_v8 = vmov (!%p5525_p8), 0.0|0.0   ;;  %vm4693_vm2 = vcmask (!%p5525_p8), 261120   ;;  %vm4795_vm3 = vcmask (!%p5525_p8), 80896  }
 0x337   : > { %4675 = sbr.rel (%p5525_p8) target bundleno = 1079 (0x437), region = 52  ;;  %5533 = vmatprep.subr.bf16.mxu0 (!%p5525_p8), %v6578_v8  ;;  %v5534_v9 = vpack.c.bf16 (!%p5525_p8), %v4696_v5, %v4695_v4  ;;  %v4698_v10 = vld [vmem:[%s7426_s3 + $0x18] sm:$0xff] (!%p5525_p8)  ;;  %v4699_v13 = vld [vmem:[%s7426_s3 + $0x20] sm:$0xff] (!%p5525_p8)  ;;  %v4700_v14 = vld [vmem:[%s7426_s3 + $0x28] sm:$0xff] (!%p5525_p8) }
 0x338   : > { %v4681_v11 = vshrl.u32 (!%p5525_p8), %v4680_v7, 7  ;;  %v5537_v12 = vpack.c.bf16 (!%p5525_p8), %v4698_v10, %v4697_v6  ;;  %v5540_v17 = vpack.c.bf16 (!%p5525_p8), %v4700_v14, %v4699_v13  ;;  %v4678_v21 = vld [vmem:[%s7425_s2] sm:$0x3] (!%p5525_p8)  ;;  %v4701_v23 = vld [vmem:[%s7426_s3 + $0x30] sm:$0xff] (!%p5525_p8)  ;;  %v4702_v26 = vld [vmem:[%s7426_s3 + $0x38] sm:$0xff] (!%p5525_p8) }
 0x339   : > { %5535 = vmatpush1.bf16.msra.mxu0 (!%p5525_p8), %v5534_v9  ;;  %v5543_v31 = vpack.c.bf16 (!%p5525_p8), %v4702_v26, %v4701_v23  ;;  %v4703_v32 = vld [vmem:[%s7426_s3 + $0x40] sm:$0xff] (!%p5525_p8)  ;;  %v4704_v33 = vld [vmem:[%s7426_s3 + $0x48] sm:$0xff] (!%p5525_p8)  ;;  %v4705_v35 = vld [vmem:[%s7426_s3 + $0x50] sm:$0xff] (!%p5525_p8) }
 0x33a   : > { %5536 = vmatprep.subr.bf16.mxu0 (!%p5525_p8), %v6578_v8  ;;  %v4682_v15 = vsub.s32 (!%p5525_p8), 0, %v4681_v11  ;;  %v4686_v16 = vsub.s32 (!%p5525_p8), 1, %v4681_v11  ;;  %v5546_v34 = vpack.c.bf16 (!%p5525_p8), %v4704_v33, %v4703_v32  ;;  %v4706_v36 = vld [vmem:[%s7426_s3 + $0x58] sm:$0xff] (!%p5525_p8)  ;;  %v4707_v38 = vld [vmem:[%s7426_s3 + $0x60] sm:$0xff] (!%p5525_p8)  ;;  %v4708_v39 = vld [vmem:[%s7426_s3 + $0x68] sm:$0xff] (!%p5525_p8) }
 0x33b   : > { %v4677_v19 = vld [vmem:[#allocation2 + $0x8] sm:$0xff] (!%p5525_p8)  ;;  %v4676_v22 = vld [vmem:[#allocation2] sm:$0xff] (!%p5525_p8)  ;;  %v5549_v37 = vpack.c.bf16 (!%p5525_p8), %v4706_v36, %v4705_v35  ;;  %v5552_v40 = vpack.c.bf16 (!%p5525_p8), %v4708_v39, %v4707_v38  ;;  %v4709_v18 = vld [vmem:[%s7426_s3 + $0x70] sm:$0xff] (!%p5525_p8) }
 0x33c   : > { %v4683_v27 = vrot.slane (!%p5525_p8), %v4678_v21, %v4682_v15  ;;  %v4687_v20 = vrot.slane (!%p5525_p8), %v4678_v21, %v4686_v16  ;;  %v4710_v42 = vld [vmem:[%s7426_s3 + $0x78] sm:$0xff] (!%p5525_p8)  ;;  %v4711_v44 = vld [vmem:[%s7426_s3 + $0x80] sm:$0xff] (!%p5525_p8)  ;;  %v4712_v45 = vld [vmem:[%s7426_s3 + $0x88] sm:$0xff] (!%p5525_p8) }
 0x33d   : > { %5538 = vmatpush1.bf16.msra.mxu0 (!%p5525_p8), %v5537_v12  ;;  %v5555_v43 = vpack.c.bf16 (!%p5525_p8), %v4710_v42, %v4709_v18  ;;  %v5558_v24 = vpack.c.bf16 (!%p5525_p8), %v4712_v45, %v4711_v44  ;;  %v4713_v25 = vld [vmem:[%s7426_s3 + $0x90] sm:$0xff] (!%p5525_p8)  ;;  %v4714_v48 = vld [vmem:[%s7426_s3 + $0x98] sm:$0xff] (!%p5525_p8)  ;;  %v5526_v50 = vld [vmem:[%s7427_s4] ss:$0 sm:$0xff] (!%p5525_p8) }
 0x33e   : > { %5539 = vmatprep.subr.bf16.mxu0 %v6578_v8  ;;  %v4691_v28 = vadd.f32 %v4687_v20, %v4677_v19  ;;  %v4690_v30 = vadd.f32 %v4683_v27, %v4676_v22  ;;  %v5561_v49 = vpack.c.bf16 %v4714_v48, %v4713_v25 }
 0x340   : > { %4694 = vst.msk [vmem:[%s7428_s5 + $0x8] sm:$0xff] %vm4693_vm2, %v4691_v28  ;;  %5527 = vmatprep.mubr.msk.f32.mxu0 %vm4693_vm2, %v4691_v28  ;;  %4692 = vst [vmem:[%s7428_s5] sm:$0xff] %v4690_v30 }
 0x341   : > { %5541 = vmatpush1.bf16.msra.mxu0 %v5540_v17 }
 0x342   : > { %5542 = vmatprep.subr.bf16.mxu0 %v6578_v8 }
 0x345   : > { %5544 = vmatpush1.bf16.msra.mxu0 %v5543_v31 }
 0x346   : > { %5545 = vmatprep.subr.bf16.mxu0 %v6578_v8 }
 0x349   : > { %5547 = vmatpush1.bf16.msra.mxu0 %v5546_v34 }
 0x34a   : > { %5548 = vmatprep.subr.bf16.mxu0 %v6578_v8 }
 0x34d   : > { %5550 = vmatpush1.bf16.msra.mxu0 %v5549_v37 }
 0x34e   : > { %5551 = vmatprep.subr.bf16.mxu0 %v6578_v8 }
 0x351   : > { %5553 = vmatpush1.bf16.msra.mxu0 %v5552_v40 }
 0x352   : > { %5554 = vmatprep.subr.bf16.mxu0 %v6578_v8 }
 0x355   : > { %5556 = vmatpush1.bf16.msra.mxu0 %v5555_v43 }
 0x356   : > { %5557 = vmatprep.subr.bf16.mxu0 %v6578_v8 }
 0x359   : > { %5559 = vmatpush1.bf16.msra.mxu0 %v5558_v24 }
 0x35a   : > { %5560 = vmatprep.subr.bf16.mxu0 %v6578_v8 }
 0x35d   : > { %5562 = vmatpush1.bf16.msra.mxu0 %v5561_v49 }
 0x360   : > { %4790 = vmatmul.mubr.f32.vlgmr.msra.gmra.mrb[0].mxu0 %v4690_v30 }
 0x433   : > { %v4791_v51 = vpop.f32.mrb[0].mxu0 }
 0x434   : > { %v4792_v29 = vadd.f32 %v5526_v50, %v4791_v51  ;;  %v4793_v41 = vpop.f32.mrb[1].mxu0 }
 0x436   : > { %4796 = vst.msk [vmem:[%s7429_s6] sm:$0xff] %vm4795_vm3, %v4792_v29 }
 0x437 PF: > { %s17_s23 = sadd.s32 1, %s6576_s23   ;;  %s7430_s21 = smov %s6572_s22 }
 0x438   : > { %p14_p9 = scmp.ge.s32.totalorder %s17_s23, 4   ;;  %s7431_s22 = smov %s7433_s24 }
 0x43a   :  { %16 = sbr.rel (!%p14_p9) target bundleno = 2 (0x2), region = 97 }

</bundles_post_ra>
